<compile_context>
chip_gen: v7x
topology: tpu7x:2x2x1
jax: 0.10.0
libtpu: 0.0.40
codegen_flags: <defaults>
</compile_context>

<pallas_src>
import numpy as np
import jax
import jax.numpy as jnp
from jax import lax
from jax.experimental import pallas as pl
from jax.experimental.pallas import tpu as pltpu

EPS = 1e-5


def _round_up(v, m):
    return (v + m - 1) // m * m


# ---------------------------- fused Pallas kernel ----------------------------

def _make_fused_block_kernel(H, W, pad_top, rpad, ca, cb):
    N = H * W

    def ln_silu(t):
        # channel LayerNorm (g=ones, bias=None, unbiased=False, eps=1e-5) -> SiLU, all f32
        mean = jnp.mean(t, axis=-1, keepdims=True)
        var = jnp.mean((t - mean) ** 2, axis=-1, keepdims=True)
        a = (t - mean) * lax.rsqrt(var + EPS)
        return a * jax.nn.sigmoid(a)

    def kernel(x_ref, w_stem, w_b1b, w_b2b, w_b2c, bias_ref, o_ref, pad_a, pad_b):
        x = x_ref[0]                                      # (N, Cin) f32
        cin = x.shape[-1]

        # --- one-time (per grid step) zeroing of the vertical-pad regions of both
        # scratches; the interior region is fully overwritten by every conv, so the
        # pad rows stay zero across the three conv calls.
        pad_a[0:pad_top, :] = jnp.zeros((pad_top, ca), jnp.bfloat16)
        pad_a[pad_top + N:, :] = jnp.zeros((rpad - pad_top - N, ca), jnp.bfloat16)
        pad_b[0:pad_top, :] = jnp.zeros((pad_top, cb), jnp.bfloat16)
        pad_b[pad_top + N:, :] = jnp.zeros((rpad - pad_top - N, cb), jnp.bfloat16)

        # --- column-wrap masks, materialized ONCE per conv input width, in bf16.
        # The 3x3 taps are flat shifts of the row-major image, so kw=0 / kw=2 taps
        # would wrap across image rows at j==0 / j==W-1; the masks zero exactly those
        # (would-be zero-padding) contributions.
        wmax = max(ca, cb)
        col = lax.broadcasted_iota(jnp.int32, (N, wmax), 0) % W
        mask_l = (col != 0).astype(jnp.bfloat16)          # for kw == 0 taps
        mask_r = (col != (W - 1)).astype(jnp.bfloat16)    # for kw == 2 taps
        mask_l_a, mask_r_a = mask_l[:, :ca], mask_r[:, :ca]
        mask_l_b, mask_r_b = mask_l[:, :cb], mask_r[:, :cb]

        def conv3x3(act, wcol_ref, pad_ref, m_l, m_r):
            # act: (N, cin_c) f32 interior activations; wcol_ref: (9*cin_c, cout) bf16.
            # Vertical zero-padding comes from the pre-zeroed scratch pad rows;
            # horizontal padding from the column masks.
            pad_ref[pad_top:pad_top + N, :] = act.astype(jnp.bfloat16)
            cols = []
            for kh in range(3):
                for kw in range(3):
                    s0 = pad_top + W * (kh - 1) + (kw - 1)    # static window start
                    win = pad_ref[s0:s0 + N, :]               # (N, cin_c) bf16
                    if kw == 0:
                        win = win * m_l
                    elif kw == 2:
                        win = win * m_r
                    cols.append(win)
            patches = jnp.concatenate(cols, axis=-1)          # (N, 9*cin_c) bf16
            return jnp.dot(patches, wcol_ref[...], preferred_element_type=jnp.float32)

        # shared LN+SiLU of x, then ONE merged stem matmul:
        #   w_stem = [ W_b0@W_u0*scale | W_b1a | W_b2a ]  -> (Cin, Cin + 2bs + 2bs)
        a_in = ln_silu(x)
        stem = jnp.dot(a_in.astype(jnp.bfloat16), w_stem[...],
                       preferred_element_type=jnp.float32)    # (N, Cin + 2*ca) f32
        u0 = stem[:, :cin]                                    # branch-0 up contribution
        b1 = stem[:, cin:cin + ca]                            # branch-1 stem (2bs)
        b2 = stem[:, cin + ca:cin + 2 * ca]                   # branch-2 stem (2bs)

        # branch 1: its 3x3 conv already has W_u1*scale folded in -> emits (N, Cin)
        u1 = conv3x3(ln_silu(b1), w_b1b, pad_a, mask_l_a, mask_r_a)
        # branch 2: intermediate 3x3 (2bs -> 3bs), then terminal 3x3 with W_u2*scale folded
        t2 = conv3x3(ln_silu(b2), w_b2b, pad_a, mask_l_a, mask_r_a)       # (N, 3bs)
        u2 = conv3x3(ln_silu(t2), w_b2c, pad_b, mask_l_b, mask_r_b)       # (N, Cin)

        # residual + final SiLU (bias already scaled in the wrapper)
        r = x + (u0 + u1 + u2 + bias_ref[...])
        o_ref[0] = r * jax.nn.sigmoid(r)

    return kernel


# ---------------------------- wrapper ----------------------------

def inception_resnet_block2d_forward(x_nchw, p, scale):
    B, C, H, W = x_nchw.shape
    N = H * W
    xf = jnp.transpose(x_nchw, (0, 2, 3, 1)).reshape(B, N, C).astype(jnp.float32)

    def to_mm(w):        # OIHW (Cout,Cin,1,1) -> (Cin,Cout) f32
        return jnp.transpose(w[:, :, 0, 0], (1, 0)).astype(jnp.float32)

    def to_col(w):       # OIHW (Cout,Cin,3,3) -> (9*Cin,Cout) f32, tap-major (kh,kw)
        cout, cin = w.shape[0], w.shape[1]
        return jnp.transpose(w, (2, 3, 1, 0)).reshape(9 * cin, cout).astype(jnp.float32)

    c0 = p['b0'].shape[0]                 # 2bs (branch-0 output width)
    c1 = p['b1b'].shape[0]                # 2bs (branch-1 output width)
    ca = p['b1b'].shape[1]                # 2bs (input width of the 16-ch 3x3 convs)
    assert p['b2b'].shape[1] == ca
    cb = p['b2c'].shape[1]                # 3bs (input width of the terminal 3x3 conv)

    # up 1x1 conv weight split by branch, with the residual `scale` folded in (f32).
    w_up = jnp.transpose(p['up'][:, :, 0, 0], (1, 0)).astype(jnp.float32)  # (mixed, Cin)
    w_u0 = w_up[:c0] * scale
    w_u1 = w_up[c0:c0 + c1] * scale
    w_u2 = w_up[c0 + c1:] * scale

    # Fold the up-projection into each branch's terminal linear op (compose in f32,
    # cast to bf16 once), and merge the three 1x1 stems into a single weight matrix.
    w_stem = jnp.concatenate(
        [to_mm(p['b0']) @ w_u0, to_mm(p['b1a']), to_mm(p['b2a'])],
        axis=1).astype(jnp.bfloat16)                          # (Cin, Cin + 2bs + 2bs)
    w_b1b = (to_col(p['b1b']) @ w_u1).astype(jnp.bfloat16)    # (9*2bs, Cin)
    w_b2b = to_col(p['b2b']).astype(jnp.bfloat16)             # (9*2bs, 3bs)
    w_b2c = (to_col(p['b2c']) @ w_u2).astype(jnp.bfloat16)    # (9*3bs, Cin)
    b_up = (p['b_up'] * scale).reshape(1, -1).astype(jnp.float32)

    pad_top = _round_up(W + 1, 8)         # >= max |tap shift|, 8-row aligned
    rpad = pad_top + N + pad_top

    kernel = _make_fused_block_kernel(H, W, pad_top, rpad, ca, cb)

    weights = [w_stem, w_b1b, w_b2b, w_b2c, b_up]
    w_specs = [pl.BlockSpec(w.shape, lambda b, _nd=w.ndim: (0,) * _nd) for w in weights]

    out = pl.pallas_call(
        kernel,
        out_shape=jax.ShapeDtypeStruct((B, N, C), jnp.float32),
        grid=(B,),
        in_specs=[pl.BlockSpec((1, N, C), lambda b: (b, 0, 0))] + w_specs,
        out_specs=pl.BlockSpec((1, N, C), lambda b: (b, 0, 0)),
        scratch_shapes=[pltpu.VMEM((rpad, ca), jnp.bfloat16),
                        pltpu.VMEM((rpad, cb), jnp.bfloat16)],
        compiler_params=pltpu.CompilerParams(dimension_semantics=("parallel",)),
    )(xf, *weights)

    return jnp.transpose(out.reshape(B, H, W, C), (0, 3, 1, 2))


# ---------------------------- pure-JAX reference ----------------------------

def reference_forward(x, p, scale):
    def ln(t):
        mean = t.mean(axis=1, keepdims=True)
        var = ((t - mean) ** 2).mean(axis=1, keepdims=True)
        return (t - mean) * lax.rsqrt(var + EPS)              # g = ones, b = None

    def silu(t):
        return t * jax.nn.sigmoid(t)

    def conv(t, w):
        return lax.conv_general_dilated(t, w, (1, 1), 'SAME',
                                        dimension_numbers=('NCHW', 'OIHW', 'NCHW'),
                                        precision=lax.Precision.HIGHEST)

    def block(t, w):
        return conv(silu(ln(t)), w)

    b0 = block(x, p['b0'])
    b1 = block(block(x, p['b1a']), p['b1b'])
    b2 = block(block(block(x, p['b2a']), p['b2b']), p['b2c'])
    mixed = jnp.concatenate([b0, b1, b2], axis=1)
    up = conv(mixed, p['up']) + p['b_up'][None, :, None, None]
    return silu(x + up * scale)


# ---------------------------- main ----------------------------

if __name__ == "__main__":
    key = jax.random.PRNGKey(0)
    B, Cin, H, W = 2, 32, 16, 16
    bs = 8            # block_size
    scale = 0.17

    keys = jax.random.split(key, 10)
    x = jax.random.normal(keys[0], (B, Cin, H, W), jnp.float32)

    def w_conv(k, cout, cin, kh, kw):
        return 0.1 * jax.random.normal(k, (cout, cin, kh, kw), jnp.float32)

    params = {
        'b0':  w_conv(keys[1], 2 * bs, Cin, 1, 1),
        'b1a': w_conv(keys[2], 2 * bs, Cin, 1, 1),
        'b1b': w_conv(keys[3], 2 * bs, 2 * bs, 3, 3),
        'b2a': w_conv(keys[4], 2 * bs, Cin, 1, 1),
        'b2b': w_conv(keys[5], 3 * bs, 2 * bs, 3, 3),
        'b2c': w_conv(keys[6], 4 * bs, 3 * bs, 3, 3),
        'up':  w_conv(keys[7], Cin, 8 * bs, 1, 1),
        'b_up': 0.1 * jax.random.normal(keys[8], (Cin,), jnp.float32),
    }

    out = inception_resnet_block2d_forward(x, params, scale)
    out = jax.block_until_ready(out)

    ref = jax.block_until_ready(reference_forward(x, params, scale))
    assert out.shape == x.shape
    np.testing.assert_allclose(np.asarray(out), np.asarray(ref), rtol=1e-2, atol=1e-2)
    print("KERNEL_OK")
</pallas_src>

<mosaic_0001>
module attributes {stable_mosaic.version = 11 : i64} {
  func.func @kernel(%arg0: i32, %arg1: memref<1x256x32xf32, #tpu.memory_space<vmem>>, %arg2: memref<32x64xbf16, #tpu.memory_space<vmem>>, %arg3: memref<144x32xbf16, #tpu.memory_space<vmem>>, %arg4: memref<144x24xbf16, #tpu.memory_space<vmem>>, %arg5: memref<216x32xbf16, #tpu.memory_space<vmem>>, %arg6: memref<1x32xf32, #tpu.memory_space<vmem>>, %arg7: memref<1x256x32xf32, #tpu.memory_space<vmem>>, %arg8: memref<304x16xbf16, #tpu.memory_space<vmem>>, %arg9: memref<304x24xbf16, #tpu.memory_space<vmem>>) attributes {dimension_semantics = [#tpu.dimension_semantics<parallel>], iteration_bounds = array<i64: 2>, scalar_prefetch = 0 : i64, scratch_operands = 2 : i64, tpu.core_type = #tpu.core_type<tc>, window_params = [{transform_indices = @transform_0, window_bounds = array<i64: 1, 256, 32>}, {pipeline_mode = #tpu.pipeline_mode<synchronous>, transform_indices = @transform_1, window_bounds = array<i64: 32, 64>}, {pipeline_mode = #tpu.pipeline_mode<synchronous>, transform_indices = @transform_2, window_bounds = array<i64: 144, 32>}, {pipeline_mode = #tpu.pipeline_mode<synchronous>, transform_indices = @transform_3, window_bounds = array<i64: 144, 24>}, {pipeline_mode = #tpu.pipeline_mode<synchronous>, transform_indices = @transform_4, window_bounds = array<i64: 216, 32>}, {pipeline_mode = #tpu.pipeline_mode<synchronous>, transform_indices = @transform_5, window_bounds = array<i64: 1, 32>}, {transform_indices = @transform_6, window_bounds = array<i64: 1, 256, 32>}]} {
    %c0 = arith.constant 0 : index
    %c0_0 = arith.constant 0 : index
    %c0_1 = arith.constant 0 : index
    %0 = vector.load %arg1[%c0, %c0_0, %c0_1] : memref<1x256x32xf32, #tpu.memory_space<vmem>>, vector<1x256x32xf32>
    %1 = vector.shape_cast %0 : vector<1x256x32xf32> to vector<256x32xf32>
    %cst = arith.constant 0.000000e+00 : bf16
    %2 = vector.broadcast %cst : bf16 to vector<24x16xbf16>
    %c0_2 = arith.constant 0 : index
    %c0_3 = arith.constant 0 : index
    %3 = vector.load %arg8[%c0_2, %c0_3] : memref<304x16xbf16, #tpu.memory_space<vmem>>, vector<24x16xbf16>
    tpu.vector_store %arg8[%c0_2, %c0_3], %2 {strides = array<i32>} : memref<304x16xbf16, #tpu.memory_space<vmem>>, vector<24x16xbf16>,
    %cst_4 = arith.constant 0.000000e+00 : bf16
    %4 = vector.broadcast %cst_4 : bf16 to vector<24x16xbf16>
    %c280 = arith.constant 280 : index
    %c0_5 = arith.constant 0 : index
    %5 = vector.load %arg8[%c280, %c0_5] : memref<304x16xbf16, #tpu.memory_space<vmem>>, vector<24x16xbf16>
    tpu.vector_store %arg8[%c280, %c0_5], %4 {strides = array<i32>} : memref<304x16xbf16, #tpu.memory_space<vmem>>, vector<24x16xbf16>,
    %cst_6 = arith.constant 0.000000e+00 : bf16
    %6 = vector.broadcast %cst_6 : bf16 to vector<24x24xbf16>
    %c0_7 = arith.constant 0 : index
    %c0_8 = arith.constant 0 : index
    %7 = vector.load %arg9[%c0_7, %c0_8] : memref<304x24xbf16, #tpu.memory_space<vmem>>, vector<24x24xbf16>
    tpu.vector_store %arg9[%c0_7, %c0_8], %6 {strides = array<i32>} : memref<304x24xbf16, #tpu.memory_space<vmem>>, vector<24x24xbf16>,
    %cst_9 = arith.constant 0.000000e+00 : bf16
    %8 = vector.broadcast %cst_9 : bf16 to vector<24x24xbf16>
    %c280_10 = arith.constant 280 : index
    %c0_11 = arith.constant 0 : index
    %9 = vector.load %arg9[%c280_10, %c0_11] : memref<304x24xbf16, #tpu.memory_space<vmem>>, vector<24x24xbf16>
    tpu.vector_store %arg9[%c280_10, %c0_11], %8 {strides = array<i32>} : memref<304x24xbf16, #tpu.memory_space<vmem>>, vector<24x24xbf16>,
    %10 = tpu.iota {dimensions = array<i32: 0>} : vector<256x24xi32>
    %c16_i32 = arith.constant 16 : i32
    %c0_i32 = arith.constant 0 : i32
    %11 = arith.cmpi eq, %c16_i32, %c0_i32 : i32
    %c1_i32 = arith.constant 1 : i32
    %12 = arith.select %11, %c1_i32, %c16_i32 : i32
    %13 = vector.broadcast %12 : i32 to vector<256x24xi32>
    %14 = arith.remsi %10, %13 : vector<256x24xi32>
    %c0_i32_12 = arith.constant 0 : i32
    %15 = vector.broadcast %c0_i32_12 : i32 to vector<256x24xi32>
    %16 = arith.cmpi ne, %14, %15 : vector<256x24xi32>
    %c0_i32_13 = arith.constant 0 : i32
    %17 = vector.broadcast %c0_i32_13 : i32 to vector<256x24xi32>
    %18 = arith.cmpi slt, %14, %17 : vector<256x24xi32>
    %c0_i32_14 = arith.constant 0 : i32
    %19 = arith.cmpi slt, %12, %c0_i32_14 : i32
    %20 = vector.broadcast %19 : i1 to vector<256x24xi1>
    %21 = vector.broadcast %20 : vector<256x24xi1> to vector<256x24xi1>
    %22 = arith.xori %18, %21 : vector<256x24xi1>
    %23 = arith.andi %22, %16 : vector<256x24xi1>
    %24 = vector.broadcast %12 : i32 to vector<256x24xi32>
    %25 = arith.addi %14, %24 : vector<256x24xi32>
    %26 = arith.select %23, %25, %14 : vector<256x24xi1>, vector<256x24xi32>
    %c0_i32_15 = arith.constant 0 : i32
    %27 = vector.broadcast %c0_i32_15 : i32 to vector<256x24xi32>
    %28 = arith.cmpi ne, %26, %27 : vector<256x24xi32>
    %29 = arith.extui %28 : vector<256x24xi1> to vector<256x24xi32>
    %30 = arith.sitofp %29 : vector<256x24xi32> to vector<256x24xf32>
    %31 = arith.truncf %30 : vector<256x24xf32> to vector<256x24xbf16>
    %c15_i32 = arith.constant 15 : i32
    %32 = vector.broadcast %c15_i32 : i32 to vector<256x24xi32>
    %33 = arith.cmpi ne, %26, %32 : vector<256x24xi32>
    %34 = arith.extui %33 : vector<256x24xi1> to vector<256x24xi32>
    %35 = arith.sitofp %34 : vector<256x24xi32> to vector<256x24xf32>
    %36 = arith.truncf %35 : vector<256x24xf32> to vector<256x24xbf16>
    %37 = vector.extract_strided_slice %31 {offsets = [0, 0], sizes = [256, 16], strides = [1, 1]} : vector<256x24xbf16> to vector<256x16xbf16>
    %38 = vector.extract_strided_slice %36 {offsets = [0, 0], sizes = [256, 16], strides = [1, 1]} : vector<256x24xbf16> to vector<256x16xbf16>
    %cst_16 = arith.constant dense<0.000000e+00> : vector<256xf32>
    %39 = vector.multi_reduction <add>, %1, %cst_16 [1] : vector<256x32xf32> to vector<256xf32>
    %40 = vector.shape_cast %39 : vector<256xf32> to vector<256x1xf32>
    %cst_17 = arith.constant 3.200000e+01 : f32
    %41 = vector.broadcast %cst_17 : f32 to vector<256x1xf32>
    %42 = arith.divf %40, %41 : vector<256x1xf32>
    %43 = vector.broadcast %42 : vector<256x1xf32> to vector<256x32xf32>
    %44 = arith.subf %1, %43 : vector<256x32xf32>
    %45 = arith.mulf %44, %44 : vector<256x32xf32>
    %cst_18 = arith.constant dense<0.000000e+00> : vector<256xf32>
    %46 = vector.multi_reduction <add>, %45, %cst_18 [1] : vector<256x32xf32> to vector<256xf32>
    %47 = vector.shape_cast %46 : vector<256xf32> to vector<256x1xf32>
    %cst_19 = arith.constant 3.200000e+01 : f32
    %48 = vector.broadcast %cst_19 : f32 to vector<256x1xf32>
    %49 = arith.divf %47, %48 : vector<256x1xf32>
    %50 = vector.broadcast %42 : vector<256x1xf32> to vector<256x32xf32>
    %51 = arith.subf %1, %50 : vector<256x32xf32>
    %cst_20 = arith.constant 9.99999974E-6 : f32
    %52 = vector.broadcast %cst_20 : f32 to vector<256x1xf32>
    %53 = arith.addf %49, %52 : vector<256x1xf32>
    %54 = math.rsqrt %53 : vector<256x1xf32>
    %55 = vector.broadcast %54 : vector<256x1xf32> to vector<256x32xf32>
    %56 = arith.mulf %51, %55 : vector<256x32xf32>
    %57 = arith.negf %56 : vector<256x32xf32>
    %58 = math.exp %57 : vector<256x32xf32>
    %cst_21 = arith.constant 1.000000e+00 : f32
    %59 = vector.broadcast %cst_21 : f32 to vector<256x32xf32>
    %60 = arith.addf %59, %58 : vector<256x32xf32>
    %61 = arith.divf %59, %60 : vector<256x32xf32>
    %62 = arith.mulf %56, %61 : vector<256x32xf32>
    %63 = arith.truncf %62 : vector<256x32xf32> to vector<256x32xbf16>
    %c0_22 = arith.constant 0 : index
    %c0_23 = arith.constant 0 : index
    %64 = vector.load %arg2[%c0_22, %c0_23] : memref<32x64xbf16, #tpu.memory_space<vmem>>, vector<32x64xbf16>
    %cst_24 = arith.constant dense<0.000000e+00> : vector<256x64xf32>
    %65 = tpu.matmul %63, %64, %cst_24 {dimension_numbers = #tpu.dot_dimension_numbers<[1], [0], [0], [1], [0, 0, 1, 1], [], []>} : vector<256x32xbf16>, vector<32x64xbf16>, vector<256x64xf32> -> vector<256x64xf32>
    %66 = vector.extract_strided_slice %65 {offsets = [0, 0], sizes = [256, 32], strides = [1, 1]} : vector<256x64xf32> to vector<256x32xf32>
    %67 = vector.extract_strided_slice %65 {offsets = [0, 32], sizes = [256, 16], strides = [1, 1]} : vector<256x64xf32> to vector<256x16xf32>
    %68 = vector.extract_strided_slice %65 {offsets = [0, 48], sizes = [256, 16], strides = [1, 1]} : vector<256x64xf32> to vector<256x16xf32>
    %cst_25 = arith.constant dense<0.000000e+00> : vector<256xf32>
    %69 = vector.multi_reduction <add>, %67, %cst_25 [1] : vector<256x16xf32> to vector<256xf32>
    %70 = vector.shape_cast %69 : vector<256xf32> to vector<256x1xf32>
    %cst_26 = arith.constant 1.600000e+01 : f32
    %71 = vector.broadcast %cst_26 : f32 to vector<256x1xf32>
    %72 = arith.divf %70, %71 : vector<256x1xf32>
    %73 = vector.broadcast %72 : vector<256x1xf32> to vector<256x16xf32>
    %74 = arith.subf %67, %73 : vector<256x16xf32>
    %75 = arith.mulf %74, %74 : vector<256x16xf32>
    %cst_27 = arith.constant dense<0.000000e+00> : vector<256xf32>
    %76 = vector.multi_reduction <add>, %75, %cst_27 [1] : vector<256x16xf32> to vector<256xf32>
    %77 = vector.shape_cast %76 : vector<256xf32> to vector<256x1xf32>
    %cst_28 = arith.constant 1.600000e+01 : f32
    %78 = vector.broadcast %cst_28 : f32 to vector<256x1xf32>
    %79 = arith.divf %77, %78 : vector<256x1xf32>
    %80 = vector.broadcast %72 : vector<256x1xf32> to vector<256x16xf32>
    %81 = arith.subf %67, %80 : vector<256x16xf32>
    %cst_29 = arith.constant 9.99999974E-6 : f32
    %82 = vector.broadcast %cst_29 : f32 to vector<256x1xf32>
    %83 = arith.addf %79, %82 : vector<256x1xf32>
    %84 = math.rsqrt %83 : vector<256x1xf32>
    %85 = vector.broadcast %84 : vector<256x1xf32> to vector<256x16xf32>
    %86 = arith.mulf %81, %85 : vector<256x16xf32>
    %87 = arith.negf %86 : vector<256x16xf32>
    %88 = math.exp %87 : vector<256x16xf32>
    %cst_30 = arith.constant 1.000000e+00 : f32
    %89 = vector.broadcast %cst_30 : f32 to vector<256x16xf32>
    %90 = arith.addf %89, %88 : vector<256x16xf32>
    %91 = arith.divf %89, %90 : vector<256x16xf32>
    %92 = arith.mulf %86, %91 : vector<256x16xf32>
    %93 = arith.truncf %92 : vector<256x16xf32> to vector<256x16xbf16>
    %c24 = arith.constant 24 : index
    %c0_31 = arith.constant 0 : index
    %94 = vector.load %arg8[%c24, %c0_31] : memref<304x16xbf16, #tpu.memory_space<vmem>>, vector<256x16xbf16>
    tpu.vector_store %arg8[%c24, %c0_31], %93 {strides = array<i32>} : memref<304x16xbf16, #tpu.memory_space<vmem>>, vector<256x16xbf16>,
    %c7 = arith.constant 7 : index
    %c0_32 = arith.constant 0 : index
    %95 = vector.load %arg8[%c7, %c0_32] : memref<304x16xbf16, #tpu.memory_space<vmem>>, vector<256x16xbf16>
    %96 = arith.mulf %95, %37 : vector<256x16xbf16>
    %c8 = arith.constant 8 : index
    %c0_33 = arith.constant 0 : index
    %97 = vector.load %arg8[%c8, %c0_33] : memref<304x16xbf16, #tpu.memory_space<vmem>>, vector<256x16xbf16>
    %c9 = arith.constant 9 : index
    %c0_34 = arith.constant 0 : index
    %98 = vector.load %arg8[%c9, %c0_34] : memref<304x16xbf16, #tpu.memory_space<vmem>>, vector<256x16xbf16>
    %99 = arith.mulf %98, %38 : vector<256x16xbf16>
    %c23 = arith.constant 23 : index
    %c0_35 = arith.constant 0 : index
    %100 = vector.load %arg8[%c23, %c0_35] : memref<304x16xbf16, #tpu.memory_space<vmem>>, vector<256x16xbf16>
    %101 = arith.mulf %100, %37 : vector<256x16xbf16>
    %c24_36 = arith.constant 24 : index
    %c0_37 = arith.constant 0 : index
    %102 = vector.load %arg8[%c24_36, %c0_37] : memref<304x16xbf16, #tpu.memory_space<vmem>>, vector<256x16xbf16>
    %c25 = arith.constant 25 : index
    %c0_38 = arith.constant 0 : index
    %103 = vector.load %arg8[%c25, %c0_38] : memref<304x16xbf16, #tpu.memory_space<vmem>>, vector<256x16xbf16>
    %104 = arith.mulf %103, %38 : vector<256x16xbf16>
    %c39 = arith.constant 39 : index
    %c0_39 = arith.constant 0 : index
    %105 = vector.load %arg8[%c39, %c0_39] : memref<304x16xbf16, #tpu.memory_space<vmem>>, vector<256x16xbf16>
    %106 = arith.mulf %105, %37 : vector<256x16xbf16>
    %c40 = arith.constant 40 : index
    %c0_40 = arith.constant 0 : index
    %107 = vector.load %arg8[%c40, %c0_40] : memref<304x16xbf16, #tpu.memory_space<vmem>>, vector<256x16xbf16>
    %c41 = arith.constant 41 : index
    %c0_41 = arith.constant 0 : index
    %108 = vector.load %arg8[%c41, %c0_41] : memref<304x16xbf16, #tpu.memory_space<vmem>>, vector<256x16xbf16>
    %109 = arith.mulf %108, %38 : vector<256x16xbf16>
    %110 = tpu.concatenate %96, %97, %99, %101, %102, %104, %106, %107, %109 in 1 : vector<256x16xbf16>, vector<256x16xbf16>, vector<256x16xbf16>, vector<256x16xbf16>, vector<256x16xbf16>, vector<256x16xbf16>, vector<256x16xbf16>, vector<256x16xbf16>, vector<256x16xbf16> -> vector<256x144xbf16>
    %c0_42 = arith.constant 0 : index
    %c0_43 = arith.constant 0 : index
    %111 = vector.load %arg3[%c0_42, %c0_43] : memref<144x32xbf16, #tpu.memory_space<vmem>>, vector<144x32xbf16>
    %cst_44 = arith.constant dense<0.000000e+00> : vector<256x32xf32>
    %112 = tpu.matmul %110, %111, %cst_44 {dimension_numbers = #tpu.dot_dimension_numbers<[1], [0], [0], [1], [0, 0, 1, 1], [], []>} : vector<256x144xbf16>, vector<144x32xbf16>, vector<256x32xf32> -> vector<256x32xf32>
    %cst_45 = arith.constant dense<0.000000e+00> : vector<256xf32>
    %113 = vector.multi_reduction <add>, %68, %cst_45 [1] : vector<256x16xf32> to vector<256xf32>
    %114 = vector.shape_cast %113 : vector<256xf32> to vector<256x1xf32>
    %cst_46 = arith.constant 1.600000e+01 : f32
    %115 = vector.broadcast %cst_46 : f32 to vector<256x1xf32>
    %116 = arith.divf %114, %115 : vector<256x1xf32>
    %117 = vector.broadcast %116 : vector<256x1xf32> to vector<256x16xf32>
    %118 = arith.subf %68, %117 : vector<256x16xf32>
    %119 = arith.mulf %118, %118 : vector<256x16xf32>
    %cst_47 = arith.constant dense<0.000000e+00> : vector<256xf32>
    %120 = vector.multi_reduction <add>, %119, %cst_47 [1] : vector<256x16xf32> to vector<256xf32>
    %121 = vector.shape_cast %120 : vector<256xf32> to vector<256x1xf32>
    %cst_48 = arith.constant 1.600000e+01 : f32
    %122 = vector.broadcast %cst_48 : f32 to vector<256x1xf32>
    %123 = arith.divf %121, %122 : vector<256x1xf32>
    %124 = vector.broadcast %116 : vector<256x1xf32> to vector<256x16xf32>
    %125 = arith.subf %68, %124 : vector<256x16xf32>
    %cst_49 = arith.constant 9.99999974E-6 : f32
    %126 = vector.broadcast %cst_49 : f32 to vector<256x1xf32>
    %127 = arith.addf %123, %126 : vector<256x1xf32>
    %128 = math.rsqrt %127 : vector<256x1xf32>
    %129 = vector.broadcast %128 : vector<256x1xf32> to vector<256x16xf32>
    %130 = arith.mulf %125, %129 : vector<256x16xf32>
    %131 = arith.negf %130 : vector<256x16xf32>
    %132 = math.exp %131 : vector<256x16xf32>
    %cst_50 = arith.constant 1.000000e+00 : f32
    %133 = vector.broadcast %cst_50 : f32 to vector<256x16xf32>
    %134 = arith.addf %133, %132 : vector<256x16xf32>
    %135 = arith.divf %133, %134 : vector<256x16xf32>
    %136 = arith.mulf %130, %135 : vector<256x16xf32>
    %137 = arith.truncf %136 : vector<256x16xf32> to vector<256x16xbf16>
    %c24_51 = arith.constant 24 : index
    %c0_52 = arith.constant 0 : index
    %138 = vector.load %arg8[%c24_51, %c0_52] : memref<304x16xbf16, #tpu.memory_space<vmem>>, vector<256x16xbf16>
    tpu.vector_store %arg8[%c24_51, %c0_52], %137 {strides = array<i32>} : memref<304x16xbf16, #tpu.memory_space<vmem>>, vector<256x16xbf16>,
    %c7_53 = arith.constant 7 : index
    %c0_54 = arith.constant 0 : index
    %139 = vector.load %arg8[%c7_53, %c0_54] : memref<304x16xbf16, #tpu.memory_space<vmem>>, vector<256x16xbf16>
    %140 = arith.mulf %139, %37 : vector<256x16xbf16>
    %c8_55 = arith.constant 8 : index
    %c0_56 = arith.constant 0 : index
    %141 = vector.load %arg8[%c8_55, %c0_56] : memref<304x16xbf16, #tpu.memory_space<vmem>>, vector<256x16xbf16>
    %c9_57 = arith.constant 9 : index
    %c0_58 = arith.constant 0 : index
    %142 = vector.load %arg8[%c9_57, %c0_58] : memref<304x16xbf16, #tpu.memory_space<vmem>>, vector<256x16xbf16>
    %143 = arith.mulf %142, %38 : vector<256x16xbf16>
    %c23_59 = arith.constant 23 : index
    %c0_60 = arith.constant 0 : index
    %144 = vector.load %arg8[%c23_59, %c0_60] : memref<304x16xbf16, #tpu.memory_space<vmem>>, vector<256x16xbf16>
    %145 = arith.mulf %144, %37 : vector<256x16xbf16>
    %c24_61 = arith.constant 24 : index
    %c0_62 = arith.constant 0 : index
    %146 = vector.load %arg8[%c24_61, %c0_62] : memref<304x16xbf16, #tpu.memory_space<vmem>>, vector<256x16xbf16>
    %c25_63 = arith.constant 25 : index
    %c0_64 = arith.constant 0 : index
    %147 = vector.load %arg8[%c25_63, %c0_64] : memref<304x16xbf16, #tpu.memory_space<vmem>>, vector<256x16xbf16>
    %148 = arith.mulf %147, %38 : vector<256x16xbf16>
    %c39_65 = arith.constant 39 : index
    %c0_66 = arith.constant 0 : index
    %149 = vector.load %arg8[%c39_65, %c0_66] : memref<304x16xbf16, #tpu.memory_space<vmem>>, vector<256x16xbf16>
    %150 = arith.mulf %149, %37 : vector<256x16xbf16>
    %c40_67 = arith.constant 40 : index
    %c0_68 = arith.constant 0 : index
    %151 = vector.load %arg8[%c40_67, %c0_68] : memref<304x16xbf16, #tpu.memory_space<vmem>>, vector<256x16xbf16>
    %c41_69 = arith.constant 41 : index
    %c0_70 = arith.constant 0 : index
    %152 = vector.load %arg8[%c41_69, %c0_70] : memref<304x16xbf16, #tpu.memory_space<vmem>>, vector<256x16xbf16>
    %153 = arith.mulf %152, %38 : vector<256x16xbf16>
    %154 = tpu.concatenate %140, %141, %143, %145, %146, %148, %150, %151, %153 in 1 : vector<256x16xbf16>, vector<256x16xbf16>, vector<256x16xbf16>, vector<256x16xbf16>, vector<256x16xbf16>, vector<256x16xbf16>, vector<256x16xbf16>, vector<256x16xbf16>, vector<256x16xbf16> -> vector<256x144xbf16>
    %c0_71 = arith.constant 0 : index
    %c0_72 = arith.constant 0 : index
    %155 = vector.load %arg4[%c0_71, %c0_72] : memref<144x24xbf16, #tpu.memory_space<vmem>>, vector<144x24xbf16>
    %cst_73 = arith.constant dense<0.000000e+00> : vector<256x24xf32>
    %156 = tpu.matmul %154, %155, %cst_73 {dimension_numbers = #tpu.dot_dimension_numbers<[1], [0], [0], [1], [0, 0, 1, 1], [], []>} : vector<256x144xbf16>, vector<144x24xbf16>, vector<256x24xf32> -> vector<256x24xf32>
    %cst_74 = arith.constant dense<0.000000e+00> : vector<256xf32>
    %157 = vector.multi_reduction <add>, %156, %cst_74 [1] : vector<256x24xf32> to vector<256xf32>
    %158 = vector.shape_cast %157 : vector<256xf32> to vector<256x1xf32>
    %cst_75 = arith.constant 2.400000e+01 : f32
    %159 = vector.broadcast %cst_75 : f32 to vector<256x1xf32>
    %160 = arith.divf %158, %159 : vector<256x1xf32>
    %161 = vector.broadcast %160 : vector<256x1xf32> to vector<256x24xf32>
    %162 = arith.subf %156, %161 : vector<256x24xf32>
    %163 = arith.mulf %162, %162 : vector<256x24xf32>
    %cst_76 = arith.constant dense<0.000000e+00> : vector<256xf32>
    %164 = vector.multi_reduction <add>, %163, %cst_76 [1] : vector<256x24xf32> to vector<256xf32>
    %165 = vector.shape_cast %164 : vector<256xf32> to vector<256x1xf32>
    %cst_77 = arith.constant 2.400000e+01 : f32
    %166 = vector.broadcast %cst_77 : f32 to vector<256x1xf32>
    %167 = arith.divf %165, %166 : vector<256x1xf32>
    %168 = vector.broadcast %160 : vector<256x1xf32> to vector<256x24xf32>
    %169 = arith.subf %156, %168 : vector<256x24xf32>
    %cst_78 = arith.constant 9.99999974E-6 : f32
    %170 = vector.broadcast %cst_78 : f32 to vector<256x1xf32>
    %171 = arith.addf %167, %170 : vector<256x1xf32>
    %172 = math.rsqrt %171 : vector<256x1xf32>
    %173 = vector.broadcast %172 : vector<256x1xf32> to vector<256x24xf32>
    %174 = arith.mulf %169, %173 : vector<256x24xf32>
    %175 = arith.negf %174 : vector<256x24xf32>
    %176 = math.exp %175 : vector<256x24xf32>
    %cst_79 = arith.constant 1.000000e+00 : f32
    %177 = vector.broadcast %cst_79 : f32 to vector<256x24xf32>
    %178 = arith.addf %177, %176 : vector<256x24xf32>
    %179 = arith.divf %177, %178 : vector<256x24xf32>
    %180 = arith.mulf %174, %179 : vector<256x24xf32>
    %181 = arith.truncf %180 : vector<256x24xf32> to vector<256x24xbf16>
    %c24_80 = arith.constant 24 : index
    %c0_81 = arith.constant 0 : index
    %182 = vector.load %arg9[%c24_80, %c0_81] : memref<304x24xbf16, #tpu.memory_space<vmem>>, vector<256x24xbf16>
    tpu.vector_store %arg9[%c24_80, %c0_81], %181 {strides = array<i32>} : memref<304x24xbf16, #tpu.memory_space<vmem>>, vector<256x24xbf16>,
    %c7_82 = arith.constant 7 : index
    %c0_83 = arith.constant 0 : index
    %183 = vector.load %arg9[%c7_82, %c0_83] : memref<304x24xbf16, #tpu.memory_space<vmem>>, vector<256x24xbf16>
    %184 = arith.mulf %183, %31 : vector<256x24xbf16>
    %c8_84 = arith.constant 8 : index
    %c0_85 = arith.constant 0 : index
    %185 = vector.load %arg9[%c8_84, %c0_85] : memref<304x24xbf16, #tpu.memory_space<vmem>>, vector<256x24xbf16>
    %c9_86 = arith.constant 9 : index
    %c0_87 = arith.constant 0 : index
    %186 = vector.load %arg9[%c9_86, %c0_87] : memref<304x24xbf16, #tpu.memory_space<vmem>>, vector<256x24xbf16>
    %187 = arith.mulf %186, %36 : vector<256x24xbf16>
    %c23_88 = arith.constant 23 : index
    %c0_89 = arith.constant 0 : index
    %188 = vector.load %arg9[%c23_88, %c0_89] : memref<304x24xbf16, #tpu.memory_space<vmem>>, vector<256x24xbf16>
    %189 = arith.mulf %188, %31 : vector<256x24xbf16>
    %c24_90 = arith.constant 24 : index
    %c0_91 = arith.constant 0 : index
    %190 = vector.load %arg9[%c24_90, %c0_91] : memref<304x24xbf16, #tpu.memory_space<vmem>>, vector<256x24xbf16>
    %c25_92 = arith.constant 25 : index
    %c0_93 = arith.constant 0 : index
    %191 = vector.load %arg9[%c25_92, %c0_93] : memref<304x24xbf16, #tpu.memory_space<vmem>>, vector<256x24xbf16>
    %192 = arith.mulf %191, %36 : vector<256x24xbf16>
    %c39_94 = arith.constant 39 : index
    %c0_95 = arith.constant 0 : index
    %193 = vector.load %arg9[%c39_94, %c0_95] : memref<304x24xbf16, #tpu.memory_space<vmem>>, vector<256x24xbf16>
    %194 = arith.mulf %193, %31 : vector<256x24xbf16>
    %c40_96 = arith.constant 40 : index
    %c0_97 = arith.constant 0 : index
    %195 = vector.load %arg9[%c40_96, %c0_97] : memref<304x24xbf16, #tpu.memory_space<vmem>>, vector<256x24xbf16>
    %c41_98 = arith.constant 41 : index
    %c0_99 = arith.constant 0 : index
    %196 = vector.load %arg9[%c41_98, %c0_99] : memref<304x24xbf16, #tpu.memory_space<vmem>>, vector<256x24xbf16>
    %197 = arith.mulf %196, %36 : vector<256x24xbf16>
    %198 = tpu.concatenate %184, %185, %187, %189, %190, %192, %194, %195, %197 in 1 : vector<256x24xbf16>, vector<256x24xbf16>, vector<256x24xbf16>, vector<256x24xbf16>, vector<256x24xbf16>, vector<256x24xbf16>, vector<256x24xbf16>, vector<256x24xbf16>, vector<256x24xbf16> -> vector<256x216xbf16>
    %c0_100 = arith.constant 0 : index
    %c0_101 = arith.constant 0 : index
    %199 = vector.load %arg5[%c0_100, %c0_101] : memref<216x32xbf16, #tpu.memory_space<vmem>>, vector<216x32xbf16>
    %cst_102 = arith.constant dense<0.000000e+00> : vector<256x32xf32>
    %200 = tpu.matmul %198, %199, %cst_102 {dimension_numbers = #tpu.dot_dimension_numbers<[1], [0], [0], [1], [0, 0, 1, 1], [], []>} : vector<256x216xbf16>, vector<216x32xbf16>, vector<256x32xf32> -> vector<256x32xf32>
    %201 = arith.addf %66, %112 : vector<256x32xf32>
    %202 = arith.addf %201, %200 : vector<256x32xf32>
    %c0_103 = arith.constant 0 : index
    %c0_104 = arith.constant 0 : index
    %203 = vector.load %arg6[%c0_103, %c0_104] : memref<1x32xf32, #tpu.memory_space<vmem>>, vector<1x32xf32>
    %204 = vector.broadcast %203 : vector<1x32xf32> to vector<256x32xf32>
    %205 = arith.addf %202, %204 : vector<256x32xf32>
    %206 = arith.addf %1, %205 : vector<256x32xf32>
    %207 = arith.negf %206 : vector<256x32xf32>
    %208 = math.exp %207 : vector<256x32xf32>
    %cst_105 = arith.constant 1.000000e+00 : f32
    %209 = vector.broadcast %cst_105 : f32 to vector<256x32xf32>
    %210 = arith.addf %209, %208 : vector<256x32xf32>
    %211 = arith.divf %209, %210 : vector<256x32xf32>
    %212 = arith.mulf %206, %211 : vector<256x32xf32>
    %c0_106 = arith.constant 0 : index
    %c0_107 = arith.constant 0 : index
    %c0_108 = arith.constant 0 : index
    %213 = vector.load %arg7[%c0_106, %c0_107, %c0_108] : memref<1x256x32xf32, #tpu.memory_space<vmem>>, vector<1x256x32xf32>
    %214 = vector.shape_cast %213 : vector<1x256x32xf32> to vector<256x32xf32>
    %215 = vector.shape_cast %212 : vector<256x32xf32> to vector<1x256x32xf32>
    tpu.vector_store %arg7[%c0_106, %c0_107, %c0_108], %215 {strides = array<i32>} : memref<1x256x32xf32, #tpu.memory_space<vmem>>, vector<1x256x32xf32>,
    return
  }
  func.func @transform_0(%arg0: i32) -> (i32, i32, i32) {
    %c0_i32 = arith.constant 0 : i32
    %c0_i32_0 = arith.constant 0 : i32
    %c0_i32_1 = arith.constant 0 : i32
    return %arg0, %c0_i32, %c0_i32_0 : i32, i32, i32
  }
  func.func @transform_1(%arg0: i32) -> (i32, i32) {
    %c0_i32 = arith.constant 0 : i32
    %c0_i32_0 = arith.constant 0 : i32
    %c0_i32_1 = arith.constant 0 : i32
    return %c0_i32, %c0_i32_0 : i32, i32
  }
  func.func @transform_2(%arg0: i32) -> (i32, i32) {
    %c0_i32 = arith.constant 0 : i32
    %c0_i32_0 = arith.constant 0 : i32
    %c0_i32_1 = arith.constant 0 : i32
    return %c0_i32, %c0_i32_0 : i32, i32
  }
  func.func @transform_3(%arg0: i32) -> (i32, i32) {
    %c0_i32 = arith.constant 0 : i32
    %c0_i32_0 = arith.constant 0 : i32
    %c0_i32_1 = arith.constant 0 : i32
    return %c0_i32, %c0_i32_0 : i32, i32
  }
  func.func @transform_4(%arg0: i32) -> (i32, i32) {
    %c0_i32 = arith.constant 0 : i32
    %c0_i32_0 = arith.constant 0 : i32
    %c0_i32_1 = arith.constant 0 : i32
    return %c0_i32, %c0_i32_0 : i32, i32
  }
  func.func @transform_5(%arg0: i32) -> (i32, i32) {
    %c0_i32 = arith.constant 0 : i32
    %c0_i32_0 = arith.constant 0 : i32
    %c0_i32_1 = arith.constant 0 : i32
    return %c0_i32, %c0_i32_0 : i32, i32
  }
  func.func @transform_6(%arg0: i32) -> (i32, i32, i32) {
    %c0_i32 = arith.constant 0 : i32
    %c0_i32_0 = arith.constant 0 : i32
    %c0_i32_1 = arith.constant 0 : i32
    return %arg0, %c0_i32, %c0_i32_0 : i32, i32, i32
  }
}

</mosaic_0001>

<bundles_post_ra>
// kernel: tpu_custom_call.1
= control target key start
LH: loop header
LB: loop body
LE: loop exit
PB: predicated region body
PF: predicated region fallthrough
CT: control target
= control target key end

     0   :  { %s11627_s21 = smov 0   ;;  %s18594_s0 = inlined_call_operand.vmem [shape: f32[2,256,32], index: 0, kind: input, shape index: {}]   ;;  %s18595_s1 = inlined_call_operand.vmem [shape: bf16[32,64], index: 1, kind: input, shape index: {}]   ;;  %s18596_s2 = inlined_call_operand.vmem [shape: bf16[144,32], index: 2, kind: input, shape index: {}]   ;;  %s18597_s3 = inlined_call_operand.vmem [shape: bf16[144,24], index: 3, kind: input, shape index: {}]   ;;  %s18598_s4 = inlined_call_operand.vmem [shape: bf16[216,32], index: 4, kind: input, shape index: {}]   ;;  %s18599_s5 = inlined_call_operand.vmem [shape: f32[1,32], index: 5, kind: input, shape index: {}]   ;;  %s18600_s6 = inlined_call_operand.vmem [shape: f32[2,256,32], index: 6, kind: output, shape index: {}]  }
   0x1 LB: > { %s10180_s22 = sadd.s32 4294967295, %s11576_s21   ;;  %p10184_p0 = scmp.ge.s32.totalorder %s11576_s21, 1  ;;  %s11576_s21 = sphi %s11627_s21, %s16_s21  }
   0x2   : > { %p212_p1 = scmp.lt.s32.totalorder %s11576_s21, 3 }
   0x4   : > { %p213_p2 = pnand %p10184_p0, %p212_p1 }
   0x6   : > { %216 = sbr.rel (%p213_p2) target bundleno = 3889 (0xf31), region = 44 }
   0xd   : > { %p242_p3 = scmp.lt.s32.totalorder %s10180_s22, 1  ;;  %vm940_vm0 = vcmask 261120   ;;  %s11578_s7 = smov 96   ;;  %vm285_vm1 = vcmask 130048   ;;  %vm289_vm2 = vcmask 130052   ;;  %vm287_vm3 = vcmask 125952  }
   0xe   : > { %s11579_s8 = smov 80   ;;  %vm2752_vm4 = vcmask 1043456   ;;  %vm3049_vm8 = vsmask.f32 4352  ;;  %vm3305_vm9 = vsmask.f32 7424 }
   0xf   : > { %s19431_s22 = smov (!%p242_p3, %s10180_s22), 1  ;;  %s11583_s9 = smov 16   ;;  %vm3492_vm11 = vcmask 1046528   ;;  %vm2869_vm13 = vsmask.f32 3328 }
  0x10   : > { %s10482_s23 = sshll.u32 %s19431_s22, 8  ;;  %s11584_s10 = smov 32  }
  0x11   : > { %s11643_s26 = scalar_lea.vmem %s18594_s0, %s10482_s23  ;;  %s11585_s11 = smov 48  }
  0x12   : > { %v11646_v0 = vld [vmem:[%s11643_s26] sm:$0xff]  ;;  %v11649_v1 = vld [vmem:[%s11643_s26 + $0x10] sm:$0xff]  ;;  %v11652_v2 = vld [vmem:[%s11643_s26 + $0x8] sm:$0xff]  ;;  %s11586_s12 = smov 64   ;;  %s11587_s13 = smov 112  }
  0x13   : > { %v941_v3 = vsel %vm940_vm0, %v11646_v0, 0.0  ;;  %v947_v4 = vsel %vm940_vm0, %v11649_v1, 0.0  ;;  %v11659_v5 = vld [vmem:[%s11643_s26 + $0x18] sm:$0xff]  ;;  %v944_v6 = vsel %vm940_vm0, %v11652_v2, 0.0  ;;  %v11666_v8 = vld [vmem:[%s11643_s26 + $0x20] sm:$0xff]  ;;  %v11669_v9 = vld [vmem:[%s11643_s26 + $0x28] sm:$0xff] }
  0x14   : > { %942 = vadd.xlane.f32.xlu0 %v941_v3  ;;  %948 = vadd.xlane.f32.xlu1 %v947_v4  ;;  %v950_v7 = vsel %vm940_vm0, %v11659_v5, 0.0  ;;  %v11672_v10 = vld [vmem:[%s11643_s26 + $0x30] sm:$0xff]  ;;  %v11675_v11 = vld [vmem:[%s11643_s26 + $0x38] sm:$0xff]  ;;  %v11678_v12 = vld [vmem:[%s11643_s26 + $0x40] sm:$0xff]  ;;  %v953_v15 = vsel %vm940_vm0, %v11666_v8, 0.0  ;;  %v956_v16 = vsel %vm940_vm0, %v11669_v9, 0.0 }
  0x15   : > { %v11681_v13 = vld [vmem:[%s11643_s26 + $0x48] sm:$0xff]  ;;  %v11684_v14 = vld [vmem:[%s11643_s26 + $0x50] sm:$0xff]  ;;  %v11691_v17 = vld [vmem:[%s11643_s26 + $0x58] sm:$0xff]  ;;  %v959_v22 = vsel %vm940_vm0, %v11672_v10, 0.0  ;;  %v962_v23 = vsel %vm940_vm0, %v11675_v11, 0.0  ;;  %v965_v24 = vsel %vm940_vm0, %v11678_v12, 0.0 }
  0x16   : > { %v11694_v18 = vld [vmem:[%s11643_s26 + $0x60] sm:$0xff]  ;;  %v11697_v19 = vld [vmem:[%s11643_s26 + $0x68] sm:$0xff]  ;;  %v11700_v20 = vld [vmem:[%s11643_s26 + $0x70] sm:$0xff]  ;;  %v968_v25 = vsel %vm940_vm0, %v11681_v13, 0.0  ;;  %v971_v26 = vsel %vm940_vm0, %v11684_v14, 0.0  ;;  %v974_v27 = vsel %vm940_vm0, %v11691_v17, 0.0 }
  0x17   : > { %v11703_v21 = vld [vmem:[%s11643_s26 + $0x78] sm:$0xff]  ;;  %v977_v28 = vsel %vm940_vm0, %v11694_v18, 0.0  ;;  %v980_v29 = vsel %vm940_vm0, %v11697_v19, 0.0  ;;  %v983_v30 = vsel %vm940_vm0, %v11700_v20, 0.0  ;;  %v11726_v32 = vld [vmem:[%s11643_s26 + $0x80] sm:$0xff]  ;;  %v11729_v33 = vld [vmem:[%s11643_s26 + $0x88] sm:$0xff] }
  0x18   : > { %945 = vadd.xlane.f32.xlu0 %v944_v6  ;;  %951 = vadd.xlane.f32.xlu1 %v950_v7  ;;  %v986_v31 = vsel %vm940_vm0, %v11703_v21, 0.0  ;;  %v989_v34 = vsel %vm940_vm0, %v11726_v32, 0.0  ;;  %v992_v35 = vsel %vm940_vm0, %v11729_v33, 0.0  ;;  %v11736_v36 = vld [vmem:[%s11643_s26 + $0x90] sm:$0xff]  ;;  %v11739_v37 = vld [vmem:[%s11643_s26 + $0x98] sm:$0xff]  ;;  %v11746_v40 = vld [vmem:[%s11643_s26 + $0xa0] sm:$0xff] }
  0x19   : > { %v995_v38 = vsel %vm940_vm0, %v11736_v36, 0.0  ;;  %v998_v39 = vsel %vm940_vm0, %v11739_v37, 0.0  ;;  %v11749_v41 = vld [vmem:[%s11643_s26 + $0xa8] sm:$0xff]  ;;  %v1001_v42 = vsel %vm940_vm0, %v11746_v40, 0.0  ;;  %v11756_v44 = vld [vmem:[%s11643_s26 + $0xb0] sm:$0xff]  ;;  %v11759_v45 = vld [vmem:[%s11643_s26 + $0xb8] sm:$0xff] }
  0x1a   : > { %v1004_v43 = vsel %vm940_vm0, %v11749_v41, 0.0  ;;  %v1007_v46 = vsel %vm940_vm0, %v11756_v44, 0.0  ;;  %v1010_v47 = vsel %vm940_vm0, %v11759_v45, 0.0  ;;  %v11766_v48 = vld [vmem:[%s11643_s26 + $0xc0] sm:$0xff]  ;;  %v11769_v49 = vld [vmem:[%s11643_s26 + $0xc8] sm:$0xff]  ;;  %v11776_v52 = vld [vmem:[%s11643_s26 + $0xd0] sm:$0xff] }
  0x1b   : > { %v1013_v50 = vsel %vm940_vm0, %v11766_v48, 0.0  ;;  %v1016_v51 = vsel %vm940_vm0, %v11769_v49, 0.0  ;;  %v11779_v53 = vld [vmem:[%s11643_s26 + $0xd8] sm:$0xff]  ;;  %v1019_v54 = vsel %vm940_vm0, %v11776_v52, 0.0  ;;  %v11786_v56 = vld [vmem:[%s11643_s26 + $0xe0] sm:$0xff]  ;;  %v11789_v57 = vld [vmem:[%s11643_s26 + $0xe8] sm:$0xff] }
  0x1c   : > { %954 = vadd.xlane.f32.xlu0 %v953_v15  ;;  %957 = vadd.xlane.f32.xlu1 %v956_v16  ;;  %v1022_v55 = vsel %vm940_vm0, %v11779_v53, 0.0  ;;  %v1025_v58 = vsel %vm940_vm0, %v11786_v56, 0.0  ;;  %v1028_v59 = vsel %vm940_vm0, %v11789_v57, 0.0  ;;  %v11796_v60 = vld [vmem:[%s11643_s26 + $0xf0] sm:$0xff]  ;;  %v11799_v61 = vld [vmem:[%s11643_s26 + $0xf8] sm:$0xff]  ;;  %s11589_s19 = smov 120  }
  0x1d   : > { %v1031_v62 = vsel %vm940_vm0, %v11796_v60, 0.0  ;;  %v1034_v63 = vsel %vm940_vm0, %v11799_v61, 0.0  ;;  %s11591_s30 = smov 40  }
  0x20   : > { %960 = vadd.xlane.f32.xlu0 %v959_v22  ;;  %963 = vadd.xlane.f32.xlu1 %v962_v23 }
  0x24   : > { %966 = vadd.xlane.f32.xlu0 %v965_v24  ;;  %969 = vadd.xlane.f32.xlu1 %v968_v25 }
  0x28   : > { %972 = vadd.xlane.f32.xlu0 %v971_v26  ;;  %975 = vadd.xlane.f32.xlu1 %v974_v27 }
  0x2c   : > { %978 = vadd.xlane.f32.xlu0 %v977_v28  ;;  %981 = vadd.xlane.f32.xlu1 %v980_v29 }
  0x30   : > { %984 = vadd.xlane.f32.xlu0 %v983_v30  ;;  %987 = vadd.xlane.f32.xlu1 %v986_v31 }
  0x34   : > { %990 = vadd.xlane.f32.xlu0 %v989_v34  ;;  %993 = vadd.xlane.f32.xlu1 %v992_v35 }
  0x38   : > { %996 = vadd.xlane.f32.xlu0 %v995_v38  ;;  %999 = vadd.xlane.f32.xlu1 %v998_v39 }
  0x3c   : > { %1002 = vadd.xlane.f32.xlu0 %v1001_v42  ;;  %1005 = vadd.xlane.f32.xlu1 %v1004_v43 }
  0x40   : > { %1008 = vadd.xlane.f32.xlu0 %v1007_v46  ;;  %1011 = vadd.xlane.f32.xlu1 %v1010_v47 }
  0x44   : > { %1014 = vadd.xlane.f32.xlu0 %v1013_v50  ;;  %1017 = vadd.xlane.f32.xlu1 %v1016_v51 }
  0x48   : > { %1020 = vadd.xlane.f32.xlu0 %v1019_v54  ;;  %1023 = vadd.xlane.f32.xlu1 %v1022_v55 }
  0x4c   : > { %1026 = vadd.xlane.f32.xlu0 %v1025_v58  ;;  %1029 = vadd.xlane.f32.xlu1 %v1028_v59 }
  0x50   : > { %1032 = vadd.xlane.f32.xlu0 %v1031_v62  ;;  %1035 = vadd.xlane.f32.xlu1 %v1034_v63 }
  0xa1   : > { %v943_v3 = vpop.xlane.xlu0 %942  ;;  %v949_v4 = vpop.xlane.xlu1 %948 }
  0xa2   : > { %v1038_v6 = vmul.f32 0.03125, %v943_v3  ;;  %v1040_v7 = vmul.f32 0.03125, %v949_v4 }
  0xa4   : > { %v11806_v15 = vsub.f32 %v11646_v0, %v1038_v6  ;;  %v11809_v16 = vsub.f32 %v11649_v1, %v1040_v7 }
  0xa5   : > { %v946_v22 = vpop.xlane.xlu0 %945  ;;  %v952_v23 = vpop.xlane.xlu1 %951 }
  0xa6   : > { %v1039_v24 = vmul.f32 0.03125, %v946_v22  ;;  %v1041_v25 = vmul.f32 0.03125, %v952_v23  ;;  %v1102_v26 = vmul.f32 %v11806_v15, %v11806_v15  ;;  %v1104_v27 = vmul.f32 %v11809_v16, %v11809_v16 }
  0xa8   : > { %v11816_v28 = vsub.f32 %v11652_v2, %v1039_v24  ;;  %v11819_v29 = vsub.f32 %v11659_v5, %v1041_v25  ;;  %v1134_v0 = vsel %vm940_vm0, %v1102_v26, 0.0  ;;  %v1140_v31 = vsel %vm940_vm0, %v1104_v27, 0.0 }
  0xa9   : > { %1135 = vadd.xlane.f32.xlu0 %v1134_v0  ;;  %v955_v1 = vpop.xlane.xlu0 %954  ;;  %v958_v30 = vpop.xlane.xlu1 %957 }
  0xaa   : > { %v1042_v34 = vmul.f32 0.03125, %v955_v1  ;;  %v1043_v35 = vmul.f32 0.03125, %v958_v30  ;;  %v1103_v38 = vmul.f32 %v11816_v28, %v11816_v28  ;;  %v1105_v39 = vmul.f32 %v11819_v29, %v11819_v29 }
  0xac   : > { %v11828_v2 = vsub.f32 %v11666_v8, %v1042_v34  ;;  %v11831_v5 = vsub.f32 %v11669_v9, %v1043_v35  ;;  %v1137_v42 = vsel %vm940_vm0, %v1103_v38, 0.0  ;;  %v1143_v47 = vsel %vm940_vm0, %v1105_v39, 0.0 }
  0xad   : > { %1141 = vadd.xlane.f32.xlu0 %v1140_v31  ;;  %1138 = vadd.xlane.f32.xlu1 %v1137_v42  ;;  %v961_v43 = vpop.xlane.xlu0 %960  ;;  %v964_v46 = vpop.xlane.xlu1 %963 }
  0xae   : > { %v1044_v50 = vmul.f32 0.03125, %v961_v43  ;;  %v1045_v51 = vmul.f32 0.03125, %v964_v46  ;;  %v1106_v54 = vmul.f32 %v11828_v2, %v11828_v2  ;;  %v1107_v8 = vmul.f32 %v11831_v5, %v11831_v5 }
  0xb0   : > { %v11840_v55 = vsub.f32 %v11672_v10, %v1044_v50  ;;  %v11843_v9 = vsub.f32 %v11675_v11, %v1045_v51  ;;  %v1146_v58 = vsel %vm940_vm0, %v1106_v54, 0.0  ;;  %v1149_v63 = vsel %vm940_vm0, %v1107_v8, 0.0 }
  0xb1   : > { %1144 = vadd.xlane.f32.xlu1 %v1143_v47  ;;  %1147 = vadd.xlane.f32.xlu0 %v1146_v58  ;;  %v967_v59 = vpop.xlane.xlu0 %966  ;;  %v970_v62 = vpop.xlane.xlu1 %969 }
  0xb2   : > { %v1046_v3 = vmul.f32 0.03125, %v967_v59  ;;  %v1047_v4 = vmul.f32 0.03125, %v970_v62  ;;  %v1108_v6 = vmul.f32 %v11840_v55, %v11840_v55  ;;  %v1109_v10 = vmul.f32 %v11843_v9, %v11843_v9 }
  0xb4   : > { %v11852_v7 = vsub.f32 %v11678_v12, %v1046_v3  ;;  %v11855_v11 = vsub.f32 %v11681_v13, %v1047_v4  ;;  %v1152_v22 = vsel %vm940_vm0, %v1108_v6, 0.0  ;;  %v1155_v25 = vsel %vm940_vm0, %v1109_v10, 0.0 }
  0xb5   : > { %1150 = vadd.xlane.f32.xlu1 %v1149_v63  ;;  %1153 = vadd.xlane.f32.xlu0 %v1152_v22  ;;  %v973_v23 = vpop.xlane.xlu0 %972  ;;  %v976_v24 = vpop.xlane.xlu1 %975 }
  0xb6   : > { %v1048_v26 = vmul.f32 0.03125, %v973_v23  ;;  %v1049_v27 = vmul.f32 0.03125, %v976_v24  ;;  %v1110_v0 = vmul.f32 %v11852_v7, %v11852_v7  ;;  %v1111_v12 = vmul.f32 %v11855_v11, %v11855_v11 }
  0xb8   : > { %v11864_v1 = vsub.f32 %v11684_v14, %v1048_v26  ;;  %v11867_v13 = vsub.f32 %v11691_v17, %v1049_v27  ;;  %v1158_v30 = vsel %vm940_vm0, %v1110_v0, 0.0  ;;  %v1161_v35 = vsel %vm940_vm0, %v1111_v12, 0.0 }
  0xb9   : > { %1156 = vadd.xlane.f32.xlu1 %v1155_v25  ;;  %1159 = vadd.xlane.f32.xlu0 %v1158_v30  ;;  %v979_v31 = vpop.xlane.xlu0 %978  ;;  %v982_v34 = vpop.xlane.xlu1 %981 }
  0xba   : > { %v1050_v38 = vmul.f32 0.03125, %v979_v31  ;;  %v1051_v39 = vmul.f32 0.03125, %v982_v34  ;;  %v1112_v42 = vmul.f32 %v11864_v1, %v11864_v1  ;;  %v1113_v14 = vmul.f32 %v11867_v13, %v11867_v13 }
  0xbc   : > { %v11876_v43 = vsub.f32 %v11694_v18, %v1050_v38  ;;  %v11879_v17 = vsub.f32 %v11697_v19, %v1051_v39  ;;  %v1164_v46 = vsel %vm940_vm0, %v1112_v42, 0.0  ;;  %v1167_v51 = vsel %vm940_vm0, %v1113_v14, 0.0 }
  0xbd   : > { %1162 = vadd.xlane.f32.xlu1 %v1161_v35  ;;  %1165 = vadd.xlane.f32.xlu0 %v1164_v46  ;;  %v985_v47 = vpop.xlane.xlu0 %984  ;;  %v988_v50 = vpop.xlane.xlu1 %987 }
  0xbe   : > { %v1052_v54 = vmul.f32 0.03125, %v985_v47  ;;  %v1053_v8 = vmul.f32 0.03125, %v988_v50  ;;  %v1114_v58 = vmul.f32 %v11876_v43, %v11876_v43  ;;  %v1115_v18 = vmul.f32 %v11879_v17, %v11879_v17 }
  0xc0   : > { %v11888_v59 = vsub.f32 %v11700_v20, %v1052_v54  ;;  %v11891_v19 = vsub.f32 %v11703_v21, %v1053_v8  ;;  %v1170_v62 = vsel %vm940_vm0, %v1114_v58, 0.0  ;;  %v1173_v4 = vsel %vm940_vm0, %v1115_v18, 0.0 }
  0xc1   : > { %1168 = vadd.xlane.f32.xlu1 %v1167_v51  ;;  %1171 = vadd.xlane.f32.xlu0 %v1170_v62  ;;  %v991_v63 = vpop.xlane.xlu0 %990  ;;  %v994_v3 = vpop.xlane.xlu1 %993 }
  0xc2   : > { %v1054_v6 = vmul.f32 0.03125, %v991_v63  ;;  %v1055_v10 = vmul.f32 0.03125, %v994_v3  ;;  %v1116_v22 = vmul.f32 %v11888_v59, %v11888_v59  ;;  %v1117_v20 = vmul.f32 %v11891_v19, %v11891_v19 }
  0xc4   : > { %v11900_v23 = vsub.f32 %v11726_v32, %v1054_v6  ;;  %v11903_v21 = vsub.f32 %v11729_v33, %v1055_v10  ;;  %v1176_v24 = vsel %vm940_vm0, %v1116_v22, 0.0  ;;  %v1179_v27 = vsel %vm940_vm0, %v1117_v20, 0.0 }
  0xc5   : > { %1174 = vadd.xlane.f32.xlu1 %v1173_v4  ;;  %1177 = vadd.xlane.f32.xlu0 %v1176_v24  ;;  %v997_v25 = vpop.xlane.xlu0 %996  ;;  %v1000_v26 = vpop.xlane.xlu1 %999 }
  0xc6   : > { %v1056_v0 = vmul.f32 0.03125, %v997_v25  ;;  %v1057_v12 = vmul.f32 0.03125, %v1000_v26  ;;  %v1118_v30 = vmul.f32 %v11900_v23, %v11900_v23  ;;  %v1119_v32 = vmul.f32 %v11903_v21, %v11903_v21 }
  0xc8   : > { %v11912_v31 = vsub.f32 %v11736_v36, %v1056_v0  ;;  %v11915_v33 = vsub.f32 %v11739_v37, %v1057_v12  ;;  %v1182_v34 = vsel %vm940_vm0, %v1118_v30, 0.0  ;;  %v1185_v39 = vsel %vm940_vm0, %v1119_v32, 0.0 }
  0xc9   : > { %1180 = vadd.xlane.f32.xlu1 %v1179_v27  ;;  %1183 = vadd.xlane.f32.xlu0 %v1182_v34  ;;  %v1003_v35 = vpop.xlane.xlu0 %1002  ;;  %v1006_v38 = vpop.xlane.xlu1 %1005 }
  0xca   : > { %v1058_v42 = vmul.f32 0.03125, %v1003_v35  ;;  %v1059_v14 = vmul.f32 0.03125, %v1006_v38  ;;  %v1120_v46 = vmul.f32 %v11912_v31, %v11912_v31  ;;  %v1121_v36 = vmul.f32 %v11915_v33, %v11915_v33 }
  0xcc   : > { %v11924_v47 = vsub.f32 %v11746_v40, %v1058_v42  ;;  %v11927_v37 = vsub.f32 %v11749_v41, %v1059_v14  ;;  %v1188_v50 = vsel %vm940_vm0, %v1120_v46, 0.0  ;;  %v1191_v8 = vsel %vm940_vm0, %v1121_v36, 0.0 }
  0xcd   : > { %1186 = vadd.xlane.f32.xlu1 %v1185_v39  ;;  %1189 = vadd.xlane.f32.xlu0 %v1188_v50  ;;  %v1009_v51 = vpop.xlane.xlu0 %1008  ;;  %v1012_v54 = vpop.xlane.xlu1 %1011 }
  0xce   : > { %v1060_v58 = vmul.f32 0.03125, %v1009_v51  ;;  %v1061_v18 = vmul.f32 0.03125, %v1012_v54  ;;  %v1122_v62 = vmul.f32 %v11924_v47, %v11924_v47  ;;  %v1123_v40 = vmul.f32 %v11927_v37, %v11927_v37 }
  0xd0   : > { %v11936_v63 = vsub.f32 %v11756_v44, %v1060_v58  ;;  %v11939_v41 = vsub.f32 %v11759_v45, %v1061_v18  ;;  %v1194_v3 = vsel %vm940_vm0, %v1122_v62, 0.0  ;;  %v1197_v10 = vsel %vm940_vm0, %v1123_v40, 0.0 }
  0xd1   : > { %1192 = vadd.xlane.f32.xlu1 %v1191_v8  ;;  %1195 = vadd.xlane.f32.xlu0 %v1194_v3  ;;  %v1015_v4 = vpop.xlane.xlu0 %1014  ;;  %v1018_v6 = vpop.xlane.xlu1 %1017 }
  0xd2   : > { %v1062_v22 = vmul.f32 0.03125, %v1015_v4  ;;  %v1063_v20 = vmul.f32 0.03125, %v1018_v6  ;;  %v1124_v24 = vmul.f32 %v11936_v63, %v11936_v63  ;;  %v1125_v44 = vmul.f32 %v11939_v41, %v11939_v41 }
  0xd4   : > { %v11948_v25 = vsub.f32 %v11766_v48, %v1062_v22  ;;  %v11951_v45 = vsub.f32 %v11769_v49, %v1063_v20  ;;  %v1200_v26 = vsel %vm940_vm0, %v1124_v24, 0.0  ;;  %v1203_v12 = vsel %vm940_vm0, %v1125_v44, 0.0  ;;  %v10579_v44 = vld [vmem:[%s18595_s1 + $0x8] sm:$0xff]  }
  0xd5   : > { %1198 = vadd.xlane.f32.xlu1 %v1197_v10  ;;  %1201 = vadd.xlane.f32.xlu0 %v1200_v26  ;;  %v1021_v27 = vpop.xlane.xlu0 %1020  ;;  %v1024_v0 = vpop.xlane.xlu1 %1023 }
  0xd6   : > { %v1064_v30 = vmul.f32 0.03125, %v1021_v27  ;;  %v1065_v32 = vmul.f32 0.03125, %v1024_v0  ;;  %v1126_v34 = vmul.f32 %v11948_v25, %v11948_v25  ;;  %v1127_v48 = vmul.f32 %v11951_v45, %v11951_v45 }
  0xd8   : > { %v11960_v35 = vsub.f32 %v11776_v52, %v1064_v30  ;;  %v11963_v49 = vsub.f32 %v11779_v53, %v1065_v32  ;;  %v1206_v38 = vsel %vm940_vm0, %v1126_v34, 0.0  ;;  %v1209_v14 = vsel %vm940_vm0, %v1127_v48, 0.0 }
  0xd9   : > { %1204 = vadd.xlane.f32.xlu1 %v1203_v12  ;;  %1207 = vadd.xlane.f32.xlu0 %v1206_v38  ;;  %v1027_v39 = vpop.xlane.xlu0 %1026  ;;  %v1030_v42 = vpop.xlane.xlu1 %1029 }
  0xda   : > { %v1066_v46 = vmul.f32 0.03125, %v1027_v39  ;;  %v1067_v36 = vmul.f32 0.03125, %v1030_v42  ;;  %v1128_v50 = vmul.f32 %v11960_v35, %v11960_v35  ;;  %v1129_v52 = vmul.f32 %v11963_v49, %v11963_v49 }
  0xdc   : > { %v11972_v51 = vsub.f32 %v11786_v56, %v1066_v46  ;;  %v11975_v53 = vsub.f32 %v11789_v57, %v1067_v36  ;;  %v1212_v54 = vsel %vm940_vm0, %v1128_v50, 0.0  ;;  %v1215_v18 = vsel %vm940_vm0, %v1129_v52, 0.0 }
  0xdd   : > { %1210 = vadd.xlane.f32.xlu1 %v1209_v14  ;;  %1213 = vadd.xlane.f32.xlu0 %v1212_v54  ;;  %v1033_v8 = vpop.xlane.xlu0 %1032  ;;  %v1036_v58 = vpop.xlane.xlu1 %1035 }
  0xde   : > { %v1068_v62 = vmul.f32 0.03125, %v1033_v8  ;;  %v1069_v40 = vmul.f32 0.03125, %v1036_v58  ;;  %v1130_v3 = vmul.f32 %v11972_v51, %v11972_v51  ;;  %v1131_v56 = vmul.f32 %v11975_v53, %v11975_v53 }
  0xe0   : > { %v11984_v4 = vsub.f32 %v11796_v60, %v1068_v62  ;;  %v11987_v57 = vsub.f32 %v11799_v61, %v1069_v40  ;;  %v1218_v6 = vsel %vm940_vm0, %v1130_v3, 0.0  ;;  %v1221_v10 = vsel %vm940_vm0, %v1131_v56, 0.0  ;;  %v10578_v60 = vld [vmem:[%s18595_s1] sm:$0xff]  }
  0xe1   : > { %1216 = vadd.xlane.f32.xlu1 %v1215_v18  ;;  %1219 = vadd.xlane.f32.xlu0 %v1218_v6 }
  0xe2   : > { %v1132_v22 = vmul.f32 %v11984_v4, %v11984_v4  ;;  %v1133_v20 = vmul.f32 %v11987_v57, %v11987_v57  ;;  %10502 = vmatprep.subr.bf16.mxu0 %v10578_v60 }
  0xe3   : > { %10503 = vmatpush3.bf16.msra.mxu0 %v10578_v60 }
  0xe4   : > { %v1224_v24 = vsel %vm940_vm0, %v1132_v22, 0.0  ;;  %v1227_v61 = vsel %vm940_vm0, %v1133_v20, 0.0  ;;  %10504 = vmatprep.subr.bf16.mxu0 %v10579_v44 }
  0xe5   : > { %1222 = vadd.xlane.f32.xlu1 %v1221_v10  ;;  %1225 = vadd.xlane.f32.xlu0 %v1224_v24 }
  0xe7   : > { %10505 = vmatpush3.bf16.msra.mxu0 %v10579_v44 }
  0xe9   : > { %1228 = vadd.xlane.f32.xlu1 %v1227_v61 }
 0x136   : > { %v1136_v26 = vpop.xlane.xlu0 %1135 }
 0x137   : > { %v1230_v27 = vmul.f32 0.03125, %v1136_v26 }
 0x139   : > { %v1262_v0 = vadd.f32 1e-05, %v1230_v27 }
 0x13a   : > { %v1139_v12 = vpop.xlane.xlu1 %1138  ;;  %v1142_v30 = vpop.xlane.xlu0 %1141 }
 0x13b   : > { %10612 = vrsqrt.f32 %v1262_v0  ;;  %v1231_v32 = vmul.f32 0.03125, %v1139_v12  ;;  %v1232_v34 = vmul.f32 0.03125, %v1142_v30 }
 0x13d   : > { %v1263_v48 = vadd.f32 1e-05, %v1231_v32  ;;  %v1264_v38 = vadd.f32 1e-05, %v1232_v34 }
 0x13e   : > { %v1145_v39 = vpop.xlane.xlu1 %1144  ;;  %v1148_v42 = vpop.xlane.xlu0 %1147 }
 0x13f   : > { %10614 = vrsqrt.f32 %v1263_v48  ;;  %v1233_v14 = vmul.f32 0.03125, %v1145_v39  ;;  %v1234_v46 = vmul.f32 0.03125, %v1148_v42 }
 0x140   : > { %10616 = vrsqrt.f32 %v1264_v38 }
 0x141   : > { %v1265_v36 = vadd.f32 1e-05, %v1233_v14  ;;  %v1266_v50 = vadd.f32 1e-05, %v1234_v46 }
 0x142   : > { %v1151_v52 = vpop.xlane.xlu1 %1150  ;;  %v1154_v54 = vpop.xlane.xlu0 %1153 }
 0x143   : > { %10618 = vrsqrt.f32 %v1265_v36  ;;  %v1235_v8 = vmul.f32 0.03125, %v1151_v52  ;;  %v1236_v58 = vmul.f32 0.03125, %v1154_v54 }
 0x144   : > { %10620 = vrsqrt.f32 %v1266_v50 }
 0x145   : > { %v10613_v18 = vpop.eup %10612  ;;  %v1267_v62 = vadd.f32 1e-05, %v1235_v8  ;;  %v1268_v40 = vadd.f32 1e-05, %v1236_v58 }
 0x146   : > { %v1157_v3 = vpop.xlane.xlu1 %1156  ;;  %v1160_v56 = vpop.xlane.xlu0 %1159  ;;  %v12004_v6 = vmul.f32 %v10613_v18, %v11806_v15 }
 0x147   : > { %10622 = vrsqrt.f32 %v1267_v62  ;;  %v1237_v10 = vmul.f32 0.03125, %v1157_v3  ;;  %v1238_v22 = vmul.f32 0.03125, %v1160_v56 }
 0x148   : > { %10624 = vrsqrt.f32 %v1268_v40  ;;  %v10221_v20 = vmul.f32 -1.442695, %v12004_v6 }
 0x149   : > { %v10615_v24 = vpop.eup %10614  ;;  %v1269_v60 = vadd.f32 1e-05, %v1237_v10  ;;  %v1270_v61 = vadd.f32 1e-05, %v1238_v22 }
 0x14a   : > { %v10617_v44 = vpop.eup %10616  ;;  %v1163_v26 = vpop.xlane.xlu1 %1162  ;;  %v12008_v0 = vmul.f32 %v10615_v24, %v11816_v28  ;;  %10626 = vpow2.f32 %v10221_v20 }
 0x14b   : > { %v1166_v27 = vpop.xlane.xlu0 %1165  ;;  %v1239_v12 = vmul.f32 0.03125, %v1163_v26  ;;  %v12011_v15 = vmul.f32 %v10617_v44, %v11809_v16  ;;  %10628 = vrsqrt.f32 %v1269_v60 }
 0x14c   : > { %v1240_v30 = vmul.f32 0.03125, %v1166_v27  ;;  %v10222_v32 = vmul.f32 -1.442695, %v12008_v0  ;;  %10630 = vrsqrt.f32 %v1270_v61 }
 0x14d   : > { %v10619_v34 = vpop.eup %10618  ;;  %v1271_v48 = vadd.f32 1e-05, %v1239_v12  ;;  %v10223_v39 = vmul.f32 -1.442695, %v12011_v15 }
 0x14e   : > { %v1272_v38 = vadd.f32 1e-05, %v1240_v30  ;;  %v10621_v42 = vpop.eup %10620  ;;  %v1169_v14 = vpop.xlane.xlu1 %1168  ;;  %10632 = vpow2.f32 %v10222_v32  ;;  %v12016_v28 = vmul.f32 %v10619_v34, %v11819_v29 }
 0x14f   : > { %v1172_v46 = vpop.xlane.xlu0 %1171  ;;  %10634 = vrsqrt.f32 %v1271_v48  ;;  %v1241_v36 = vmul.f32 0.03125, %v1169_v14  ;;  %v12019_v50 = vmul.f32 %v10621_v42, %v11828_v2 }
 0x150   : > { %v1242_v16 = vmul.f32 0.03125, %v1172_v46  ;;  %10636 = vrsqrt.f32 %v1272_v38  ;;  %v10224_v52 = vmul.f32 -1.442695, %v12016_v28 }
 0x151   : > { %v10623_v54 = vpop.eup %10622  ;;  %v1273_v8 = vadd.f32 1e-05, %v1241_v36  ;;  %10638 = vpow2.f32 %v10223_v39  ;;  %v10225_v18 = vmul.f32 -1.442695, %v12019_v50 }
 0x152   : > { %v1274_v58 = vadd.f32 1e-05, %v1242_v16  ;;  %v10625_v62 = vpop.eup %10624  ;;  %v1175_v40 = vpop.xlane.xlu1 %1174  ;;  %10640 = vpow2.f32 %v10224_v52  ;;  %v12024_v29 = vmul.f32 %v10623_v54, %v11831_v5 }
 0x153   : > { %v1178_v3 = vpop.xlane.xlu0 %1177  ;;  %10642 = vrsqrt.f32 %v1273_v8  ;;  %v1243_v56 = vmul.f32 0.03125, %v1175_v40  ;;  %v12027_v10 = vmul.f32 %v10625_v62, %v11840_v55 }
 0x154   : > { %v1244_v2 = vmul.f32 0.03125, %v1178_v3  ;;  %v10627_v22 = vpop.eup %10626  ;;  %10644 = vrsqrt.f32 %v1274_v58  ;;  %v10226_v20 = vmul.f32 -1.442695, %v12024_v29 }
 0x155   : > { %v1275_v24 = vadd.f32 1e-05, %v1243_v56  ;;  %v1454_v61 = vadd.f32 1.0, %v10627_v22  ;;  %10646 = vpow2.f32 %v10225_v18  ;;  %v10629_v44 = vpop.eup %10628  ;;  %v10227_v5 = vmul.f32 -1.442695, %v12027_v10 }
 0x156   : > { %v1276_v60 = vadd.f32 1e-05, %v1244_v2  ;;  %v1181_v26 = vpop.xlane.xlu1 %1180  ;;  %10648 = vpow2.f32 %v10226_v20  ;;  %v10631_v12 = vpop.eup %10630  ;;  %v12032_v22 = vmul.f32 %v10629_v44, %v11843_v9 }
 0x157   : > { %v1184_v27 = vpop.xlane.xlu0 %1183  ;;  %10650 = vrsqrt.f32 %v1275_v24  ;;  %v1245_v30 = vmul.f32 0.03125, %v1181_v26  ;;  %v12040_v44 = vmul.f32 %v10631_v12, %v11852_v7 }
 0x158   : > { %v1246_v32 = vmul.f32 0.03125, %v1184_v27  ;;  %v10633_v55 = vpop.eup %10632  ;;  %10652 = vrsqrt.f32 %v1276_v60  ;;  %v10228_v9 = vmul.f32 -1.442695, %v12032_v22 }
 0x159   : > { %v10635_v34 = vpop.eup %10634  ;;  %v1277_v48 = vadd.f32 1e-05, %v1245_v30  ;;  %v1455_v39 = vadd.f32 1.0, %v10633_v55  ;;  %10654 = vrcp.f32 %v1454_v61  ;;  %v10229_v12 = vmul.f32 -1.442695, %v12040_v44 }
 0x15a   : > { %v1278_v38 = vadd.f32 1e-05, %v1246_v32  ;;  %v10637_v42 = vpop.eup %10636  ;;  %v1187_v14 = vpop.xlane.xlu1 %1186  ;;  %10656 = vpow2.f32 %v10227_v5 }
 0x15b   : > { %v1190_v46 = vpop.xlane.xlu0 %1189  ;;  %v10639_v36 = vpop.eup %10638  ;;  %10658 = vrsqrt.f32 %v1277_v48  ;;  %v1247_v16 = vmul.f32 0.03125, %v1187_v14 }
 0x15c   : > { %v1248_v52 = vmul.f32 0.03125, %v1190_v46  ;;  %v10641_v54 = vpop.eup %10640  ;;  %10660 = vrsqrt.f32 %v1278_v38  ;;  %v1456_v8 = vadd.f32 1.0, %v10639_v36 }
 0x15d   : > { %v10643_v58 = vpop.eup %10642  ;;  %v1279_v18 = vadd.f32 1e-05, %v1247_v16  ;;  %10662 = vrcp.f32 %v1455_v39  ;;  %v1457_v40 = vadd.f32 1.0, %v10641_v54  ;;  %v12043_v16 = vmul.f32 %v10635_v34, %v11855_v11 }
 0x15e   : > { %v1280_v62 = vadd.f32 1e-05, %v1248_v52  ;;  %v10645_v3 = vpop.eup %10644  ;;  %v1193_v56 = vpop.xlane.xlu1 %1192  ;;  %10664 = vrcp.f32 %v1456_v8 }
 0x15f   : > { %v1196_v2 = vpop.xlane.xlu0 %1195  ;;  %v10647_v20 = vpop.eup %10646  ;;  %10666 = vrsqrt.f32 %v1279_v18  ;;  %v1249_v24 = vmul.f32 0.03125, %v1193_v56  ;;  %v12051_v56 = vmul.f32 %v10637_v42, %v11864_v1  ;;  %v12059_v1 = vmul.f32 %v10643_v58, %v11867_v13 }
 0x160   : > { %v1250_v60 = vmul.f32 0.03125, %v1196_v2  ;;  %v10649_v61 = vpop.eup %10648  ;;  %10668 = vrsqrt.f32 %v1280_v62  ;;  %v1458_v26 = vadd.f32 1.0, %v10647_v20 }
 0x161   : > { %v12034_v27 = vpop.eup %10650  ;;  %v1281_v5 = vadd.f32 1e-05, %v1249_v24  ;;  %10670 = vrcp.f32 %v1457_v40  ;;  %v1459_v32 = vadd.f32 1.0, %v10649_v61  ;;  %v10230_v61 = vmul.f32 -1.442695, %v12043_v16 }
 0x162   : > { %v1282_v30 = vadd.f32 1e-05, %v1250_v60  ;;  %v12036_v55 = vpop.eup %10652  ;;  %v1199_v48 = vpop.xlane.xlu1 %1198  ;;  %10672 = vrcp.f32 %v1458_v26 }
 0x163   : > { %v1202_v38 = vpop.xlane.xlu0 %1201  ;;  %v10655_v39 = vpop.eup %10654  ;;  %10674 = vrsqrt.f32 %v1281_v5  ;;  %v1251_v14 = vmul.f32 0.03125, %v1199_v48 }
 0x164   : > { %v1252_v46 = vmul.f32 0.03125, %v1202_v38  ;;  %v10657_v36 = vpop.eup %10656  ;;  %10676 = vrsqrt.f32 %v1282_v30  ;;  %v1550_v24 = vmul.f32 %v10655_v39, %v12004_v6  ;;  %v10231_v6 = vmul.f32 -1.442695, %v12051_v56 }
 0x165   : > { %v12045_v52 = vpop.eup %10658  ;;  %v1283_v54 = vadd.f32 1e-05, %v1251_v14  ;;  %10678 = vrcp.f32 %v1459_v32  ;;  %v1460_v18 = vadd.f32 1.0, %v10657_v36 }
 0x166   : > { %v1284_v8 = vadd.f32 1e-05, %v1252_v46  ;;  %v12047_v62 = vpop.eup %10660  ;;  %v1205_v40 = vpop.xlane.xlu1 %1204  ;;  %10680 = vpow2.f32 %v10228_v9 }
 0x167   : > { %v1208_v7 = vpop.xlane.xlu0 %1207  ;;  %v10663_v2 = vpop.eup %10662  ;;  %10682 = vrsqrt.f32 %v1283_v54  ;;  %v1253_v11 = vmul.f32 0.03125, %v1205_v40 }
 0x168   : > { %v1254_v34 = vmul.f32 0.03125, %v1208_v7  ;;  %v10665_v20 = vpop.eup %10664  ;;  %10684 = vrsqrt.f32 %v1284_v8  ;;  %v1551_v60 = vmul.f32 %v10663_v2, %v12008_v0  ;;  %v12065_v0 = vmul.f32 %v10645_v3, %v11876_v43 }
 0x169   : > { %v12056_v26 = vpop.eup %10666  ;;  %v1285_v5 = vadd.f32 1e-05, %v1253_v11  ;;  %10686 = vrcp.f32 %v1460_v18  ;;  %v1552_v13 = vmul.f32 %v10665_v20, %v12011_v15  ;;  %v10232_v43 = vmul.f32 -1.442695, %v12059_v1 }
 0x16a   : > { %v1286_v30 = vadd.f32 1e-05, %v1254_v34  ;;  %v12061_v42 = vpop.eup %10668  ;;  %v1211_v32 = vpop.xlane.xlu1 %1210  ;;  %v1582_v48 = vpack.c.bf16 %v1551_v60, %v1550_v24  ;;  %10688 = vpow2.f32 %v10229_v12  ;;  %v12077_v12 = vmul.f32 %v12034_v27, %v11879_v17 }
 0x16b   : > { %v1214_v38 = vpop.xlane.xlu0 %1213  ;;  %v10671_v9 = vpop.eup %10670  ;;  %10690 = vrsqrt.f32 %v1285_v5  ;;  %v1255_v39 = vmul.f32 0.03125, %v1211_v32  ;;  %v10233_v15 = vmul.f32 -1.442695, %v12065_v0 }
 0x16c   : > { %v1256_v14 = vmul.f32 0.03125, %v1214_v38  ;;  %v10673_v46 = vpop.eup %10672  ;;  %10692 = vrsqrt.f32 %v1286_v30  ;;  %10506 = vmatprep.mubr.msk.bf16.mxu0 %vm940_vm0, %v1582_v48  ;;  %v1553_v58 = vmul.f32 %v10671_v9, %v12016_v28  ;;  %v10234_v38 = vmul.f32 -1.442695, %v12077_v12 }
 0x16d   : > { %v12070_v36 = vpop.eup %10674  ;;  %v1287_v54 = vadd.f32 1e-05, %v1255_v39  ;;  %10694 = vpow2.f32 %v10230_v61  ;;  %v1554_v20 = vmul.f32 %v10673_v46, %v12019_v50  ;;  %v12087_v50 = vmul.f32 %v12036_v55, %v11888_v59 }
 0x16e   : > { %v1288_v8 = vadd.f32 1e-05, %v1256_v14  ;;  %v12073_v3 = vpop.eup %10676  ;;  %v1217_v18 = vpop.xlane.xlu1 %1216  ;;  %v1583_v40 = vpack.c.bf16 %v1553_v58, %v1552_v13  ;;  %10696 = vpow2.f32 %v10231_v6 }
 0x16f   : > { %v1220_v7 = vpop.xlane.xlu0 %1219  ;;  %v10679_v28 = vpop.eup %10678  ;;  %10698 = vrsqrt.f32 %v1287_v54  ;;  %v1257_v2 = vmul.f32 0.03125, %v1217_v18  ;;  %v10235_v59 = vmul.f32 -1.442695, %v12087_v50 }
 0x170   : > { %v1258_v11 = vmul.f32 0.03125, %v1220_v7  ;;  %v10681_v34 = vpop.eup %10680  ;;  %10700 = vrsqrt.f32 %v1288_v8  ;;  %10507 = vmatmul.mubr.msk.bf16.vlgmr.msra.gmra.mrb[0].mxu0 %vm940_vm0, %v1583_v40  ;;  %v1555_v24 = vmul.f32 %v10679_v28, %v12024_v29 }
 0x171   : > { %v10683_v60 = vpop.eup %10682  ;;  %v1289_v61 = vadd.f32 1e-05, %v1257_v2  ;;  %v1461_v30 = vadd.f32 1.0, %v10681_v34  ;;  %10702 = vpow2.f32 %v10232_v43 }
 0x172   : > { %v1290_v5 = vadd.f32 1e-05, %v1258_v11  ;;  %v10685_v17 = vpop.eup %10684  ;;  %v1223_v27 = vpop.xlane.xlu1 %1222  ;;  %v1584_v32 = vpack.c.bf16 %v1555_v24, %v1554_v20  ;;  %10704 = vpow2.f32 %v10233_v15  ;;  %v12091_v15 = vmul.f32 %v12045_v52, %v11891_v19 }
 0x173   : > { %v1226_v48 = vpop.xlane.xlu0 %1225  ;;  %v10687_v6 = vpop.eup %10686  ;;  %10706 = vrsqrt.f32 %v1289_v61  ;;  %v1259_v9 = vmul.f32 0.03125, %v1223_v27  ;;  %v12096_v11 = vmul.f32 %v12047_v62, %v11900_v23  ;;  %v12100_v20 = vmul.f32 %v12056_v26, %v11903_v21 }
 0x174   : > { %v1260_v39 = vmul.f32 0.03125, %v1226_v48  ;;  %v10689_v14 = vpop.eup %10688  ;;  %10708 = vrsqrt.f32 %v1290_v5  ;;  %10510 = vmatprep.mubr.msk.bf16.mxu0 %vm940_vm0, %v1584_v32  ;;  %v12104_v19 = vmul.f32 %v12061_v42, %v11912_v31  ;;  %v10236_v5 = vmul.f32 -1.442695, %v12091_v15 }
 0x175   : > { %v10691_v29 = vpop.eup %10690  ;;  %v1291_v46 = vadd.f32 1e-05, %v1259_v9  ;;  %10710 = vrcp.f32 %v1461_v30  ;;  %v1462_v58 = vadd.f32 1.0, %v10689_v14  ;;  %v10237_v62 = vmul.f32 -1.442695, %v12096_v11 }
 0x176   : > { %v1292_v13 = vadd.f32 1e-05, %v1260_v39  ;;  %v10693_v54 = vpop.eup %10692  ;;  %v1229_v8 = vpop.xlane.xlu1 %1228  ;;  %10712 = vpow2.f32 %v10234_v38  ;;  %v12112_v21 = vmul.f32 %v12070_v36, %v11915_v33  ;;  %v10238_v31 = vmul.f32 -1.442695, %v12100_v20 }
 0x177   : > { %v10695_v43 = vpop.eup %10694  ;;  %10714 = vrsqrt.f32 %v1291_v46  ;;  %v1261_v18 = vmul.f32 0.03125, %v1229_v8  ;;  %v12119_v42 = vmul.f32 %v12073_v3, %v11924_v47  ;;  %v10239_v32 = vmul.f32 -1.442695, %v12104_v19 }
 0x178   : > { %v10697_v40 = vpop.eup %10696  ;;  %10716 = vrsqrt.f32 %v1292_v13  ;;  %v1463_v7 = vadd.f32 1.0, %v10695_v43  ;;  %v12123_v48 = vmul.f32 %v10683_v60, %v11927_v37  ;;  %v1556_v33 = vmul.f32 %v10687_v6, %v12027_v10 }
 0x179   : > { %v10699_v55 = vpop.eup %10698  ;;  %v1293_v28 = vadd.f32 1e-05, %v1261_v18  ;;  %10718 = vrcp.f32 %v1462_v58  ;;  %v1464_v2 = vadd.f32 1.0, %v10697_v40  ;;  %v12128_v9 = vmul.f32 %v10685_v17, %v11936_v63 }
 0x17a   : > { %v10701_v34 = vpop.eup %10700  ;;  %10720 = vrcp.f32 %v1463_v7  ;;  %v10240_v3 = vmul.f32 -1.442695, %v12112_v21  ;;  %v12134_v14 = vmul.f32 %v10691_v29, %v11939_v41  ;;  %v10241_v10 = vmul.f32 -1.442695, %v12119_v42 }
 0x17b   : > { %v10703_v24 = vpop.eup %10702  ;;  %10722 = vrsqrt.f32 %v1293_v28  ;;  %v10242_v63 = vmul.f32 -1.442695, %v12123_v48  ;;  %v12141_v17 = vmul.f32 %v10693_v54, %v11948_v25  ;;  %v10243_v41 = vmul.f32 -1.442695, %v12128_v9 }
 0x17c   : > { %v10705_v52 = vpop.eup %10704  ;;  %v1465_v61 = vadd.f32 1.0, %v10703_v24  ;;  %10724 = vrcp.f32 %v1464_v2  ;;  %v12146_v29 = vmul.f32 %v10699_v55, %v11951_v45  ;;  %v10244_v8 = vmul.f32 -1.442695, %v12134_v14 }
 0x17d   : > { %v12107_v30 = vpop.eup %10706  ;;  %v1466_v23 = vadd.f32 1.0, %v10705_v52  ;;  %10726 = vpow2.f32 %v10235_v59  ;;  %v10245_v18 = vmul.f32 -1.442695, %v12141_v17  ;;  %v12156_v59 = vmul.f32 %v10701_v34, %v11960_v35 }
 0x17e   : > { %v12114_v26 = vpop.eup %10708  ;;  %10728 = vrcp.f32 %v1465_v61  ;;  %v10246_v45 = vmul.f32 -1.442695, %v12146_v29 }
 0x17f   : > { %v10711_v27 = vpop.eup %10710  ;;  %10730 = vrcp.f32 %v1466_v23  ;;  %v10247_v35 = vmul.f32 -1.442695, %v12156_v59 }
 0x180   : > { %v10713_v38 = vpop.eup %10712  ;;  %v1557_v36 = vmul.f32 %v10711_v27, %v12032_v22  ;;  %10732 = vpow2.f32 %v10236_v5 }
 0x181   : > { %v12130_v39 = vpop.eup %10714  ;;  %v1467_v47 = vadd.f32 1.0, %v10713_v38  ;;  %10734 = vpow2.f32 %v10237_v62 }
 0x182   : > { %v12136_v37 = vpop.eup %10716  ;;  %v1585_v60 = vpack.c.bf16 %v1557_v36, %v1556_v33  ;;  %10736 = vpow2.f32 %v10238_v31 }
 0x183   : > { %v10719_v22 = vpop.eup %10718  ;;  %10738 = vrcp.f32 %v1467_v47 }
 0x184   : > { %v10721_v6 = vpop.eup %10720  ;;  %10511 = vmatmul.mubr.msk.bf16.gmra.mrb[4].mxu0 %vm940_vm0, %v1585_v60  ;;  %10740 = vpow2.f32 %v10239_v32  ;;  %v1558_v13 = vmul.f32 %v10719_v22, %v12040_v44  ;;  %v12167_v32 = vmul.f32 %v12107_v30, %v11963_v49  ;;  %v12177_v22 = vmul.f32 %v12130_v39, %v11975_v53 }
 0x185   : > { %v12148_v46 = vpop.eup %10722  ;;  %v1559_v58 = vmul.f32 %v10721_v6, %v12043_v16  ;;  %10742 = vpow2.f32 %v10240_v3 }
 0x186   : > { %v10725_v25 = vpop.eup %10724  ;;  %10744 = vpow2.f32 %v10241_v10  ;;  %v10248_v30 = vmul.f32 -1.442695, %v12167_v32 }
 0x187   : > { %v10727_v54 = vpop.eup %10726  ;;  %v1586_v43 = vpack.c.bf16 %v1559_v58, %v1558_v13  ;;  %10746 = vpow2.f32 %v10242_v63  ;;  %v1560_v16 = vmul.f32 %v10725_v25, %v12051_v56  ;;  %v10250_v25 = vmul.f32 -1.442695, %v12177_v22 }
 0x188   : > { %v10729_v40 = vpop.eup %10728  ;;  %v1468_v7 = vadd.f32 1.0, %v10727_v54  ;;  %10748 = vpow2.f32 %v10243_v41  ;;  %v12181_v41 = vmul.f32 %v12136_v37, %v11984_v4 }
 0x189   : > { %v10731_v44 = vpop.eup %10730  ;;  %10514 = vmatprep.mubr.msk.bf16.mxu0 %vm940_vm0, %v1586_v43  ;;  %v1561_v55 = vmul.f32 %v10729_v40, %v12059_v1  ;;  %10750 = vpow2.f32 %v10244_v8 }
 0x18a   : > { %v10733_v28 = vpop.eup %10732  ;;  %10752 = vrcp.f32 %v1468_v7  ;;  %v1562_v1 = vmul.f32 %v10731_v44, %v12065_v0  ;;  %v10251_v43 = vmul.f32 -1.442695, %v12181_v41 }
 0x18b   : > { %v10735_v2 = vpop.eup %10734  ;;  %v1587_v24 = vpack.c.bf16 %v1561_v55, %v1560_v16  ;;  %v1469_v52 = vadd.f32 1.0, %v10733_v28  ;;  %10754 = vpow2.f32 %v10245_v18 }
 0x18c   : > { %v10737_v61 = vpop.eup %10736  ;;  %v1470_v5 = vadd.f32 1.0, %v10735_v2  ;;  %10756 = vpow2.f32 %v10246_v45 }
 0x18d   : > { %v10739_v34 = vpop.eup %10738  ;;  %10515 = vmatmul.mubr.msk.bf16.gmra.mrb[8].mxu0 %vm940_vm0, %v1587_v24  ;;  %10758 = vrcp.f32 %v1469_v52  ;;  %v1471_v23 = vadd.f32 1.0, %v10737_v61 }
 0x18e   : > { %v10741_v56 = vpop.eup %10740  ;;  %v1563_v62 = vmul.f32 %v10739_v34, %v12077_v12  ;;  %10760 = vrcp.f32 %v1470_v5  ;;  %v12172_v12 = vmul.f32 %v12114_v26, %v11972_v51  ;;  %v12185_v51 = vmul.f32 %v12148_v46, %v11987_v57 }
 0x18f   : > { %v10743_v31 = vpop.eup %10742  ;;  %10762 = vrcp.f32 %v1471_v23  ;;  %v1472_v27 = vadd.f32 1.0, %v10741_v56 }
 0x190   : > { %v10745_v38 = vpop.eup %10744  ;;  %v1588_v33 = vpack.c.bf16 %v1563_v62, %v1562_v1  ;;  %v1473_v36 = vadd.f32 1.0, %v10743_v31  ;;  %10764 = vpow2.f32 %v10247_v35  ;;  %v10249_v8 = vmul.f32 -1.442695, %v12172_v12 }
 0x191   : > { %v10747_v47 = vpop.eup %10746  ;;  %10766 = vrcp.f32 %v1472_v27  ;;  %v1474_v3 = vadd.f32 1.0, %v10745_v38  ;;  %v10252_v46 = vmul.f32 -1.442695, %v12185_v51 }
 0x192   : > { %v10749_v60 = vpop.eup %10748  ;;  %10518 = vmatprep.mubr.msk.bf16.mxu0 %vm940_vm0, %v1588_v33  ;;  %10768 = vrcp.f32 %v1473_v36  ;;  %v1475_v0 = vadd.f32 1.0, %v10747_v47 }
 0x193   : > { %v10751_v10 = vpop.eup %10750  ;;  %10770 = vrcp.f32 %v1474_v3  ;;  %v1476_v49 = vadd.f32 1.0, %v10749_v60 }
 0x194   : > { %v10753_v63 = vpop.eup %10752  ;;  %10772 = vrcp.f32 %v1475_v0  ;;  %v1477_v6 = vadd.f32 1.0, %v10751_v10 }
 0x195   : > { %v10755_v13 = vpop.eup %10754  ;;  %10774 = vrcp.f32 %v1476_v49  ;;  %v1564_v4 = vmul.f32 %v10753_v63, %v12087_v50 }
 0x196   : > { %v10757_v26 = vpop.eup %10756  ;;  %10776 = vrcp.f32 %v1477_v6  ;;  %v1478_v58 = vadd.f32 1.0, %v10755_v13 }
 0x197   : > { %v10759_v53 = vpop.eup %10758  ;;  %v1479_v39 = vadd.f32 1.0, %v10757_v26  ;;  %10778 = vpow2.f32 %v10248_v30 }
 0x198   : > { %v10761_v54 = vpop.eup %10760  ;;  %v1565_v37 = vmul.f32 %v10759_v53, %v12091_v15  ;;  %10780 = vrcp.f32 %v1478_v58 }
 0x199   : > { %v10763_v57 = vpop.eup %10762  ;;  %10782 = vrcp.f32 %v1479_v39  ;;  %v1566_v7 = vmul.f32 %v10761_v54, %v12096_v11 }
 0x19a   : > { %v10765_v18 = vpop.eup %10764  ;;  %v1589_v40 = vpack.c.bf16 %v1565_v37, %v1564_v4  ;;  %v1567_v45 = vmul.f32 %v10763_v57, %v12100_v20  ;;  %10784 = vpow2.f32 %v10249_v8 }
 0x19b   : > { %v10767_v44 = vpop.eup %10766  ;;  %10786 = vpow2.f32 %v10250_v25  ;;  %v1480_v24 = vadd.f32 1.0, %v10765_v18 }
 0x19c   : > { %v10769_v16 = vpop.eup %10768  ;;  %10519 = vmatmul.mubr.msk.bf16.gmra.mrb[12].mxu0 %vm940_vm0, %v1589_v40  ;;  %v1590_v50 = vpack.c.bf16 %v1567_v45, %v1566_v7  ;;  %10788 = vpow2.f32 %v10251_v43  ;;  %v1568_v2 = vmul.f32 %v10767_v44, %v12104_v19 }
 0x19d   : > { %v10771_v15 = vpop.eup %10770  ;;  %v1569_v55 = vmul.f32 %v10769_v16, %v12112_v21  ;;  %10790 = vpow2.f32 %v10252_v46 }
 0x19e   : > { %v10773_v28 = vpop.eup %10772  ;;  %10522 = vmatprep.mubr.msk.bf16.mxu0 %vm940_vm0, %v1590_v50  ;;  %v1570_v20 = vmul.f32 %v10771_v15, %v12119_v42  ;;  %10792 = vrcp.f32 %v1480_v24 }
 0x19f   : > { %v10775_v11 = vpop.eup %10774  ;;  %v1571_v52 = vmul.f32 %v10773_v28, %v12123_v48  ;;  %v1591_v5 = vpack.c.bf16 %v1569_v55, %v1568_v2 }
 0x1a0   : > { %v10777_v61 = vpop.eup %10776  ;;  %v1572_v27 = vmul.f32 %v10775_v11, %v12128_v9 }
 0x1a1   : > { %v10779_v35 = vpop.eup %10778  ;;  %v1592_v34 = vpack.c.bf16 %v1571_v52, %v1570_v20  ;;  %v1573_v19 = vmul.f32 %v10777_v61, %v12134_v14 }
 0x1a2   : > { %v10781_v23 = vpop.eup %10780  ;;  %v1481_v56 = vadd.f32 1.0, %v10779_v35 }
 0x1a3   : > { %v10783_v21 = vpop.eup %10782  ;;  %v1574_v33 = vmul.f32 %v10781_v23, %v12141_v17  ;;  %v1593_v3 = vpack.c.bf16 %v1573_v19, %v1572_v27 }
 0x1a4   : > { %v10785_v1 = vpop.eup %10784  ;;  %10523 = vmatmul.mubr.msk.bf16.gmra.mrb[16].mxu0 %vm940_vm0, %v1591_v5  ;;  %10794 = vrcp.f32 %v1481_v56  ;;  %v1575_v42 = vmul.f32 %v10783_v21, %v12146_v29 }
 0x1a5   : > { %v10787_v62 = vpop.eup %10786  ;;  %10526 = vmatprep.mubr.msk.bf16.mxu0 %vm940_vm0, %v1592_v34  ;;  %v1482_v48 = vadd.f32 1.0, %v10785_v1 }
 0x1a6   : > { %v10789_v31 = vpop.eup %10788  ;;  %v1483_v38 = vadd.f32 1.0, %v10787_v62  ;;  %v1594_v60 = vpack.c.bf16 %v1575_v42, %v1574_v33 }
 0x1a7   : > { %10796 = vrcp.f32 %v1482_v48  ;;  %v1484_v36 = vadd.f32 1.0, %v10789_v31  ;;  %v10791_v47 = vpop.eup %10790 }
 0x1a8   : > { %10798 = vrcp.f32 %v1483_v38  ;;  %v1485_v14 = vadd.f32 1.0, %v10791_v47  ;;  %v10793_v0 = vpop.eup %10792 }
 0x1a9   : > { %10800 = vrcp.f32 %v1484_v36  ;;  %v1576_v9 = vmul.f32 %v10793_v0, %v12156_v59 }
 0x1aa   : > { %10802 = vrcp.f32 %v1485_v14 }
 0x1ac   : > { %10527 = vmatmul.mubr.msk.bf16.gmra.mrb[20].mxu0 %vm940_vm0, %v1593_v3 }
 0x1ad   : > { %10530 = vmatprep.mubr.msk.bf16.mxu0 %vm940_vm0, %v1594_v60 }
 0x1ae   : > { %v10795_v29 = vpop.eup %10794 }
 0x1af   : > { %v1577_v10 = vmul.f32 %v10795_v29, %v12167_v32 }
 0x1b1   : > { %v10797_v17 = vpop.eup %10796  ;;  %v1595_v49 = vpack.c.bf16 %v1577_v10, %v1576_v9 }
 0x1b2   : > { %v10799_v30 = vpop.eup %10798  ;;  %v1578_v6 = vmul.f32 %v10797_v17, %v12172_v12 }
 0x1b3   : > { %v10801_v63 = vpop.eup %10800  ;;  %v1579_v13 = vmul.f32 %v10799_v30, %v12177_v22 }
 0x1b4   : > { %10531 = vmatmul.mubr.msk.bf16.gmra.mrb[24].mxu0 %vm940_vm0, %v1595_v49  ;;  %v10803_v26 = vpop.eup %10802  ;;  %v1580_v8 = vmul.f32 %v10801_v63, %v12181_v41 }
 0x1b5   : > { %v1596_v58 = vpack.c.bf16 %v1579_v13, %v1578_v6  ;;  %v1581_v53 = vmul.f32 %v10803_v26, %v12185_v51 }
 0x1b7   : > { %10534 = vmatprep.mubr.msk.bf16.mxu0 %vm940_vm0, %v1596_v58  ;;  %v1597_v59 = vpack.c.bf16 %v1581_v53, %v1580_v8 }
 0x1bc   : > { %10535 = vmatmul.mubr.msk.bf16.gmra.mrb[28].mxu0 %vm940_vm0, %v1597_v59 }
 0x243   : > { %v12218_v32 = vpop.f32.mrb[0].mxu0 }
 0x244   : > { %18855 = vst [vmem:[#allocation4_spill] sm:$0xff] %v12218_v32  ;;  %1859 = vrot.lane.b32.xlu1 %v12218_v32, %s11578_s7  ;;  %v12222_v12 = vpop.f32.mrb[1].mxu0 }
 0x245   : > { %18856 = vst [vmem:[#allocation5_spill] sm:$0xff] %v12222_v12  ;;  %1855 = vrot.lane.b32.xlu0 %v12222_v12, %s11578_s7  ;;  %v12226_v22 = vpop.f32.mrb[2].mxu0 }
 0x246   : > { %18857 = vst [vmem:[#allocation6_spill] sm:$0xff] %v12226_v22  ;;  %v12228_v41 = vpop.f32.mrb[3].mxu0 }
 0x247   : > { %18858 = vst [vmem:[#allocation7_spill] sm:$0xff] %v12228_v41 }
 0x248   : > { %4760 = vrot.lane.b32.xlu1 %v12218_v32, %s11579_s8 }
 0x24c   : > { %4756 = vrot.lane.b32.xlu1 %v12222_v12, %s11579_s8 }
 0x250   : > { %1861 = vrot.lane.b32.xlu1 %v12226_v22, %s11578_s7 }
 0x254   : > { %4762 = vrot.lane.b32.xlu1 %v12226_v22, %s11579_s8 }
 0x257   : > { %v12238_v51 = vpop.f32.mrb[4].mxu0 }
 0x258   : > { %18859 = vst [vmem:[#allocation8_spill] sm:$0xff] %v12238_v51  ;;  %1867 = vrot.lane.b32.xlu0 %v12238_v51, %s11578_s7  ;;  %v12242_v39 = vpop.f32.mrb[5].mxu0  ;;  %1857 = vrot.lane.b32.xlu1 %v12228_v41, %s11578_s7 }
 0x259   : > { %18860 = vst [vmem:[#allocation9_spill] sm:$0xff] %v12242_v39  ;;  %v12246_v25 = vpop.f32.mrb[6].mxu0 }
 0x25a   : > { %18861 = vst [vmem:[#allocation10_spill] sm:$0xff] %v12246_v25  ;;  %v12248_v54 = vpop.f32.mrb[7].mxu0 }
 0x25b   : > { %18862 = vst [vmem:[#allocation11_spill] sm:$0xff] %v12248_v54 }
 0x25c   : > { %1863 = vrot.lane.b32.xlu0 %v12242_v39, %s11578_s7  ;;  %4758 = vrot.lane.b32.xlu1 %v12228_v41, %s11579_s8 }
 0x260   : > { %v12254_v4 = vpop.f32.mrb[8].mxu0  ;;  %4770 = vrot.lane.b32.xlu0 %v12246_v25, %s11579_s8  ;;  %4768 = vrot.lane.b32.xlu1 %v12238_v51, %s11579_s8 }
 0x261   : > { %18863 = vst [vmem:[#allocation12_spill] sm:$0xff] %v12254_v4  ;;  %v12260_v37 = vpop.f32.mrb[9].mxu0 }
 0x262   : > { %18864 = vst [vmem:[#allocation13_spill] sm:$0xff] %v12260_v37  ;;  %v12262_v43 = vpop.f32.mrb[10].mxu0 }
 0x263   : > { %18865 = vst [vmem:[#allocation14_spill] sm:$0xff] %v12262_v43  ;;  %v12264_v57 = vpop.f32.mrb[11].mxu0 }
 0x264   : > { %18866 = vst [vmem:[#allocation15_spill] sm:$0xff] %v12264_v57  ;;  %1875 = vrot.lane.b32.xlu0 %v12254_v4, %s11578_s7  ;;  %4764 = vrot.lane.b32.xlu1 %v12242_v39, %s11579_s8 }
 0x268   : > { %1871 = vrot.lane.b32.xlu0 %v12260_v37, %s11578_s7  ;;  %1869 = vrot.lane.b32.xlu1 %v12246_v25, %s11578_s7 }
 0x26c   : > { %1865 = vrot.lane.b32.xlu1 %v12248_v54, %s11578_s7 }
 0x26f   : > { %v12276_v46 = vpop.f32.mrb[12].mxu0 }
 0x270   : > { %18867 = vst [vmem:[#allocation16_spill] sm:$0xff] %v12276_v46  ;;  %v12278_v18 = vpop.f32.mrb[13].mxu0  ;;  %1883 = vrot.lane.b32.xlu0 %v12276_v46, %s11578_s7  ;;  %4766 = vrot.lane.b32.xlu1 %v12248_v54, %s11579_s8 }
 0x271   : > { %18868 = vst [vmem:[#allocation17_spill] sm:$0xff] %v12278_v18  ;;  %v12284_v40 = vpop.f32.mrb[14].mxu0 }
 0x272   : > { %18869 = vst [vmem:[#allocation18_spill] sm:$0xff] %v12284_v40  ;;  %v12286_v7 = vpop.f32.mrb[15].mxu0 }
 0x273   : > { %18870 = vst [vmem:[#allocation19_spill] sm:$0xff] %v12286_v7 }
 0x274   : > { %4784 = vrot.lane.b32.xlu0 %v12276_v46, %s11579_s8  ;;  %4776 = vrot.lane.b32.xlu1 %v12254_v4, %s11579_s8 }
 0x277   : > { %v12292_v45 = vpop.f32.mrb[16].mxu0 }
 0x278   : > { %18871 = vst [vmem:[#allocation20_spill] sm:$0xff] %v12292_v45  ;;  %v12294_v44 = vpop.f32.mrb[17].mxu0  ;;  %1879 = vrot.lane.b32.xlu0 %v12278_v18, %s11578_s7  ;;  %4772 = vrot.lane.b32.xlu1 %v12260_v37, %s11579_s8 }
 0x279   : > { %18872 = vst [vmem:[#allocation21_spill] sm:$0xff] %v12294_v44  ;;  %v12300_v16 = vpop.f32.mrb[18].mxu0 }
 0x27a   : > { %18873 = vst [vmem:[#allocation22_spill] sm:$0xff] %v12300_v16  ;;  %v12302_v50 = vpop.f32.mrb[19].mxu0 }
 0x27b   : > { %18874 = vst [vmem:[#allocation23_spill] sm:$0xff] %v12302_v50 }
 0x27c   : > { %1891 = vrot.lane.b32.xlu0 %v12292_v45, %s11578_s7  ;;  %1877 = vrot.lane.b32.xlu1 %v12262_v43, %s11578_s7 }
 0x27f   : > { %v12308_v15 = vpop.f32.mrb[20].mxu0 }
 0x280   : > { %18875 = vst [vmem:[#allocation24_spill] sm:$0xff] %v12308_v15  ;;  %v12310_v55 = vpop.f32.mrb[21].mxu0  ;;  %4792 = vrot.lane.b32.xlu0 %v12292_v45, %s11579_s8  ;;  %4778 = vrot.lane.b32.xlu1 %v12262_v43, %s11579_s8 }
 0x281   : > { %18876 = vst [vmem:[#allocation25_spill] sm:$0xff] %v12310_v55  ;;  %v12316_v28 = vpop.f32.mrb[22].mxu0 }
 0x282   : > { %18877 = vst [vmem:[#allocation26_spill] sm:$0xff] %v12316_v28  ;;  %v12318_v2 = vpop.f32.mrb[23].mxu0 }
 0x283   : > { %18878 = vst [vmem:[#allocation27_spill] sm:$0xff] %v12318_v2 }
 0x284   : > { %1887 = vrot.lane.b32.xlu0 %v12294_v44, %s11578_s7  ;;  %1873 = vrot.lane.b32.xlu1 %v12264_v57, %s11578_s7 }
 0x287   : > { %v12324_v24 = vpop.f32.mrb[24].mxu0 }
 0x288   : > { %18879 = vst [vmem:[#allocation28_spill] sm:$0xff] %v12324_v24  ;;  %v12326_v11 = vpop.f32.mrb[25].mxu0  ;;  %4788 = vrot.lane.b32.xlu0 %v12294_v44, %s11579_s8  ;;  %4774 = vrot.lane.b32.xlu1 %v12264_v57, %s11579_s8 }
 0x289   : > { %18880 = vst [vmem:[#allocation29_spill] sm:$0xff] %v12326_v11  ;;  %v12332_v20 = vpop.f32.mrb[26].mxu0 }
 0x28a   : > { %18881 = vst [vmem:[#allocation30_spill] sm:$0xff] %v12332_v20  ;;  %v12334_v52 = vpop.f32.mrb[27].mxu0 }
 0x28b   : > { %18882 = vst [vmem:[#allocation31_spill] sm:$0xff] %v12334_v52 }
 0x28c   : > { %1899 = vrot.lane.b32.xlu0 %v12308_v15, %s11578_s7  ;;  %4780 = vrot.lane.b32.xlu1 %v12278_v18, %s11579_s8 }
 0x28f   : > { %v12340_v61 = vpop.f32.mrb[28].mxu0 }
 0x290   : > { %18883 = vst [vmem:[#allocation32_spill] sm:$0xff] %v12340_v61  ;;  %v12342_v5 = vpop.f32.mrb[29].mxu0  ;;  %1895 = vrot.lane.b32.xlu0 %v12310_v55, %s11578_s7  ;;  %1885 = vrot.lane.b32.xlu1 %v12284_v40, %s11578_s7 }
 0x291   : > { %18884 = vst [vmem:[#allocation33_spill] sm:$0xff] %v12342_v5  ;;  %v12348_v35 = vpop.f32.mrb[30].mxu0 }
 0x292   : > { %18885 = vst [vmem:[#allocation34_spill] sm:$0xff] %v12348_v35  ;;  %v12350_v34 = vpop.f32.mrb[31].mxu0 }
 0x293   : > { %18886 = vst [vmem:[#allocation35_spill] sm:$0xff] %v12350_v34 }
 0x294   : > { %4802 = vrot.lane.b32.xlu0 %v12316_v28, %s11579_s8  ;;  %4786 = vrot.lane.b32.xlu1 %v12284_v40, %s11579_s8 }
 0x298   : > { %4798 = vrot.lane.b32.xlu0 %v12318_v2, %s11579_s8  ;;  %1881 = vrot.lane.b32.xlu1 %v12286_v7, %s11578_s7 }
 0x29c   : > { %1907 = vrot.lane.b32.xlu0 %v12324_v24, %s11578_s7  ;;  %4782 = vrot.lane.b32.xlu1 %v12286_v7, %s11579_s8 }
 0x2a0   : > { %1903 = vrot.lane.b32.xlu0 %v12326_v11, %s11578_s7  ;;  %1893 = vrot.lane.b32.xlu1 %v12300_v16, %s11578_s7 }
 0x2a4   : > { %4810 = vrot.lane.b32.xlu0 %v12332_v20, %s11579_s8  ;;  %4794 = vrot.lane.b32.xlu1 %v12300_v16, %s11579_s8 }
 0x2a8   : > { %4806 = vrot.lane.b32.xlu0 %v12334_v52, %s11579_s8  ;;  %1889 = vrot.lane.b32.xlu1 %v12302_v50, %s11578_s7 }
 0x2ac   : > { %1915 = vrot.lane.b32.xlu0 %v12340_v61, %s11578_s7  ;;  %4790 = vrot.lane.b32.xlu1 %v12302_v50, %s11579_s8 }
 0x2b0   : > { %1911 = vrot.lane.b32.xlu0 %v12342_v5, %s11578_s7  ;;  %4800 = vrot.lane.b32.xlu1 %v12308_v15, %s11579_s8 }
 0x2b4   : > { %4818 = vrot.lane.b32.xlu0 %v12348_v35, %s11579_s8  ;;  %4796 = vrot.lane.b32.xlu1 %v12310_v55, %s11579_s8 }
 0x2b6   : > { %v1860_v23 = vpop.permute.xlu1 %1859 }
 0x2b7   : > { %v1856_v19 = vpop.permute.xlu0 %1855  ;;  %v1957_v36 = vsel %vm285_vm1, %v1860_v23, 0.0 }
 0x2b8   : > { %4814 = vrot.lane.b32.xlu0 %v12350_v34, %s11579_s8  ;;  %1901 = vrot.lane.b32.xlu1 %v12316_v28, %s11578_s7  ;;  %v1951_v0 = vsel %vm285_vm1, %v1856_v19, 0.0 }
 0x2ba   : > { %v4761_v56 = vpop.permute.xlu1 %4760 }
 0x2bb   : > { %v4858_v3 = vsel %vm285_vm1, %v4761_v56, 0.0 }
 0x2bc   : > { %1897 = vrot.lane.b32.xlu1 %v12318_v2, %s11578_s7 }
 0x2be   : > { %v4757_v21 = vpop.permute.xlu1 %4756 }
 0x2bf   : > { %v4852_v10 = vsel %vm285_vm1, %v4757_v21, 0.0 }
 0x2c0   : > { %4808 = vrot.lane.b32.xlu1 %v12324_v24, %s11579_s8 }
 0x2c2   : > { %v1862_v1 = vpop.permute.xlu1 %1861 }
 0x2c3   : > { %v1960_v49 = vsel %vm285_vm1, %v1862_v1, 0.0 }
 0x2c4   : > { %4804 = vrot.lane.b32.xlu1 %v12326_v11, %s11579_s8 }
 0x2c6   : > { %v4763_v62 = vpop.permute.xlu1 %4762 }
 0x2c7   : > { %v4861_v6 = vsel %vm285_vm1, %v4763_v62, 0.0 }
 0x2c8   : > { %1909 = vrot.lane.b32.xlu1 %v12332_v20, %s11578_s7 }
 0x2ca   : > { %v1868_v42 = vpop.permute.xlu0 %1867  ;;  %v1858_v48 = vpop.permute.xlu1 %1857 }
 0x2cb   : > { %v1969_v58 = vsel %vm285_vm1, %v1868_v42, 0.0 }
 0x2cc   : > { %1905 = vrot.lane.b32.xlu1 %v12334_v52, %s11578_s7 }
 0x2ce   : > { %v4759_v31 = vpop.permute.xlu1 %4758  ;;  %v1864_v27 = vpop.permute.xlu0 %1863 }
 0x2cf   : > { %v1963_v53 = vsel %vm285_vm1, %v1864_v27, 0.0  ;;  %v1954_v27 = vsel %vm285_vm1, %v1858_v48, 0.0 }
 0x2d0   : > { %4816 = vrot.lane.b32.xlu1 %v12340_v61, %s11579_s8 }
 0x2d2   : > { %v4769_v38 = vpop.permute.xlu1 %4768  ;;  %v4771_v33 = vpop.permute.xlu0 %4770 }
 0x2d3   : > { %v4873_v56 = vsel %vm285_vm1, %v4771_v33, 0.0 }
 0x2d4   : > { %4812 = vrot.lane.b32.xlu1 %v12342_v5, %s11579_s8 }
 0x2d6   : > { %v4765_v47 = vpop.permute.xlu1 %4764  ;;  %v1876_v14 = vpop.permute.xlu0 %1875 }
 0x2d7   : > { %1958 = vadd.xlane.f32.xlu0 %v1957_v36  ;;  %v1981_v36 = vsel %vm285_vm1, %v1876_v14, 0.0 }
 0x2d8   : > { %1917 = vrot.lane.b32.xlu1 %v12348_v35, %s11578_s7 }
 0x2da   : > { %v1870_v60 = vpop.permute.xlu1 %1869  ;;  %v1872_v9 = vpop.permute.xlu0 %1871 }
 0x2db   : > { %4859 = vadd.xlane.f32.xlu0 %v4858_v3 }
 0x2dc   : > { %1913 = vrot.lane.b32.xlu1 %v12350_v34, %s11578_s7 }
 0x2de   : > { %v1866_v29 = vpop.permute.xlu1 %1865 }
 0x2df   : > { %1952 = vadd.xlane.f32.xlu0 %v1951_v0  ;;  %v1975_v0 = vsel %vm285_vm1, %v1872_v9, 0.0  ;;  %v4864_v9 = vsel %vm285_vm1, %v4765_v47, 0.0 }
 0x2e2   : > { %v4767_v17 = vpop.permute.xlu1 %4766  ;;  %v1884_v63 = vpop.permute.xlu0 %1883 }
 0x2e3   : > { %4853 = vadd.xlane.f32.xlu0 %v4852_v10  ;;  %v4867_v19 = vsel %vm285_vm1, %v4767_v17, 0.0  ;;  %v4855_v10 = vsel %vm285_vm1, %v4759_v31, 0.0  ;;  %v1993_v31 = vsel %vm285_vm1, %v1884_v63, 0.0 }
 0x2e6   : > { %v4777_v30 = vpop.permute.xlu1 %4776  ;;  %v12416_v26 = vpop.permute.xlu0 %4784 }
 0x2e7   : > { %1961 = vadd.xlane.f32.xlu0 %v1960_v49  ;;  %v4882_v63 = vsel %vm285_vm1, %v4777_v30, 0.0 }
 0x2ea   : > { %v4773_v13 = vpop.permute.xlu1 %4772  ;;  %v1880_v23 = vpop.permute.xlu0 %1879 }
 0x2eb   : > { %4862 = vadd.xlane.f32.xlu0 %v4861_v6  ;;  %v4870_v6 = vsel %vm285_vm1, %v4769_v38, 0.0  ;;  %v1987_v38 = vsel %vm285_vm1, %v1880_v23, 0.0 }
 0x2ee   : > { %v1878_v8 = vpop.permute.xlu1 %1877  ;;  %v1892_v1 = vpop.permute.xlu0 %1891 }
 0x2ef   : > { %1970 = vadd.xlane.f32.xlu0 %v1969_v58 }
 0x2f2   : > { %v4779_v59 = vpop.permute.xlu1 %4778  ;;  %v12425_v42 = vpop.permute.xlu0 %4792 }
 0x2f3   : > { %1964 = vadd.xlane.f32.xlu0 %v1963_v53  ;;  %v4885_v49 = vsel %vm285_vm1, %v4779_v59, 0.0  ;;  %v1972_v59 = vsel %vm285_vm1, %v1870_v60, 0.0 }
 0x2f6   : > { %v1874_v21 = vpop.permute.xlu1 %1873  ;;  %v1888_v17 = vpop.permute.xlu0 %1887 }
 0x2f7   : > { %4874 = vadd.xlane.f32.xlu0 %v4873_v56 }
 0x2fa   : > { %v4775_v62 = vpop.permute.xlu1 %4774  ;;  %v12435_v53 = vpop.permute.xlu0 %4788 }
 0x2fb   : > { %4868 = vadd.xlane.f32.xlu0 %v4867_v19  ;;  %v4879_v58 = vsel %vm285_vm1, %v4775_v62, 0.0  ;;  %v1966_v62 = vsel %vm285_vm1, %v1866_v29, 0.0 }
 0x2fe   : > { %v12423_v3 = vpop.permute.xlu1 %4780  ;;  %v1900_v19 = vpop.permute.xlu0 %1899 }
 0x2ff   : > { %1982 = vadd.xlane.f32.xlu0 %v1981_v36 }
 0x300   : > { %1955 = vadd.xlane.f32.xlu1 %v1954_v27 }
 0x302   : > { %v12429_v33 = vpop.permute.xlu1 %1885  ;;  %v1896_v47 = vpop.permute.xlu0 %1895 }
 0x303   : > { %1976 = vadd.xlane.f32.xlu0 %v1975_v0 }
 0x304   : > { %4856 = vadd.xlane.f32.xlu1 %v4855_v10 }
 0x306   : > { %v4787_v14 = vpop.permute.xlu1 %4786  ;;  %v4803_v23 = vpop.permute.xlu0 %4802 }
 0x307   : > { %4886 = vadd.xlane.f32.xlu0 %v4885_v49  ;;  %v4897_v27 = vsel %vm285_vm1, %v4787_v14, 0.0  ;;  %v4876_v49 = vsel %vm285_vm1, %v4773_v13, 0.0  ;;  %v1984_v14 = vsel %vm285_vm1, %v1878_v8, 0.0 }
 0x308   : > { %4871 = vadd.xlane.f32.xlu1 %v4870_v6  ;;  %v2005_v6 = vsel %vm285_vm1, %v1892_v1, 0.0  ;;  %v4894_v1 = vsel %vm285_vm1, %v12416_v26, 0.0  ;;  %v2011_v26 = vsel %vm285_vm1, %v1896_v47, 0.0  ;;  %v4900_v47 = vsel %vm285_vm1, %v12435_v53, 0.0 }
 0x30a   : > { %v1882_v48 = vpop.permute.xlu1 %1881  ;;  %v4799_v30 = vpop.permute.xlu0 %4798 }
 0x30b   : > { %4880 = vadd.xlane.f32.xlu0 %v4879_v58  ;;  %v1999_v58 = vsel %vm285_vm1, %v1888_v17, 0.0  ;;  %v4888_v17 = vsel %vm285_vm1, %v12423_v3, 0.0  ;;  %v4921_v3 = vsel %vm285_vm1, %v4803_v23, 0.0 }
 0x30c   : > { %4865 = vadd.xlane.f32.xlu1 %v4864_v9 }
 0x30e   : > { %v4783_v56 = vpop.permute.xlu1 %4782  ;;  %v1908_v8 = vpop.permute.xlu0 %1907 }
 0x30f   : > { %1994 = vadd.xlane.f32.xlu0 %v1993_v31  ;;  %v4891_v10 = vsel %vm285_vm1, %v4783_v56, 0.0  ;;  %v1978_v31 = vsel %vm285_vm1, %v1874_v21, 0.0  ;;  %v2017_v21 = vsel %vm285_vm1, %v1900_v19, 0.0  ;;  %v4906_v19 = vsel %vm285_vm1, %v12425_v42, 0.0 }
 0x310   : > { %1973 = vadd.xlane.f32.xlu1 %v1972_v59 }
 0x312   : > { %v1894_v36 = vpop.permute.xlu1 %1893 }
 0x313   : > { %1988 = vadd.xlane.f32.xlu0 %v1987_v38  ;;  %v2008_v23 = vsel %vm285_vm1, %v1894_v36, 0.0 }
 0x314   : > { %1967 = vadd.xlane.f32.xlu1 %v1966_v62  ;;  %v1904_v62 = vpop.permute.xlu0 %1903 }
 0x316   : > { %v4795_v0 = vpop.permute.xlu1 %4794 }
 0x317   : > { %4898 = vadd.xlane.f32.xlu0 %v4897_v27  ;;  %v4909_v56 = vsel %vm285_vm1, %v4795_v0, 0.0  ;;  %v1996_v27 = vsel %vm285_vm1, %v12429_v33, 0.0  ;;  %v4915_v33 = vsel %vm285_vm1, %v4799_v30, 0.0 }
 0x318   : > { %4883 = vadd.xlane.f32.xlu1 %v4882_v63  ;;  %v1990_v63 = vsel %vm285_vm1, %v1882_v48, 0.0 }
 0x31a   : > { %v1890_v60 = vpop.permute.xlu1 %1889 }
 0x31b   : > { %4892 = vadd.xlane.f32.xlu0 %v4891_v10  ;;  %v12461_v10 = vpop.permute.xlu0 %4810  ;;  %v2002_v30 = vsel %vm285_vm1, %v1890_v60, 0.0 }
 0x31c   : > { %4877 = vadd.xlane.f32.xlu1 %v4876_v49 }
 0x31e   : > { %v4791_v29 = vpop.permute.xlu1 %4790 }
 0x31f   : > { %2006 = vadd.xlane.f32.xlu0 %v2005_v6  ;;  %v4903_v59 = vsel %vm285_vm1, %v4791_v29, 0.0  ;;  %v4807_v6 = vpop.permute.xlu0 %4806  ;;  %v2029_v29 = vsel %vm285_vm1, %v1908_v8, 0.0 }
 0x320   : > { %1985 = vadd.xlane.f32.xlu1 %v1984_v14 }
 0x322   : > { %v4801_v9 = vpop.permute.xlu1 %4800 }
 0x323   : > { %2000 = vadd.xlane.f32.xlu0 %v1999_v58  ;;  %v1916_v14 = vpop.permute.xlu0 %1915  ;;  %v2023_v58 = vsel %vm285_vm1, %v1904_v62, 0.0  ;;  %v4918_v53 = vsel %vm285_vm1, %v4801_v9, 0.0 }
 0x324   : > { %1979 = vadd.xlane.f32.xlu1 %v1978_v31  ;;  %v2041_v31 = vsel %vm285_vm1, %v1916_v14, 0.0 }
 0x326   : > { %v4797_v13 = vpop.permute.xlu1 %4796 }
 0x327   : > { %4910 = vadd.xlane.f32.xlu0 %v4909_v56  ;;  %v1912_v56 = vpop.permute.xlu0 %1911  ;;  %v4912_v36 = vsel %vm285_vm1, %v4797_v13, 0.0 }
 0x328   : > { %4895 = vadd.xlane.f32.xlu1 %v4894_v1 }
 0x32a   : > { %v1902_v38 = vpop.permute.xlu1 %1901 }
 0x32b   : > { %4904 = vadd.xlane.f32.xlu0 %v4903_v59  ;;  %v2035_v59 = vsel %vm285_vm1, %v1912_v56, 0.0  ;;  %v2020_v60 = vsel %vm285_vm1, %v1902_v38, 0.0 }
 0x32c   : > { %4889 = vadd.xlane.f32.xlu1 %v4888_v17  ;;  %v4927_v17 = vsel %vm285_vm1, %v4807_v6, 0.0 }
 0x32e   : > { %v1898_v0 = vpop.permute.xlu1 %1897 }
 0x32f   : > { %2018 = vadd.xlane.f32.xlu0 %v2017_v21  ;;  %v2014_v21 = vsel %vm285_vm1, %v1898_v0, 0.0 }
 0x330   : > { %1997 = vadd.xlane.f32.xlu1 %v1996_v27  ;;  %v12487_v27 = vpop.permute.xlu0 %4818 }
 0x332   : > { %v12464_v49 = vpop.permute.xlu1 %4808 }
 0x333   : > { %2012 = vadd.xlane.f32.xlu0 %v2011_v26 }
 0x334   : > { %1991 = vadd.xlane.f32.xlu1 %v1990_v63 }
 0x336   : > { %v4805_v48 = vpop.permute.xlu1 %4804 }
 0x337   : > { %4922 = vadd.xlane.f32.xlu0 %v4921_v3  ;;  %v12491_v3 = vpop.permute.xlu0 %4814 }
 0x338   : > { %4907 = vadd.xlane.f32.xlu1 %v4906_v19 }
 0x33a   : > { %v1910_v42 = vpop.permute.xlu1 %1909 }
 0x33b   : > { %4916 = vadd.xlane.f32.xlu0 %v4915_v33  ;;  %v2032_v9 = vsel %vm285_vm1, %v1910_v42, 0.0  ;;  %v4924_v33 = vsel %vm285_vm1, %v4805_v48, 0.0 }
 0x33c   : > { %4901 = vadd.xlane.f32.xlu1 %v4900_v47 }
 0x33e   : > { %v1906_v1 = vpop.permute.xlu1 %1905 }
 0x33f   : > { %2030 = vadd.xlane.f32.xlu0 %v2029_v29  ;;  %v2026_v26 = vsel %vm285_vm1, %v1906_v1, 0.0 }
 0x340   : > { %2009 = vadd.xlane.f32.xlu1 %v2008_v23 }
 0x342   : > { %v12479_v8 = vpop.permute.xlu1 %4816 }
 0x343   : > { %2024 = vadd.xlane.f32.xlu0 %v2023_v58 }
 0x344   : > { %2003 = vadd.xlane.f32.xlu1 %v2002_v30 }
 0x346   : > { %v12484_v62 = vpop.permute.xlu1 %4812 }
 0x347   : > { %2042 = vadd.xlane.f32.xlu0 %v2041_v31 }
 0x348   : > { %4919 = vadd.xlane.f32.xlu1 %v4918_v53 }
 0x34a   : > { %v1918_v13 = vpop.permute.xlu1 %1917 }
 0x34b   : > { %2036 = vadd.xlane.f32.xlu0 %v2035_v59  ;;  %v2044_v63 = vsel %vm285_vm1, %v1918_v13, 0.0 }
 0x34c   : > { %4913 = vadd.xlane.f32.xlu1 %v4912_v36 }
 0x34e   : > { %v1914_v38 = vpop.permute.xlu1 %1913 }
 0x34f   : > { %4928 = vadd.xlane.f32.xlu0 %v4927_v17  ;;  %v2038_v0 = vsel %vm285_vm1, %v1914_v38, 0.0 }
 0x350   : > { %2021 = vadd.xlane.f32.xlu1 %v2020_v60 }
 0x354   : > { %2015 = vadd.xlane.f32.xlu1 %v2014_v21 }
 0x358   : > { %2033 = vadd.xlane.f32.xlu1 %v2032_v9 }
 0x35c   : > { %2027 = vadd.xlane.f32.xlu1 %v2026_v26 }
 0x360   : > { %2045 = vadd.xlane.f32.xlu1 %v2044_v63 }
 0x364   : > { %v1959_v19 = vpop.xlane.xlu0 %1958  ;;  %2039 = vadd.xlane.f32.xlu1 %v2038_v0 }
 0x365   : > { %v2050_v23 = vmul.f32 0.0625, %v1959_v19 }
 0x367   : > { %v12501_v30 = vsub.f32 %v12218_v32, %v2050_v23 }
 0x368   : > { %v4860_v6 = vpop.xlane.xlu0 %4859  ;;  %4925 = vadd.xlane.f32.xlu1 %v4924_v33 }
 0x369   : > { %18888 = vst [vmem:[#allocation37_spill] sm:$0xff] %v12501_v30  ;;  %v4950_v31 = vmul.f32 0.0625, %v4860_v6  ;;  %v2114_v48 = vmul.f32 %v12501_v30, %v12501_v30 }
 0x36b   : > { %v12507_v53 = vsub.f32 %v12218_v32, %v4950_v31 }
 0x36c   : > { %v1953_v47 = vpop.xlane.xlu0 %1952 }
 0x36d   : > { %v2048_v29 = vmul.f32 0.0625, %v1953_v47  ;;  %18889 = vst [vmem:[#allocation38_spill] sm:$0xff] %v12507_v53  ;;  %v5014_v17 = vmul.f32 %v12507_v53, %v12507_v53 }
 0x36f   : > { %v12496_v14 = vsub.f32 %v12222_v12, %v2048_v29 }
 0x370   : > { %v4854_v58 = vpop.xlane.xlu0 %4853 }
 0x371   : > { %18887 = vst [vmem:[#allocation36_spill] sm:$0xff] %v12496_v14  ;;  %v2112_v42 = vmul.f32 %v12496_v14, %v12496_v14  ;;  %v4948_v1 = vmul.f32 0.0625, %v4854_v58 }
 0x373   : > { %2176 = vrot.lane.b32.xlu0 %v2112_v42, %s11578_s7  ;;  %v12513_v60 = vsub.f32 %v12222_v12, %v4948_v1 }
 0x374   : > { %v1962_v56 = vpop.xlane.xlu0 %1961 }
 0x375   : > { %18890 = vst [vmem:[#allocation39_spill] sm:$0xff] %v12513_v60  ;;  %v2051_v21 = vmul.f32 0.0625, %v1962_v56  ;;  %v5012_v63 = vmul.f32 %v12513_v60, %v12513_v60 }
 0x377   : > { %v12524_v38 = vsub.f32 %v12226_v22, %v2051_v21 }
 0x378   : > { %v4863_v59 = vpop.xlane.xlu0 %4862 }
 0x379   : > { %v4951_v36 = vmul.f32 0.0625, %v4863_v59  ;;  %2180 = vrot.lane.b32.xlu1 %v2114_v48, %s11578_s7  ;;  %18892 = vst [vmem:[#allocation41_spill] sm:$0xff] %v12524_v38  ;;  %v2115_v19 = vmul.f32 %v12524_v38, %v12524_v38 }
 0x37b   : > { %v12516_v9 = vsub.f32 %v12226_v22, %v4951_v36 }
 0x37c   : > { %v1971_v13 = vpop.xlane.xlu0 %1970 }
 0x37d   : > { %18891 = vst [vmem:[#allocation40_spill] sm:$0xff] %v12516_v9  ;;  %v5015_v26 = vmul.f32 %v12516_v9, %v12516_v9  ;;  %5080 = vrot.lane.b32.xlu1 %v5014_v17, %s11579_s8  ;;  %v2054_v56 = vmul.f32 0.0625, %v1971_v13 }
 0x37f   : > { %5082 = vrot.lane.b32.xlu0 %v5015_v26, %s11579_s8  ;;  %v12549_v21 = vsub.f32 %v12238_v51, %v2054_v56 }
 0x380   : > { %v1965_v0 = vpop.xlane.xlu0 %1964 }
 0x381   : > { %5076 = vrot.lane.b32.xlu1 %v5012_v63, %s11579_s8  ;;  %18895 = vst [vmem:[#allocation44_spill] sm:$0xff] %v12549_v21  ;;  %v2052_v26 = vmul.f32 0.0625, %v1965_v0 }
 0x384   : > { %v12530_v33 = vpop.xlane.xlu0 %4874 }
 0x385   : > { %2182 = vrot.lane.b32.xlu1 %v2115_v19, %s11578_s7 }
 0x388   : > { %v12533_v6 = vpop.xlane.xlu0 %4868 }
 0x38c   : > { %v1983_v47 = vpop.xlane.xlu0 %1982 }
 0x38d   : > { %v1956_v29 = vpop.xlane.xlu1 %1955  ;;  %v2058_v19 = vmul.f32 0.0625, %v1983_v47 }
 0x38e   : > { %v2049_v23 = vmul.f32 0.0625, %v1956_v29 }
 0x38f   : > { %v12565_v0 = vsub.f32 %v12254_v4, %v2058_v19 }
 0x390   : > { %v1977_v58 = vpop.xlane.xlu0 %1976  ;;  %v12536_v42 = vsub.f32 %v12228_v41, %v2049_v23  ;;  %v2118_v23 = vmul.f32 %v12549_v21, %v12549_v21 }
 0x391   : > { %v4857_v31 = vpop.xlane.xlu1 %4856  ;;  %18897 = vst [vmem:[#allocation46_spill] sm:$0xff] %v12565_v0 }
 0x392   : > { %18893 = vst [vmem:[#allocation42_spill] sm:$0xff] %v12536_v42  ;;  %v2113_v48 = vmul.f32 %v12536_v42, %v12536_v42  ;;  %v4949_v1 = vmul.f32 0.0625, %v4857_v31  ;;  %v12561_v31 = vsub.f32 %v12242_v39, %v2052_v26  ;;  %v2122_v26 = vmul.f32 %v12565_v0, %v12565_v0 }
 0x394   : > { %v12540_v59 = vpop.xlane.xlu0 %4886  ;;  %v12543_v36 = vsub.f32 %v12228_v41, %v4949_v1  ;;  %2178 = vrot.lane.b32.xlu1 %v2113_v48, %s11578_s7  ;;  %18896 = vst [vmem:[#allocation45_spill] sm:$0xff] %v12561_v31  ;;  %v2116_v1 = vmul.f32 %v12561_v31, %v12561_v31 }
 0x395   : > { %v12546_v17 = vpop.xlane.xlu1 %4871 }
 0x396   : > { %18894 = vst [vmem:[#allocation43_spill] sm:$0xff] %v12543_v36  ;;  %v5013_v13 = vmul.f32 %v12543_v36, %v12543_v36 }
 0x398   : > { %v12553_v63 = vpop.xlane.xlu0 %4880  ;;  %5078 = vrot.lane.b32.xlu0 %v5013_v13, %s11579_s8  ;;  %v2056_v13 = vmul.f32 0.0625, %v1977_v58 }
 0x399   : > { %v12556_v29 = vpop.xlane.xlu1 %4865 }
 0x39c   : > { %v1995_v48 = vpop.xlane.xlu0 %1994  ;;  %2188 = vrot.lane.b32.xlu0 %v2118_v23, %s11578_s7  ;;  %v12576_v23 = vsub.f32 %v12260_v37, %v2056_v13 }
 0x39d   : > { %v1974_v56 = vpop.xlane.xlu1 %1973  ;;  %v2062_v19 = vmul.f32 0.0625, %v1995_v48 }
 0x39e   : > { %v2055_v47 = vmul.f32 0.0625, %v1974_v56  ;;  %18899 = vst [vmem:[#allocation48_spill] sm:$0xff] %v12576_v23  ;;  %v2120_v13 = vmul.f32 %v12576_v23, %v12576_v23 }
 0x39f   : > { %v12592_v48 = vsub.f32 %v12276_v46, %v2062_v19 }
 0x3a0   : > { %v1989_v22 = vpop.xlane.xlu0 %1988  ;;  %v12570_v32 = vsub.f32 %v12246_v25, %v2055_v47  ;;  %2184 = vrot.lane.b32.xlu0 %v2116_v1, %s11578_s7 }
 0x3a1   : > { %v1968_v41 = vpop.xlane.xlu1 %1967  ;;  %18901 = vst [vmem:[#allocation50_spill] sm:$0xff] %v12592_v48  ;;  %v2060_v47 = vmul.f32 0.0625, %v1989_v22 }
 0x3a2   : > { %18898 = vst [vmem:[#allocation47_spill] sm:$0xff] %v12570_v32  ;;  %v2119_v12 = vmul.f32 %v12570_v32, %v12570_v32  ;;  %v2053_v9 = vmul.f32 0.0625, %v1968_v41 }
 0x3a4   : > { %v12580_v58 = vpop.xlane.xlu0 %4898  ;;  %v12583_v56 = vsub.f32 %v12248_v54, %v2053_v9  ;;  %2190 = vrot.lane.b32.xlu1 %v2119_v12, %s11578_s7  ;;  %2196 = vrot.lane.b32.xlu0 %v2122_v26, %s11578_s7  ;;  %v2126_v9 = vmul.f32 %v12592_v48, %v12592_v48  ;;  %v12605_v26 = vsub.f32 %v12278_v18, %v2060_v47 }
 0x3a5   : > { %v12587_v1 = vpop.xlane.xlu1 %4883 }
 0x3a6   : > { %18900 = vst [vmem:[#allocation49_spill] sm:$0xff] %v12583_v56  ;;  %v2117_v41 = vmul.f32 %v12583_v56, %v12583_v56  ;;  %18902 = vst [vmem:[#allocation51_spill] sm:$0xff] %v12605_v26  ;;  %v2124_v60 = vmul.f32 %v12605_v26, %v12605_v26 }
 0x3a8   : > { %v12596_v36 = vpop.xlane.xlu0 %4892  ;;  %2186 = vrot.lane.b32.xlu1 %v2117_v41, %s11578_s7  ;;  %2192 = vrot.lane.b32.xlu0 %v2120_v13, %s11578_s7 }
 0x3a9   : > { %v12600_v12 = vpop.xlane.xlu1 %4877 }
 0x3ac   : > { %v2007_v19 = vpop.xlane.xlu0 %2006  ;;  %2204 = vrot.lane.b32.xlu0 %v2126_v9, %s11578_s7 }
 0x3ad   : > { %v2066_v22 = vmul.f32 0.0625, %v2007_v19  ;;  %v1986_v53 = vpop.xlane.xlu1 %1985 }
 0x3ae   : > { %v2059_v0 = vmul.f32 0.0625, %v1986_v53 }
 0x3af   : > { %v12611_v41 = vsub.f32 %v12292_v45, %v2066_v22 }
 0x3b0   : > { %v2001_v13 = vpop.xlane.xlu0 %2000  ;;  %v12614_v21 = vsub.f32 %v12262_v43, %v2059_v0  ;;  %2200 = vrot.lane.b32.xlu0 %v2124_v60, %s11578_s7 }
 0x3b1   : > { %18903 = vst [vmem:[#allocation52_spill] sm:$0xff] %v12611_v41  ;;  %v2064_v47 = vmul.f32 0.0625, %v2001_v13  ;;  %v1980_v48 = vpop.xlane.xlu1 %1979  ;;  %v2130_v9 = vmul.f32 %v12611_v41, %v12611_v41 }
 0x3b2   : > { %18904 = vst [vmem:[#allocation53_spill] sm:$0xff] %v12614_v21  ;;  %v2123_v19 = vmul.f32 %v12614_v21, %v12614_v21  ;;  %v2057_v23 = vmul.f32 0.0625, %v1980_v48 }
 0x3b3   : > { %v12622_v53 = vsub.f32 %v12294_v44, %v2064_v47 }
 0x3b4   : > { %v12624_v22 = vpop.xlane.xlu0 %4910  ;;  %v12627_v26 = vsub.f32 %v12264_v57, %v2057_v23  ;;  %2198 = vrot.lane.b32.xlu1 %v2123_v19, %s11578_s7  ;;  %2212 = vrot.lane.b32.xlu0 %v2130_v9, %s11578_s7 }
 0x3b5   : > { %18905 = vst [vmem:[#allocation54_spill] sm:$0xff] %v12622_v53  ;;  %v12631_v60 = vpop.xlane.xlu1 %4895  ;;  %v2128_v0 = vmul.f32 %v12622_v53, %v12622_v53 }
 0x3b6   : > { %18906 = vst [vmem:[#allocation55_spill] sm:$0xff] %v12627_v26  ;;  %v2121_v48 = vmul.f32 %v12627_v26, %v12627_v26 }
 0x3b8   : > { %v12637_v13 = vpop.xlane.xlu0 %4904  ;;  %2194 = vrot.lane.b32.xlu1 %v2121_v48, %s11578_s7  ;;  %2208 = vrot.lane.b32.xlu0 %v2128_v0, %s11578_s7 }
 0x3b9   : > { %v12641_v23 = vpop.xlane.xlu1 %4889 }
 0x3bc   : > { %v2019_v47 = vpop.xlane.xlu0 %2018 }
 0x3bd   : > { %v2070_v19 = vmul.f32 0.0625, %v2019_v47  ;;  %v1998_v41 = vpop.xlane.xlu1 %1997 }
 0x3be   : > { %v2063_v9 = vmul.f32 0.0625, %v1998_v41 }
 0x3bf   : > { %v12644_v21 = vsub.f32 %v12308_v15, %v2070_v19 }
 0x3c0   : > { %v2013_v32 = vpop.xlane.xlu0 %2012  ;;  %v12647_v53 = vsub.f32 %v12284_v40, %v2063_v9 }
 0x3c1   : > { %18907 = vst [vmem:[#allocation56_spill] sm:$0xff] %v12644_v21  ;;  %v2134_v26 = vmul.f32 %v12644_v21, %v12644_v21  ;;  %v2068_v31 = vmul.f32 0.0625, %v2013_v32  ;;  %v1992_v48 = vpop.xlane.xlu1 %1991 }
 0x3c2   : > { %18908 = vst [vmem:[#allocation57_spill] sm:$0xff] %v12647_v53  ;;  %v2127_v0 = vmul.f32 %v12647_v53, %v12647_v53  ;;  %v2061_v56 = vmul.f32 0.0625, %v1992_v48 }
 0x3c3   : > { %v12654_v47 = vsub.f32 %v12310_v55, %v2068_v31  ;;  %2220 = vrot.lane.b32.xlu0 %v2134_v26, %s11578_s7 }
 0x3c4   : > { %v12657_v41 = vpop.xlane.xlu0 %4922  ;;  %v12660_v19 = vsub.f32 %v12286_v7, %v2061_v56  ;;  %2206 = vrot.lane.b32.xlu1 %v2127_v0, %s11578_s7 }
 0x3c5   : > { %18909 = vst [vmem:[#allocation58_spill] sm:$0xff] %v12654_v47  ;;  %v2132_v32 = vmul.f32 %v12654_v47, %v12654_v47  ;;  %v12665_v9 = vpop.xlane.xlu1 %4907 }
 0x3c6   : > { %18910 = vst [vmem:[#allocation59_spill] sm:$0xff] %v12660_v19  ;;  %v2125_v48 = vmul.f32 %v12660_v19, %v12660_v19 }
 0x3c7   : > { %2216 = vrot.lane.b32.xlu0 %v2132_v32, %s11578_s7 }
 0x3c8   : > { %v12670_v31 = vpop.xlane.xlu0 %4916  ;;  %2202 = vrot.lane.b32.xlu1 %v2125_v48, %s11578_s7 }
 0x3c9   : > { %v12673_v26 = vpop.xlane.xlu1 %4901 }
 0x3cc   : > { %v2031_v56 = vpop.xlane.xlu0 %2030 }
 0x3cd   : > { %v2074_v21 = vmul.f32 0.0625, %v2031_v56  ;;  %v2010_v53 = vpop.xlane.xlu1 %2009 }
 0x3ce   : > { %v2067_v0 = vmul.f32 0.0625, %v2010_v53 }
 0x3cf   : > { %v12676_v30 = vsub.f32 %v12324_v24, %v2074_v21 }
 0x3d0   : > { %v2025_v47 = vpop.xlane.xlu0 %2024  ;;  %v12679_v38 = vsub.f32 %v12300_v16, %v2067_v0 }
 0x3d1   : > { %18911 = vst [vmem:[#allocation60_spill] sm:$0xff] %v12676_v30  ;;  %v2138_v32 = vmul.f32 %v12676_v30, %v12676_v30  ;;  %v2072_v19 = vmul.f32 0.0625, %v2025_v47  ;;  %v2004_v14 = vpop.xlane.xlu1 %2003 }
 0x3d2   : > { %18912 = vst [vmem:[#allocation61_spill] sm:$0xff] %v12679_v38  ;;  %v2131_v48 = vmul.f32 %v12679_v38, %v12679_v38  ;;  %v2065_v42 = vmul.f32 0.0625, %v2004_v14 }
 0x3d3   : > { %v12686_v56 = vsub.f32 %v12326_v11, %v2072_v19  ;;  %2228 = vrot.lane.b32.xlu0 %v2138_v32, %s11578_s7 }
 0x3d4   : > { %v2043_v21 = vpop.xlane.xlu0 %2042  ;;  %v12690_v53 = vsub.f32 %v12302_v50, %v2065_v42  ;;  %2214 = vrot.lane.b32.xlu1 %v2131_v48, %s11578_s7  ;;  %v4954_v42 = vmul.f32 0.0625, %v12546_v17 }
 0x3d5   : > { %18913 = vst [vmem:[#allocation62_spill] sm:$0xff] %v12686_v56  ;;  %v2136_v0 = vmul.f32 %v12686_v56, %v12686_v56  ;;  %v2078_v47 = vmul.f32 0.0625, %v2043_v21  ;;  %v12695_v30 = vpop.xlane.xlu1 %4919 }
 0x3d6   : > { %18914 = vst [vmem:[#allocation63_spill] sm:$0xff] %v12690_v53  ;;  %v2129_v14 = vmul.f32 %v12690_v53, %v12690_v53 }
 0x3d7   : > { %v12700_v19 = vsub.f32 %v12340_v61, %v2078_v47  ;;  %2224 = vrot.lane.b32.xlu0 %v2136_v0, %s11578_s7  ;;  %v12714_v47 = vsub.f32 %v12238_v51, %v4954_v42 }
 0x3d8   : > { %v2037_v32 = vpop.xlane.xlu0 %2036  ;;  %2210 = vrot.lane.b32.xlu1 %v2129_v14, %s11578_s7 }
 0x3d9   : > { %18915 = vst [vmem:[#allocation64_spill] sm:$0xff] %v12700_v19  ;;  %v2142_v48 = vmul.f32 %v12700_v19, %v12700_v19  ;;  %v2076_v56 = vmul.f32 0.0625, %v2037_v32  ;;  %v12707_v21 = vpop.xlane.xlu1 %4913  ;;  %v5018_v32 = vmul.f32 %v12714_v47, %v12714_v47 }
 0x3db   : > { %v12710_v38 = vsub.f32 %v12342_v5, %v2076_v56  ;;  %2236 = vrot.lane.b32.xlu0 %v2142_v48, %s11578_s7 }
 0x3dd   : > { %18916 = vst [vmem:[#allocation65_spill] sm:$0xff] %v12710_v38  ;;  %v2140_v0 = vmul.f32 %v12710_v38, %v12710_v38  ;;  %v2022_v14 = vpop.xlane.xlu1 %2021 }
 0x3de   : > { %v2071_v53 = vmul.f32 0.0625, %v2022_v14 }
 0x3df   : > { %2232 = vrot.lane.b32.xlu0 %v2140_v0, %s11578_s7 }
 0x3e0   : > { %v12720_v17 = vsub.f32 %v12316_v28, %v2071_v53 }
 0x3e1   : > { %v2016_v56 = vpop.xlane.xlu1 %2015 }
 0x3e2   : > { %18917 = vst [vmem:[#allocation66_spill] sm:$0xff] %v12720_v17  ;;  %v2135_v48 = vmul.f32 %v12720_v17, %v12720_v17  ;;  %v2069_v19 = vmul.f32 0.0625, %v2016_v56 }
 0x3e3   : > { %5088 = vrot.lane.b32.xlu0 %v5018_v32, %s11579_s8 }
 0x3e4   : > { %v12728_v42 = vsub.f32 %v12318_v2, %v2069_v19  ;;  %2222 = vrot.lane.b32.xlu1 %v2135_v48, %s11578_s7 }
 0x3e5   : > { %v2034_v14 = vpop.xlane.xlu1 %2033 }
 0x3e6   : > { %18918 = vst [vmem:[#allocation67_spill] sm:$0xff] %v12728_v42  ;;  %v2133_v53 = vmul.f32 %v12728_v42, %v12728_v42  ;;  %v2075_v0 = vmul.f32 0.0625, %v2034_v14  ;;  %v4952_v42 = vmul.f32 0.0625, %v12556_v29  ;;  %v4955_v29 = vmul.f32 0.0625, %v12530_v33 }
 0x3e7   : > { %v4930_v33 = vsel %vm285_vm1, %v12464_v49, 0.0 }
 0x3e8   : > { %v12734_v51 = vsub.f32 %v12332_v20, %v2075_v0  ;;  %2218 = vrot.lane.b32.xlu1 %v2133_v53, %s11578_s7 }
 0x3e9   : > { %v2028_v38 = vpop.xlane.xlu1 %2027 }
 0x3ea   : > { %18919 = vst [vmem:[#allocation68_spill] sm:$0xff] %v12734_v51  ;;  %v2139_v56 = vmul.f32 %v12734_v51, %v12734_v51  ;;  %v2073_v32 = vmul.f32 0.0625, %v2028_v38 }
 0x3ec   : > { %v12740_v19 = vsub.f32 %v12334_v52, %v2073_v32  ;;  %2230 = vrot.lane.b32.xlu1 %v2139_v56, %s11578_s7  ;;  %v4953_v56 = vmul.f32 0.0625, %v12533_v6  ;;  %v12773_v6 = vsub.f32 %v12246_v25, %v4955_v29  ;;  %v4956_v29 = vmul.f32 0.0625, %v12600_v12 }
 0x3ed   : > { %v2046_v48 = vpop.xlane.xlu1 %2045 }
 0x3ee   : > { %18920 = vst [vmem:[#allocation69_spill] sm:$0xff] %v12740_v19  ;;  %v2137_v17 = vmul.f32 %v12740_v19, %v12740_v19  ;;  %v2079_v14 = vmul.f32 0.0625, %v2046_v48  ;;  %v12758_v48 = vsub.f32 %v12242_v39, %v4952_v42 }
 0x3f0   : > { %v12746_v0 = vsub.f32 %v12348_v35, %v2079_v14  ;;  %2226 = vrot.lane.b32.xlu1 %v2137_v17, %s11578_s7  ;;  %v12765_v14 = vsub.f32 %v12248_v54, %v4953_v56 }
 0x3f1   : > { %v2040_v53 = vpop.xlane.xlu1 %2039 }
 0x3f2   : > { %18921 = vst [vmem:[#allocation70_spill] sm:$0xff] %v12746_v0  ;;  %v2143_v38 = vmul.f32 %v12746_v0, %v12746_v0  ;;  %v2077_v32 = vmul.f32 0.0625, %v2040_v53  ;;  %v5016_v53 = vmul.f32 %v12758_v48, %v12758_v48  ;;  %v5017_v42 = vmul.f32 %v12765_v14, %v12765_v14 }
 0x3f3   : > { %v4958_v0 = vmul.f32 0.0625, %v12587_v1 }
 0x3f4   : > { %v12753_v51 = vsub.f32 %v12350_v34, %v2077_v32  ;;  %2238 = vrot.lane.b32.xlu1 %v2143_v38, %s11578_s7  ;;  %v12769_v32 = vpop.xlane.xlu0 %4928  ;;  %v5019_v38 = vmul.f32 %v12773_v6, %v12773_v6 }
 0x3f5   : > { %v12791_v49 = vpop.xlane.xlu1 %4925 }
 0x3f6   : > { %18922 = vst [vmem:[#allocation71_spill] sm:$0xff] %v12753_v51  ;;  %v2141_v17 = vmul.f32 %v12753_v51, %v12753_v51 }
 0x3f8   : > { %2234 = vrot.lane.b32.xlu1 %v2141_v17, %s11578_s7  ;;  %v2177_v56 = vpop.permute.xlu0 %2176 }
 0x3f9   : > { %v2272_v17 = vsel %vm285_vm1, %v2177_v56, 0.0  ;;  %v2181_v25 = vpop.permute.xlu1 %2180  ;;  %v4957_v56 = vmul.f32 0.0625, %v12553_v63 }
 0x3fc   : > { %5084 = vrot.lane.b32.xlu1 %v5016_v53, %s11579_s8  ;;  %v12786_v53 = vsub.f32 %v12260_v37, %v4956_v29  ;;  %v12803_v29 = vpop.permute.xlu0 %5082 }
 0x400   : > { %5086 = vrot.lane.b32.xlu1 %v5017_v42, %s11579_s8  ;;  %v5020_v42 = vmul.f32 %v12786_v53, %v12786_v53 }
 0x402   : > { %4931 = vadd.xlane.f32.xlu0 %v4930_v33  ;;  %v4933_v33 = vsel %vm285_vm1, %v12461_v10, 0.0  ;;  %v4936_v10 = vsel %vm285_vm1, %v12484_v62, 0.0 }
 0x404   : > { %5090 = vrot.lane.b32.xlu1 %v5019_v38, %s11579_s8  ;;  %v12795_v38 = vpop.permute.xlu1 %5080 }
 0x406   : > { %2273 = vadd.xlane.f32.xlu0 %v2272_v17  ;;  %v12801_v17 = vsub.f32 %v12264_v57, %v4957_v56  ;;  %v2278_v56 = vsel %vm285_vm1, %v2181_v25, 0.0 }
 0x408   : > { %v12798_v12 = vpop.permute.xlu1 %5076 }
 0x40a   : > { %v12807_v54 = vpop.permute.xlu0 %5078 }
 0x40c   : > { %v2183_v37 = vpop.permute.xlu1 %2182 }
 0x40e   : > { %v2189_v63 = vpop.permute.xlu0 %2188 }
 0x412   : > { %v2185_v57 = vpop.permute.xlu0 %2184 }
 0x413   : > { %v2284_v51 = vsel %vm285_vm1, %v2185_v57, 0.0  ;;  %v4959_v57 = vmul.f32 0.0625, %v12540_v59 }
 0x415   : > { %v12828_v1 = vsub.f32 %v12262_v43, %v4959_v57 }
 0x41c   : > { %5092 = vrot.lane.b32.xlu0 %v5020_v42, %s11579_s8  ;;  %v5021_v42 = vmul.f32 %v12801_v17, %v12801_v17 }
 0x428   : > { %4934 = vadd.xlane.f32.xlu1 %v4933_v33  ;;  %v2179_v33 = vpop.permute.xlu1 %2178 }
 0x429   : > { %v2275_v39 = vsel %vm285_vm1, %v2179_v33, 0.0  ;;  %v4939_v33 = vsel %vm285_vm1, %v12491_v3, 0.0  ;;  %v4945_v3 = vsel %vm285_vm1, %v12487_v27, 0.0 }
 0x439   : > { %5094 = vrot.lane.b32.xlu1 %v5021_v42, %s11579_s8  ;;  %v12817_v42 = vsub.f32 %v12254_v4, %v4958_v0  ;;  %v5023_v0 = vmul.f32 %v12828_v1, %v12828_v1 }
 0x43b   : > { %4937 = vadd.xlane.f32.xlu0 %v4936_v10  ;;  %v5022_v62 = vmul.f32 %v12817_v42, %v12817_v42  ;;  %v2191_v10 = vpop.permute.xlu1 %2190 }
 0x43c   : > { %v2293_v27 = vsel %vm285_vm1, %v2191_v10, 0.0 }
 0x43f   : > { %2276 = vadd.xlane.f32.xlu0 %v2275_v39  ;;  %v2281_v39 = vsel %vm285_vm1, %v2183_v37, 0.0  ;;  %v2187_v25 = vpop.permute.xlu1 %2186  ;;  %v2290_v37 = vsel %vm285_vm1, %v2189_v63, 0.0  ;;  %v4961_v63 = vmul.f32 0.0625, %v12596_v36 }
 0x443   : > { %2279 = vadd.xlane.f32.xlu0 %v2278_v56  ;;  %v4960_v56 = vmul.f32 0.0625, %v12641_v23  ;;  %v2199_v23 = vpop.permute.xlu1 %2198 }
 0x447   : > { %2285 = vadd.xlane.f32.xlu0 %v2284_v51  ;;  %v2287_v51 = vsel %vm285_vm1, %v2187_v25, 0.0 }
 0x45d   : > { %5096 = vrot.lane.b32.xlu0 %v5022_v62, %s11579_s8  ;;  %4940 = vadd.xlane.f32.xlu1 %v4939_v33  ;;  %v12838_v62 = vsub.f32 %v12278_v18, %v4960_v56  ;;  %v4942_v33 = vsel %vm285_vm1, %v12479_v8, 0.0  ;;  %v4962_v8 = vmul.f32 0.0625, %v12631_v60  ;;  %v4963_v56 = vmul.f32 0.0625, %v12580_v58 }
 0x45f   : > { %v5024_v59 = vmul.f32 %v12838_v62, %v12838_v62  ;;  %v12856_v10 = vsub.f32 %v12276_v46, %v4962_v8 }
 0x461   : > { %2282 = vadd.xlane.f32.xlu1 %v2281_v39  ;;  %v12848_v39 = vsub.f32 %v12286_v7, %v4961_v63  ;;  %v5026_v36 = vmul.f32 %v12856_v10, %v12856_v10 }
 0x463   : > { %v5025_v25 = vmul.f32 %v12848_v39, %v12848_v39 }
 0x465   : > { %2288 = vadd.xlane.f32.xlu1 %v2287_v51  ;;  %v2195_v51 = vpop.permute.xlu1 %2194 }
 0x466   : > { %v2299_v57 = vsel %vm285_vm1, %v2195_v51, 0.0  ;;  %v4965_v51 = vmul.f32 0.0625, %v12637_v13 }
 0x476   : > { %5098 = vrot.lane.b32.xlu1 %v5023_v0, %s11579_s8  ;;  %v2197_v0 = vpop.permute.xlu0 %2196 }
 0x477   : > { %v2302_v58 = vsel %vm285_vm1, %v2197_v0, 0.0 }
 0x47c   : > { %4946 = vadd.xlane.f32.xlu0 %v4945_v3  ;;  %v2193_v3 = vpop.permute.xlu0 %2192 }
 0x480   : > { %2291 = vadd.xlane.f32.xlu0 %v2290_v37  ;;  %v2296_v37 = vsel %vm285_vm1, %v2193_v3, 0.0  ;;  %v4966_v3 = vmul.f32 0.0625, %v12665_v9 }
 0x482   : > { %v12888_v0 = vsub.f32 %v12292_v45, %v4966_v3  ;;  %v4968_v3 = vmul.f32 0.0625, %v12707_v21 }
 0x484   : > { %18923 = vst [vmem:[#allocation72_spill] sm:$0xff] %v12888_v0  ;;  %v5030_v13 = vmul.f32 %v12888_v0, %v12888_v0 }
 0x496   : > { %5100 = vrot.lane.b32.xlu0 %v5024_v59, %s11579_s8  ;;  %v12864_v59 = vsub.f32 %v12284_v40, %v4963_v56 }
 0x498   : > { %v5027_v60 = vmul.f32 %v12864_v59, %v12864_v59 }
 0x49a   : > { %4943 = vadd.xlane.f32.xlu1 %v4942_v33  ;;  %v2305_v33 = vsel %vm285_vm1, %v2199_v23, 0.0  ;;  %v2207_v23 = vpop.permute.xlu1 %2206 }
 0x49e   : > { %2294 = vadd.xlane.f32.xlu1 %v2293_v27  ;;  %v4964_v27 = vmul.f32 0.0625, %v12673_v26  ;;  %v2203_v8 = vpop.permute.xlu1 %2202 }
 0x4a0   : > { %v12872_v63 = vsub.f32 %v12294_v44, %v4964_v27 }
 0x4af   : > { %5102 = vrot.lane.b32.xlu1 %v5025_v25, %s11579_s8  ;;  %v5028_v25 = vmul.f32 %v12872_v63, %v12872_v63 }
 0x4b5   : > { %2300 = vadd.xlane.f32.xlu0 %v2299_v57  ;;  %v12880_v57 = vsub.f32 %v12302_v50, %v4965_v51  ;;  %v12904_v51 = vpop.permute.xlu1 %2214 }
 0x4b7   : > { %v5029_v26 = vmul.f32 %v12880_v57, %v12880_v57 }
 0x4cb   : > { %5104 = vrot.lane.b32.xlu0 %v5026_v36, %s11579_s8  ;;  %v2311_v36 = vsel %vm285_vm1, %v2203_v8, 0.0 }
 0x4d3   : > { %2297 = vadd.xlane.f32.xlu1 %v2296_v37  ;;  %v2205_v37 = vpop.permute.xlu0 %2204 }
 0x4d7   : > { %v2201_v56 = vpop.permute.xlu0 %2200 }
 0x4db   : > { %v12910_v8 = vpop.permute.xlu0 %2212 }
 0x4e4   : > { %5106 = vrot.lane.b32.xlu1 %v5027_v60, %s11579_s8  ;;  %v2308_v60 = vsel %vm285_vm1, %v2201_v56, 0.0 }
 0x4ea   : > { %2306 = vadd.xlane.f32.xlu0 %v2305_v33  ;;  %v4967_v33 = vmul.f32 0.0625, %v12624_v22  ;;  %v5178_v22 = vsel %vm285_vm1, %v12795_v38, 0.0 }
 0x4ec   : > { %v12896_v27 = vsub.f32 %v12300_v16, %v4967_v33  ;;  %v2314_v33 = vsel %vm285_vm1, %v2205_v37, 0.0 }
 0x4ee   : > { %18924 = vst [vmem:[#allocation73_spill] sm:$0xff] %v12896_v27  ;;  %v5031_v9 = vmul.f32 %v12896_v27, %v12896_v27 }
 0x500   : > { %5108 = vrot.lane.b32.xlu0 %v5028_v25, %s11579_s8  ;;  %v2317_v25 = vsel %vm285_vm1, %v2207_v23, 0.0  ;;  %v12915_v23 = vpop.permute.xlu0 %2208 }
 0x504   : > { %v12922_v56 = vpop.permute.xlu0 %2220 }
 0x508   : > { %2303 = vadd.xlane.f32.xlu1 %v2302_v58  ;;  %v5172_v58 = vsel %vm285_vm1, %v12798_v12, 0.0  ;;  %v12920_v12 = vsub.f32 %v12310_v55, %v4968_v3  ;;  %v12930_v21 = vpop.permute.xlu0 %2216 }
 0x50a   : > { %18925 = vst [vmem:[#allocation74_spill] sm:$0xff] %v12920_v12  ;;  %v5032_v38 = vmul.f32 %v12920_v12, %v12920_v12 }
 0x519   : > { %5110 = vrot.lane.b32.xlu1 %v5029_v26, %s11579_s8  ;;  %v12908_v26 = vpop.permute.xlu1 %2210 }
 0x51f   : > { %2312 = vadd.xlane.f32.xlu0 %v2311_v36  ;;  %v12912_v36 = vpop.permute.xlu1 %2222 }
 0x535   : > { %5112 = vrot.lane.b32.xlu0 %v5030_v13, %s11579_s8  ;;  %v12917_v13 = vpop.permute.xlu1 %2218 }
 0x53d   : > { %2309 = vadd.xlane.f32.xlu1 %v2308_v60  ;;  %v12924_v60 = vpop.permute.xlu1 %2230 }
 0x54e   : > { %5114 = vrot.lane.b32.xlu1 %v5031_v9, %s11579_s8  ;;  %v12932_v9 = vpop.permute.xlu1 %2226 }
 0x552   : > { %v12940_v3 = vpop.permute.xlu1 %2238 }
 0x554   : > { %2318 = vadd.xlane.f32.xlu0 %v2317_v25  ;;  %v5175_v25 = vsel %vm285_vm1, %v12807_v54, 0.0 }
 0x558   : > { %5173 = vadd.xlane.f32.xlu0 %v5172_v58  ;;  %v12936_v58 = vpop.permute.xlu0 %2228 }
 0x55c   : > { %5179 = vadd.xlane.f32.xlu0 %v5178_v22  ;;  %v5181_v22 = vsel %vm285_vm1, %v12803_v29, 0.0  ;;  %v12942_v37 = vpop.permute.xlu0 %2224 }
 0x560   : > { %v12950_v16 = vpop.permute.xlu0 %2236 }
 0x564   : > { %v12954_v45 = vpop.permute.xlu0 %2232 }
 0x568   : > { %v5089_v50 = vpop.permute.xlu0 %5088 }
 0x572   : > { %5116 = vrot.lane.b32.xlu0 %v5032_v38, %s11579_s8  ;;  %2315 = vadd.xlane.f32.xlu1 %v2314_v33  ;;  %v4969_v38 = vmul.f32 0.0625, %v12670_v31  ;;  %v12945_v33 = vpop.permute.xlu1 %2234  ;;  %v5190_v31 = vsel %vm285_vm1, %v5089_v50, 0.0  ;;  %v4971_v50 = vmul.f32 0.0625, %v12657_v41 }
 0x574   : > { %v12948_v55 = vsub.f32 %v12318_v2, %v4969_v38  ;;  %v4970_v38 = vmul.f32 0.0625, %v12695_v30 }
 0x576   : > { %5176 = vadd.xlane.f32.xlu1 %v5175_v25  ;;  %18926 = vst [vmem:[#allocation75_spill] sm:$0xff] %v12948_v55  ;;  %v5085_v54 = vpop.permute.xlu1 %5084  ;;  %v5033_v25 = vmul.f32 %v12948_v55, %v12948_v55  ;;  %v12961_v2 = vsub.f32 %v12308_v15, %v4970_v38 }
 0x578   : > { %18927 = vst [vmem:[#allocation76_spill] sm:$0xff] %v12961_v2  ;;  %v5034_v44 = vmul.f32 %v12961_v2, %v12961_v2  ;;  %v18686_v2 = vmov 1.0  }
 0x57a   : > { %5182 = vadd.xlane.f32.xlu1 %v5181_v22  ;;  %v5087_v29 = vpop.permute.xlu1 %5086 }
 0x57b   : > { %v5187_v22 = vsel %vm285_vm1, %v5087_v29, 0.0 }
 0x57e   : > { %v5091_v40 = vpop.permute.xlu1 %5090 }
 0x57f   : > { %v5193_v29 = vsel %vm285_vm1, %v5091_v40, 0.0 }
 0x582   : > { %v4935_v30 = vpop.xlane.xlu1 %4934 }
 0x586   : > { %v5095_v38 = vpop.permute.xlu1 %5094 }
 0x58b   : > { %5118 = vrot.lane.b32.xlu1 %v5033_v25, %s11579_s8  ;;  %v5184_v25 = vsel %vm285_vm1, %v5085_v54, 0.0  ;;  %v4972_v54 = vmul.f32 0.0625, %v12791_v49 }
 0x58d   : > { %v12978_v40 = vsub.f32 %v12326_v11, %v4972_v54 }
 0x58f   : > { %18929 = vst [vmem:[#allocation78_spill] sm:$0xff] %v12978_v40  ;;  %v5036_v41 = vmul.f32 %v12978_v40, %v12978_v40 }
 0x591   : > { %5188 = vadd.xlane.f32.xlu0 %v5187_v22  ;;  %v12970_v22 = vsub.f32 %v12316_v28, %v4971_v50  ;;  %v4941_v28 = vpop.xlane.xlu1 %4940 }
 0x593   : > { %18928 = vst [vmem:[#allocation77_spill] sm:$0xff] %v12970_v22 }
 0x595   : > { %5191 = vadd.xlane.f32.xlu0 %v5190_v31  ;;  %v5035_v31 = vmul.f32 %v12970_v22, %v12970_v22 }
 0x5ab   : > { %5120 = vrot.lane.b32.xlu0 %v5034_v44, %s11579_s8  ;;  %v5199_v44 = vsel %vm285_vm1, %v5095_v38, 0.0  ;;  %v4973_v38 = vmul.f32 0.0625, %v12769_v32 }
 0x5ad   : > { %v12990_v49 = vsub.f32 %v12334_v52, %v4973_v38 }
 0x5af   : > { %5185 = vadd.xlane.f32.xlu1 %v5184_v25  ;;  %v4932_v25 = vpop.xlane.xlu0 %4931  ;;  %18930 = vst [vmem:[#allocation79_spill] sm:$0xff] %v12990_v49  ;;  %v5037_v11 = vmul.f32 %v12990_v49, %v12990_v49 }
 0x5b0   : > { %v4974_v46 = vmul.f32 0.0625, %v4932_v25 }
 0x5b2   : > { %v13001_v7 = vsub.f32 %v12324_v24, %v4974_v46 }
 0x5b3   : > { %5194 = vadd.xlane.f32.xlu1 %v5193_v29  ;;  %v12982_v29 = vpop.xlane.xlu0 %2273 }
 0x5b4   : > { %18931 = vst [vmem:[#allocation80_spill] sm:$0xff] %v13001_v7  ;;  %v5038_v38 = vmul.f32 %v13001_v7, %v13001_v7 }
 0x5b7   : > { %v5093_v50 = vpop.permute.xlu0 %5092 }
 0x5c4   : > { %5122 = vrot.lane.b32.xlu1 %v5035_v31, %s11579_s8  ;;  %v5196_v31 = vsel %vm285_vm1, %v5093_v50, 0.0  ;;  %v4938_v50 = vpop.xlane.xlu0 %4937 }
 0x5ca   : > { %5200 = vadd.xlane.f32.xlu0 %v5199_v44  ;;  %v12987_v44 = vpop.xlane.xlu1 %2282 }
 0x5ce   : > { %v12992_v54 = vpop.xlane.xlu1 %2288 }
 0x5cf   : > { %v2373_v22 = vmul.f32 0.0625, %v12992_v54 }
 0x5e0   : > { %5124 = vrot.lane.b32.xlu0 %v5036_v41, %s11579_s8  ;;  %v5099_v41 = vpop.permute.xlu1 %5098 }
 0x5e1   : > { %v5205_v15 = vsel %vm285_vm1, %v5099_v41, 0.0 }
 0x5e4   : > { %v4944_v41 = vpop.xlane.xlu1 %4943 }
 0x5e8   : > { %5197 = vadd.xlane.f32.xlu1 %v5196_v31  ;;  %v2277_v31 = vpop.xlane.xlu0 %2276  ;;  %v13012_v43 = vpop.xlane.xlu1 %2294 }
 0x5ec   : > { %v12998_v32 = vpop.xlane.xlu0 %2279  ;;  %v5103_v24 = vpop.permute.xlu1 %5102 }
 0x5ed   : > { %v5211_v4 = vsel %vm285_vm1, %v5103_v24, 0.0  ;;  %v2370_v49 = vmul.f32 0.0625, %v12998_v32  ;;  %v2405_v32 = vadd.f32 1e-05, %v2373_v22 }
 0x5f0   : > { %v13005_v52 = vpop.xlane.xlu0 %2285 }
 0x5f9   : > { %5126 = vrot.lane.b32.xlu1 %v5037_v11, %s11579_s8  ;;  %v5097_v11 = vpop.permute.xlu0 %5096 }
 0x5fa   : > { %v5202_v18 = vsel %vm285_vm1, %v5097_v11, 0.0 }
 0x5fd   : > { %v4947_v7 = vpop.xlane.xlu0 %4946 }
 0x5ff   : > { %5206 = vadd.xlane.f32.xlu0 %v5205_v15  ;;  %v4975_v15 = vmul.f32 0.0625, %v4935_v30 }
 0x601   : > { %v13010_v25 = vsub.f32 %v12332_v20, %v4975_v15  ;;  %v13023_v11 = vpop.xlane.xlu0 %2291 }
 0x603   : > { %18932 = vst [vmem:[#allocation81_spill] sm:$0xff] %v13010_v25  ;;  %v5039_v46 = vmul.f32 %v13010_v25, %v13010_v25 }
 0x605   : > { %v5101_v15 = vpop.permute.xlu0 %5100 }
 0x606   : > { %v5208_v20 = vsel %vm285_vm1, %v5101_v15, 0.0 }
 0x615   : > { %5128 = vrot.lane.b32.xlu0 %v5038_v38, %s11579_s8  ;;  %v4976_v38 = vmul.f32 0.0625, %v4938_v50  ;;  %v13032_v50 = vpop.xlane.xlu0 %2300 }
 0x61d   : > { %5203 = vadd.xlane.f32.xlu1 %v5202_v18  ;;  %v13019_v18 = vsub.f32 %v12342_v5, %v4976_v38  ;;  %v2323_v38 = vsel %vm285_vm1, %v12908_v26, 0.0  ;;  %v5105_v5 = vpop.permute.xlu0 %5104  ;;  %v2320_v26 = vsel %vm285_vm1, %v12915_v23, 0.0 }
 0x61f   : > { %18933 = vst [vmem:[#allocation82_spill] sm:$0xff] %v13019_v18  ;;  %v5040_v30 = vmul.f32 %v13019_v18, %v13019_v18 }
 0x62e   : > { %5130 = vrot.lane.b32.xlu1 %v5039_v46, %s11579_s8  ;;  %v4977_v46 = vmul.f32 0.0625, %v4941_v28 }
 0x630   : > { %v13028_v24 = vsub.f32 %v12350_v34, %v4977_v46  ;;  %v13043_v46 = vpop.xlane.xlu1 %2297  ;;  %v13045_v34 = vpop.xlane.xlu0 %2306 }
 0x632   : > { %18934 = vst [vmem:[#allocation83_spill] sm:$0xff] %v13028_v24 }
 0x634   : > { %5212 = vadd.xlane.f32.xlu0 %v5211_v4  ;;  %v5041_v4 = vmul.f32 %v13028_v24, %v13028_v24  ;;  %v2369_v24 = vmul.f32 0.0625, %v2277_v31 }
 0x64a   : > { %5132 = vrot.lane.b32.xlu0 %v5040_v30, %s11579_s8  ;;  %v5214_v30 = vsel %vm285_vm1, %v5105_v5, 0.0  ;;  %v5109_v5 = vpop.permute.xlu0 %5108 }
 0x652   : > { %5209 = vadd.xlane.f32.xlu1 %v5208_v20  ;;  %v4978_v20 = vmul.f32 0.0625, %v4944_v41 }
 0x654   : > { %v13039_v28 = vsub.f32 %v12340_v61, %v4978_v20 }
 0x656   : > { %18935 = vst [vmem:[#allocation84_spill] sm:$0xff] %v13039_v28  ;;  %v5042_v15 = vmul.f32 %v13039_v28, %v13039_v28 }
 0x663   : > { %5134 = vrot.lane.b32.xlu1 %v5041_v4, %s11579_s8  ;;  %v5107_v4 = vpop.permute.xlu1 %5106 }
 0x664   : > { %v5217_v41 = vsel %vm285_vm1, %v5107_v4, 0.0 }
 0x669   : > { %2324 = vadd.xlane.f32.xlu0 %v2323_v38  ;;  %v13051_v38 = vpop.xlane.xlu0 %2312 }
 0x66d   : > { %5215 = vadd.xlane.f32.xlu0 %v5214_v30  ;;  %v4979_v30 = vmul.f32 0.0625, %v4947_v7  ;;  %v5113_v20 = vpop.permute.xlu0 %5112  ;;  %v13064_v7 = vpop.xlane.xlu1 %2303 }
 0x66f   : > { %v13054_v61 = vsub.f32 %v12348_v35, %v4979_v30 }
 0x671   : > { %18936 = vst [vmem:[#allocation85_spill] sm:$0xff] %v13054_v61  ;;  %v13056_v28 = vpop.xlane.xlu0 %2318  ;;  %v5043_v23 = vmul.f32 %v13054_v61, %v13054_v61  ;;  %v5111_v31 = vpop.permute.xlu1 %5110  ;;  %v18937_v61 = vld [vmem:[#allocation42_spill] sm:$0xff] }
 0x675   : > { %v13061_v18 = vpop.xlane.xlu0 %5173 }
 0x679   : > { %v13068_v30 = vpop.xlane.xlu0 %5179 }
 0x683   : > { %5136 = vrot.lane.b32.xlu0 %v5042_v15, %s11579_s8  ;;  %v2368_v15 = vmul.f32 0.0625, %v12982_v29  ;;  %v5220_v29 = vsel %vm285_vm1, %v5109_v5, 0.0  ;;  %v5226_v5 = vsel %vm285_vm1, %v5113_v20, 0.0  ;;  %v2402_v20 = vadd.f32 1e-05, %v2370_v49 }
 0x685   : > { %v2400_v4 = vadd.f32 1e-05, %v2368_v15  ;;  %v13073_v15 = vpop.xlane.xlu1 %2309 }
 0x687   : > { %2321 = vadd.xlane.f32.xlu1 %v2320_v26  ;;  %v2401_v26 = vadd.f32 1e-05, %v2369_v24  ;;  %v5117_v24 = vpop.permute.xlu0 %5116 }
 0x689   : > { %10804 = vrsqrt.f32 %v2401_v26 }
 0x68a   : > { %10806 = vrsqrt.f32 %v2400_v4 }
 0x68b   : > { %5218 = vadd.xlane.f32.xlu1 %v5217_v41  ;;  %v2329_v41 = vsel %vm285_vm1, %v12904_v51, 0.0  ;;  %v13075_v4 = vpop.xlane.xlu0 %5188 }
 0x693   : > { %v10805_v35 = vpop.eup %10804 }
 0x694   : > { %v10807_v26 = vpop.eup %10806  ;;  %v13078_v51 = vmul.f32 %v10805_v35, %v18937_v61  ;;  %v2338_v61 = vsel %vm285_vm1, %v12922_v56, 0.0  ;;  %v13090_v35 = vpop.xlane.xlu0 %5191 }
 0x696   : > { %v10272_v40 = vmul.f32 -1.442695, %v13078_v51 }
 0x698   : > { %10808 = vpow2.f32 %v10272_v40  ;;  %v5121_v56 = vpop.permute.xlu0 %5120 }
 0x699   : > { %v5238_v40 = vsel %vm285_vm1, %v5121_v56, 0.0 }
 0x69c   : > { %5138 = vrot.lane.b32.xlu1 %v5043_v23, %s11579_s8  ;;  %v2332_v23 = vsel %vm285_vm1, %v12930_v21, 0.0  ;;  %v5115_v21 = vpop.permute.xlu1 %5114 }
 0x6a2   : > { %2330 = vadd.xlane.f32.xlu0 %v2329_v41  ;;  %v2371_v41 = vmul.f32 0.0625, %v12987_v44  ;;  %v10809_v22 = vpop.eup %10808 }
 0x6a6   : > { %5221 = vadd.xlane.f32.xlu0 %v5220_v29  ;;  %v18938_v29 = vld [vmem:[#allocation36_spill] sm:$0xff] }
 0x6a7   : > { %v13083_v25 = vmul.f32 %v10807_v26, %v18938_v29  ;;  %v2372_v26 = vmul.f32 0.0625, %v13005_v52  ;;  %v2344_v29 = vsel %vm285_vm1, %v12942_v37, 0.0  ;;  %v13101_v52 = vpop.xlane.xlu0 %5200  ;;  %v2350_v37 = vsel %vm285_vm1, %v12936_v58, 0.0 }
 0x6a9   : > { %v10271_v44 = vmul.f32 -1.442695, %v13083_v25  ;;  %v2404_v54 = vadd.f32 1e-05, %v2372_v26  ;;  %v2593_v26 = vadd.f32 1.0, %v10809_v22  ;;  %v18941_v22 = vld [vmem:[#allocation49_spill] sm:$0xff] }
 0x6aa   : > { %2333 = vadd.xlane.f32.xlu0 %v2332_v23  ;;  %v2403_v23 = vadd.f32 1e-05, %v2371_v41  ;;  %v5232_v41 = vsel %vm285_vm1, %v5117_v24, 0.0  ;;  %v2326_v24 = vsel %vm285_vm1, %v12910_v8, 0.0  ;;  %v18940_v8 = vld [vmem:[#allocation37_spill] sm:$0xff] }
 0x6ac   : > { %10810 = vrsqrt.f32 %v2403_v23 }
 0x6ad   : > { %10812 = vpow2.f32 %v10271_v44 }
 0x6ae   : > { %5227 = vadd.xlane.f32.xlu0 %v5226_v5  ;;  %v13094_v5 = vpop.xlane.xlu1 %2315  ;;  %10814 = vrsqrt.f32 %v2402_v20 }
 0x6af   : > { %10816 = vrsqrt.f32 %v2405_v32  ;;  %v5125_v32 = vpop.permute.xlu0 %5124 }
 0x6b0   : > { %10818 = vrsqrt.f32 %v2404_v54 }
 0x6b1   : > { %10820 = vrcp.f32 %v2593_v26 }
 0x6b2   : > { %2339 = vadd.xlane.f32.xlu0 %v2338_v61  ;;  %v13099_v61 = vpop.xlane.xlu1 %5176 }
 0x6b6   : > { %5233 = vadd.xlane.f32.xlu0 %v5232_v41  ;;  %v10811_v49 = vpop.eup %10810  ;;  %v13106_v44 = vpop.xlane.xlu1 %5182  ;;  %v18939_v41 = vld [vmem:[#allocation41_spill] sm:$0xff] }
 0x6b7   : > { %v10813_v23 = vpop.eup %10812  ;;  %v13111_v54 = vmul.f32 %v10811_v49, %v18939_v41  ;;  %v2335_v49 = vsel %vm285_vm1, %v12917_v13, 0.0 }
 0x6b8   : > { %v10815_v20 = vpop.eup %10814 }
 0x6b9   : > { %v10817_v56 = vpop.eup %10816  ;;  %v13115_v19 = vmul.f32 %v10815_v20, %v18940_v8  ;;  %v10274_v58 = vmul.f32 -1.442695, %v13111_v54 }
 0x6ba   : > { %2345 = vadd.xlane.f32.xlu0 %v2344_v29  ;;  %v5223_v29 = vsel %vm285_vm1, %v5111_v31, 0.0  ;;  %v10819_v55 = vpop.eup %10818  ;;  %v5119_v27 = vpop.permute.xlu1 %5118 }
 0x6bb   : > { %v10273_v31 = vmul.f32 -1.442695, %v13115_v19  ;;  %v10821_v13 = vpop.eup %10820 }
 0x6bc   : > { %v2689_v8 = vmul.f32 %v10821_v13, %v13078_v51 }
 0x6be   : > { %5239 = vadd.xlane.f32.xlu0 %v5238_v40  ;;  %v2592_v40 = vadd.f32 1.0, %v10813_v23  ;;  %v18942_v23 = vld [vmem:[#allocation45_spill] sm:$0xff]  ;;  %v13128_v41 = vpop.xlane.xlu1 %5185 }
 0x6bf   : > { %v13126_v20 = vmul.f32 %v10819_v55, %v18942_v23  ;;  %v2347_v23 = vsel %vm285_vm1, %v12932_v9, 0.0 }
 0x6c0   : > { %2327 = vadd.xlane.f32.xlu1 %v2326_v24  ;;  %v5244_v24 = vsel %vm285_vm1, %v5125_v32, 0.0  ;;  %10822 = vrcp.f32 %v2592_v40  ;;  %v5229_v32 = vsel %vm285_vm1, %v5115_v21, 0.0 }
 0x6c1   : > { %10824 = vpow2.f32 %v10274_v58 }
 0x6c2   : > { %2351 = vadd.xlane.f32.xlu0 %v2350_v37  ;;  %v13120_v37 = vmul.f32 %v10817_v56, %v18941_v22  ;;  %10826 = vpow2.f32 %v10273_v31  ;;  %v10275_v56 = vmul.f32 -1.442695, %v13126_v20  ;;  %v13135_v40 = vpop.xlane.xlu1 %5194 }
 0x6c4   : > { %5224 = vadd.xlane.f32.xlu1 %v5223_v29  ;;  %v10276_v26 = vmul.f32 -1.442695, %v13120_v37  ;;  %v2341_v29 = vsel %vm285_vm1, %v12912_v36, 0.0 }
 0x6c6   : > { %5245 = vadd.xlane.f32.xlu0 %v5244_v24  ;;  %10828 = vpow2.f32 %v10276_v26  ;;  %v5235_v24 = vsel %vm285_vm1, %v5119_v27, 0.0 }
 0x6c7   : > { %10830 = vpow2.f32 %v10275_v56  ;;  %v18680_v56 = vmov 0  }
 0x6c8   : > { %2336 = vadd.xlane.f32.xlu1 %v2335_v49  ;;  %v5123_v49 = vpop.permute.xlu1 %5122  ;;  %290 = vst.msk [vmem:[#allocation2 + $0x88] sm:$0xf0] %vm289_vm2, %v18680_v56  ;;  %4595 = vmatprep.subr.bf16.mxu0 %v18680_v56 }
 0x6c9   : > { %286 = vst.msk [vmem:[#allocation2] sm:$0xff] %vm285_vm1, %v18680_v56  ;;  %291 = vst.msk [vmem:[#allocation2 + $0x90] sm:$0xff] %vm285_vm1, %v18680_v56  ;;  %10538 = vmatprep.subr.bf16.mxu1 %v18680_v56  ;;  %v5241_v51 = vsel %vm285_vm1, %v5123_v49, 0.0  ;;  %v2374_v49 = vmul.f32 0.0625, %v13023_v11 }
 0x6ca   : > { %v10823_v55 = vpop.eup %10822  ;;  %288 = vst.msk [vmem:[#allocation2 + $0x8] sm:$0xf] %vm287_vm3, %v18680_v56 }
 0x6cb   : > { %v10825_v58 = vpop.eup %10824  ;;  %v2688_v21 = vmul.f32 %v10823_v55, %v13083_v25  ;;  %v2353_v55 = vsel %vm285_vm1, %v12924_v60, 0.0 }
 0x6cc   : > { %5230 = vadd.xlane.f32.xlu1 %v5229_v32  ;;  %v10827_v22 = vpop.eup %10826  ;;  %v2595_v36 = vadd.f32 1.0, %v10825_v58  ;;  %v13150_v9 = vpop.xlane.xlu1 %5197  ;;  %v2376_v58 = vmul.f32 0.0625, %v13043_v46 }
 0x6cd   : > { %v2720_v31 = vpack.c.bf16 %v2689_v8, %v2688_v21  ;;  %v2594_v32 = vadd.f32 1.0, %v10827_v22  ;;  %v2375_v8 = vmul.f32 0.0625, %v13012_v43  ;;  %v2377_v21 = vmul.f32 0.0625, %v13032_v50 }
 0x6ce   : > { %10832 = vrcp.f32 %v2595_v36 }
 0x6cf   : > { %v2753_v25 = vrot.slane %v2720_v31, 4  ;;  %10834 = vrcp.f32 %v2594_v32  ;;  %v2407_v31 = vadd.f32 1e-05, %v2375_v8  ;;  %v2409_v43 = vadd.f32 1e-05, %v2377_v21 }
 0x6d0   : > { %2342 = vadd.xlane.f32.xlu1 %v2341_v29  ;;  %v10829_v26 = vpop.eup %10828 }
 0x6d1   : > { %v10831_v27 = vpop.eup %10830  ;;  %v2597_v13 = vadd.f32 1.0, %v10829_v26  ;;  %v2406_v26 = vadd.f32 1e-05, %v2374_v49 }
 0x6d2   : > { %v2596_v29 = vadd.f32 1.0, %v10831_v27 }
 0x6d3   : > { %10836 = vrcp.f32 %v2597_v13 }
 0x6d4   : > { %5236 = vadd.xlane.f32.xlu1 %v5235_v24  ;;  %v5127_v24 = vpop.permute.xlu1 %5126  ;;  %10838 = vrcp.f32 %v2596_v29 }
 0x6d5   : > { %v5247_v22 = vsel %vm285_vm1, %v5127_v24, 0.0  ;;  %10840 = vrsqrt.f32 %v2407_v31  ;;  %v18944_v31 = vld [vmem:[#allocation48_spill] sm:$0xff] }
 0x6d8   : > { %2348 = vadd.xlane.f32.xlu1 %v2347_v23  ;;  %v10833_v60 = vpop.eup %10832  ;;  %v2408_v23 = vadd.f32 1e-05, %v2376_v58 }
 0x6d9   : > { %v10835_v36 = vpop.eup %10834  ;;  %v2691_v46 = vmul.f32 %v10833_v60, %v13111_v54  ;;  %v18945_v60 = vld [vmem:[#allocation55_spill] sm:$0xff] }
 0x6da   : > { %10842 = vrsqrt.f32 %v2408_v23  ;;  %v2690_v50 = vmul.f32 %v10835_v36, %v13115_v19  ;;  %v18943_v19 = vld [vmem:[#allocation47_spill] sm:$0xff]  ;;  %v18946_v36 = vld [vmem:[#allocation44_spill] sm:$0xff] }
 0x6db   : > { %10844 = vrsqrt.f32 %v2409_v43 }
 0x6dc   : > { %2784 = vrot.lane.b32.xlu0 %v2753_v25, %s11578_s7  ;;  %5242 = vadd.xlane.f32.xlu1 %v5241_v51  ;;  %10846 = vrsqrt.f32 %v2406_v26  ;;  %v2721_v51 = vpack.c.bf16 %v2691_v46, %v2690_v50 }
 0x6dd   : > { %v10837_v32 = vpop.eup %10836 }
 0x6de   : > { %v10839_v27 = vpop.eup %10838  ;;  %v2693_v11 = vmul.f32 %v10837_v32, %v13120_v37  ;;  %v2754_v29 = vrot.slane %v2721_v51, 4  ;;  %v2356_v32 = vsel %vm285_vm1, %v12954_v45, 0.0 }
 0x6df   : > { %v2692_v13 = vmul.f32 %v10839_v27, %v13126_v20  ;;  %v10841_v8 = vpop.eup %10840 }
 0x6e0   : > { %2354 = vadd.xlane.f32.xlu1 %v2353_v55  ;;  %v2755_v54 = vsel %vm2752_vm4, %v2753_v25, %v2754_v29  ;;  %v13174_v49 = vmul.f32 %v10841_v8, %v18943_v19  ;;  %v5204_v25 = vpop.xlane.xlu1 %5203  ;;  %v2362_v8 = vsel %vm285_vm1, %v12950_v16, 0.0  ;;  %v2379_v19 = vmul.f32 0.0625, %v13045_v34 }
 0x6e1   : > { %v2722_v55 = vpack.c.bf16 %v2693_v11, %v2692_v13  ;;  %v2378_v34 = vmul.f32 0.0625, %v13064_v7 }
 0x6e2   : > { %v10278_v46 = vmul.f32 -1.442695, %v13174_v49  ;;  %v2411_v16 = vadd.f32 1e-05, %v2379_v19 }
 0x6e3   : > { %v13168_v21 = vrot.slane %v2722_v55, 4 }
 0x6e4   : > { %5248 = vadd.xlane.f32.xlu1 %v5247_v22  ;;  %v10843_v24 = vpop.eup %10842  ;;  %v13170_v22 = vpop.xlane.xlu0 %5206  ;;  %10848 = vpow2.f32 %v10278_v46 }
 0x6e5   : > { %v10845_v58 = vpop.eup %10844  ;;  %v13177_v20 = vmul.f32 %v10843_v24, %v18944_v31  ;;  %v2757_v43 = vsel %vm2752_vm4, %v2754_v29, %v13168_v21  ;;  %v5131_v29 = vpop.permute.xlu1 %5130  ;;  %v2365_v31 = vsel %vm285_vm1, %v12940_v3, 0.0  ;;  %v2381_v3 = vmul.f32 0.0625, %v13051_v38 }
 0x6e6   : > { %v10847_v37 = vpop.eup %10846  ;;  %v13180_v23 = vmul.f32 %v10845_v58, %v18945_v60  ;;  %v5253_v55 = vsel %vm285_vm1, %v5131_v29, 0.0  ;;  %v2383_v29 = vmul.f32 0.0625, %v13056_v28  ;;  %v5276_v28 = vmul.f32 0.0625, %v13150_v9 }
 0x6e7   : > { %v13186_v26 = vmul.f32 %v10847_v37, %v18946_v36  ;;  %v10279_v50 = vmul.f32 -1.442695, %v13177_v20 }
 0x6e8   : > { %v5129_v27 = vpop.permute.xlu0 %5128  ;;  %v10280_v51 = vmul.f32 -1.442695, %v13180_v23 }
 0x6e9   : > { %v10277_v11 = vmul.f32 -1.442695, %v13186_v26  ;;  %v5250_v13 = vsel %vm285_vm1, %v5129_v27, 0.0  ;;  %10850 = vpow2.f32 %v10279_v50  ;;  %v13201_v37 = vpop.xlane.xlu1 %5209 }
 0x6ea   : > { %10852 = vpow2.f32 %v10280_v51 }
 0x6eb   : > { %10854 = vpow2.f32 %v10277_v11 }
 0x6ec   : > { %v13196_v45 = vpop.xlane.xlu0 %5212 }
 0x6ed   : > { %v5135_v11 = vpop.permute.xlu1 %5134 }
 0x6ee   : > { %v10849_v24 = vpop.eup %10848 }
 0x6ef   : > { %v2599_v60 = vadd.f32 1.0, %v10849_v24  ;;  %v2413_v24 = vadd.f32 1e-05, %v2381_v3 }
 0x6f0   : > { %v5133_v36 = vpop.permute.xlu0 %5132 }
 0x6f1   : > { %v5256_v27 = vsel %vm285_vm1, %v5133_v36, 0.0  ;;  %10856 = vrcp.f32 %v2599_v60  ;;  %v5279_v36 = vmul.f32 0.0625, %v13170_v22 }
 0x6f3   : > { %v10851_v58 = vpop.eup %10850  ;;  %v5311_v9 = vadd.f32 1e-05, %v5279_v36 }
 0x6f4   : > { %v2600_v46 = vadd.f32 1.0, %v10851_v58  ;;  %v2382_v58 = vmul.f32 0.0625, %v13094_v5  ;;  %v5277_v5 = vmul.f32 0.0625, %v13101_v52 }
 0x6f5   : > { %2786 = vrot.lane.b32.xlu1 %v2755_v54, %s11578_s7  ;;  %v10853_v54 = vpop.eup %10852 }
 0x6f6   : > { %v2601_v50 = vadd.f32 1.0, %v10853_v54  ;;  %10858 = vrcp.f32 %v2600_v46  ;;  %v2415_v54 = vadd.f32 1e-05, %v2383_v29  ;;  %v2414_v38 = vadd.f32 1e-05, %v2382_v58 }
 0x6f7   : > { %v5309_v3 = vadd.f32 1e-05, %v5277_v5  ;;  %v5272_v5 = vmul.f32 0.0625, %v13128_v41  ;;  %v5273_v41 = vmul.f32 0.0625, %v13075_v4 }
 0x6f8   : > { %10860 = vrcp.f32 %v2601_v50 }
 0x6f9   : > { %2788 = vrot.lane.b32.xlu1 %v2757_v43, %s11578_s7  ;;  %v10855_v43 = vpop.eup %10854  ;;  %10862 = vrsqrt.f32 %v2411_v16  ;;  %v5308_v16 = vadd.f32 1e-05, %v5276_v28 }
 0x6fa   : > { %v2598_v51 = vadd.f32 1.0, %v10855_v43 }
 0x6fb   : > { %2357 = vadd.xlane.f32.xlu0 %v2356_v32  ;;  %v2380_v32 = vmul.f32 0.0625, %v13073_v15  ;;  %v5259_v15 = vsel %vm285_vm1, %v5135_v11, 0.0  ;;  %v10857_v7 = vpop.eup %10856  ;;  %v18947_v11 = vld [vmem:[#allocation53_spill] sm:$0xff] }
 0x6fc   : > { %10864 = vrcp.f32 %v2598_v51  ;;  %v2695_v51 = vmul.f32 %v10857_v7, %v13174_v49 }
 0x6ff   : > { %5251 = vadd.xlane.f32.xlu0 %v5250_v13  ;;  %v2412_v13 = vadd.f32 1e-05, %v2380_v32 }
 0x700   : > { %v10859_v60 = vpop.eup %10858 }
 0x701   : > { %10866 = vrsqrt.f32 %v2412_v13  ;;  %v13225_v13 = vpop.xlane.xlu0 %2324 }
 0x702   : > { %v10861_v43 = vpop.eup %10860 }
 0x703   : > { %5254 = vadd.xlane.f32.xlu0 %v5253_v55  ;;  %v2410_v55 = vadd.f32 1e-05, %v2378_v34  ;;  %v10863_v46 = vpop.eup %10862  ;;  %v2697_v22 = vmul.f32 %v10861_v43, %v13180_v23  ;;  %v5271_v23 = vmul.f32 0.0625, %v13106_v44  ;;  %v18950_v43 = vld [vmem:[#allocation59_spill] sm:$0xff] }
 0x704   : > { %v13222_v34 = vmul.f32 %v10863_v46, %v18947_v11 }
 0x705   : > { %10868 = vrsqrt.f32 %v2410_v55  ;;  %v13236_v7 = vpop.xlane.xlu0 %5215  ;;  %v5303_v44 = vadd.f32 1e-05, %v5271_v23 }
 0x706   : > { %10870 = vrsqrt.f32 %v2413_v24  ;;  %v10865_v32 = vpop.eup %10864 }
 0x707   : > { %2363 = vadd.xlane.f32.xlu0 %v2362_v8  ;;  %v5268_v8 = vmul.f32 0.0625, %v13061_v18  ;;  %10872 = vrsqrt.f32 %v2415_v54  ;;  %v2359_v18 = vsel %vm285_vm1, %v12945_v33, 0.0  ;;  %v5270_v33 = vmul.f32 0.0625, %v13068_v30 }
 0x708   : > { %v2694_v52 = vmul.f32 %v10865_v32, %v13186_v26  ;;  %v10282_v30 = vmul.f32 -1.442695, %v13222_v34 }
 0x709   : > { %v5300_v19 = vadd.f32 1e-05, %v5268_v8  ;;  %v5302_v58 = vadd.f32 1e-05, %v5270_v33 }
 0x70a   : > { %v2723_v8 = vpack.c.bf16 %v2695_v51, %v2694_v52  ;;  %v13261_v52 = vpop.permute.xlu0 %5136 }
 0x70b   : > { %2366 = vadd.xlane.f32.xlu0 %v2365_v31  ;;  %v5278_v31 = vmul.f32 0.0625, %v5204_v25  ;;  %10874 = vrsqrt.f32 %v5300_v19  ;;  %v2696_v25 = vmul.f32 %v10859_v60, %v13177_v20  ;;  %v5269_v20 = vmul.f32 0.0625, %v13099_v61  ;;  %v18949_v19 = vld [vmem:[#allocation46_spill] sm:$0xff] }
 0x70c   : > { %10876 = vrsqrt.f32 %v2414_v38  ;;  %v2758_v28 = vrot.slane %v2723_v8, 4 }
 0x70d   : > { %v5310_v50 = vadd.f32 1e-05, %v5278_v31  ;;  %v2724_v29 = vpack.c.bf16 %v2697_v22, %v2696_v25  ;;  %v5301_v26 = vadd.f32 1e-05, %v5269_v20  ;;  %v18953_v22 = vld [vmem:[#allocation50_spill] sm:$0xff] }
 0x70f   : > { %5257 = vadd.xlane.f32.xlu0 %v5256_v27  ;;  %v10867_v27 = vpop.eup %10866  ;;  %10878 = vrsqrt.f32 %v5310_v50  ;;  %v13234_v61 = vrot.slane %v2724_v29, 4  ;;  %v5304_v29 = vadd.f32 1e-05, %v5272_v5 }
 0x710   : > { %10880 = vrsqrt.f32 %v5308_v16  ;;  %v10869_v49 = vpop.eup %10868  ;;  %v18952_v16 = vld [vmem:[#allocation39_spill] sm:$0xff] }
 0x711   : > { %10882 = vrsqrt.f32 %v5311_v9  ;;  %v10871_v24 = vpop.eup %10870  ;;  %v13239_v31 = vmul.f32 %v10869_v49, %v18949_v19  ;;  %v2761_v50 = vsel %vm2752_vm4, %v2758_v28, %v13234_v61  ;;  %v2759_v49 = vsel %vm2752_vm4, %v13168_v21, %v2758_v28 }
 0x712   : > { %v10873_v54 = vpop.eup %10872  ;;  %10884 = vrsqrt.f32 %v5309_v3  ;;  %v13243_v36 = vmul.f32 %v10871_v24, %v18950_v43 }
 0x713   : > { %5260 = vadd.xlane.f32.xlu0 %v5259_v15  ;;  %v18948_v15 = vld [vmem:[#allocation51_spill] sm:$0xff]  ;;  %10886 = vpow2.f32 %v10282_v30  ;;  %v10281_v25 = vmul.f32 -1.442695, %v13239_v31 }
 0x714   : > { %v13230_v55 = vmul.f32 %v10867_v27, %v18948_v15  ;;  %10888 = vrsqrt.f32 %v5302_v58  ;;  %v10284_v51 = vmul.f32 -1.442695, %v13243_v36  ;;  %v5275_v15 = vmul.f32 0.0625, %v13135_v40 }
 0x715   : > { %v10875_v38 = vpop.eup %10874  ;;  %10890 = vrsqrt.f32 %v5301_v26  ;;  %v5305_v58 = vadd.f32 1e-05, %v5273_v41  ;;  %v299_v41 = vlaneseq }
 0x716   : > { %v10283_v60 = vmul.f32 -1.442695, %v13230_v55  ;;  %v10877_v46 = vpop.eup %10876  ;;  %v13254_v27 = vmul.f32 %v10875_v38, %v18952_v16  ;;  %v5307_v26 = vadd.f32 1e-05, %v5275_v15  ;;  %v5280_v16 = vmul.f32 0.0625, %v13201_v37 }
 0x717   : > { %v13258_v11 = vmul.f32 %v10877_v46, %v18953_v22  ;;  %v5281_v15 = vmul.f32 0.0625, %v13196_v45 }
 0x718   : > { %10892 = vpow2.f32 %v10283_v60  ;;  %v10328_v8 = vmul.f32 -1.442695, %v13254_v27 }
 0x719   : > { %v10879_v9 = vpop.eup %10878  ;;  %10894 = vrsqrt.f32 %v5303_v44  ;;  %v10285_v24 = vmul.f32 -1.442695, %v13258_v11 }
 0x71a   : > { %v10881_v33 = vpop.eup %10880  ;;  %10896 = vpow2.f32 %v10281_v25  ;;  %v13268_v23 = vmul.f32 %v10879_v9, %v12817_v42 }
 0x71b   : > { %v10883_v3 = vpop.eup %10882  ;;  %10898 = vpow2.f32 %v10284_v51  ;;  %v13273_v4 = vmul.f32 %v10881_v33, %v12786_v53 }
 0x71c   : > { %v10885_v30 = vpop.eup %10884  ;;  %v13279_v21 = vmul.f32 %v10883_v3, %v12828_v1  ;;  %v10338_v53 = vmul.f32 -1.442695, %v13268_v23 }
 0x71d   : > { %2360 = vadd.xlane.f32.xlu1 %v2359_v18  ;;  %v18951_v18 = vld [vmem:[#allocation57_spill] sm:$0xff]  ;;  %v10887_v42 = vpop.eup %10886  ;;  %v13283_v60 = vmul.f32 %v10885_v30, %v12801_v17  ;;  %v10336_v44 = vmul.f32 -1.442695, %v13273_v4 }
 0x71e   : > { %v13246_v32 = vmul.f32 %v10873_v54, %v18951_v18  ;;  %v5274_v54 = vmul.f32 0.0625, %v13090_v35  ;;  %v10889_v19 = vpop.eup %10888  ;;  %v10339_v43 = vmul.f32 -1.442695, %v13279_v21  ;;  %v18954_v18 = vld [vmem:[#allocation38_spill] sm:$0xff]  ;;  %v2603_v9 = vadd.f32 1.0, %v10887_v42 }
 0x71f   : > { %v10891_v38 = vpop.eup %10890  ;;  %v13291_v5 = vmul.f32 %v10889_v19, %v18954_v18  ;;  %v10337_v17 = vmul.f32 -1.442695, %v13283_v60 }
 0x720   : > { %v10286_v20 = vmul.f32 -1.442695, %v13246_v32  ;;  %v5306_v46 = vadd.f32 1e-05, %v5274_v54 }
 0x722   : > { %10900 = vpow2.f32 %v10286_v20  ;;  %v10893_v28 = vpop.eup %10892  ;;  %v18956_v20 = vld [vmem:[#allocation40_spill] sm:$0xff] }
 0x723   : > { %10902 = vrsqrt.f32 %v5304_v29  ;;  %v10895_v35 = vpop.eup %10894  ;;  %v2604_v33 = vadd.f32 1.0, %v10893_v28 }
 0x724   : > { %10904 = vpow2.f32 %v10328_v8  ;;  %v10897_v51 = vpop.eup %10896  ;;  %v13301_v3 = vmul.f32 %v10895_v35, %v18956_v20  ;;  %v10330_v8 = vmul.f32 -1.442695, %v13291_v5 }
 0x725   : > { %10906 = vpow2.f32 %v10285_v24  ;;  %v10899_v29 = vpop.eup %10898 }
 0x726   : > { %10908 = vrsqrt.f32 %v5305_v58  ;;  %v5312_v58 = vadd.f32 1e-05, %v5280_v16  ;;  %v10331_v19 = vmul.f32 -1.442695, %v13301_v3 }
 0x727   : > { %10910 = vrsqrt.f32 %v5307_v26  ;;  %v13310_v26 = vshrl.u32 %v299_v41, 7 }
 0x728   : > { %10912 = vpow2.f32 %v10338_v53  ;;  %v5313_v53 = vadd.f32 1e-05, %v5281_v15 }
 0x729   : > { %2792 = vrot.lane.b32.xlu0 %v2761_v50, %s11578_s7  ;;  %v18955_v50 = vld [vmem:[#allocation43_spill] sm:$0xff]  ;;  %10914 = vpow2.f32 %v10336_v44  ;;  %v2605_v44 = vadd.f32 1.0, %v10899_v29 }
 0x72a   : > { %v13295_v25 = vmul.f32 %v10891_v38, %v18955_v50  ;;  %10916 = vpow2.f32 %v10339_v43  ;;  %v301_v50 = vadd.s32 8, %v13310_v26 }
 0x72b   : > { %10918 = vrsqrt.f32 %v5306_v46  ;;  %v2602_v46 = vadd.f32 1.0, %v10897_v51 }
 0x72c   : > { %v10901_v37 = vpop.eup %10900  ;;  %10920 = vpow2.f32 %v10337_v17  ;;  %v10329_v30 = vmul.f32 -1.442695, %v13295_v25 }
 0x72d   : > { %v10903_v24 = vpop.eup %10902  ;;  %10922 = vrcp.f32 %v2603_v9  ;;  %v2607_v16 = vadd.f32 1.0, %v10901_v37 }
 0x72e   : > { %2790 = vrot.lane.b32.xlu1 %v2759_v49, %s11578_s7  ;;  %v13304_v49 = vpop.xlane.xlu1 %2321  ;;  %v10905_v42 = vpop.eup %10904  ;;  %10924 = vrcp.f32 %v2604_v33  ;;  %v13314_v28 = vmul.f32 %v10903_v24, %v12758_v48  ;;  %v303_v33 = vadd.s32 24, %v13310_v26  ;;  %v343_v24 = vand.u32 15, %v301_v50 }
 0x72f   : > { %v13276_v40 = vpop.xlane.xlu0 %2330  ;;  %v10907_v45 = vpop.eup %10906  ;;  %10926 = vpow2.f32 %v10330_v8  ;;  %v5492_v50 = vadd.f32 1.0, %v10905_v42  ;;  %v2384_v42 = vmul.f32 0.0625, %v13304_v49 }
 0x730   : > { %v10909_v38 = vpop.eup %10908  ;;  %10928 = vpow2.f32 %v10329_v30  ;;  %v2606_v41 = vadd.f32 1.0, %v10907_v45  ;;  %v10332_v29 = vmul.f32 -1.442695, %v13314_v28  ;;  %v357_v45 = vand.u32 15, %v303_v33 }
 0x731   : > { %v10911_v43 = vpop.eup %10910  ;;  %10930 = vrsqrt.f32 %v5312_v58  ;;  %v13323_v48 = vmul.f32 %v10909_v38, %v12765_v14  ;;  %vm829_vm5 = vcmp.ne.s32.totalorder %v343_v24, 15 }
 0x732   : > { %v13316_v35 = vpop.xlane.xlu1 %5218  ;;  %v10913_v18 = vpop.eup %10912  ;;  %10932 = vpow2.f32 %v10331_v19  ;;  %vm831_vm6 = vcmp.ne.s32.totalorder %v357_v45, 15 }
 0x733   : > { %v13287_v1 = vpop.xlane.xlu0 %5221  ;;  %v10915_v9 = vpop.eup %10914  ;;  %10934 = vrsqrt.f32 %v5313_v53  ;;  %v5502_v15 = vadd.f32 1.0, %v10913_v18  ;;  %v10333_v38 = vmul.f32 -1.442695, %v13323_v48 }
 0x734   : > { %v10917_v20 = vpop.eup %10916  ;;  %10936 = vrcp.f32 %v2605_v44  ;;  %v5500_v37 = vadd.f32 1.0, %v10915_v9  ;;  %v13329_v44 = vmul.f32 %v10911_v43, %v12773_v6 }
 0x735   : > { %v10919_v51 = vpop.eup %10918  ;;  %10938 = vrcp.f32 %v2602_v46  ;;  %v5503_v53 = vadd.f32 1.0, %v10917_v20 }
 0x736   : > { %v10921_v8 = vpop.eup %10920  ;;  %10940 = vrcp.f32 %v2607_v16  ;;  %v5139_v19 = vpop.permute.xlu1 %5138  ;;  %v13333_v46 = vmul.f32 %v10919_v51, %v12714_v47  ;;  %v10335_v43 = vmul.f32 -1.442695, %v13329_v44  ;;  %v18684_v51 = vmov 0.0  }
 0x737   : > { %v13298_v22 = vpop.xlane.xlu0 %2333  ;;  %v10923_v58 = vpop.eup %10922  ;;  %10942 = vrcp.f32 %v2606_v41  ;;  %v5501_v56 = vadd.f32 1.0, %v10921_v8  ;;  %v5265_v33 = vsel %vm285_vm1, %v5139_v19, 0.0  ;;  %v10206_v24 = vsel %vm831_vm6, 1.0, %v18684_v51 }
 0x738   : > { %v10925_v14 = vpop.eup %10924  ;;  %10944 = vpow2.f32 %v10332_v29  ;;  %v10334_v20 = vmul.f32 -1.442695, %v13333_v46 }
 0x739   : > { %v10927_v18 = vpop.eup %10926  ;;  %10946 = vrcp.f32 %v5502_v15  ;;  %v10205_v15 = vsel %vm829_vm5, 1.0, %v18684_v51 }
 0x73a   : > { %v10929_v16 = vpop.eup %10928  ;;  %10948 = vrcp.f32 %v5500_v37  ;;  %v5494_v47 = vadd.f32 1.0, %v10927_v18  ;;  %v2700_v18 = vmul.f32 %v10925_v14, %v13230_v55  ;;  %v924_v12 = vpack.c.bf16 %v10205_v15, %v18686_v2 }
 0x73b   : > { %v13308_v54 = vpop.xlane.xlu0 %5227  ;;  %v10931_v6 = vpop.eup %10930  ;;  %10950 = vrcp.f32 %v5503_v53  ;;  %v5493_v19 = vadd.f32 1.0, %v10929_v16 }
 0x73c   : > { %v10933_v41 = vpop.eup %10932  ;;  %10952 = vpow2.f32 %v10333_v38  ;;  %v13346_v53 = vmul.f32 %v10931_v6, %v12838_v62  ;;  %v2385_v38 = vmul.f32 0.0625, %v13225_v13  ;;  %v2416_v62 = vadd.f32 1e-05, %v2384_v42 }
 0x73d   : > { %v10935_v29 = vpop.eup %10934  ;;  %10954 = vrcp.f32 %v5501_v56  ;;  %v5495_v49 = vadd.f32 1.0, %v10933_v41  ;;  %v925_v13 = vpack.c.bf16 %v10206_v24, %v18686_v2 }
 0x73e   : > { %v10937_v8 = vpop.eup %10936  ;;  %10956 = vrcp.f32 %v5492_v50  ;;  %v13354_v16 = vmul.f32 %v10935_v29, %v12848_v39  ;;  %v10340_v41 = vmul.f32 -1.442695, %v13346_v53  ;;  %v2699_v39 = vmul.f32 %v10923_v58, %v13222_v34 }
 0x73f   : > { %v13318_v17 = vpop.xlane.xlu0 %2339  ;;  %v10939_v45 = vpop.eup %10938  ;;  %10958 = vpow2.f32 %v10335_v43  ;;  %v2701_v6 = vmul.f32 %v10937_v8, %v13243_v36  ;;  %v5262_v36 = vsel %vm285_vm1, %v13261_v52, 0.0  ;;  %v336_v8 = vand.u32 15, %v13310_v26 }
 0x740   : > { %v10941_v56 = vpop.eup %10940  ;;  %10960 = vpow2.f32 %v10334_v20  ;;  %v2698_v43 = vmul.f32 %v10939_v45, %v13239_v31  ;;  %v2417_v20 = vadd.f32 1e-05, %v2385_v38  ;;  %v10341_v31 = vmul.f32 -1.442695, %v13354_v16 }
 0x741   : > { %v10943_v50 = vpop.eup %10942  ;;  %10962 = vrcp.f32 %v5494_v47  ;;  %v2726_v29 = vpack.c.bf16 %v2701_v6, %v2700_v18  ;;  %v3051_v47 = vshrl.u32 %v924_v12, 16  ;;  %v3059_v45 = vshrl.u32 %v925_v13, 16 }
 0x742   : > { %v10945_v55 = vpop.eup %10944  ;;  %10964 = vrcp.f32 %v5493_v19  ;;  %v3054_v19 = vshll.u32 %v924_v12, 16  ;;  %v3062_v38 = vshll.u32 %v925_v13, 16  ;;  %v2725_v18 = vpack.c.bf16 %v2699_v39, %v2698_v43 }
 0x743   : > { %v13326_v30 = vpop.xlane.xlu0 %5233  ;;  %v10947_v15 = vpop.eup %10946  ;;  %10966 = vrcp.f32 %v5495_v49  ;;  %v13372_v52 = vrot.slane %v2726_v29, 4  ;;  %v2702_v2 = vmul.f32 %v10943_v50, %v13258_v11  ;;  %vm13381_vm7 = vcmp.ne.s32.totalorder %v336_v8, 0 }
 0x744   : > { %v10949_v42 = vpop.eup %10948  ;;  %10968 = vrsqrt.f32 %v2416_v62  ;;  %v5598_v49 = vmul.f32 %v10947_v15, %v13268_v23  ;;  %v3056_v15 = vrot.slane %v3054_v19, 4  ;;  %v3064_v11 = vrot.slane %v3062_v38, 4 }
 0x745   : > { %v10951_v24 = vpop.eup %10950  ;;  %10970 = vpow2.f32 %v10340_v41  ;;  %v5596_v12 = vmul.f32 %v10949_v42, %v13273_v4  ;;  %v3053_v41 = vrot.slane %v3051_v47, 3  ;;  %v2703_v4 = vmul.f32 %v10941_v56, %v13246_v32 }
 0x746   : > { %v10953_v34 = vpop.eup %10952  ;;  %10972 = vrsqrt.f32 %v2417_v20  ;;  %v5599_v13 = vmul.f32 %v10951_v24, %v13279_v21  ;;  %v3061_v20 = vrot.slane %v3059_v45, 3  ;;  %v2762_v8 = vrot.slane %v2725_v18, 4 }
 0x747   : > { %v13335_v9 = vpop.xlane.xlu0 %2345  ;;  %v10955_v6 = vpop.eup %10954  ;;  %10974 = vpow2.f32 %v10341_v31  ;;  %v5497_v21 = vadd.f32 1.0, %v10953_v34  ;;  %v18961_v31 = vmov 0.0   ;;  %v13396_v56 = vor.u32 %v3056_v15, %v3053_v41 }
 0x748   : > { %5266 = vadd.xlane.f32.xlu0 %v5265_v33  ;;  %v10957_v0 = vpop.eup %10956  ;;  %v5597_v39 = vmul.f32 %v10955_v6, %v13283_v60  ;;  %v5625_v29 = vpack.c.bf16 %v5599_v13, %v5598_v49  ;;  %v10189_v47 = vsel %vm13381_vm7, 1.0, %v18961_v31  ;;  %v2765_v32 = vsel %vm2752_vm4, %v2762_v8, %v13372_v52 }
 0x749   : > { %v10959_v23 = vpop.eup %10958  ;;  %18962 = vst [vmem:[#allocation41_spill] sm:$0xff] %v13396_v56  ;;  %v13398_v34 = vor.u32 %v3064_v11, %v3061_v20  ;;  %v18963_v13 = vmov 1.0  }
 0x74a   : > { %v10961_v50 = vpop.eup %10960  ;;  %v5624_v45 = vpack.c.bf16 %v5597_v39, %v5596_v12  ;;  %v5499_v60 = vadd.f32 1.0, %v10959_v23  ;;  %v13400_v6 = vrot.slane %v5625_v29, 4  ;;  %v812_v43 = vpack.c.bf16 %v18963_v13, %v10189_v47 }
 0x74b   : > { %v13342_v37 = vpop.xlane.xlu0 %5239  ;;  %v10963_v42 = vpop.eup %10962  ;;  %v5498_v18 = vadd.f32 1.0, %v10961_v50  ;;  %v13405_v23 = vmul.f32 %v10957_v0, %v13254_v27  ;;  %v305_v50 = vadd.s32 40, %v13310_v26  ;;  %v13421_v0 = vsel %vm3049_vm8, %v13396_v56, %v13398_v34 }
 0x74c   : > { %v10965_v19 = vpop.eup %10964  ;;  %v13410_v15 = vrot.slane %v5624_v45, 4  ;;  %18965 = vst [vmem:[#allocation49_spill] sm:$0xff] %v13421_v0 }
 0x74d   : > { %v13350_v33 = vpop.xlane.xlu1 %2327  ;;  %v10967_v49 = vpop.eup %10966  ;;  %v5589_v27 = vmul.f32 %v10965_v19, %v13295_v25 }
 0x74e   : > { %v10969_v12 = vpop.eup %10968 }
 0x74f   : > { %v13358_v14 = vpop.xlane.xlu0 %2351  ;;  %v10971_v41 = vpop.eup %10970 }
 0x750   : > { %18957 = vst [vmem:[#allocation42_spill] sm:$0xff] %v13358_v14  ;;  %v5496_v14 = vadd.f32 1.0, %v10945_v55  ;;  %v10973_v39 = vpop.eup %10972  ;;  %v5504_v25 = vadd.f32 1.0, %v10971_v41 }
 0x751   : > { %v13363_v51 = vpop.xlane.xlu1 %5224  ;;  %v10975_v29 = vpop.eup %10974 }
 0x752   : > { %5263 = vadd.xlane.f32.xlu1 %v5262_v36  ;;  %v13379_v36 = vld [vmem:[#allocation2] sm:$0xf0]  ;;  %10976 = vrcp.f32 %v5496_v14 }
 0x753   : > { %v13369_v58 = vpop.xlane.xlu0 %5245  ;;  %v3309_v24 = vshll.u32 %v13379_v36, 16  ;;  %10978 = vrcp.f32 %v5497_v21  ;;  %v2871_v21 = vshrl.u32 %v812_v43, 16 }
 0x754   : > { %18958 = vst [vmem:[#allocation36_spill] sm:$0xff] %v13369_v58  ;;  %v2727_v58 = vpack.c.bf16 %v2703_v4, %v2702_v2  ;;  %v3307_v2 = vshrl.u32 %v13379_v36, 16  ;;  %10980 = vrcp.f32 %v5499_v60  ;;  %v2874_v60 = vshll.u32 %v812_v43, 16 }
 0x755   : > { %v13375_v62 = vpop.xlane.xlu1 %2336  ;;  %v3311_v14 = vrot.slane %v3309_v24, 1  ;;  %10982 = vrcp.f32 %v5498_v18  ;;  %v18967_v18 = vld [vmem:[#allocation63_spill] sm:$0xff]  ;;  %v2763_v43 = vsel %vm2752_vm4, %v13234_v61, %v2762_v8  ;;  %v2873_v41 = vrot.slane %v2871_v21, 4 }
 0x756   : > { %v13414_v11 = vrot.slane %v2727_v58, 4  ;;  %v5662_v58 = vsel %vm2752_vm4, %v13410_v15, %v13400_v6  ;;  %v2876_v8 = vrot.slane %v2874_v60, 5  ;;  %10984 = vrcp.f32 %v5504_v25 }
 0x757   : > { %v2785_v55 = vpop.permute.xlu0 %2784  ;;  %v3312_v47 = vor.u32 %v3311_v14, %v3307_v2  ;;  %v5505_v2 = vadd.f32 1.0, %v10975_v29 }
 0x758   : > { %2835 = vst.msk [vmem:[#allocation2 + $0x8] sm:$0xf0] %vm289_vm2, %v2785_v55  ;;  %v13408_v55 = vmul.f32 %v10963_v42, %v13291_v5  ;;  %v5591_v5 = vmul.f32 %v10967_v49, %v13301_v3  ;;  %v18966_v42 = vld [vmem:[#allocation54_spill] sm:$0xff]  ;;  %v3210_v3 = vmul.bf16 %v13396_v56, %v13379_v36  ;;  %v2767_v36 = vsel %vm2752_vm4, %v13372_v52, %v13414_v11 }
 0x759   : > { %v13392_v38 = vpop.xlane.xlu1 %5230  ;;  %v13431_v24 = vmul.f32 %v10969_v12, %v18966_v42  ;;  %v5282_v42 = vmul.f32 0.0625, %v13236_v7  ;;  %10986 = vrcp.f32 %v5505_v2 }
 0x75a   : > { %v3493_v52 = vrot.slane %v3210_v3, 1 }
 0x75b   : > { %v5314_v21 = vadd.f32 1e-05, %v5282_v42 }
 0x75c   : > { %v10977_v14 = vpop.eup %10976 }
 0x75d   : > { %v13412_v20 = vpop.xlane.xlu1 %2342  ;;  %v5592_v7 = vmul.f32 %v10977_v14, %v13314_v28 }
 0x75e   : > { %18964 = vst [vmem:[#allocation37_spill] sm:$0xff] %v13412_v20  ;;  %2796 = vrot.lane.b32.xlu0 %v2765_v32, %s11578_s7  ;;  %v371_v32 = vand.u32 15, %v305_v50  ;;  %v13441_v20 = vmul.f32 %v10973_v39, %v18967_v18  ;;  %v5620_v50 = vpack.c.bf16 %v5589_v27, %v13405_v23  ;;  %v5621_v39 = vpack.c.bf16 %v5591_v5, %v13408_v55 }
 0x75f   : > { %v13428_v4 = vld [vmem:[#allocation2 + $0x8] sm:$0xff]  ;;  %v302_v55 = vadd.s32 16, %v13310_v26 }
 0x760   : > { %v3314_v45 = vshll.u32 %v13428_v4, 16  ;;  %v3211_v19 = vmul.bf16 %v13421_v0, %v13428_v4  ;;  %vm833_vm10 = vcmp.ne.s32.totalorder %v371_v32, 15  ;;  %v10288_v23 = vmul.f32 -1.442695, %v13441_v20 }
 0x761   : > { %v13438_v49 = vpop.xlane.xlu1 %5236  ;;  %v10207_v25 = vsel %vm833_vm10, 1.0, %v18961_v31  ;;  %v5652_v32 = vrot.slane %v5620_v50, 4 }
 0x762   : > { %5693 = vrot.lane.b32.xlu0 %v5662_v58, %s11579_s8  ;;  %v13444_v12 = vrot.slane %v3314_v45, 1  ;;  %v10287_v58 = vmul.f32 -1.442695, %v13431_v24  ;;  %v10979_v45 = vpop.eup %10978  ;;  %v13458_v29 = vrot.slane %v3211_v19, 1  ;;  %v3227_v19 = vld [vmem:[#allocation2 + $0x8] sm:$0xf8] }
 0x763   : > { %2794 = vrot.lane.b32.xlu1 %v2763_v43, %s11578_s7  ;;  %v10981_v27 = vpop.eup %10980  ;;  %v5593_v60 = vmul.f32 %v10979_v45, %v13323_v48  ;;  %v5653_v43 = vrot.slane %v5621_v39, 4  ;;  %v350_v48 = vand.u32 15, %v302_v55 }
 0x764   : > { %v3317_v61 = vsel %vm3305_vm9, %v3312_v47, %v13444_v12  ;;  %10988 = vpow2.f32 %v10287_v58  ;;  %v10983_v5 = vpop.eup %10982  ;;  %v13467_v47 = vor.u32 %v2876_v8, %v2873_v41  ;;  %v3495_v3 = vsel %vm3492_vm11, %v3493_v52, %v13458_v29 }
 0x765   : > { %v13460_v18 = vpop.xlane.xlu1 %2348  ;;  %10990 = vpow2.f32 %v10288_v23  ;;  %v5622_v2 = vpack.c.bf16 %v5593_v60, %v5592_v7  ;;  %v5595_v14 = vmul.f32 %v10981_v27, %v13329_v44  ;;  %v926_v41 = vpack.c.bf16 %v10207_v25, %v18963_v13  ;;  %v10985_v42 = vpop.eup %10984 }
 0x766   : > { %3441 = vrot.lane.b32.xlu0 %v3317_v61, %s11583_s9  ;;  %18968 = vst [vmem:[#allocation45_spill] sm:$0xff] %v13467_v47  ;;  %10992 = vrsqrt.f32 %v5314_v21  ;;  %v3230_v58 = vmul.bf16 %v3227_v19, %v13467_v47  ;;  %v5594_v50 = vmul.f32 %v10983_v5, %v13333_v46  ;;  %vm718_vm12 = vcmp.ne.s32.totalorder %v350_v48, 0  ;;  %v10987_v23 = vpop.eup %10986  ;;  %v13495_v48 = vld [vmem:[#allocation2 + $0x8] sm:$0xf0] }
 0x767   : > { %2798 = vrot.lane.b32.xlu1 %v2767_v36, %s11578_s7  ;;  %v5283_v36 = vmul.f32 0.0625, %v13316_v35  ;;  %v5654_v35 = vsel %vm2752_vm4, %v5652_v32, %v5653_v43  ;;  %v5655_v44 = vrot.slane %v5622_v2, 4  ;;  %v3068_v45 = vshrl.u32 %v926_v41, 16 }
 0x768   : > { %v5623_v8 = vpack.c.bf16 %v5595_v14, %v5594_v50  ;;  %v3071_v52 = vshll.u32 %v926_v41, 16  ;;  %v5600_v46 = vmul.f32 %v10985_v42, %v13346_v53  ;;  %v10190_v27 = vsel %vm718_vm12, 1.0, %v18961_v31 }
 0x769   : > { %v13473_v28 = vpop.xlane.xlu1 %5242  ;;  %v5315_v61 = vadd.f32 1e-05, %v5283_v36  ;;  %v5656_v5 = vsel %vm2752_vm4, %v5653_v43, %v5655_v44  ;;  %v5601_v25 = vmul.f32 %v10987_v23, %v13354_v16  ;;  %v3614_v50 = vshll.u32 %v13495_v48, 16 }
 0x76a   : > { %3526 = vrot.lane.b32.xlu0 %v3495_v3, %s11584_s10  ;;  %v5657_v21 = vrot.slane %v5623_v8, 4  ;;  %v3070_v3 = vrot.slane %v3068_v45, 3  ;;  %v3073_v19 = vrot.slane %v3071_v52, 4  ;;  %v304_v42 = vadd.s32 32, %v13310_v26 }
 0x76b   : > { %5683 = vrot.lane.b32.xlu1 %v5652_v32, %s11579_s8  ;;  %10994 = vrsqrt.f32 %v5315_v61  ;;  %v813_v32 = vpack.c.bf16 %v18963_v13, %v10190_v27  ;;  %v5626_v14 = vpack.c.bf16 %v5601_v25, %v5600_v46  ;;  %v5285_v52 = vmul.f32 0.0625, %v13363_v51 }
 0x76c   : > { %v5658_v43 = vsel %vm2752_vm4, %v5655_v44, %v5657_v21  ;;  %v13501_v16 = vor.u32 %v3073_v19, %v3070_v3  ;;  %v3612_v3 = vshrl.u32 %v13495_v48, 16 }
 0x76d   : > { %v13482_v39 = vpop.xlane.xlu1 %2354  ;;  %v13505_v8 = vrot.slane %v5626_v14, 4 }
 0x76e   : > { %3577 = vrot.lane.b32.xlu0 %v3230_v58, %s11585_s11  ;;  %v10989_v7 = vpop.eup %10988  ;;  %v5284_v58 = vmul.f32 0.0625, %v13287_v1  ;;  %v5660_v1 = vsel %vm2752_vm4, %v5657_v21, %v13410_v15  ;;  %v13518_v23 = vsel %vm3049_vm8, %v13398_v34, %v13501_v16  ;;  %v3318_v21 = vshrl.u32 %v13428_v4, 16 }
 0x76f   : > { %5685 = vrot.lane.b32.xlu1 %v5654_v35, %s11579_s8  ;;  %v10991_v60 = vpop.eup %10990  ;;  %v2608_v36 = vadd.f32 1.0, %v10989_v7  ;;  %v2879_v35 = vshrl.u32 %v813_v32, 16  ;;  %18969 = vst [vmem:[#allocation47_spill] sm:$0xff] %v13518_v23  ;;  %v2882_v7 = vshll.u32 %v813_v32, 16  ;;  %v5664_v15 = vsel %vm2752_vm4, %v13400_v6, %v13505_v8 }
 0x770   : > { %v10993_v53 = vpop.eup %10992  ;;  %v2609_v41 = vadd.f32 1.0, %v10991_v60  ;;  %v5316_v44 = vadd.f32 1e-05, %v5284_v58  ;;  %v2387_v60 = vmul.f32 0.0625, %v13276_v40  ;;  %v5317_v32 = vadd.f32 1e-05, %v5285_v52 }
 0x771   : > { %v13487_v55 = vpop.xlane.xlu1 %5248  ;;  %10996 = vrcp.f32 %v2608_v36  ;;  %v13508_v45 = vmul.f32 %v10993_v53, %v12856_v10  ;;  %v3616_v10 = vrot.slane %v3614_v50, 1  ;;  %v2881_v27 = vrot.slane %v2879_v35, 4 }
 0x772   : > { %10998 = vrcp.f32 %v2609_v41  ;;  %v2884_v6 = vrot.slane %v2882_v7, 5  ;;  %v3320_v4 = vor.u32 %v3318_v21, %v13444_v12  ;;  %v3249_v53 = vmul.bf16 %v13495_v48, %v13396_v56 }
 0x773   : > { %5687 = vrot.lane.b32.xlu1 %v5656_v5, %s11579_s8  ;;  %v364_v5 = vand.u32 15, %v304_v42  ;;  %v10342_v25 = vmul.f32 -1.442695, %v13508_v45  ;;  %11000 = vrsqrt.f32 %v5316_v44  ;;  %v3617_v14 = vor.u32 %v3616_v10, %v3612_v3 }
 0x774   : > { %v13556_v48 = vor.u32 %v2884_v6, %v2881_v27  ;;  %v307_v44 = vadd.s32 56, %v13310_v26  ;;  %v3686_v7 = vrot.slane %v3249_v53, 1 }
 0x775   : > { %v2787_v2 = vpop.permute.xlu1 %2786  ;;  %v10995_v46 = vpop.eup %10994  ;;  %vm13543_vm14 = vcmp.ne.s32.totalorder %v364_v5, 0  ;;  %11002 = vpow2.f32 %v10342_v25 }
 0x776   : > { %2836 = vst.msk [vmem:[#allocation2 + $0x10] sm:$0xff] %vm285_vm1, %v2787_v2  ;;  %v13536_v36 = vmul.f32 %v10995_v46, %v12864_v59  ;;  %11004 = vrsqrt.f32 %v5317_v32  ;;  %v385_v6 = vand.u32 15, %v307_v44 }
 0x777   : > { %5689 = vrot.lane.b32.xlu1 %v5658_v43, %s11579_s8  ;;  %v2419_v43 = vadd.f32 1e-05, %v2387_v60  ;;  %v306_v60 = vadd.s32 48, %v13310_v26 }
 0x778   : > { %v10343_v10 = vmul.f32 -1.442695, %v13536_v36  ;;  %vm13601_vm15 = vcmp.ne.s32.totalorder %v385_v6, 15 }
 0x779   : > { %v2789_v61 = vpop.permute.xlu1 %2788  ;;  %11006 = vrsqrt.f32 %v2419_v43  ;;  %v378_v58 = vand.u32 15, %v306_v60 }
 0x77a   : > { %2837 = vst.msk [vmem:[#allocation2 + $0x18] sm:$0xff] %vm285_vm1, %v2789_v61  ;;  %v2388_v61 = vmul.f32 0.0625, %v13298_v22  ;;  %v10191_v22 = vsel %vm13543_vm14, 1.0, %v18961_v31  ;;  %11008 = vpow2.f32 %v10343_v10 }
 0x77b   : > { %5691 = vrot.lane.b32.xlu1 %v5660_v1, %s11579_s8  ;;  %v10997_v50 = vpop.eup %10996  ;;  %vm13608_vm5 = vcmp.ne.s32.totalorder %v378_v58, 0 }
 0x77c   : > { %v10999_v52 = vpop.eup %10998  ;;  %v2704_v5 = vmul.f32 %v10997_v50, %v13431_v24  ;;  %v13579_v24 = vsel %vm2869_vm13, %v13467_v47, %v13556_v48 }
 0x77d   : > { %v13524_v51 = vld [vmem:[#allocation2 + $0x10] sm:$0xff]  ;;  %18973 = vst [vmem:[#allocation55_spill] sm:$0xff] %v13579_v24  ;;  %v2705_v3 = vmul.f32 %v10999_v52, %v13441_v20 }
 0x77e   : > { %v3322_v34 = vshll.u32 %v13524_v51, 16  ;;  %v3212_v19 = vmul.bf16 %v13518_v23, %v13524_v51  ;;  %v3250_v40 = vmul.bf16 %v13421_v0, %v13524_v51  ;;  %v13541_v41 = vld [vmem:[#allocation2 + $0x10] sm:$0xf0]  ;;  %v3326_v50 = vshrl.u32 %v13524_v51, 16 }
 0x77f   : > { %5695 = vrot.lane.b32.xlu1 %v5664_v15, %s11579_s8  ;;  %v3807_v46 = vshll.u32 %v13541_v41, 16  ;;  %v3266_v21 = vld [vmem:[#allocation2 + $0x10] sm:$0xf8]  ;;  %v2728_v43 = vpack.c.bf16 %v2705_v3, %v2704_v5  ;;  %v5286_v5 = vmul.f32 0.0625, %v13308_v54 }
 0x780   : > { %v3324_v2 = vrot.slane %v3322_v34, 1  ;;  %v13549_v42 = vrot.slane %v3212_v19, 1  ;;  %v13551_v12 = vrot.slane %v3250_v40, 1  ;;  %v2420_v34 = vadd.f32 1e-05, %v2388_v61 }
 0x781   : > { %v13558_v1 = vld [vmem:[#allocation2 + $0x18] sm:$0xff]  ;;  %v2386_v19 = vmul.f32 0.0625, %v13350_v33  ;;  %v3809_v32 = vrot.slane %v3807_v46, 1  ;;  %v3269_v53 = vmul.bf16 %v3266_v21, %v13467_v47  ;;  %v2389_v61 = vmul.f32 0.0625, %v13375_v62 }
 0x782   : > { %v3325_v35 = vsel %vm3305_vm9, %v3320_v4, %v3324_v2  ;;  %v3618_v59 = vsel %vm3305_vm9, %v3617_v14, %v3324_v2  ;;  %18972 = vst [vmem:[#allocation48_spill] sm:$0xff] %v13558_v1  ;;  %v3497_v27 = vsel %vm3492_vm11, %v13458_v29, %v13549_v42  ;;  %v3688_v15 = vsel %vm3492_vm11, %v3686_v7, %v13551_v12  ;;  %v11001_v4 = vpop.eup %11000 }
 0x783   : > { %3443 = vrot.lane.b32.xlu1 %v3325_v35, %s11583_s9  ;;  %3635 = vrot.lane.b32.xlu0 %v3618_v59, %s11586_s12  ;;  %v3330_v25 = vshll.u32 %v13558_v1, 16  ;;  %v814_v29 = vpack.c.bf16 %v18963_v13, %v10191_v22  ;;  %v3231_v14 = vmul.bf16 %v13579_v24, %v13524_v51  ;;  %v3805_v35 = vshrl.u32 %v13541_v41, 16  ;;  %v11003_v59 = vpop.eup %11002 }
 0x784   : > { %v3251_v33 = vmul.bf16 %v13518_v23, %v13558_v1  ;;  %11010 = vrsqrt.f32 %v2420_v34  ;;  %v2418_v7 = vadd.f32 1e-05, %v2386_v19  ;;  %v3328_v51 = vor.u32 %v3326_v50, %v3324_v2  ;;  %v11005_v10 = vpop.eup %11004 }
 0x785   : > { %v13590_v20 = vrot.slane %v3330_v25, 1  ;;  %v2888_v44 = vshrl.u32 %v814_v29, 16  ;;  %v2891_v52 = vshll.u32 %v814_v29, 16  ;;  %v3810_v22 = vor.u32 %v3809_v32, %v3805_v35  ;;  %v11007_v29 = vpop.eup %11006 }
 0x786   : > { %v13606_v62 = vmul.f32 %v11001_v4, %v12872_v63  ;;  %v13616_v21 = vrot.slane %v3251_v33, 1  ;;  %v13618_v54 = vrot.slane %v2728_v43, 4  ;;  %v2390_v25 = vmul.f32 0.0625, %v13318_v17 }
 0x787   : > { %3528 = vrot.lane.b32.xlu1 %v3497_v27, %s11584_s10  ;;  %3719 = vrot.lane.b32.xlu0 %v3688_v15, %s11579_s8  ;;  %v3333_v15 = vsel %vm3305_vm9, %v3328_v51, %v13590_v20  ;;  %v3811_v2 = vsel %vm3305_vm9, %v3810_v22, %v13590_v20  ;;  %v2421_v34 = vadd.f32 1e-05, %v2389_v61  ;;  %v2890_v63 = vrot.slane %v2888_v44, 4 }
 0x788   : > { %v13584_v40 = vpop.xlane.xlu0 %2357  ;;  %v2893_v3 = vrot.slane %v2891_v52, 5  ;;  %11012 = vrsqrt.f32 %v2418_v7  ;;  %v10208_v32 = vsel %vm13601_vm15, 1.0, %v18961_v31  ;;  %v5506_v6 = vadd.f32 1.0, %v11003_v59  ;;  %v18978_v59 = vld [vmem:[#allocation61_spill] sm:$0xff]  ;;  %v10580_v52 = vld [vmem:[%s18596_s2] sm:$0xff]  }
 0x789   : > { %v13629_v4 = vmul.f32 %v11005_v10, %v12880_v57  ;;  %v5318_v17 = vadd.f32 1e-05, %v5286_v5  ;;  %v5288_v43 = vmul.f32 0.0625, %v13326_v30  ;;  %v3690_v58 = vsel %vm3492_vm11, %v13551_v12, %v13616_v21  ;;  %4596 = vmatpush1.bf16.msra.mxu0 %v10580_v52  ;;  %10547 = vmatpush1.bf16.msra.mxu1 %v10580_v52 }
 0x78a   : > { %v2769_v50 = vsel %vm2752_vm4, %v13414_v11, %v13618_v54  ;;  %v10344_v35 = vmul.f32 -1.442695, %v13606_v62  ;;  %v2422_v57 = vadd.f32 1e-05, %v2390_v25  ;;  %11014 = vrsqrt.f32 %v2421_v34 }
 0x78b   : > { %3579 = vrot.lane.b32.xlu1 %v3231_v14, %s11585_s11  ;;  %3770 = vrot.lane.b32.xlu0 %v3269_v53, %s11578_s7  ;;  %v10192_v14 = vsel %vm13608_vm5, 1.0, %v18961_v31  ;;  %v11009_v53 = vpop.eup %11008  ;;  %v927_v33 = vpack.c.bf16 %v10208_v32, %v18963_v13  ;;  %v13646_v30 = vmul.f32 %v11007_v29, %v18978_v59  ;;  %v13650_v12 = vor.u32 %v2893_v3, %v2890_v63  ;;  %v18981_v3 = vld [vmem:[#allocation58_spill] sm:$0xff] }
 0x78c   : > { %v13598_v46 = vpop.xlane.xlu0 %5251  ;;  %11016 = vrcp.f32 %v5506_v6  ;;  %v10345_v11 = vmul.f32 -1.442695, %v13629_v4  ;;  %v309_v44 = vadd.s32 72, %v13310_v26  ;;  %v2392_v51 = vmul.f32 0.0625, %v13335_v9 }
 0x78d   : > { %11018 = vrsqrt.f32 %v5318_v17  ;;  %v3270_v22 = vmul.bf16 %v13579_v24, %v13558_v1  ;;  %v5507_v10 = vadd.f32 1.0, %v11009_v53  ;;  %v5320_v5 = vadd.f32 1e-05, %v5288_v43  ;;  %v10582_v43 = vld [vmem:[%s18596_s2 + $0x10] sm:$0xff]  }
 0x78e   : > { %v11011_v7 = vpop.eup %11010  ;;  %11020 = vpow2.f32 %v10344_v35  ;;  %v815_v60 = vpack.c.bf16 %v18963_v13, %v10192_v14  ;;  %v3077_v27 = vshrl.u32 %v927_v33, 16  ;;  %v10290_v25 = vmul.f32 -1.442695, %v13646_v30 }
 0x78f   : > { %3637 = vrot.lane.b32.xlu1 %v3333_v15, %s11586_s12  ;;  %3828 = vrot.lane.b32.xlu0 %v3811_v2, %s11587_s13  ;;  %11022 = vrsqrt.f32 %v2422_v57  ;;  %v3080_v2 = vshll.u32 %v927_v33, 16  ;;  %v13669_v34 = vsel %vm2869_vm13, %v13556_v48, %v13650_v12  ;;  %v399_v63 = vand.u32 15, %v309_v44  ;;  %v18986_v44 = vld [vmem:[#allocation52_spill] sm:$0xff] }
 0x790   : > { %v13623_v19 = vpop.xlane.xlu0 %5254  ;;  %18980 = vst [vmem:[#allocation53_spill] sm:$0xff] %v13669_v34  ;;  %11024 = vpow2.f32 %v10345_v11  ;;  %v13672_v29 = vmul.f32 %v11011_v7, %v18981_v3  ;;  %v18982_v32 = vmov 0   ;;  %v2424_v6 = vadd.f32 1e-05, %v2392_v51 }
 0x791   : > { %4597 = vmatprep.subr.bf16.mxu0 %v18982_v32  ;;  %10539 = vmatprep.subr.bf16.mxu1 %v18982_v32  ;;  %v3232_v17 = vmul.bf16 %v13669_v34, %v13558_v1  ;;  %11026 = vrcp.f32 %v5507_v10  ;;  %v2897_v14 = vshrl.u32 %v815_v60, 16  ;;  %v2900_v53 = vshll.u32 %v815_v60, 16 }
 0x792   : > { %v11013_v48 = vpop.eup %11012  ;;  %11028 = vrsqrt.f32 %v5320_v5  ;;  %v3082_v35 = vrot.slane %v3080_v2, 4  ;;  %v5287_v57 = vmul.f32 0.0625, %v13392_v38  ;;  %vm13690_vm6 = vcmp.ne.s32.totalorder %v399_v63, 15  ;;  %v10583_v5 = vld [vmem:[%s18596_s2 + $0x18] sm:$0xff]  }
 0x793   : > { %3721 = vrot.lane.b32.xlu1 %v3690_v58, %s11579_s8  ;;  %2800 = vrot.lane.b32.xlu0 %v2769_v50, %s11578_s7  ;;  %v5290_v58 = vmul.f32 0.0625, %v13342_v37  ;;  %v3079_v50 = vrot.slane %v3077_v27, 3  ;;  %11030 = vpow2.f32 %v10290_v25  ;;  %v10291_v11 = vmul.f32 -1.442695, %v13672_v29 }
 0x794   : > { %v13648_v61 = vpop.xlane.xlu0 %2363  ;;  %v11015_v37 = vpop.eup %11014  ;;  %11032 = vrsqrt.f32 %v2424_v6  ;;  %v13697_v52 = vmul.f32 %v11013_v48, %v18986_v44  ;;  %v308_v7 = vadd.s32 64, %v13310_v26  ;;  %v2902_v38 = vrot.slane %v2900_v53, 5  ;;  %v18988_v6 = vld [vmem:[#allocation67_spill] sm:$0xff] }
 0x795   : > { %v311_v10 = vadd.s32 88, %v13310_v26  ;;  %v5322_v27 = vadd.f32 1e-05, %v5290_v58  ;;  %v13704_v2 = vor.u32 %v3082_v35, %v3079_v50  ;;  %v10209_v25 = vsel %vm13690_vm6, 1.0, %v18961_v31 }
 0x796   : > { %v11017_v51 = vpop.eup %11016  ;;  %v5319_v3 = vadd.f32 1e-05, %v5287_v57  ;;  %11034 = vpow2.f32 %v10291_v11  ;;  %v310_v48 = vadd.s32 80, %v13310_v26  ;;  %v10289_v53 = vmul.f32 -1.442695, %v13697_v52  ;;  %v10584_v57 = vld [vmem:[%s18596_s2 + $0x20] sm:$0xff]  }
 0x797   : > { %3772 = vrot.lane.b32.xlu1 %v3270_v22, %s11578_s7  ;;  %3445 = vrot.lane.b32.xlu0 %v3333_v15, %s11583_s9  ;;  %v10581_v15 = vld [vmem:[%s18596_s2 + $0x8] sm:$0xff]   ;;  %v2899_v22 = vrot.slane %v2897_v14, 4  ;;  %v11019_v60 = vpop.eup %11018  ;;  %v928_v50 = vpack.c.bf16 %v10209_v25, %v18963_v13  ;;  %v413_v59 = vand.u32 15, %v311_v10  ;;  %11036 = vrsqrt.f32 %v5322_v27 }
 0x798   : > { %v13664_v9 = vpop.xlane.xlu0 %2366  ;;  %4598 = vmatpush1.bf16.msra.mxu0 %v10581_v15  ;;  %10548 = vmatpush1.bf16.msra.mxu1 %v10581_v15  ;;  %v11021_v63 = vpop.eup %11020  ;;  %v13727_v11 = vsel %vm3049_vm8, %v13501_v16, %v13704_v2  ;;  %11038 = vrsqrt.f32 %v5319_v3  ;;  %v13735_v10 = vmul.f32 %v11017_v51, %v13508_v45  ;;  %v406_v27 = vand.u32 15, %v310_v48  ;;  %v18996_v3 = vld [vmem:[#allocation42_spill] sm:$0xff]  ;;  %v10585_v48 = vld [vmem:[%s18596_s2 + $0x28] sm:$0xff]   ;;  %v19007_v51 = vld [vmem:[#allocation37_spill] sm:$0xff] }
 0x799   : > { %18979 = vst [vmem:[#allocation44_spill] sm:$0xff] %v13664_v9  ;;  %4599 = vmatprep.subr.bf16.mxu0 %v18982_v32  ;;  %10540 = vmatprep.subr.bf16.mxu1 %v18982_v32  ;;  %v11023_v14 = vpop.eup %11022  ;;  %v13719_v35 = vor.u32 %v2902_v38, %v2899_v22  ;;  %18989 = vst [vmem:[#allocation59_spill] sm:$0xff] %v13727_v11  ;;  %v5508_v44 = vadd.f32 1.0, %v11021_v63  ;;  %11040 = vpow2.f32 %v10289_v53  ;;  %v18994_v63 = vld [vmem:[#allocation56_spill] sm:$0xff]  ;;  %v3089_v45 = vshll.u32 %v928_v50, 16 }
 0x79a   : > { %v11025_v58 = vpop.eup %11024  ;;  %vm13747_vm10 = vcmp.ne.s32.totalorder %v413_v59, 15  ;;  %vm13769_vm12 = vcmp.ne.s32.totalorder %v406_v27, 0  ;;  %v2391_v27 = vmul.f32 0.0625, %v19007_v51  ;;  %v3213_v47 = vmul.bf16 %v13727_v11, %v13558_v1 }
 0x79b   : > { %3581 = vrot.lane.b32.xlu0 %v3232_v17, %s11585_s11  ;;  %v13714_v17 = vmul.f32 %v11015_v37, %v18988_v6  ;;  %v11027_v37 = vpop.eup %11026  ;;  %v5509_v16 = vadd.f32 1.0, %v11025_v58  ;;  %11042 = vrcp.f32 %v5508_v44  ;;  %v18999_v58 = vld [vmem:[#allocation74_spill] sm:$0xff] }
 0x79c   : > { %v13688_v33 = vpop.xlane.xlu0 %5257  ;;  %4600 = vmatpush1.bf16.msra.mxu0 %v10582_v43  ;;  %10549 = vmatpush1.bf16.msra.mxu1 %v10582_v43  ;;  %v392_v43 = vand.u32 15, %v308_v7  ;;  %v18990_v7 = vld [vmem:[#allocation72_spill] sm:$0xff]  ;;  %v11029_v22 = vpop.eup %11028 }
 0x79d   : > { %18983 = vst [vmem:[#allocation51_spill] sm:$0xff] %v13688_v33  ;;  %4601 = vmatprep.subr.bf16.mxu0 %v18982_v32  ;;  %10541 = vmatprep.subr.bf16.mxu1 %v18982_v32  ;;  %v13730_v6 = vmul.f32 %v11019_v60, %v18990_v7  ;;  %v11031_v25 = vpop.eup %11030  ;;  %v13744_v7 = vmul.f32 %v11023_v14, %v18994_v63  ;;  %v3086_v33 = vshrl.u32 %v928_v50, 16  ;;  %v19001_v50 = vld [vmem:[#allocation36_spill] sm:$0xff] }
 0x79e   : > { %vm13739_vm7 = vcmp.ne.s32.totalorder %v392_v43, 0  ;;  %v11033_v53 = vpop.eup %11032  ;;  %v5603_v43 = vmul.f32 %v11027_v37, %v13536_v36  ;;  %v5292_v59 = vmul.f32 0.0625, %v19001_v50  ;;  %v2611_v63 = vadd.f32 1.0, %v11031_v25  ;;  %v19005_v50 = vld [vmem:[#allocation62_spill] sm:$0xff] }
 0x79f   : > { %18991 = vst [vmem:[#allocation57_spill] sm:$0xff] %v13730_v6  ;;  %18995 = vst [vmem:[#allocation39_spill] sm:$0xff] %v13744_v7  ;;  %v10346_v14 = vmul.f32 -1.442695, %v13730_v6  ;;  %v10210_v36 = vsel %vm13747_vm10, 1.0, %v18961_v31  ;;  %v3091_v25 = vrot.slane %v3089_v45, 4  ;;  %v13776_v60 = vmul.f32 %v11033_v53, %v19005_v50 }
 0x7a0   : > { %v13711_v15 = vpop.xlane.xlu0 %5260  ;;  %4602 = vmatpush1.bf16.msra.mxu0 %v10583_v5  ;;  %10550 = vmatpush1.bf16.msra.mxu1 %v10583_v5  ;;  %v10292_v5 = vmul.f32 -1.442695, %v13714_v17  ;;  %v10293_v37 = vmul.f32 -1.442695, %v13744_v7  ;;  %v5627_v9 = vpack.c.bf16 %v5603_v43, %v13735_v10  ;;  %v5289_v45 = vmul.f32 0.0625, %v13438_v49 }
 0x7a1   : > { %18987 = vst [vmem:[#allocation46_spill] sm:$0xff] %v13711_v15  ;;  %4603 = vmatprep.subr.bf16.mxu0 %v18982_v32  ;;  %10542 = vmatprep.subr.bf16.mxu1 %v18982_v32  ;;  %v2394_v15 = vmul.f32 0.0625, %v18996_v3  ;;  %19006 = vst [vmem:[#allocation43_spill] sm:$0xff] %v13776_v60  ;;  %v3289_v10 = vmul.bf16 %v13421_v0, %v13558_v1  ;;  %v10194_v49 = vsel %vm13769_vm12, 1.0, %v18961_v31  ;;  %vm3997_vm10 = vcmask 392192  }
 0x7a2   : > { %11044 = vpow2.f32 %v10292_v5  ;;  %v3088_v5 = vrot.slane %v3086_v33, 3  ;;  %v5324_v33 = vadd.f32 1e-05, %v5292_v59  ;;  %v10295_v59 = vmul.f32 -1.442695, %v13776_v60 }
 0x7a3   : > { %11046 = vrcp.f32 %v5509_v16  ;;  %v2426_v3 = vadd.f32 1e-05, %v2394_v15  ;;  %v10586_v16 = vld [vmem:[%s18596_s2 + $0x30] sm:$0xff]   ;;  %v5321_v44 = vadd.f32 1e-05, %v5289_v45  ;;  %vm4032_vm12 = vcmask 523264  }
 0x7a4   : > { %v2793_v38 = vpop.permute.xlu0 %2792  ;;  %4604 = vmatpush1.bf16.msra.mxu0 %v10584_v57  ;;  %10551 = vmatpush1.bf16.msra.mxu1 %v10584_v57  ;;  %v10193_v57 = vsel %vm13739_vm7, 1.0, %v18961_v31  ;;  %11048 = vpow2.f32 %v10346_v14 }
 0x7a5   : > { %2839 = vst.msk [vmem:[#allocation2 + $0x28] sm:$0xff] %vm285_vm1, %v2793_v38  ;;  %v13757_v38 = vmul.f32 %v11029_v22, %v18999_v58  ;;  %4605 = vmatprep.subr.bf16.mxu0 %v18982_v32  ;;  %10543 = vmatprep.subr.bf16.mxu1 %v18982_v32  ;;  %v11035_v22 = vpop.eup %11034  ;;  %11050 = vrcp.f32 %v2611_v63  ;;  %v13788_v53 = vpack.c.bf16 %v18963_v13, %v10193_v57  ;;  %v13800_v57 = vrot.slane %v5627_v9, 4 }
 0x7a6   : > { %v11037_v50 = vpop.eup %11036  ;;  %v2612_v43 = vadd.f32 1.0, %v11035_v22  ;;  %11052 = vpow2.f32 %v10293_v37  ;;  %v3288_v37 = vmul.bf16 %v13541_v41, %v13396_v56  ;;  %v13807_v22 = vpack.c.bf16 %v10210_v36, %v18963_v13 }
 0x7a7   : > { %19000 = vst [vmem:[#allocation50_spill] sm:$0xff] %v13757_v38  ;;  %v10348_v15 = vmul.f32 -1.442695, %v13757_v38  ;;  %v11039_v14 = vpop.eup %11038  ;;  %11054 = vrsqrt.f32 %v2426_v3  ;;  %v19009_v3 = vld [vmem:[#allocation76_spill] sm:$0xff]  ;;  %v3880_v9 = vrot.slane %v3289_v10, 1  ;;  %v13821_v36 = vpack.c.bf16 %v18963_v13, %v10194_v49 }
 0x7a8   : > { %4606 = vmatpush1.bf16.msra.mxu0 %v10585_v48  ;;  %10552 = vmatpush1.bf16.msra.mxu1 %v10585_v48  ;;  %v2393_v48 = vmul.f32 0.0625, %v13460_v18  ;;  %v11041_v63 = vpop.eup %11040  ;;  %v2423_v18 = vadd.f32 1e-05, %v2391_v27  ;;  %v19011_v27 = vld [vmem:[#allocation73_spill] sm:$0xff] }
 0x7a9   : > { %4607 = vmatprep.subr.bf16.mxu0 %v18982_v32  ;;  %10544 = vmatprep.subr.bf16.mxu1 %v18982_v32  ;;  %11056 = vpow2.f32 %v10348_v15 }
 0x7aa   : > { %v13773_v58 = vpop.xlane.xlu1 %2360  ;;  %11058 = vrsqrt.f32 %v5324_v33  ;;  %v2610_v33 = vadd.f32 1.0, %v11041_v63 }
 0x7ab   : > { %19004 = vst [vmem:[#allocation38_spill] sm:$0xff] %v13773_v58  ;;  %v13793_v58 = vor.u32 %v3091_v25, %v3088_v5  ;;  %v13810_v5 = vmul.f32 %v11037_v50, %v19009_v3  ;;  %v11043_v25 = vpop.eup %11042  ;;  %11060 = vrcp.f32 %v2612_v43  ;;  %v5291_v50 = vmul.f32 0.0625, %v13473_v28  ;;  %v10587_v28 = vld [vmem:[%s18596_s2 + $0x38] sm:$0xff]  }
 0x7ac   : > { %4608 = vmatpush1.bf16.msra.mxu0 %v10586_v16  ;;  %10553 = vmatpush1.bf16.msra.mxu1 %v10586_v16  ;;  %v2425_v16 = vadd.f32 1e-05, %v2393_v48  ;;  %v11045_v41 = vpop.eup %11044  ;;  %11062 = vpow2.f32 %v10295_v59  ;;  %v13827_v48 = vsel %vm2752_vm4, %v13505_v8, %v13800_v57  ;;  %v13829_v10 = vld [vmem:[#allocation2 + $0x28] sm:$0xff]  ;;  %v3879_v43 = vrot.slane %v3288_v37, 1 }
 0x7ad   : > { %19008 = vst [vmem:[#allocation40_spill] sm:$0xff] %v13793_v58  ;;  %4609 = vmatprep.subr.bf16.mxu0 %v18982_v32  ;;  %10545 = vmatprep.subr.bf16.mxu1 %v18982_v32  ;;  %19010 = vst [vmem:[#allocation54_spill] sm:$0xff] %v13810_v5  ;;  %v13818_v15 = vsel %vm3049_vm8, %v13704_v2, %v13793_v58  ;;  %v11047_v45 = vpop.eup %11046  ;;  %11064 = vrsqrt.f32 %v2423_v18  ;;  %v13832_v2 = vmul.f32 %v11043_v25, %v13606_v62  ;;  %v10588_v25 = vld [vmem:[%s18596_s2 + $0x40] sm:$0xff]  }
 0x7ae   : > { %v2791_v51 = vpop.permute.xlu1 %2790  ;;  %19012 = vst [vmem:[#allocation63_spill] sm:$0xff] %v13818_v15  ;;  %19013 = vst [vmem:[#allocation61_spill] sm:$0xff] %v13829_v10  ;;  %11066 = vrsqrt.f32 %v5321_v44  ;;  %v13838_v49 = vmul.f32 -1.442695, %v13810_v5  ;;  %v13843_v59 = vpop.eup %11048  ;;  %v3881_v8 = vsel %vm3492_vm11, %v3879_v43, %v3880_v9  ;;  %v2613_v63 = vadd.f32 1.0, %v11045_v41 }
 0x7af   : > { %2838 = vst.msk [vmem:[#allocation2 + $0x20] sm:$0xff] %vm285_vm1, %v2791_v51  ;;  %v13813_v51 = vmul.f32 %v11039_v14, %v19011_v27  ;;  %v13835_v14 = vadd.s32 104, %v13310_v26  ;;  %11068 = vrsqrt.f32 %v2425_v16  ;;  %v13847_v62 = vpop.eup %11050  ;;  %v3334_v44 = vshrl.u32 %v13558_v1, 16 }
 0x7b0   : > { %v5605_v3 = vmul.f32 %v11047_v45, %v13629_v4  ;;  %11070 = vrcp.f32 %v2610_v33  ;;  %4610 = vmatpush1.bf16.msra.mxu0 %v10587_v28  ;;  %v3291_v16 = vmul.bf16 %v13727_v11, %v13829_v10  ;;  %10554 = vmatpush1.bf16.msra.mxu1 %v10587_v28  ;;  %v13858_v27 = vpop.eup %11052  ;;  %v5323_v41 = vadd.f32 1e-05, %v5291_v50 }
 0x7b1   : > { %v10347_v18 = vmul.f32 -1.442695, %v13813_v51  ;;  %4611 = vmatprep.subr.bf16.mxu0 %v18982_v32  ;;  %10546 = vmatprep.subr.bf16.mxu1 %v18982_v32  ;;  %v13867_v33 = vpop.eup %11054  ;;  %v3336_v45 = vor.u32 %v3334_v44, %v13590_v20  ;;  %v3346_v28 = vshll.u32 %v13829_v10, 16  ;;  %v4206_v56 = vshrl.u32 %v3881_v8, 16 }
 0x7b2   : > { %v4209_v50 = vshll.u32 %v3881_v8, 16  ;;  %v5628_v6 = vpack.c.bf16 %v5605_v3, %v13832_v2  ;;  %11072 = vrcp.f32 %v2613_v63  ;;  %v13881_v20 = vrot.slane %v3291_v16, 1 }
 0x7b3   : > { %v13871_v5 = vpop.eup %11056  ;;  %v4208_v63 = vrot.slane %v4206_v56, 3  ;;  %11074 = vpow2.f32 %v10347_v18 }
 0x7b4   : > { %v13876_v24 = vpop.eup %11058  ;;  %4612 = vmatpush1.bf16.msra.mxu0 %v10588_v25  ;;  %19015 = vst [vmem:[#allocation52_spill] sm:$0xff] %v13881_v20  ;;  %10555 = vmatpush1.bf16.msra.mxu1 %v10588_v25  ;;  %v4211_v3 = vrot.slane %v4209_v50, 4  ;;  %11076 = vpow2.f32 %v13838_v49 }
 0x7b5   : > { %v13883_v8 = vpop.eup %11060  ;;  %7165 = vmatprep.subr.bf16.mxu0 %v18982_v32  ;;  %9573 = vmatprep.subr.bf16.mxu1 %v18982_v32  ;;  %11078 = vrsqrt.f32 %v5323_v41 }
 0x7b6   : > { %v13849_v37 = vld [vmem:[#allocation2 + $0x20] sm:$0xff]  ;;  %v13893_v2 = vpop.eup %11062 }
 0x7b7   : > { %19014 = vst [vmem:[#allocation58_spill] sm:$0xff] %v13849_v37  ;;  %v3338_v43 = vshll.u32 %v13849_v37, 16  ;;  %v3252_v0 = vmul.bf16 %v13727_v11, %v13849_v37  ;;  %v3290_v4 = vmul.bf16 %v13518_v23, %v13849_v37  ;;  %v3342_v38 = vshrl.u32 %v13849_v37, 16 }
 0x7b8   : > { %v3214_v18 = vmul.bf16 %v13818_v15, %v13849_v37 }
 0x7b9   : > { %v3340_v60 = vrot.slane %v3338_v43, 1  ;;  %v13873_v7 = vrot.slane %v3252_v0, 1  ;;  %v3882_v23 = vrot.slane %v3290_v4, 1 }
 0x7bb   : > { %v13886_v0 = vsel %vm3305_vm9, %v3336_v45, %v3340_v60  ;;  %v3692_v44 = vsel %vm3492_vm11, %v13616_v21, %v13873_v7  ;;  %v3344_v43 = vor.u32 %v3342_v38, %v3340_v60  ;;  %v3883_v4 = vsel %vm3492_vm11, %v3880_v9, %v3882_v23  ;;  %v13898_v45 = vpop.eup %11064 }
 0x7bc   : > { %3830 = vrot.lane.b32.xlu1 %v13886_v0, %s11587_s13  ;;  %3723 = vrot.lane.b32.xlu0 %v3692_v44, %s11579_s8  ;;  %v4214_v25 = vshrl.u32 %v3883_v4, 16  ;;  %v4217_v16 = vshll.u32 %v3883_v4, 16  ;;  %v2395_v21 = vmul.f32 0.0625, %v13482_v39  ;;  %v13901_v38 = vrot.slane %v3346_v28, 1  ;;  %v11067_v9 = vpop.eup %11066 }
 0x7bd   : > { %v3885_v60 = vsel %vm3492_vm11, %v3882_v23, %v13881_v20  ;;  %v13906_v50 = vpop.eup %11068  ;;  %v3498_v39 = vrot.slane %v3213_v47, 1  ;;  %v13912_v28 = vrot.slane %v5628_v6, 4  ;;  %v19017_v20 = vld [vmem:[#allocation75_spill] sm:$0xff]  ;;  %v427_v47 = vand.u32 15, %v13835_v14 }
 0x7be   : > { %19016 = vst [vmem:[#allocation67_spill] sm:$0xff] %v13901_v38  ;;  %v4216_v11 = vrot.slane %v4214_v25, 3  ;;  %v4219_v1 = vrot.slane %v4217_v16, 4  ;;  %v4231_v44 = vshrl.u32 %v3885_v60, 16  ;;  %v4234_v56 = vshll.u32 %v3885_v60, 16  ;;  %v11071_v23 = vpop.eup %11070 }
 0x7bf   : > { %v13910_v4 = vsel %vm3305_vm9, %v3344_v43, %v13901_v38  ;;  %v4212_v25 = vor.u32 %v4211_v3, %v4208_v63  ;;  %v13921_v43 = vmul.f32 %v11067_v9, %v19017_v20  ;;  %v315_v6 = vadd.s32 120, %v13310_v26  ;;  %v11073_v41 = vpop.eup %11072 }
 0x7c0   : > { %5697 = vrot.lane.b32.xlu1 %v13827_v48, %s11579_s8  ;;  %3832 = vrot.lane.b32.xlu0 %v13910_v4, %s11587_s13  ;;  %v4220_v16 = vor.u32 %v4219_v1, %v4216_v11  ;;  %v4233_v60 = vrot.slane %v4231_v44, 3  ;;  %v4236_v32 = vrot.slane %v4234_v56, 4  ;;  %v5293_v38 = vmul.f32 0.0625, %v13487_v55  ;;  %v11075_v56 = vpop.eup %11074 }
 0x7c1   : > { %v3499_v1 = vsel %vm3492_vm11, %v13549_v42, %v3498_v39  ;;  %v5668_v11 = vsel %vm2752_vm4, %v13800_v57, %v13912_v28  ;;  %v13936_v14 = vrot.slane %v3214_v18, 1  ;;  %v2706_v49 = vmul.f32 %v11071_v23, %v13697_v52 }
 0x7c2   : > { %v4221_v48 = vsel %vm3049_vm8, %v4212_v25, %v4220_v16  ;;  %v13928_v58 = vor.u32 %v4236_v32, %v4233_v60  ;;  %v2427_v20 = vadd.f32 1e-05, %v2395_v21  ;;  %v2906_v55 = vshrl.u32 %v13788_v53, 16 }
 0x7c3   : > { %10312 = vmatprep.mubr.msk.bf16.mxu0 %vm285_vm1, %v4221_v48  ;;  %v2909_v32 = vshll.u32 %v13788_v53, 16  ;;  %v2707_v57 = vmul.f32 %v13847_v62, %v13646_v30  ;;  %v3095_v63 = vshrl.u32 %v13807_v22, 16  ;;  %v3098_v52 = vshll.u32 %v13807_v22, 16  ;;  %v11077_v48 = vpop.eup %11076 }
 0x7c4   : > { %19018 = vst [vmem:[#allocation72_spill] sm:$0xff] %v13928_v58  ;;  %3530 = vrot.lane.b32.xlu1 %v3499_v1, %s11584_s10  ;;  %5699 = vrot.lane.b32.xlu0 %v5668_v11, %s11579_s8  ;;  %v13945_v42 = vsel %vm3049_vm8, %v4220_v16, %v13928_v58  ;;  %v10349_v3 = vmul.f32 -1.442695, %v13921_v43  ;;  %v13955_v21 = vsel %vm2869_vm13, %v13650_v12, %v13719_v35  ;;  %vm13957_vm14 = vcmp.ne.s32.totalorder %v427_v47, 15  ;;  %v19023_v47 = vld [vmem:[#allocation66_spill] sm:$0xff] }
 0x7c5   : > { %19019 = vst [vmem:[#allocation56_spill] sm:$0xff] %v13945_v42  ;;  %19020 = vst [vmem:[#allocation42_spill] sm:$0xff] %v13955_v21  ;;  %v2915_v9 = vshrl.u32 %v13821_v36, 16  ;;  %v441_v44 = vand.u32 15, %v315_v6  ;;  %v5325_v30 = vadd.f32 1e-05, %v5293_v38  ;;  %v3501_v62 = vsel %vm3492_vm11, %v3498_v39, %v13936_v14 }
 0x7c6   : > { %v2729_v22 = vpack.c.bf16 %v2707_v57, %v2706_v49  ;;  %v2709_v18 = vmul.f32 %v11073_v41, %v13714_v17  ;;  %11080 = vrsqrt.f32 %v2427_v20  ;;  %v2908_v12 = vrot.slane %v2906_v55, 4  ;;  %v19024_v20 = vld [vmem:[#allocation69_spill] sm:$0xff]  ;;  %v19025_v57 = vld [vmem:[#allocation60_spill] sm:$0xff] }
 0x7c7   : > { %v2911_v23 = vrot.slane %v2909_v32, 5  ;;  %v5510_v25 = vadd.f32 1.0, %v13843_v59  ;;  %v2708_v16 = vmul.f32 %v13883_v8, %v13672_v29  ;;  %v3097_v38 = vrot.slane %v3095_v63, 3  ;;  %v11079_v8 = vpop.eup %11078 }
 0x7c8   : > { %3639 = vrot.lane.b32.xlu1 %v13886_v0, %s11586_s12  ;;  %3532 = vrot.lane.b32.xlu0 %v3501_v62, %s11584_s10  ;;  %v3100_v60 = vrot.slane %v3098_v52, 4  ;;  %11082 = vpow2.f32 %v10349_v3  ;;  %v3271_v39 = vmul.bf16 %v13669_v34, %v13849_v37  ;;  %v10211_v17 = vsel %vm13957_vm14, 1.0, %v18961_v31 }
 0x7c9   : > { %v13978_v6 = vmul.f32 %v13898_v45, %v19023_v47  ;;  %vm843_vm15 = vcmp.ne.s32.totalorder %v441_v44, 15  ;;  %11084 = vrsqrt.f32 %v5325_v30  ;;  %v2770_v59 = vrot.slane %v2729_v22, 4  ;;  %v19027_v30 = vld [vmem:[#allocation78_spill] sm:$0xff] }
 0x7ca   : > { %v2730_v1 = vpack.c.bf16 %v2709_v18, %v2708_v16  ;;  %v5511_v29 = vadd.f32 1.0, %v11075_v56  ;;  %v13983_v11 = vor.u32 %v2911_v23, %v2908_v12  ;;  %11086 = vrcp.f32 %v5510_v25 }
 0x7cb   : > { %v5512_v49 = vadd.f32 1.0, %v13871_v5  ;;  %v13986_v41 = vrot.slane %v2915_v9, 4  ;;  %v2614_v45 = vadd.f32 1.0, %v13858_v27  ;;  %v13991_v55 = vmul.f32 %v13906_v50, %v19024_v20  ;;  %v19026_v9 = vld [vmem:[#allocation77_spill] sm:$0xff] }
 0x7cc   : > { %3774 = vrot.lane.b32.xlu1 %v3271_v39, %s11578_s7  ;;  %3641 = vrot.lane.b32.xlu0 %v13910_v4, %s11586_s12  ;;  %v10212_v32 = vsel %vm843_vm15, 1.0, %v18961_v31  ;;  %v13996_v63 = vmul.f32 %v13867_v33, %v19025_v57  ;;  %v3272_v52 = vmul.bf16 %v13955_v21, %v13829_v10  ;;  %v930_v3 = vpack.c.bf16 %v10211_v17, %v18963_v13 }
 0x7cd   : > { %v10294_v5 = vmul.f32 -1.442695, %v13978_v6  ;;  %v2616_v53 = vadd.f32 1.0, %v13893_v2  ;;  %v2771_v27 = vsel %vm2752_vm4, %v13618_v54, %v2770_v59  ;;  %v14005_v50 = vrot.slane %v2730_v1, 4 }
 0x7ce   : > { %11088 = vrcp.f32 %v5511_v29  ;;  %v14008_v44 = vmul.f32 %v11079_v8, %v19026_v9  ;;  %v5514_v33 = vadd.f32 1.0, %v11077_v48  ;;  %v931_v56 = vpack.c.bf16 %v10212_v32, %v18963_v13 }
 0x7cf   : > { %11090 = vrcp.f32 %v5512_v49  ;;  %v14015_v2 = vmul.f32 %v13876_v24, %v19027_v30  ;;  %v2396_v54 = vmul.f32 0.0625, %v13584_v40  ;;  %v2918_v62 = vshll.u32 %v13821_v36, 16  ;;  %v19028_v49 = vld [vmem:[#allocation68_spill] sm:$0xff] }
 0x7d0   : > { %2802 = vrot.lane.b32.xlu1 %v2771_v27, %s11578_s7  ;;  %3776 = vrot.lane.b32.xlu0 %v3272_v52, %s11578_s7  ;;  %11092 = vrcp.f32 %v2614_v45  ;;  %v10296_v22 = vmul.f32 -1.442695, %v13991_v55  ;;  %v11081_v18 = vpop.eup %11080  ;;  %v14020_v12 = vor.u32 %v3100_v60, %v3097_v38  ;;  %v3104_v23 = vshrl.u32 %v930_v3, 16 }
 0x7d1   : > { %11094 = vrcp.f32 %v2616_v53  ;;  %v10297_v25 = vmul.f32 -1.442695, %v13996_v63  ;;  %v2773_v39 = vsel %vm2752_vm4, %v2770_v59, %v14005_v50  ;;  %v3107_v24 = vshll.u32 %v930_v3, 16  ;;  %v19030_v3 = vld [vmem:[#allocation79_spill] sm:$0xff] }
 0x7d2   : > { %v11083_v16 = vpop.eup %11082  ;;  %11096 = vpow2.f32 %v10294_v5  ;;  %v10351_v40 = vmul.f32 -1.442695, %v14008_v44  ;;  %v3113_v36 = vshrl.u32 %v931_v56, 16  ;;  %v3116_v38 = vshll.u32 %v931_v56, 16 }
 0x7d3   : > { %11098 = vrcp.f32 %v5514_v33  ;;  %v10352_v60 = vmul.f32 -1.442695, %v14015_v2  ;;  %v11085_v17 = vpop.eup %11084  ;;  %v2428_v47 = vadd.f32 1e-05, %v2396_v54  ;;  %v5294_v48 = vmul.f32 0.0625, %v13598_v46 }
 0x7d4   : > { %3447 = vrot.lane.b32.xlu1 %v13886_v0, %s11583_s9  ;;  %2804 = vrot.lane.b32.xlu0 %v2773_v39, %s11578_s7  ;;  %v3253_v59 = vmul.bf16 %v13818_v15, %v13829_v10  ;;  %11100 = vpow2.f32 %v10296_v22  ;;  %v11087_v29 = vpop.eup %11086  ;;  %v3233_v0 = vmul.bf16 %v13955_v21, %v13849_v37  ;;  %v5513_v8 = vadd.f32 1.0, %v11083_v16 }
 0x7d5   : > { %v14031_v1 = vpop.xlane.xlu0 %5266  ;;  %v14038_v45 = vmul.f32 %v11081_v18, %v19028_v49  ;;  %11102 = vpow2.f32 %v10297_v25  ;;  %v14043_v20 = vsel %vm2869_vm13, %v13719_v35, %v13983_v11  ;;  %v2920_v46 = vrot.slane %v2918_v62, 5 }
 0x7d6   : > { %19029 = vst [vmem:[#allocation74_spill] sm:$0xff] %v14043_v20  ;;  %11104 = vpow2.f32 %v10351_v40  ;;  %v312_v32 = vadd.s32 96, %v13310_v26  ;;  %v3106_v57 = vrot.slane %v3104_v23, 3  ;;  %v3109_v52 = vrot.slane %v3107_v24, 4 }
 0x7d7   : > { %v14050_v5 = vmul.f32 %v11085_v17, %v19030_v3  ;;  %11106 = vpow2.f32 %v10352_v60  ;;  %v5326_v27 = vadd.f32 1e-05, %v5294_v48  ;;  %v14052_v9 = vrot.slane %v3253_v59, 1  ;;  %v14071_v60 = vld [vmem:[#allocation2] sm:$0xf8]  ;;  %v19033_v17 = vld [vmem:[#allocation40_spill] sm:$0xff] }
 0x7d8   : > { %3583 = vrot.lane.b32.xlu1 %v3233_v0, %s11585_s11  ;;  %3449 = vrot.lane.b32.xlu0 %v13910_v4, %s11583_s9  ;;  %v11089_v53 = vpop.eup %11088  ;;  %11108 = vrsqrt.f32 %v2428_v47  ;;  %v3115_v33 = vrot.slane %v3113_v36, 3  ;;  %v3234_v30 = vmul.bf16 %v14043_v20, %v13829_v10  ;;  %v3118_v4 = vrot.slane %v3116_v38, 4  ;;  %19032 = vst [vmem:[#allocation62_spill] sm:$0xff] %v14071_v60  ;;  %v19035_v48 = vld [vmem:[#allocation57_spill] sm:$0xff] }
 0x7d9   : > { %v2797_v35 = vpop.permute.xlu0 %2796  ;;  %v11091_v56 = vpop.eup %11090  ;;  %11110 = vrcp.f32 %v5513_v8  ;;  %v10298_v54 = vmul.f32 -1.442695, %v14038_v45  ;;  %v5295_v22 = vmul.f32 0.0625, %v13623_v19  ;;  %v3694_v18 = vsel %vm3492_vm11, %v13873_v7, %v14052_v9 }
 0x7da   : > { %2841 = vst.msk [vmem:[#allocation2 + $0x38] sm:$0xff] %vm285_vm1, %v2797_v35  ;;  %v11093_v62 = vpop.eup %11092  ;;  %v420_v23 = vand.u32 15, %v312_v32  ;;  %v314_v25 = vadd.s32 112, %v13310_v26  ;;  %v5607_v39 = vmul.f32 %v11089_v53, %v13813_v51  ;;  %v14067_v24 = vor.u32 %v2920_v46, %v13986_v41 }
 0x7db   : > { %v11095_v16 = vpop.eup %11094  ;;  %v10353_v40 = vmul.f32 -1.442695, %v14050_v5  ;;  %11112 = vrsqrt.f32 %v5326_v27  ;;  %v2398_v36 = vmul.f32 0.0625, %v13648_v61  ;;  %v3110_v7 = vor.u32 %v3109_v52, %v3106_v57  ;;  %v19039_v27 = vld [vmem:[#allocation45_spill] sm:$0xff] }
 0x7dc   : > { %3725 = vrot.lane.b32.xlu1 %v3694_v18, %s11579_s8  ;;  %3585 = vrot.lane.b32.xlu0 %v3234_v30, %s11585_s11  ;;  %19031 = vst [vmem:[#allocation36_spill] sm:$0xff] %v14067_v24  ;;  %v11097_v19 = vpop.eup %11096  ;;  %v14076_v47 = vsel %vm3049_vm8, %v19033_v17, %v14020_v12  ;;  %v5606_v51 = vmul.f32 %v11087_v29, %v19035_v48  ;;  %11114 = vpow2.f32 %v10298_v54  ;;  %v5327_v59 = vadd.f32 1e-05, %v5295_v22  ;;  %v14100_v30 = vld [vmem:[#allocation2 + $0x8] sm:$0xff]  ;;  %v19043_v18 = vld [vmem:[#allocation50_spill] sm:$0xff] }
 0x7dd   : > { %v11099_v38 = vpop.eup %11098  ;;  %19034 = vst [vmem:[#allocation37_spill] sm:$0xff] %v14076_v47  ;;  %v14079_v0 = vpop.permute.xlu0 %5693  ;;  %v14083_v49 = vor.u32 %v3118_v4, %v3115_v33  ;;  %vm14085_vm5 = vcmp.ne.s32.totalorder %v420_v23, 0  ;;  %v434_v46 = vand.u32 15, %v314_v25  ;;  %v2615_v52 = vadd.f32 1.0, %v11097_v19  ;;  %19041 = vst [vmem:[#allocation75_spill] sm:$0xff] %v14100_v30  ;;  %v19059_v30 = vld [vmem:[#allocation46_spill] sm:$0xff] }
 0x7de   : > { %v11101_v41 = vpop.eup %11100  ;;  %v5629_v57 = vpack.c.bf16 %v5607_v39, %v5606_v51  ;;  %v14092_v29 = vsel %vm2869_vm13, %v13983_v11, %v14067_v24  ;;  %11116 = vpow2.f32 %v10353_v40  ;;  %v2430_v53 = vadd.f32 1e-05, %v2398_v36  ;;  %v19044_v11 = vld [vmem:[#allocation39_spill] sm:$0xff]  ;;  %v19047_v51 = vld [vmem:[#allocation44_spill] sm:$0xff] }
 0x7df   : > { %v14081_v8 = vpop.xlane.xlu1 %5263  ;;  %v11103_v32 = vpop.eup %11102  ;;  %19038 = vst [vmem:[#allocation76_spill] sm:$0xff] %v14092_v29  ;;  %v14098_v33 = vsel %vm3049_vm8, %v14020_v12, %v3110_v7  ;;  %v14105_v23 = vmul.f32 %v11091_v56, %v19043_v18  ;;  %v14108_v25 = vmul.f32 %v11093_v62, %v19044_v11  ;;  %v19045_v39 = vld [vmem:[#allocation43_spill] sm:$0xff]  ;;  %v10195_v12 = vsel %vm14085_vm5, 1.0, %v18961_v31 }
 0x7e0   : > { %v11105_v3 = vpop.eup %11104  ;;  %19040 = vst [vmem:[#allocation73_spill] sm:$0xff] %v14098_v33  ;;  %v14111_v40 = vmul.f32 %v11095_v16, %v19045_v39  ;;  %11118 = vrsqrt.f32 %v5327_v59  ;;  %v2617_v17 = vadd.f32 1.0, %v11101_v41  ;;  %v14118_v48 = vsel %vm3049_vm8, %v3110_v7, %v14083_v49  ;;  %v14126_v59 = vld [vmem:[#allocation2] sm:$0xf0] }
 0x7e1   : > { %v11107_v22 = vpop.eup %11106  ;;  %19046 = vst [vmem:[#allocation66_spill] sm:$0xff] %v14118_v48  ;;  %vm730_vm6 = vcmp.ne.s32.totalorder %v434_v46, 0  ;;  %v2399_v62 = vmul.f32 0.0625, %v19047_v51  ;;  %v14122_v16 = vrot.slane %v5629_v57, 4  ;;  %11120 = vrcp.f32 %v2615_v52  ;;  %v14124_v61 = vpop.permute.xlu0 %3441  ;;  %v19049_v41 = vld [vmem:[#allocation54_spill] sm:$0xff]  ;;  %v19050_v51 = vld [vmem:[#allocation65_spill] sm:$0xff] }
 0x7e2   : > { %v11109_v19 = vpop.eup %11108  ;;  %v5515_v18 = vadd.f32 1.0, %v11105_v3  ;;  %11122 = vrsqrt.f32 %v2430_v53  ;;  %19048 = vst [vmem:[#allocation69_spill] sm:$0xff] %v14124_v61  ;;  %v14129_v11 = vmul.f32 %v11099_v38, %v19049_v41  ;;  %v2618_v7 = vadd.f32 1.0, %v11103_v32  ;;  %v14142_v38 = vld [vmem:[#allocation2 + $0x10] sm:$0xff] }
 0x7e3   : > { %v2795_v36 = vpop.permute.xlu1 %2794  ;;  %v11111_v56 = vpop.eup %11110  ;;  %v14132_v46 = vpack.c.bf16 %v18963_v13, %v10195_v12  ;;  %v5516_v39 = vadd.f32 1.0, %v11107_v22  ;;  %v14135_v54 = vmul.f32 %v11109_v19, %v19050_v51  ;;  %v10196_v57 = vsel %vm730_vm6, 1.0, %v18961_v31  ;;  %19052 = vst [vmem:[#allocation77_spill] sm:$0xff] %v14142_v38 }
 0x7e4   : > { %2840 = vst.msk [vmem:[#allocation2 + $0x30] sm:$0xff] %vm285_vm1, %v2795_v36  ;;  %v317_v52 = vadd.s32 136, %v13310_v26  ;;  %v14140_v36 = vmul.f32 %v11111_v56, %v13921_v43  ;;  %11124 = vrcp.f32 %v2617_v17  ;;  %v2431_v19 = vadd.f32 1e-05, %v2399_v62  ;;  %v14159_v62 = vld [vmem:[#allocation2 + $0x38] sm:$0xff]  ;;  %v19056_v43 = vld [vmem:[#allocation80_spill] sm:$0xff] }
 0x7e5   : > { %19051 = vst [vmem:[#allocation60_spill] sm:$0xff] %v14135_v54  ;;  %v11113_v3 = vpop.eup %11112  ;;  %v14151_v41 = vsel %vm2752_vm4, %v13912_v28, %v14122_v16  ;;  %11126 = vrcp.f32 %v5515_v18  ;;  %v14157_v51 = vpack.c.bf16 %v18963_v13, %v10196_v57  ;;  %19053 = vst [vmem:[#allocation78_spill] sm:$0xff] %v14159_v62  ;;  %v14163_v28 = vadd.s32 128, %v13310_v26  ;;  %v14165_v22 = vpop.permute.xlu0 %3526 }
 0x7e6   : > { %v11115_v12 = vpop.eup %11114  ;;  %11128 = vrcp.f32 %v2618_v7  ;;  %v455_v35 = vand.u32 15, %v317_v52  ;;  %19054 = vst [vmem:[#allocation68_spill] sm:$0xff] %v14165_v22  ;;  %v3350_v56 = vshrl.u32 %v13829_v10, 16  ;;  %v5630_v57 = vpack.c.bf16 %v14140_v36, %v14105_v23  ;;  %v19057_v23 = vld [vmem:[#allocation51_spill] sm:$0xff] }
 0x7e7   : > { %v2799_v53 = vpop.permute.xlu1 %2798  ;;  %11130 = vrcp.f32 %v5516_v39  ;;  %v2619_v17 = vadd.f32 1.0, %v11115_v12  ;;  %v14173_v24 = vmul.f32 %v11113_v3, %v19056_v43  ;;  %v5296_v36 = vmul.f32 0.0625, %v19057_v23  ;;  %v19058_v12 = vld [vmem:[#allocation67_spill] sm:$0xff]  ;;  %v19062_v23 = vld [vmem:[#allocation81_spill] sm:$0xff] }
 0x7e8   : > { %2842 = vst.msk [vmem:[#allocation2 + $0x40] sm:$0xff] %vm285_vm1, %v2799_v53  ;;  %v11117_v32 = vpop.eup %11116  ;;  %v10299_v53 = vmul.f32 -1.442695, %v14135_v54  ;;  %11132 = vrsqrt.f32 %v2431_v19  ;;  %v3352_v3 = vor.u32 %v3350_v56, %v19058_v12  ;;  %v3217_v19 = vmul.bf16 %v14118_v48, %v14159_v62 }
 0x7e9   : > { %v5517_v43 = vadd.f32 1.0, %v11117_v32  ;;  %v3362_v38 = vshll.u32 %v14159_v62, 16  ;;  %v5297_v4 = vmul.f32 0.0625, %v19059_v30  ;;  %11134 = vrcp.f32 %v2619_v17  ;;  %v19063_v17 = vld [vmem:[#allocation38_spill] sm:$0xff]  ;;  %v14209_v61 = vpop.permute.xlu0 %3577 }
 0x7ea   : > { %v11119_v58 = vpop.eup %11118  ;;  %v5328_v12 = vadd.f32 1e-05, %v5296_v36  ;;  %19064 = vst [vmem:[#allocation40_spill] sm:$0xff] %v14209_v61  ;;  %vm4067_vm14 = vcmask 654336   ;;  %vm4102_vm15 = vcmask 785408   ;;  %vm4137_vm5 = vcmask 916480  }
 0x7eb   : > { %v14167_v18 = vld [vmem:[#allocation2 + $0x30] sm:$0xff]  ;;  %v5684_v7 = vpop.permute.xlu1 %5683  ;;  %v14206_v30 = vmul.f32 %v11119_v58, %v19062_v23  ;;  %v3215_v58 = vmul.bf16 %v14076_v47, %v13829_v10  ;;  %11136 = vrcp.f32 %v5517_v43  ;;  %v14239_v43 = vrot.slane %v5630_v57, 4 }
 0x7ec   : > { %19055 = vst [vmem:[#allocation79_spill] sm:$0xff] %v14167_v18  ;;  %5739 = vst.msk [vmem:[#allocation2 + $0x30] sm:$0xff] %vm285_vm1, %v14079_v0  ;;  %v3354_v39 = vshll.u32 %v14167_v18, 16  ;;  %v3254_v52 = vmul.bf16 %v14076_v47, %v14167_v18  ;;  %v3216_v37 = vmul.bf16 %v14098_v33, %v14167_v18  ;;  %v11121_v0 = vpop.eup %11120  ;;  %v3358_v42 = vshrl.u32 %v14167_v18, 16 }
 0x7ed   : > { %5734 = vst.msk [vmem:[#allocation2 + $0x8] sm:$0xf0] %vm289_vm2, %v5684_v7  ;;  %v11123_v34 = vpop.eup %11122  ;;  %vm14194_vm2 = vcmp.ne.s32.totalorder %v455_v35, 15  ;;  %v2397_v35 = vmul.f32 0.0625, %v19063_v17  ;;  %v5329_v17 = vadd.f32 1e-05, %v5297_v4  ;;  %11138 = vpow2.f32 %v10299_v53 }
 0x7ee   : > { %v3356_v54 = vrot.slane %v3354_v39, 1  ;;  %v14187_v7 = vrot.slane %v3254_v52, 1  ;;  %v14192_v60 = vrot.slane %v3216_v37, 1  ;;  %v11125_v37 = vpop.eup %11124  ;;  %v10355_v4 = vmul.f32 -1.442695, %v14206_v30 }
 0x7ef   : > { %v5686_v22 = vpop.permute.xlu1 %5685  ;;  %11140 = vrsqrt.f32 %v5328_v12  ;;  %v2429_v53 = vadd.f32 1e-05, %v2397_v35  ;;  %v2933_v57 = vshrl.u32 %v14157_v51, 16 }
 0x7f0   : > { %5735 = vst.msk [vmem:[#allocation2 + $0x10] sm:$0xff] %vm285_vm1, %v5686_v22  ;;  %v14200_v56 = vsel %vm3305_vm9, %v3352_v3, %v3356_v54  ;;  %v3696_v39 = vsel %vm3492_vm11, %v14052_v9, %v14187_v7  ;;  %v3360_v52 = vor.u32 %v3358_v42, %v3356_v54  ;;  %v10354_v22 = vmul.f32 -1.442695, %v14173_v24  ;;  %v11127_v9 = vpop.eup %11126  ;;  %v19066_v54 = vld [vmem:[#allocation64_spill] sm:$0xff] }
 0x7f1   : > { %3834 = vrot.lane.b32.xlu1 %v14200_v56, %s11587_s13  ;;  %3727 = vrot.lane.b32.xlu0 %v3696_v39, %s11579_s8  ;;  %v14215_v3 = vrot.slane %v3217_v19, 1  ;;  %v14217_v42 = vrot.slane %v3362_v38, 1  ;;  %v14222_v36 = vmul.f32 %v11123_v34, %v19066_v54  ;;  %v14224_v23 = vpop.eup %11128  ;;  %v2711_v39 = vmul.f32 %v11121_v0, %v13978_v6 }
 0x7f2   : > { %v14232_v38 = vpop.eup %11130  ;;  %v10213_v6 = vsel %vm14194_vm2, 1.0, %v18961_v31  ;;  %v2713_v0 = vmul.f32 %v11125_v37, %v13991_v55  ;;  %v3502_v54 = vrot.slane %v3215_v58, 1  ;;  %11142 = vpow2.f32 %v10354_v22  ;;  %v19071_v58 = vld [vmem:[#allocation41_spill] sm:$0xff] }
 0x7f3   : > { %19065 = vst [vmem:[#allocation57_spill] sm:$0xff] %v14215_v3  ;;  %19067 = vst [vmem:[#allocation50_spill] sm:$0xff] %v14222_v36  ;;  %v5688_v61 = vpop.permute.xlu1 %5687  ;;  %v14230_v19 = vsel %vm3492_vm11, %v14192_v60, %v14215_v3  ;;  %v14237_v34 = vsel %vm3305_vm9, %v3360_v52, %v14217_v42  ;;  %v11133_v52 = vpop.eup %11132  ;;  %v5611_v3 = vmul.f32 %v11127_v9, %v14008_v44  ;;  %v10301_v32 = vmul.f32 -1.442695, %v14222_v36 }
 0x7f4   : > { %19068 = vst [vmem:[#allocation39_spill] sm:$0xff] %v14230_v19  ;;  %5736 = vst.msk [vmem:[#allocation2 + $0x18] sm:$0xff] %vm285_vm1, %v5688_v61  ;;  %11144 = vrsqrt.f32 %v5329_v17  ;;  %v932_v35 = vpack.c.bf16 %v10213_v6, %v18963_v13  ;;  %v448_v19 = vand.u32 15, %v14163_v28  ;;  %v3503_v55 = vsel %vm3492_vm11, %v13936_v14, %v3502_v54  ;;  %v11135_v22 = vpop.eup %11134 }
 0x7f5   : > { %19069 = vst [vmem:[#allocation43_spill] sm:$0xff] %v14237_v34  ;;  %5701 = vrot.lane.b32.xlu1 %v14151_v41, %s11579_s8  ;;  %3836 = vrot.lane.b32.xlu0 %v14237_v34, %s11587_s13  ;;  %v14249_v61 = vpop.permute.xlu0 %3635  ;;  %v2936_v41 = vshll.u32 %v14157_v51, 16  ;;  %v5672_v44 = vsel %vm2752_vm4, %v14122_v16, %v14239_v43  ;;  %v2731_v37 = vpack.c.bf16 %v2711_v39, %v14108_v25  ;;  %11146 = vpow2.f32 %v10355_v4  ;;  %v11137_v36 = vpop.eup %11136  ;;  %v19086_v16 = vld [vmem:[#allocation83_spill] sm:$0xff] }
 0x7f6   : > { %11148 = vrsqrt.f32 %v2429_v53  ;;  %v19070_v28 = vshll.u32 %v14126_v59, 16  ;;  %v5787_v14 = vmul.bf16 %v14126_v59, %v19071_v58  ;;  %v2732_v25 = vpack.c.bf16 %v2713_v0, %v14111_v40 }
 0x7f7   : > { %v5690_v12 = vpop.permute.xlu1 %5689  ;;  %v5631_v39 = vpack.c.bf16 %v5611_v3, %v14129_v11  ;;  %11150 = vpow2.f32 %v10301_v32  ;;  %v19073_v4 = vshrl.u32 %v14132_v46, 16  ;;  %vm14281_vm7 = vcmp.ne.s32.totalorder %v448_v19, 0  ;;  %v11139_v32 = vpop.eup %11138 }
 0x7f8   : > { %5737 = vst.msk [vmem:[#allocation2 + $0x20] sm:$0xff] %vm285_vm1, %v5690_v12  ;;  %v5887_v9 = vrot.slane %v19070_v28, 1  ;;  %v19074_v12 = vshll.u32 %v14132_v46, 16  ;;  %v3125_v28 = vshll.u32 %v932_v35, 16  ;;  %v3505_v40 = vsel %vm3492_vm11, %v3502_v54, %v14192_v60  ;;  %v19078_v60 = vld [vmem:[#allocation70_spill] sm:$0xff] }
 0x7f9   : > { %3534 = vrot.lane.b32.xlu1 %v3503_v55, %s11584_s10  ;;  %5703 = vrot.lane.b32.xlu0 %v5672_v44, %s11579_s8  ;;  %v14267_v51 = vpop.permute.xlu0 %3719  ;;  %v2926_v6 = vrot.slane %v19073_v4, 4  ;;  %v3122_v44 = vshrl.u32 %v932_v35, 16  ;;  %v2774_v11 = vrot.slane %v2731_v37, 4  ;;  %v2935_v3 = vrot.slane %v2933_v57, 4 }
 0x7fa   : > { %v2929_v55 = vrot.slane %v19074_v12, 5  ;;  %v2938_v0 = vrot.slane %v2936_v41, 5  ;;  %v19077_v19 = vshrl.u32 %v14126_v59, 16  ;;  %v14297_v4 = vrot.slane %v5787_v14, 1 }
 0x7fb   : > { %v5692_v53 = vpop.permute.xlu1 %5691  ;;  %v14301_v54 = vmul.f32 %v11133_v52, %v19078_v60  ;;  %v14303_v57 = vrot.slane %v2732_v25, 4  ;;  %v14305_v41 = vrot.slane %v5631_v39, 4  ;;  %v2714_v37 = vmul.f32 %v14224_v23, %v13996_v63 }
 0x7fc   : > { %5738 = vst.msk [vmem:[#allocation2 + $0x28] sm:$0xff] %vm285_vm1, %v5692_v53  ;;  %v14295_v35 = vor.u32 %v5887_v9, %v19077_v19  ;;  %v2715_v53 = vmul.f32 %v11135_v22, %v14038_v45  ;;  %v10197_v59 = vsel %vm14281_vm7, 1.0, %v18961_v31  ;;  %v11141_v9 = vpop.eup %11140  ;;  %v3273_v14 = vmul.bf16 %v14043_v20, %v14167_v18  ;;  %v14314_v45 = vld [vmem:[#allocation2 + $0x40] sm:$0xff] }
 0x7fd   : > { %3643 = vrot.lane.b32.xlu1 %v14200_v56, %s11586_s12  ;;  %3536 = vrot.lane.b32.xlu0 %v3505_v40, %s11584_s10  ;;  %v14291_v46 = vpop.permute.xlu0 %3770  ;;  %19079 = vst [vmem:[#allocation44_spill] sm:$0xff] %v14314_v45  ;;  %v5613_v52 = vmul.f32 %v11137_v36, %v14050_v5  ;;  %v3124_v22 = vrot.slane %v3122_v44, 3  ;;  %v3127_v25 = vrot.slane %v3125_v28, 4  ;;  %v11143_v39 = vpop.eup %11142  ;;  %v2775_v63 = vsel %vm2752_vm4, %v14005_v50, %v2774_v11  ;;  %v14329_v36 = vld [vmem:[#allocation2 + $0x8] sm:$0xff] }
 0x7fe   : > { %v2620_v23 = vadd.f32 1.0, %v11139_v32  ;;  %v14320_v10 = vor.u32 %v2929_v55, %v2926_v6  ;;  %v14322_v40 = vor.u32 %v2938_v0, %v2935_v3  ;;  %v11145_v19 = vpop.eup %11144  ;;  %v2733_v44 = vpack.c.bf16 %v2715_v53, %v2714_v37  ;;  %v19083_v53 = vld [vmem:[#allocation82_spill] sm:$0xff] }
 0x7ff   : > { %v5696_v12 = vpop.permute.xlu1 %5695  ;;  %v5612_v28 = vmul.f32 %v14232_v38, %v14015_v2  ;;  %v10302_v50 = vmul.f32 -1.442695, %v14301_v54  ;;  %v14335_v6 = vpack.c.bf16 %v18963_v13, %v10197_v59  ;;  %v11147_v55 = vpop.eup %11146  ;;  %v2777_v3 = vsel %vm2752_vm4, %v2774_v11, %v14303_v57 }
 0x800   : > { %5740 = vst.msk [vmem:[#allocation2 + $0x38] sm:$0xff] %vm285_vm1, %v5696_v12  ;;  %19080 = vst [vmem:[#allocation54_spill] sm:$0xff] %v14320_v10  ;;  %v14342_v0 = vsel %vm2752_vm4, %v14239_v43, %v14305_v41  ;;  %v3294_v32 = vmul.bf16 %v14098_v33, %v14314_v45  ;;  %v14347_v60 = vmul.f32 %v11141_v9, %v19083_v53  ;;  %v11149_v2 = vpop.eup %11148  ;;  %v5518_v59 = vadd.f32 1.0, %v11143_v39  ;;  %v19089_v39 = vld [vmem:[#allocation71_spill] sm:$0xff] }
 0x801   : > { %19081 = vst [vmem:[#allocation65_spill] sm:$0xff] %v14322_v40  ;;  %3778 = vrot.lane.b32.xlu1 %v3273_v14, %s11578_s7  ;;  %3645 = vrot.lane.b32.xlu0 %v14237_v34, %s11586_s12  ;;  %v14327_v5 = vpop.permute.xlu0 %3828  ;;  %19082 = vst [vmem:[#allocation80_spill] sm:$0xff] %v14335_v6  ;;  %v3274_v38 = vmul.bf16 %v14092_v29, %v14159_v62  ;;  %v5632_v37 = vpack.c.bf16 %v5613_v52, %v5612_v28  ;;  %v11151_v11 = vpop.eup %11150  ;;  %v5890_v14 = vshll.u32 %v14329_v36, 16  ;;  %v5804_v40 = vld [vmem:[#allocation2 + $0x8] sm:$0xf8] }
 0x802   : > { %19084 = vst [vmem:[#allocation51_spill] sm:$0xff] %v14347_v60  ;;  %v14351_v12 = vor.u32 %v3127_v25, %v3124_v22  ;;  %v3293_v43 = vmul.bf16 %v14076_v47, %v14159_v62  ;;  %11152 = vrcp.f32 %v2620_v23  ;;  %v14357_v34 = vmul.f32 %v11145_v19, %v19086_v16 }
 0x803   : > { %v14361_v53 = vrot.slane %v2733_v44, 4  ;;  %v5519_v52 = vadd.f32 1.0, %v11147_v55  ;;  %11154 = vpow2.f32 %v10302_v50  ;;  %v14365_v25 = vrot.slane %v3294_v32, 1  ;;  %v19091_v55 = vld [vmem:[#allocation49_spill] sm:$0xff] }
 0x804   : > { %19085 = vst [vmem:[#allocation67_spill] sm:$0xff] %v14351_v12  ;;  %19087 = vst [vmem:[#allocation46_spill] sm:$0xff] %v14357_v34  ;;  %v14368_v23 = vmul.f32 %v11149_v2, %v19089_v39  ;;  %v3292_v16 = vmul.bf16 %v13818_v15, %v14167_v18  ;;  %v14373_v19 = vrot.slane %v5632_v37, 4  ;;  %11156 = vrcp.f32 %v5518_v59 }
 0x805   : > { %2806 = vrot.lane.b32.xlu1 %v2775_v63, %s11578_s7  ;;  %3780 = vrot.lane.b32.xlu0 %v3274_v38, %s11578_s7  ;;  %v2801_v9 = vpop.permute.xlu0 %2800  ;;  %19088 = vst [vmem:[#allocation81_spill] sm:$0xff] %v14361_v53  ;;  %v10356_v63 = vmul.f32 -1.442695, %v14347_v60  ;;  %v2622_v44 = vadd.f32 1.0, %v11151_v11  ;;  %v14378_v28 = vsel %vm3049_vm8, %v14083_v49, %v14351_v12  ;;  %v14380_v50 = vrot.slane %v5890_v14, 1 }
 0x806   : > { %2843 = vst.msk [vmem:[#allocation2 + $0x48] sm:$0xff] %vm285_vm1, %v2801_v9  ;;  %19090 = vst [vmem:[#allocation38_spill] sm:$0xff] %v14378_v28  ;;  %v5788_v32 = vmul.bf16 %v14329_v36, %v19091_v55  ;;  %v3888_v2 = vrot.slane %v3293_v43, 1  ;;  %v10357_v38 = vmul.f32 -1.442695, %v14357_v34  ;;  %v3255_v37 = vmul.bf16 %v14098_v33, %v14159_v62 }
 0x807   : > { %v14393_v49 = vsel %vm2752_vm4, %v14303_v57, %v14361_v53  ;;  %11158 = vrcp.f32 %v5519_v52  ;;  %v14396_v59 = vadd.s32 152, %v13310_v26  ;;  %v10300_v14 = vmul.f32 -1.442695, %v14368_v23  ;;  %v14406_v9 = vld [vmem:[#allocation2 + $0x8] sm:$0xf0]  ;;  %v14413_v52 = vpop.permute.xlu1 %3443 }
 0x808   : > { %v3891_v11 = vsel %vm3492_vm11, %v3888_v2, %v14365_v25  ;;  %11160 = vpow2.f32 %v10356_v63  ;;  %v3235_v43 = vmul.bf16 %v14092_v29, %v14167_v18  ;;  %v14411_v57 = vsel %vm2752_vm4, %v14305_v41, %v14373_v19  ;;  %v14425_v41 = vld [vmem:[#allocation2 + $0x10] sm:$0xff] }
 0x809   : > { %3451 = vrot.lane.b32.xlu1 %v14200_v56, %s11583_s9  ;;  %2808 = vrot.lane.b32.xlu0 %v2777_v3, %s11578_s7  ;;  %v14401_v56 = vrot.slane %v3292_v16, 1  ;;  %v5299_v3 = vmul.f32 0.0625, %v14031_v1  ;;  %11162 = vrcp.f32 %v2622_v44  ;;  %v5893_v39 = vsel %vm3305_vm9, %v14295_v35, %v14380_v50  ;;  %v14574_v33 = vpop.permute.xlu0 %3445 }
 0x80a   : > { %v14418_v16 = vrot.slane %v5788_v32, 1  ;;  %v3370_v1 = vshll.u32 %v14314_v45, 16  ;;  %11164 = vpow2.f32 %v10357_v38  ;;  %v14423_v63 = vrot.slane %v3255_v37, 1 }
 0x80b   : > { %v4282_v22 = vshrl.u32 %v3891_v11, 16  ;;  %v4285_v18 = vshll.u32 %v3891_v11, 16  ;;  %v6189_v32 = vshll.u32 %v14406_v9, 16  ;;  %11166 = vpow2.f32 %v10300_v14  ;;  %v14455_v28 = vpop.permute.xlu1 %3528 }
 0x80c   : > { %19092 = vst [vmem:[#allocation64_spill] sm:$0xff] %v14423_v63  ;;  %v14430_v35 = vpop.eup %11152  ;;  %v3889_v37 = vsel %vm3492_vm11, %v14401_v56, %v3888_v2  ;;  %v5298_v45 = vmul.f32 0.0625, %v14081_v8  ;;  %v3698_v11 = vsel %vm3492_vm11, %v14187_v7, %v14423_v63  ;;  %v3366_v10 = vshrl.u32 %v14159_v62, 16 }
 0x80d   : > { %3587 = vrot.lane.b32.xlu1 %v3235_v43, %s11585_s11  ;;  %6017 = vrot.lane.b32.xlu0 %v5893_v39, %s11583_s9  ;;  %v14427_v44 = vld [vmem:[#allocation2 + $0x48] sm:$0xff]  ;;  %v11155_v43 = vpop.eup %11154  ;;  %v5331_v39 = vadd.f32 1e-05, %v5299_v3  ;;  %v6070_v29 = vsel %vm3492_vm11, %v14297_v4, %v14418_v16  ;;  %v14445_v6 = vrot.slane %v3370_v1, 1  ;;  %v5898_v14 = vshll.u32 %v14425_v41, 16 }
 0x80e   : > { %19093 = vst [vmem:[#allocation70_spill] sm:$0xff] %v14427_v44  ;;  %v3295_v38 = vmul.bf16 %v14118_v48, %v14427_v44  ;;  %v14450_v3 = vpop.eup %11156  ;;  %v3368_v8 = vor.u32 %v3366_v10, %v14217_v42  ;;  %v4284_v7 = vrot.slane %v4282_v22, 3  ;;  %v4287_v63 = vrot.slane %v4285_v18, 4 }
 0x80f   : > { %19094 = vst [vmem:[#allocation82_spill] sm:$0xff] %v14445_v6  ;;  %v4265_v62 = vshrl.u32 %v3889_v37, 16  ;;  %v5807_v4 = vmul.bf16 %v5804_v40, %v19039_v27  ;;  %v6191_v1 = vrot.slane %v6189_v32, 1  ;;  %v4268_v17 = vshll.u32 %v3889_v37, 16 }
 0x810   : > { %v14448_v2 = vrot.slane %v3295_v38, 1  ;;  %v5827_v42 = vmul.bf16 %v14425_v41, %v19091_v55  ;;  %v14469_v22 = vsel %vm3305_vm9, %v3368_v8, %v14445_v6  ;;  %v14471_v40 = vrot.slane %v5898_v14, 1  ;;  %v14481_v8 = vld [vmem:[#allocation2 + $0x10] sm:$0xf0] }
 0x811   : > { %6101 = vrot.lane.b32.xlu0 %v6070_v29, %s11584_s10  ;;  %3729 = vrot.lane.b32.xlu1 %v3698_v11, %s11579_s8  ;;  %v14461_v12 = vpop.eup %11158  ;;  %v4267_v10 = vrot.slane %v4265_v62, 3  ;;  %19096 = vst [vmem:[#allocation71_spill] sm:$0xff] %v14469_v22  ;;  %v6187_v32 = vshrl.u32 %v14406_v9, 16  ;;  %v4288_v11 = vor.u32 %v4287_v63, %v4284_v7  ;;  %11168 = vrsqrt.f32 %v5331_v39  ;;  %v14494_v7 = vld [vmem:[#allocation2 + $0x20] sm:$0xff]  ;;  %v19099_v39 = vld [vmem:[#allocation69_spill] sm:$0xff] }
 0x812   : > { %19095 = vst [vmem:[#allocation83_spill] sm:$0xff] %v14448_v2  ;;  %v3893_v38 = vsel %vm3492_vm11, %v14365_v25, %v14448_v2  ;;  %v14465_v18 = vpop.eup %11160  ;;  %v4270_v25 = vrot.slane %v4268_v17, 4  ;;  %v5826_v2 = vmul.bf16 %v14406_v9, %v19071_v58  ;;  %v5330_v6 = vadd.f32 1e-05, %v5298_v45  ;;  %v19100_v45 = vld [vmem:[#allocation62_spill] sm:$0xff] }
 0x813   : > { %v4299_v29 = vshrl.u32 %v3893_v38, 16  ;;  %v4302_v20 = vshll.u32 %v3893_v38, 16  ;;  %v14474_v37 = vpop.eup %11162  ;;  %v6192_v17 = vor.u32 %v6191_v1, %v6187_v32  ;;  %v14485_v44 = vadd.f32 1.0, %v11155_v43  ;;  %v14505_v32 = vpop.permute.xlu1 %3579 }
 0x814   : > { %v14483_v14 = vpop.eup %11164  ;;  %v14489_v53 = vrot.slane %v5827_v42, 1  ;;  %v5894_v63 = vshrl.u32 %v14329_v36, 16  ;;  %v14496_v9 = vor.u32 %v4270_v25, %v4267_v10  ;;  %v19101_v43 = vmul.bf16 %v19039_v27, %v19100_v45  ;;  %v19102_v36 = vld [vmem:[#allocation47_spill] sm:$0xff] }
 0x815   : > { %6152 = vrot.lane.b32.xlu0 %v5807_v4, %s11585_s11  ;;  %3838 = vrot.lane.b32.xlu1 %v14469_v22, %s11587_s13  ;;  %v4301_v62 = vrot.slane %v4299_v29, 3  ;;  %v4304_v38 = vrot.slane %v4302_v20, 4  ;;  %v14492_v20 = vld [vmem:[#allocation2 + $0x18] sm:$0xff]  ;;  %v14498_v29 = vpop.eup %11166  ;;  %v6193_v42 = vsel %vm3305_vm9, %v6192_v17, %v14471_v40  ;;  %v5865_v10 = vmul.bf16 %v14481_v8, %v19071_v58  ;;  %v14513_v25 = vld [vmem:[#allocation2 + $0x28] sm:$0xff] }
 0x816   : > { %19098 = vst [vmem:[#allocation87_spill] sm:$0xff] %v14496_v9  ;;  %v3914_v1 = vsel %vm285_vm1, %v19101_v43, %v19099_v39  ;;  %v6261_v39 = vrot.slane %v5826_v2, 1  ;;  %v5896_v45 = vor.u32 %v5894_v63, %v14380_v50  ;;  %v14523_v17 = vsel %vm3049_vm8, %v14496_v9, %v4288_v11  ;;  %v19104_v63 = vld [vmem:[#allocation59_spill] sm:$0xff] }
 0x817   : > { %v14487_v4 = vor.u32 %v4304_v38, %v4301_v62  ;;  %v5789_v62 = vmul.bf16 %v14425_v41, %v19102_v36  ;;  %19103 = vst [vmem:[#allocation69_spill] sm:$0xff] %v14523_v17  ;;  %11170 = vrsqrt.f32 %v5330_v6  ;;  %v6382_v43 = vshll.u32 %v14481_v8, 16  ;;  %v19105_v17 = vld [vmem:[#allocation68_spill] sm:$0xff] }
 0x818   : > { %v6263_v50 = vsel %vm3492_vm11, %v6261_v39, %v14489_v53  ;;  %v5901_v2 = vsel %vm3305_vm9, %v5896_v45, %v14471_v40  ;;  %v5906_v6 = vshll.u32 %v14492_v20, 16  ;;  %v3964_v9 = vsel %vm940_vm0, %v3914_v1, %v19105_v17 }
 0x819   : > { %19097 = vst [vmem:[#allocation86_spill] sm:$0xff] %v14487_v4  ;;  %6210 = vrot.lane.b32.xlu0 %v6193_v42, %s11586_s12  ;;  %5705 = vrot.lane.b32.xlu1 %v14342_v0, %s11579_s8  ;;  %v4306_v38 = vsel %vm3049_vm8, %v4288_v11, %v14487_v4  ;;  %v5866_v42 = vmul.bf16 %v14492_v20, %v19091_v55  ;;  %v5843_v11 = vld [vmem:[#allocation2 + $0x10] sm:$0xf8]  ;;  %v14538_v58 = vrot.slane %v5789_v62, 1  ;;  %v6454_v55 = vrot.slane %v5865_v10, 1  ;;  %v14554_v10 = vpop.permute.xlu1 %3637 }
 0x81a   : > { %10317 = vmatprep.mubr.msk.bf16.mxu1 %vm285_vm1, %v4306_v38  ;;  %v5867_v0 = vmul.bf16 %v14494_v7, %v19102_v36  ;;  %v5868_v38 = vmul.bf16 %v14513_v25, %v19104_v63  ;;  %v14546_v39 = vmul.f32 %v14450_v3, %v14173_v24  ;;  %v14550_v45 = vmul.f32 %v14461_v12, %v14206_v30 }
 0x81b   : > { %v6455_v4 = vrot.slane %v5866_v42, 1  ;;  %v5846_v42 = vmul.bf16 %v5843_v11, %v19039_v27  ;;  %v6384_v1 = vrot.slane %v6382_v43, 1  ;;  %v11169_v3 = vpop.eup %11168  ;;  %v6072_v30 = vsel %vm3492_vm11, %v14418_v16, %v14538_v58 }
 0x81c   : > { %v6457_v22 = vrot.slane %v5867_v0, 1  ;;  %v14552_v62 = vrot.slane %v5868_v38, 1  ;;  %v14562_v12 = vrot.slane %v5906_v6, 1  ;;  %v6380_v38 = vshrl.u32 %v14481_v8, 16  ;;  %v19107_v6 = vld [vmem:[#allocation55_spill] sm:$0xff] }
 0x81d   : > { %6294 = vrot.lane.b32.xlu0 %v6263_v50, %s11579_s8  ;;  %6019 = vrot.lane.b32.xlu1 %v5901_v2, %s11583_s9  ;;  %v6456_v17 = vsel %vm3492_vm11, %v6454_v55, %v6455_v4  ;;  %11172 = vrcp.f32 %v14485_v44  ;;  %v5808_v8 = vmul.bf16 %v14425_v41, %v19107_v6 }
 0x81e   : > { %v6458_v0 = vsel %vm3492_vm11, %v6455_v4, %v6457_v22  ;;  %v6776_v50 = vshrl.u32 %v6456_v17, 16  ;;  %v6779_v2 = vshll.u32 %v6456_v17, 16  ;;  %v6460_v43 = vsel %vm3492_vm11, %v6457_v22, %v14552_v62 }
 0x81f   : > { %v6784_v21 = vshrl.u32 %v6458_v0, 16  ;;  %v6787_v24 = vshll.u32 %v6458_v0, 16  ;;  %v19106_v0 = vld [vmem:[#allocation40_spill] sm:$0xff]  ;;  %v6385_v48 = vor.u32 %v6384_v1, %v6380_v38  ;;  %v6801_v16 = vshrl.u32 %v6460_v43, 16 }
 0x820   : > { %v6778_v55 = vrot.slane %v6776_v50, 3  ;;  %v6781_v4 = vrot.slane %v6779_v2, 4  ;;  %v3999_v27 = vsel %vm3997_vm10, %v3964_v9, %v19106_v0  ;;  %v6804_v34 = vshll.u32 %v6460_v43, 16  ;;  %v3722_v50 = vpop.permute.xlu1 %3721 }
 0x821   : > { %6345 = vrot.lane.b32.xlu0 %v5846_v42, %s11578_s7  ;;  %6103 = vrot.lane.b32.xlu1 %v6072_v30, %s11584_s10  ;;  %v6786_v11 = vrot.slane %v6784_v21, 3  ;;  %v6789_v17 = vrot.slane %v6787_v24, 4  ;;  %v11171_v42 = vpop.eup %11170  ;;  %v6386_v21 = vsel %vm3305_vm9, %v6385_v48, %v14562_v12  ;;  %v5902_v2 = vshrl.u32 %v14425_v41, 16  ;;  %v14586_v30 = vld [vmem:[#allocation2 + $0x30] sm:$0xff] }
 0x822   : > { %v6782_v60 = vor.u32 %v6781_v4, %v6778_v55  ;;  %v5828_v9 = vmul.bf16 %v14492_v20, %v19102_v36  ;;  %v6803_v44 = vrot.slane %v6801_v16, 3  ;;  %v4034_v1 = vsel %vm4032_vm12, %v3999_v27, %v14249_v61  ;;  %v19108_v27 = vld [vmem:[#allocation85_spill] sm:$0xff] }
 0x823   : > { %v6790_v22 = vor.u32 %v6789_v17, %v6786_v11  ;;  %v2621_v24 = vadd.f32 1.0, %v14498_v29  ;;  %v6806_v48 = vrot.slane %v6804_v34, 4  ;;  %v4069_v41 = vsel %vm4067_vm14, %v4034_v1, %v14267_v51  ;;  %v14673_v51 = vld [vmem:[#allocation2 + $0x38] sm:$0xff] }
 0x824   : > { %v5904_v43 = vor.u32 %v5902_v2, %v14471_v40  ;;  %v14595_v55 = vadd.f32 1.0, %v14465_v18  ;;  %v14598_v61 = vmul.f32 %v11169_v3, %v19108_v27  ;;  %v19109_v4 = vand.u32 15, %v14396_v59  ;;  %v3773_v2 = vpop.permute.xlu1 %3772 }
 0x825   : > { %6403 = vrot.lane.b32.xlu0 %v6386_v21, %s11587_s13  ;;  %6154 = vrot.lane.b32.xlu1 %v5808_v8, %s11585_s11  ;;  %v14589_v38 = vsel %vm3049_vm8, %v6782_v60, %v6790_v22  ;;  %v4104_v34 = vsel %vm4102_vm15, %v4069_v41, %v14291_v46  ;;  %v19112_v60 = vld [vmem:[#allocation84_spill] sm:$0xff]  ;;  %v14613_v18 = vor.u32 %v6806_v48, %v6803_v44  ;;  %v6264_v11 = vrot.slane %v5828_v9, 1  ;;  %v19113_v46 = vld [vmem:[#allocation75_spill] sm:$0xff]  ;;  %v14638_v21 = vpop.permute.xlu0 %3581  ;;  %v19115_v41 = vld [vmem:[#allocation53_spill] sm:$0xff] }
 0x826   : > { %vm14602_vm6 = vcmp.ne.s32.totalorder %v19109_v4, 15  ;;  %v14611_v40 = vmul.f32 %v11171_v42, %v19112_v60  ;;  %v4139_v3 = vsel %vm4137_vm5, %v4104_v34, %v14327_v5  ;;  %v5909_v59 = vsel %vm3305_vm9, %v5904_v43, %v14562_v12 }
 0x827   : > { %v5869_v17 = vmul.bf16 %v14586_v30, %v13818_v15  ;;  %v19114_v0 = vmul.bf16 %v19113_v46, %v19107_v6  ;;  %11174 = vrcp.f32 %v2621_v24  ;;  %v14630_v5 = vadd.f32 1.0, %v14483_v14  ;;  %v14648_v24 = vpop.eup %11172 }
 0x828   : > { %v14634_v8 = vsel %vm3049_vm8, %v6790_v22, %v14613_v18  ;;  %v10359_v9 = vmul.f32 -1.442695, %v14598_v61  ;;  %v4190_v44 = vshrl.u32 %v4139_v3, 16  ;;  %v4193_v14 = vshll.u32 %v4139_v3, 16 }
 0x829   : > { %v3917_v16 = vsel %vm285_vm1, %v19114_v0, %v14413_v52  ;;  %2810 = vrot.lane.b32.xlu0 %v14393_v49, %s11578_s7  ;;  %6212 = vrot.lane.b32.xlu1 %v5909_v59, %s11586_s12  ;;  %v5829_v52 = vmul.bf16 %v14494_v7, %v19104_v63  ;;  %v5914_v49 = vshll.u32 %v14494_v7, 16  ;;  %v14646_v22 = vrot.slane %v5869_v17, 1 }
 0x82a   : > { %v3966_v42 = vsel %vm940_vm0, %v3917_v16, %v14455_v28  ;;  %v6265_v48 = vsel %vm3492_vm11, %v14489_v53, %v6264_v11  ;;  %v5809_v43 = vmul.bf16 %v14492_v20, %v19115_v41  ;;  %v10358_v27 = vmul.f32 -1.442695, %v14611_v40 }
 0x82b   : > { %v4001_v1 = vsel %vm3997_vm10, %v3966_v42, %v14505_v32  ;;  %v5847_v32 = vmul.bf16 %v14492_v20, %v19107_v6  ;;  %v5910_v34 = vshrl.u32 %v14492_v20, 16  ;;  %v6462_v53 = vsel %vm3492_vm11, %v14552_v62, %v14646_v22 }
 0x82c   : > { %v4036_v28 = vsel %vm4032_vm12, %v4001_v1, %v14554_v10  ;;  %v14669_v17 = vrot.slane %v5829_v52, 1  ;;  %v4192_v46 = vrot.slane %v4190_v44, 3  ;;  %v4195_v0 = vrot.slane %v4193_v14, 4 }
 0x82d   : > { %v4071_v4 = vsel %vm4067_vm14, %v4036_v28, %v3722_v50  ;;  %6021 = vrot.lane.b32.xlu0 %v5909_v59, %s11583_s9  ;;  %6296 = vrot.lane.b32.xlu1 %v6265_v48, %s11579_s8  ;;  %v6818_v50 = vshrl.u32 %v6462_v53, 16  ;;  %v6821_v59 = vshll.u32 %v6462_v53, 16  ;;  %v5916_v42 = vrot.slane %v5914_v49, 1 }
 0x82e   : > { %v4106_v10 = vsel %vm4102_vm15, %v4071_v4, %v3773_v2  ;;  %v3831_v60 = vpop.permute.xlu1 %3830  ;;  %v14667_v3 = vpop.permute.xlu0 %3723  ;;  %v5922_v48 = vshll.u32 %v14513_v25, 16  ;;  %v5912_v2 = vor.u32 %v5910_v34, %v14562_v12  ;;  %11176 = vpow2.f32 %v10359_v9 }
 0x82f   : > { %v4141_v16 = vsel %vm4137_vm5, %v4106_v10, %v3831_v60  ;;  %v6820_v62 = vrot.slane %v6818_v50, 3  ;;  %v10214_v52 = vsel %vm14602_vm6, 1.0, %v18961_v31  ;;  %v6823_v44 = vrot.slane %v6821_v59, 4 }
 0x830   : > { %v4197_v1 = vshrl.u32 %v4141_v16, 16  ;;  %v4200_v28 = vshll.u32 %v4141_v16, 16  ;;  %v5918_v10 = vshrl.u32 %v14494_v7, 16  ;;  %11178 = vpow2.f32 %v10358_v27  ;;  %v19118_v16 = vld [vmem:[#allocation77_spill] sm:$0xff] }
 0x831   : > { %6156 = vrot.lane.b32.xlu0 %v5809_v43, %s11585_s11  ;;  %6347 = vrot.lane.b32.xlu1 %v5847_v32, %s11578_s7  ;;  %v11175_v60 = vpop.eup %11174  ;;  %v6267_v12 = vsel %vm3492_vm11, %v6264_v11, %v14669_v17  ;;  %v5790_v9 = vmul.bf16 %v14492_v20, %v19104_v63  ;;  %v14689_v29 = vor.u32 %v6823_v44, %v6820_v62  ;;  %v14698_v27 = vrot.slane %v5922_v48, 1  ;;  %v10589_v11 = vld [vmem:[%s18597_s3] sm:$0xff]   ;;  %v19120_v44 = vld [vmem:[#allocation52_spill] sm:$0xff] }
 0x832   : > { %v4199_v49 = vrot.slane %v4197_v1, 3  ;;  %v4202_v14 = vrot.slane %v4200_v28, 4  ;;  %v5698_v4 = vpop.permute.xlu1 %5697  ;;  %v14681_v53 = vpop.permute.xlu0 %3832  ;;  %v5870_v43 = vmul.bf16 %v14673_v51, %v14076_v47  ;;  %v4196_v32 = vor.u32 %v4195_v0, %v4192_v46 }
 0x833   : > { %5741 = vst.msk [vmem:[#allocation2 + $0x40] sm:$0xff] %vm285_vm1, %v5698_v4  ;;  %v14696_v50 = vsel %vm3305_vm9, %v5912_v2, %v5916_v42  ;;  %v19116_v20 = vpack.c.bf16 %v14550_v45, %v14546_v39  ;;  %11180 = vrcp.f32 %v14630_v5  ;;  %v14715_v46 = vsel %vm3049_vm8, %v14613_v18, %v14689_v29 }
 0x834   : > { %v14693_v34 = vor.u32 %v4202_v14, %v4199_v49  ;;  %19117 = vst [vmem:[#allocation62_spill] sm:$0xff] %v14715_v46  ;;  %v14717_v0 = vrot.slane %v5870_v43, 1  ;;  %v19119_v1 = vmul.bf16 %v19118_v16, %v19115_v41  ;;  %v5920_v45 = vor.u32 %v5918_v10, %v5916_v42  ;;  %v19121_v14 = vld [vmem:[#allocation56_spill] sm:$0xff]  ;;  %v10590_v10 = vld [vmem:[%s18597_s3 + $0x8] sm:$0xff]  }
 0x835   : > { %6298 = vrot.lane.b32.xlu0 %v6267_v12, %s11579_s8  ;;  %6405 = vrot.lane.b32.xlu1 %v14696_v50, %s11587_s13  ;;  %v14709_v59 = vrot.slane %v19116_v20, 4  ;;  %v321_v5 = vadd.s32 168, %v13310_v26  ;;  %v5791_v18 = vmul.bf16 %v14494_v7, %v13818_v15  ;;  %v6073_v4 = vrot.slane %v5790_v9, 1 }
 0x836   : > { %v3920_v28 = vsel %vm285_vm1, %v19119_v1, %v14574_v33  ;;  %v3531_v48 = vpop.permute.xlu1 %3530  ;;  %v5700_v62 = vpop.permute.xlu0 %5699  ;;  %v4204_v39 = vsel %vm3049_vm8, %v4196_v32, %v14693_v34  ;;  %v3887_v33 = vsel %vm3492_vm11, %v19120_v44, %v14401_v56  ;;  %v6464_v49 = vsel %vm3492_vm11, %v14646_v22, %v14717_v0  ;;  %v19122_v56 = vld [vmem:[#allocation60_spill] sm:$0xff] }
 0x837   : > { %v3968_v2 = vsel %vm940_vm0, %v3920_v28, %v3531_v48  ;;  %5742 = vst.msk [vmem:[#allocation2 + $0x48] sm:$0xff] %vm285_vm1, %v5700_v62  ;;  %4628 = vmatmul.mubr.bf16.vlgmr.msra.gmra.mrb[32].mxu0 %v4204_v39  ;;  %v14741_v42 = vsel %vm3305_vm9, %v5920_v45, %v14698_v27  ;;  %v6835_v12 = vshrl.u32 %v6464_v49, 16  ;;  %v6838_v43 = vshll.u32 %v6464_v49, 16 }
 0x838   : > { %10313 = vmatprep.mubr.msk.bf16.mxu0 %vm285_vm1, %v19121_v14  ;;  %7166 = vmatpush1.bf16.msra.mxu0 %v10589_v11  ;;  %v14752_v22 = vmul.f32 %v14430_v35, %v19122_v56  ;;  %11182 = vrcp.f32 %v14595_v55  ;;  %v933_v9 = vpack.c.bf16 %v10214_v52, %v18963_v13  ;;  %v323_v32 = vadd.s32 184, %v13310_v26  ;;  %v11177_v48 = vpop.eup %11176 }
 0x839   : > { %6407 = vrot.lane.b32.xlu0 %v14741_v42, %s11587_s13  ;;  %5707 = vrot.lane.b32.xlu1 %v14411_v57, %s11579_s8  ;;  %v4003_v20 = vsel %vm3997_vm10, %v3968_v2, %v14638_v21  ;;  %v2717_v1 = vmul.f32 %v11175_v60, %v14368_v23  ;;  %v19123_v28 = vmov 0   ;;  %v14764_v57 = vadd.s32 144, %v13310_v26  ;;  %v10591_v60 = vld [vmem:[%s18597_s3 + $0x10] sm:$0xff]  }
 0x83a   : > { %v3640_v11 = vpop.permute.xlu1 %3639  ;;  %v14759_v16 = vpop.permute.xlu0 %3532  ;;  %7167 = vmatprep.subr.bf16.mxu0 %v19123_v28  ;;  %v483_v35 = vand.u32 15, %v321_v5  ;;  %v5678_v52 = vsel %vm2752_vm4, %v14373_v19, %v14709_v59  ;;  %v4248_v62 = vshrl.u32 %v3887_v33, 16  ;;  %v4251_v39 = vshll.u32 %v3887_v33, 16  ;;  %v19124_v19 = vld [vmem:[#allocation50_spill] sm:$0xff] }
 0x83b   : > { %v4038_v55 = vsel %vm4032_vm12, %v4003_v20, %v3640_v11  ;;  %v11179_v21 = vpop.eup %11178  ;;  %v6074_v45 = vsel %vm3492_vm11, %v14538_v58, %v6073_v4  ;;  %v14772_v23 = vrot.slane %v5791_v18, 1  ;;  %v6837_v5 = vrot.slane %v6835_v12, 3  ;;  %v14790_v56 = vld [vmem:[#allocation2 + $0x40] sm:$0xff] }
 0x83c   : > { %7168 = vmatpush1.bf16.msra.mxu0 %v10590_v10  ;;  %v6840_v2 = vrot.slane %v6838_v43, 4  ;;  %v14781_v44 = vmul.f32 %v14474_v37, %v19124_v19  ;;  %v3131_v33 = vshrl.u32 %v933_v9, 16  ;;  %v3134_v49 = vshll.u32 %v933_v9, 16 }
 0x83d   : > { %5709 = vrot.lane.b32.xlu0 %v5678_v52, %s11579_s8  ;;  %6105 = vrot.lane.b32.xlu1 %v6074_v45, %s11584_s10  ;;  %v497_v58 = vand.u32 15, %v323_v32  ;;  %v4073_v14 = vsel %vm4067_vm14, %v4038_v55, %v14667_v3  ;;  %v2734_v12 = vpack.c.bf16 %v2717_v1, %v14752_v22  ;;  %v2719_v43 = vmul.f32 %v14648_v24, %v14301_v54  ;;  %v11181_v9 = vpop.eup %11180  ;;  %v10592_v1 = vld [vmem:[%s18597_s3 + $0x18] sm:$0xff]   ;;  %v19130_v45 = vld [vmem:[#allocation46_spill] sm:$0xff] }
 0x83e   : > { %v3775_v18 = vpop.permute.xlu1 %3774  ;;  %v14785_v10 = vpop.permute.xlu0 %3641  ;;  %7169 = vmatprep.subr.bf16.mxu0 %v19123_v28  ;;  %vm14793_vm2 = vcmp.ne.s32.totalorder %v483_v35, 15  ;;  %v4250_v11 = vrot.slane %v4248_v62, 3  ;;  %v4253_v3 = vrot.slane %v4251_v39, 4  ;;  %v5522_v20 = vadd.f32 1.0, %v11179_v21 }
 0x83f   : > { %v4108_v32 = vsel %vm4102_vm15, %v4073_v14, %v3775_v18  ;;  %v6076_v54 = vsel %vm3492_vm11, %v6073_v4, %v14772_v23  ;;  %v5523_v24 = vadd.f32 1.0, %v11177_v48  ;;  %v14805_v35 = vor.u32 %v6840_v2, %v6837_v5  ;;  %v19129_v4 = vld [vmem:[#allocation73_spill] sm:$0xff] }
 0x840   : > { %v4143_v22 = vsel %vm4137_vm5, %v4108_v32, %v14681_v53  ;;  %7170 = vmatpush1.bf16.msra.mxu0 %v10591_v60  ;;  %vm14810_vm7 = vcmp.ne.s32.totalorder %v497_v58, 15  ;;  %v5871_v48 = vmul.bf16 %v14790_v56, %v19129_v4  ;;  %v2735_v21 = vpack.c.bf16 %v2719_v43, %v14781_v44  ;;  %v14826_v32 = vld [vmem:[#allocation2 + $0x48] sm:$0xff] }
 0x841   : > { %v4222_v55 = vshrl.u32 %v4143_v22, 16  ;;  %v4225_v52 = vshll.u32 %v4143_v22, 16  ;;  %6107 = vrot.lane.b32.xlu0 %v6076_v54, %s11584_s10  ;;  %6214 = vrot.lane.b32.xlu1 %v14696_v50, %s11586_s12  ;;  %v14820_v60 = vmul.f32 %v11181_v9, %v19130_v45  ;;  %v3133_v5 = vrot.slane %v3131_v33, 3  ;;  %v19135_v45 = vld [vmem:[#allocation81_spill] sm:$0xff] }
 0x842   : > { %v2803_v62 = vpop.permute.xlu1 %2802  ;;  %v14816_v39 = vpop.permute.xlu0 %3776  ;;  %v3136_v2 = vrot.slane %v3134_v49, 4  ;;  %7171 = vmatprep.subr.bf16.mxu0 %v19123_v28  ;;  %v5848_v14 = vmul.bf16 %v14494_v7, %v19115_v41  ;;  %11184 = vrcp.f32 %v5522_v20  ;;  %v2780_v22 = vrot.slane %v2734_v12, 4  ;;  %v19132_v20 = vld [vmem:[#allocation51_spill] sm:$0xff] }
 0x843   : > { %v11183_v19 = vpop.eup %11182  ;;  %v4224_v58 = vrot.slane %v4222_v55, 3  ;;  %v4227_v18 = vrot.slane %v4225_v52, 4  ;;  %2844 = vst.msk [vmem:[#allocation2 + $0x50] sm:$0xff] %vm285_vm1, %v2803_v62  ;;  %v10215_v44 = vsel %vm14793_vm2, 1.0, %v18961_v31  ;;  %v10216_v33 = vsel %vm14810_vm7, 1.0, %v18961_v31  ;;  %v19133_v52 = vld [vmem:[#allocation66_spill] sm:$0xff] }
 0x844   : > { %7172 = vmatpush1.bf16.msra.mxu0 %v10592_v1  ;;  %v14837_v49 = vsel %vm3049_vm8, %v14689_v29, %v14805_v35  ;;  %v14844_v43 = vor.u32 %v4253_v3, %v4250_v11  ;;  %11186 = vrcp.f32 %v5523_v24  ;;  %v6465_v37 = vrot.slane %v5871_v48, 1  ;;  %v10593_v29 = vld [vmem:[%s18597_s3 + $0x20] sm:$0xff]  }
 0x845   : > { %19131 = vst [vmem:[#allocation68_spill] sm:$0xff] %v14837_v49  ;;  %6216 = vrot.lane.b32.xlu0 %v14741_v42, %s11586_s12  ;;  %6349 = vrot.lane.b32.xlu1 %v5848_v14, %s11578_s7  ;;  %v14842_v12 = vor.u32 %v4227_v18, %v4224_v58  ;;  %v14847_v54 = vmul.f32 %v11183_v19, %v19132_v20  ;;  %v19134_v24 = vld [vmem:[#allocation42_spill] sm:$0xff]  ;;  %v320_v49 = vadd.s32 160, %v13310_v26 }
 0x846   : > { %v2805_v9 = vpop.permute.xlu0 %2804  ;;  %v14849_v1 = vor.u32 %v3136_v2, %v3133_v5  ;;  %7173 = vmatprep.subr.bf16.mxu0 %v19123_v28  ;;  %v5872_v11 = vmul.bf16 %v14826_v32, %v19133_v52  ;;  %v5849_v53 = vmul.bf16 %v14513_v25, %v19134_v24  ;;  %v934_v48 = vpack.c.bf16 %v10215_v44, %v18963_v13 }
 0x847   : > { %2845 = vst.msk [vmem:[#allocation2 + $0x58] sm:$0xff] %vm285_vm1, %v2805_v9  ;;  %v4229_v3 = vsel %vm3049_vm8, %v14693_v34, %v14842_v12  ;;  %v935_v62 = vpack.c.bf16 %v10216_v33, %v18963_v13  ;;  %v2781_v5 = vsel %vm2752_vm4, %v19135_v45, %v2780_v22  ;;  %v14868_v2 = vrot.slane %v2735_v21, 4  ;;  %v19136_v34 = vld [vmem:[#allocation72_spill] sm:$0xff]  ;;  %v10594_v9 = vld [vmem:[%s18597_s3 + $0x28] sm:$0xff]  }
 0x848   : > { %4636 = vmatmul.mubr.bf16.gmra.mrb[36].mxu0 %v4229_v3  ;;  %v6466_v19 = vsel %vm3492_vm11, %v14717_v0, %v6465_v37  ;;  %v14872_v58 = vrot.slane %v5872_v11, 1  ;;  %v4255_v18 = vsel %vm3049_vm8, %v19136_v34, %v14844_v43  ;;  %v5830_v14 = vmul.bf16 %v14513_v25, %v13818_v15 }
 0x849   : > { %6351 = vrot.lane.b32.xlu0 %v5849_v53, %s11578_s7  ;;  %2812 = vrot.lane.b32.xlu1 %v2781_v5, %s11578_s7  ;;  %v5634_v21 = vpack.c.bf16 %v14820_v60, %v14847_v54  ;;  %v6852_v44 = vshrl.u32 %v6466_v19, 16  ;;  %v2783_v0 = vsel %vm2752_vm4, %v2780_v22, %v14868_v2  ;;  %v5930_v33 = vshll.u32 %v14586_v30, 16 }
 0x84a   : > { %10314 = vmatprep.mubr.msk.bf16.mxu0 %vm285_vm1, %v4255_v18  ;;  %7174 = vmatpush1.bf16.msra.mxu0 %v10593_v29  ;;  %v6855_v20 = vshll.u32 %v6466_v19, 16  ;;  %v6468_v11 = vsel %vm3492_vm11, %v6465_v37, %v14872_v58  ;;  %v5810_v60 = vmul.bf16 %v14494_v7, %v19134_v24  ;;  %v3140_v54 = vshrl.u32 %v934_v48, 16 }
 0x84b   : > { %7175 = vmatprep.subr.bf16.mxu0 %v19123_v28  ;;  %v3143_v3 = vshll.u32 %v934_v48, 16  ;;  %v3149_v53 = vshrl.u32 %v935_v62, 16  ;;  %v5926_v22 = vshrl.u32 %v14513_v25, 16  ;;  %v3152_v45 = vshll.u32 %v935_v62, 16 }
 0x84c   : > { %v6854_v29 = vrot.slane %v6852_v44, 3  ;;  %v6857_v5 = vrot.slane %v6855_v20, 4  ;;  %v11185_v34 = vpop.eup %11184  ;;  %v6268_v37 = vrot.slane %v5830_v14, 1  ;;  %v5831_v7 = vmul.bf16 %v14586_v30, %v14076_v47  ;;  %v10595_v44 = vld [vmem:[%s18597_s3 + $0x30] sm:$0xff]  }
 0x84d   : > { %2814 = vrot.lane.b32.xlu0 %v2783_v0, %s11578_s7  ;;  %6023 = vrot.lane.b32.xlu1 %v14696_v50, %s11583_s9  ;;  %v6869_v19 = vshrl.u32 %v6468_v11, 16  ;;  %v6872_v18 = vshll.u32 %v6468_v11, 16  ;;  %v5932_v55 = vrot.slane %v5930_v33, 1  ;;  %v5938_v48 = vshll.u32 %v14673_v51, 16 }
 0x84e   : > { %v5792_v62 = vmul.bf16 %v14513_v25, %v14076_v47  ;;  %7176 = vmatpush1.bf16.msra.mxu0 %v10594_v9  ;;  %v6858_v0 = vor.u32 %v6857_v5, %v6854_v29  ;;  %v11187_v20 = vpop.eup %11186  ;;  %v3142_v50 = vrot.slane %v3140_v54, 3  ;;  %v3145_v14 = vrot.slane %v3143_v3, 4  ;;  %v3448_v47 = vpop.permute.xlu1 %3447 }
 0x84f   : > { %7177 = vmatprep.subr.bf16.mxu0 %v19123_v28  ;;  %v3151_v15 = vrot.slane %v3149_v53, 3  ;;  %v6871_v63 = vrot.slane %v6869_v19, 3  ;;  %v5618_v33 = vmul.f32 %v11185_v34, %v14611_v40  ;;  %v3154_v11 = vrot.slane %v3152_v45, 4  ;;  %v19138_v53 = vld [vmem:[#allocation70_spill] sm:$0xff] }
 0x850   : > { %v14911_v36 = vsel %vm3049_vm8, %v14805_v35, %v6858_v0  ;;  %v6874_v9 = vrot.slane %v6872_v18, 4  ;;  %v5928_v29 = vor.u32 %v5926_v22, %v14698_v27  ;;  %v14917_v54 = vrot.slane %v5634_v21, 4  ;;  %v19139_v45 = vld [vmem:[#allocation74_spill] sm:$0xff] }
 0x851   : > { %19137 = vst [vmem:[#allocation40_spill] sm:$0xff] %v14911_v36  ;;  %6025 = vrot.lane.b32.xlu0 %v14741_v42, %s11583_s9  ;;  %6158 = vrot.lane.b32.xlu1 %v5810_v60, %s11585_s11  ;;  %v5934_v3 = vshrl.u32 %v14586_v30, 16  ;;  %v3378_v40 = vshll.u32 %v19138_v53, 16  ;;  %v5811_v5 = vmul.bf16 %v14513_v25, %v19139_v45  ;;  %v14923_v35 = vrot.slane %v5938_v48, 1  ;;  %v10596_v42 = vld [vmem:[%s18597_s3 + $0x38] sm:$0xff]  }
 0x852   : > { %v5619_v34 = vmul.f32 %v11187_v20, %v14598_v61  ;;  %7178 = vmatpush1.bf16.msra.mxu0 %v10595_v44  ;;  %v14929_v60 = vor.u32 %v6874_v9, %v6871_v63  ;;  %v6269_v27 = vsel %vm3492_vm11, %v14669_v17, %v6268_v37  ;;  %v14933_v21 = vrot.slane %v5831_v7, 1  ;;  %v14938_v61 = vld [vmem:[#allocation2 + $0x50] sm:$0xff]  ;;  %v3584_v9 = vpop.permute.xlu1 %3583 }
 0x853   : > { %v5936_v22 = vor.u32 %v5934_v3, %v5932_v55  ;;  %v3146_v19 = vor.u32 %v3145_v14, %v3142_v50  ;;  %7179 = vmatprep.subr.bf16.mxu0 %v19123_v28  ;;  %v14936_v25 = vrot.slane %v5792_v62, 1  ;;  %19140 = vst [vmem:[#allocation85_spill] sm:$0xff] %v14938_v61  ;;  %v14940_v48 = vor.u32 %v3154_v11, %v3151_v15  ;;  %v19142_v62 = vld [vmem:[#allocation67_spill] sm:$0xff] }
 0x854   : > { %v5635_v18 = vpack.c.bf16 %v5619_v34, %v5618_v33  ;;  %v14944_v63 = vsel %vm3049_vm8, %v6858_v0, %v14929_v60  ;;  %v14949_v17 = vsel %vm3305_vm9, %v5928_v29, %v5932_v55  ;;  %v5680_v7 = vsel %vm2752_vm4, %v14709_v59, %v14917_v54  ;;  %v19145_v0 = vld [vmem:[#allocation48_spill] sm:$0xff] }
 0x855   : > { %19141 = vst [vmem:[#allocation84_spill] sm:$0xff] %v14944_v63  ;;  %6160 = vrot.lane.b32.xlu0 %v5811_v5, %s11585_s11  ;;  %6300 = vrot.lane.b32.xlu1 %v6269_v27, %s11579_s8  ;;  %v14957_v15 = vsel %vm3049_vm8, %v19142_v62, %v14849_v1  ;;  %v14959_v44 = vrot.slane %v3378_v40, 1  ;;  %v19146_v20 = vmul.bf16 %v19134_v24, %v19145_v0  ;;  %v19147_v33 = vand.u32 15, %v14764_v57  ;;  %v19152_v57 = vld [vmem:[#allocation38_spill] sm:$0xff]  ;;  %v15006_v62 = vpop.permute.xlu0 %3449 }
 0x856   : > { %19143 = vst [vmem:[#allocation75_spill] sm:$0xff] %v14957_v15  ;;  %v6271_v55 = vsel %vm3492_vm11, %v6268_v37, %v14933_v21  ;;  %v14969_v14 = vsel %vm3305_vm9, %v5936_v22, %v14923_v35  ;;  %v5793_v59 = vmul.bf16 %v14586_v30, %v19129_v4  ;;  %7180 = vmatpush1.bf16.msra.mxu0 %v10596_v42  ;;  %v14982_v37 = vld [vmem:[#allocation2 + $0x58] sm:$0xff]  ;;  %v3382_v40 = vshrl.u32 %v19138_v53, 16  ;;  %v19166_v63 = vld [vmem:[#allocation58_spill] sm:$0xff] }
 0x857   : > { %19144 = vst [vmem:[#allocation77_spill] sm:$0xff] %v14959_v44  ;;  %v3923_v50 = vsel %vm285_vm1, %v19146_v20, %v3448_v47  ;;  %vm14975_vm6 = vcmp.ne.s32.totalorder %v19147_v33, 0  ;;  %v10597_v47 = vld [vmem:[%s18597_s3 + $0x40] sm:$0xff]   ;;  %19150 = vst [vmem:[#allocation52_spill] sm:$0xff] %v14982_v37  ;;  %v14986_v29 = vsel %vm3049_vm8, %v14849_v1, %v3146_v19  ;;  %7181 = vmatprep.subr.bf16.mxu0 %v19123_v28  ;;  %v3386_v5 = vshll.u32 %v14938_v61, 16 }
 0x858   : > { %19151 = vst [vmem:[#allocation56_spill] sm:$0xff] %v14986_v29  ;;  %v3257_v3 = vmul.bf16 %v19152_v57, %v19138_v53  ;;  %v6078_v34 = vsel %vm3492_vm11, %v14772_v23, %v14936_v25  ;;  %v14996_v42 = vrot.slane %v5635_v18, 4  ;;  %v15000_v27 = vsel %vm3049_vm8, %v3146_v19, %v14940_v48 }
 0x859   : > { %19153 = vst [vmem:[#allocation60_spill] sm:$0xff] %v15000_v27  ;;  %v3219_v1 = vmul.bf16 %v14957_v15, %v19138_v53  ;;  %v3970_v22 = vsel %vm940_vm0, %v3923_v50, %v14759_v16  ;;  %6409 = vrot.lane.b32.xlu1 %v14949_v17, %s11587_s13  ;;  %6302 = vrot.lane.b32.xlu0 %v6271_v55, %s11579_s8  ;;  %v3388_v18 = vrot.slane %v3386_v5, 1  ;;  %v3390_v20 = vshrl.u32 %v14938_v61, 16 }
 0x85a   : > { %v3384_v23 = vor.u32 %v3382_v40, %v14959_v44  ;;  %v3258_v19 = vmul.bf16 %v14957_v15, %v14938_v61  ;;  %v4005_v0 = vsel %vm3997_vm10, %v3970_v22, %v3584_v9  ;;  %7182 = vmatpush1.bf16.msra.mxu0 %v10597_v47  ;;  %v3394_v16 = vshll.u32 %v14982_v37, 16  ;;  %v3726_v9 = vpop.permute.xlu1 %3725 }
 0x85b   : > { %v3220_v50 = vmul.bf16 %v14986_v29, %v14938_v61  ;;  %v15019_v33 = vrot.slane %v3257_v3, 1  ;;  %v15024_v40 = vrot.slane %v3219_v1, 1  ;;  %v3392_v53 = vor.u32 %v3390_v20, %v3388_v18 }
 0x85c   : > { %v15022_v55 = vsel %vm3305_vm9, %v3384_v23, %v3388_v18  ;;  %v3703_v5 = vrot.slane %v3258_v19, 1  ;;  %v3396_v44 = vrot.slane %v3394_v16, 1  ;;  %v3296_v47 = vmul.bf16 %v19152_v57, %v14938_v61 }
 0x85d   : > { %19154 = vst [vmem:[#allocation50_spill] sm:$0xff] %v15019_v33  ;;  %19155 = vst [vmem:[#allocation46_spill] sm:$0xff] %v15022_v55  ;;  %v3512_v28 = vrot.slane %v3220_v50, 1  ;;  %5711 = vrot.lane.b32.xlu1 %v5680_v7, %s11579_s8  ;;  %6411 = vrot.lane.b32.xlu0 %v14969_v14, %s11587_s13  ;;  %v325_v3 = vadd.s32 200, %v13310_v26  ;;  %v3259_v1 = vmul.bf16 %v14986_v29, %v14982_v37  ;;  %v3398_v23 = vshrl.u32 %v14982_v37, 16  ;;  %v15049_v50 = vpop.permute.xlu0 %3585 }
 0x85e   : > { %19156 = vst [vmem:[#allocation51_spill] sm:$0xff] %v15024_v40  ;;  %v15034_v22 = vsel %vm3492_vm11, %v15019_v33, %v3703_v5  ;;  %v327_v18 = vadd.s32 216, %v13310_v26  ;;  %v15041_v19 = vsel %vm3305_vm9, %v3392_v53, %v3396_v44  ;;  %v3894_v20 = vrot.slane %v3296_v47, 1 }
 0x85f   : > { %19157 = vst [vmem:[#allocation81_spill] sm:$0xff] %v15034_v22  ;;  %19158 = vst [vmem:[#allocation72_spill] sm:$0xff] %v15041_v19  ;;  %v15045_v7 = vsel %vm3492_vm11, %v15024_v40, %v3512_v28  ;;  %v4040_v16 = vsel %vm4032_vm12, %v4005_v0, %v14785_v10  ;;  %v15051_v22 = vrot.slane %v3259_v1, 1  ;;  %v15053_v61 = vor.u32 %v3398_v23, %v3396_v44 }
 0x860   : > { %19159 = vst [vmem:[#allocation67_spill] sm:$0xff] %v15045_v7  ;;  %v3221_v55 = vmul.bf16 %v15000_v27, %v14982_v37  ;;  %v4075_v53 = vsel %vm4067_vm14, %v4040_v16, %v3726_v9  ;;  %v5682_v19 = vsel %vm2752_vm4, %v14917_v54, %v14996_v42  ;;  %v19160_v7 = vld [vmem:[#allocation83_spill] sm:$0xff]  ;;  %v3297_v10 = vmul.bf16 %v14957_v15, %v14982_v37  ;;  %v19162_v37 = vld [vmem:[#allocation80_spill] sm:$0xff] }
 0x861   : > { %v3895_v47 = vsel %vm3492_vm11, %v19160_v7, %v3894_v20  ;;  %6109 = vrot.lane.b32.xlu1 %v6078_v34, %s11584_s10  ;;  %5713 = vrot.lane.b32.xlu0 %v5682_v19, %s11579_s8  ;;  %v15067_v44 = vrot.slane %v5793_v59, 1  ;;  %v10198_v0 = vsel %vm14975_vm6, 1.0, %v18961_v31  ;;  %v15074_v9 = vsel %vm3492_vm11, %v3703_v5, %v15051_v22 }
 0x862   : > { %19161 = vst [vmem:[#allocation48_spill] sm:$0xff] %v15074_v9  ;;  %v15076_v54 = vrot.slane %v3221_v55, 1  ;;  %v511_v1 = vand.u32 15, %v325_v3  ;;  %v4316_v23 = vshrl.u32 %v3895_v47, 16  ;;  %v4319_v7 = vshll.u32 %v3895_v47, 16 }
 0x863   : > { %v15078_v16 = vrot.slane %v3297_v10, 1  ;;  %v3835_v34 = vpop.permute.xlu1 %3834  ;;  %v4110_v59 = vsel %vm4102_vm15, %v4075_v53, %v14816_v39  ;;  %v15082_v19 = vpop.permute.xlu0 %3727  ;;  %v2945_v11 = vshll.u32 %v19162_v37, 16  ;;  %v525_v40 = vand.u32 15, %v327_v18 }
 0x864   : > { %v15087_v5 = vsel %vm3492_vm11, %v3512_v28, %v15076_v54  ;;  %v4145_v55 = vsel %vm4137_vm5, %v4110_v59, %v3835_v34  ;;  %v6080_v3 = vsel %vm3492_vm11, %v14936_v25, %v15067_v44  ;;  %v821_v47 = vpack.c.bf16 %v18963_v13, %v10198_v0 }
 0x865   : > { %19163 = vst [vmem:[#allocation83_spill] sm:$0xff] %v15087_v5  ;;  %v3897_v39 = vsel %vm3492_vm11, %v3894_v20, %v15078_v16  ;;  %v4239_v53 = vshrl.u32 %v4145_v55, 16  ;;  %v4242_v10 = vshll.u32 %v4145_v55, 16  ;;  %6218 = vrot.lane.b32.xlu1 %v14949_v17, %s11586_s12  ;;  %6111 = vrot.lane.b32.xlu0 %v6080_v3, %s11584_s10  ;;  %v5850_v28 = vmul.bf16 %v14586_v30, %v19139_v45 }
 0x866   : > { %v4333_v18 = vshrl.u32 %v3897_v39, 16  ;;  %vm15101_vm2 = vcmp.ne.s32.totalorder %v511_v1, 15  ;;  %v4318_v25 = vrot.slane %v4316_v23, 3  ;;  %v4321_v0 = vrot.slane %v4319_v7, 4 }
 0x867   : > { %v4336_v59 = vshll.u32 %v3897_v39, 16  ;;  %v4241_v5 = vrot.slane %v4239_v53, 3  ;;  %v4244_v20 = vrot.slane %v4242_v10, 4  ;;  %v5702_v9 = vpop.permute.xlu1 %5701  ;;  %v15105_v55 = vpop.permute.xlu0 %3836  ;;  %vm855_vm7 = vcmp.ne.s32.totalorder %v525_v40, 15 }
 0x868   : > { %v4335_v33 = vrot.slane %v4333_v18, 3  ;;  %v3034_v3 = vmul.bf16 %v19139_v45, %v19166_v63  ;;  %5743 = vst.msk [vmem:[#allocation2 + $0x50] sm:$0xff] %vm285_vm1, %v5702_v9  ;;  %v19167_v1 = vshrl.u32 %v19162_v37, 16  ;;  %v2951_v40 = vshrl.u32 %v821_v47, 16 }
 0x869   : > { %v4338_v23 = vrot.slane %v4336_v59, 4  ;;  %v15113_v7 = vor.u32 %v4244_v20, %v4241_v5  ;;  %6353 = vrot.lane.b32.xlu1 %v5850_v28, %s11578_s7  ;;  %6220 = vrot.lane.b32.xlu0 %v14969_v14, %s11586_s12  ;;  %v2954_v39 = vshll.u32 %v821_v47, 16  ;;  %v10217_v63 = vsel %vm15101_vm2, 1.0, %v18961_v31  ;;  %v19169_v59 = vld [vmem:[#allocation76_spill] sm:$0xff] }
 0x86a   : > { %v2944_v36 = vrot.slane %v19167_v1, 4  ;;  %v2947_v9 = vrot.slane %v2945_v11, 5  ;;  %v10218_v37 = vsel %vm855_vm7, 1.0, %v18961_v31  ;;  %v15122_v53 = vor.u32 %v4321_v0, %v4318_v25 }
 0x86b   : > { %v15124_v10 = vor.u32 %v4338_v23, %v4335_v33  ;;  %v3926_v5 = vsel %vm285_vm1, %v3034_v3, %v15006_v62  ;;  %v3535_v28 = vpop.permute.xlu1 %3534  ;;  %v5704_v18 = vpop.permute.xlu0 %5703  ;;  %v4246_v47 = vsel %vm3049_vm8, %v14842_v12, %v15113_v7  ;;  %v5851_v34 = vmul.bf16 %v14673_v51, %v19169_v59  ;;  %v19171_v12 = vld [vmem:[#allocation87_spill] sm:$0xff] }
 0x86c   : > { %19168 = vst [vmem:[#allocation80_spill] sm:$0xff] %v15122_v53  ;;  %v5794_v11 = vmul.bf16 %v14673_v51, %v19133_v52  ;;  %v3972_v25 = vsel %vm940_vm0, %v3926_v5, %v3535_v28  ;;  %5744 = vst.msk [vmem:[#allocation2 + $0x58] sm:$0xff] %vm285_vm1, %v5704_v18  ;;  %4644 = vmatmul.mubr.bf16.gmra.mrb[40].mxu0 %v4246_v47  ;;  %v476_v33 = vand.u32 15, %v320_v49  ;;  %v2953_v3 = vrot.slane %v2951_v40, 4  ;;  %v19173_v5 = vld [vmem:[#allocation36_spill] sm:$0xff]  ;;  %v19177_v47 = vld [vmem:[#allocation61_spill] sm:$0xff] }
 0x86d   : > { %v936_v62 = vpack.c.bf16 %v10217_v63, %v18963_v13  ;;  %v15141_v0 = vsel %vm3049_vm8, %v15122_v53, %v15124_v10  ;;  %2816 = vrot.lane.b32.xlu1 %v14868_v2, %s11578_s7  ;;  %6355 = vrot.lane.b32.xlu0 %v5851_v34, %s11578_s7  ;;  %v4272_v20 = vsel %vm3049_vm8, %v14844_v43, %v19171_v12  ;;  %v2956_v1 = vrot.slane %v2954_v39, 5  ;;  %v19172_v63 = vld [vmem:[#allocation54_spill] sm:$0xff]  ;;  %v19175_v2 = vld [vmem:[#allocation65_spill] sm:$0xff] }
 0x86e   : > { %19170 = vst [vmem:[#allocation58_spill] sm:$0xff] %v15141_v0  ;;  %v937_v49 = vpack.c.bf16 %v10218_v37, %v18963_v13  ;;  %10315 = vmatprep.mubr.msk.bf16.mxu0 %vm285_vm1, %v4272_v20  ;;  %v5832_v23 = vmul.bf16 %v14673_v51, %v19129_v4  ;;  %v15156_v28 = vsel %vm2869_vm13, %v19173_v5, %v19172_v63  ;;  %v15167_v37 = vrot.slane %v5794_v11, 1 }
 0x86f   : > { %19174 = vst [vmem:[#allocation87_spill] sm:$0xff] %v15156_v28  ;;  %v15161_v18 = vsel %vm2869_vm13, %v19172_v63, %v19175_v2  ;;  %v3644_v43 = vpop.permute.xlu1 %3643  ;;  %v4007_v40 = vsel %vm3997_vm10, %v3972_v25, %v15049_v50  ;;  %v15165_v39 = vpop.permute.xlu0 %3536  ;;  %v15171_v12 = vor.u32 %v2947_v9, %v2944_v36  ;;  %v5946_v5 = vshll.u32 %v14790_v56, 16 }
 0x870   : > { %19176 = vst [vmem:[#allocation54_spill] sm:$0xff] %v15161_v18  ;;  %v4042_v20 = vsel %vm4032_vm12, %v4007_v40, %v3644_v43  ;;  %vm15175_vm6 = vcmp.ne.s32.totalorder %v476_v33, 0  ;;  %v3158_v4 = vshrl.u32 %v936_v62, 16  ;;  %v15183_v50 = vor.u32 %v2956_v1, %v2953_v3  ;;  %v15199_v3 = vld [vmem:[#allocation2 + $0x50] sm:$0xff] }
 0x871   : > { %6027 = vrot.lane.b32.xlu1 %v14949_v17, %s11583_s9  ;;  %5715 = vrot.lane.b32.xlu0 %v14996_v42, %s11579_s8  ;;  %v3161_v11 = vshll.u32 %v936_v62, 16  ;;  %v3167_v36 = vshrl.u32 %v937_v49, 16  ;;  %v3170_v9 = vshll.u32 %v937_v49, 16  ;;  %v5812_v25 = vmul.bf16 %v14586_v30, %v19169_v59 }
 0x872   : > { %v15187_v43 = vrot.slane %v5832_v23, 1  ;;  %v5942_v33 = vshrl.u32 %v14673_v51, 16  ;;  %v4077_v17 = vsel %vm4067_vm14, %v4042_v20, %v15082_v19  ;;  %v6082_v62 = vsel %vm3492_vm11, %v15067_v44, %v15167_v37 }
 0x873   : > { %v3779_v34 = vpop.permute.xlu1 %3778  ;;  %v15194_v42 = vpop.permute.xlu0 %3645  ;;  %v10199_v30 = vsel %vm15175_vm6, 1.0, %v18961_v31  ;;  %v15205_v1 = vadd.s32 176, %v13310_v26  ;;  %v5948_v23 = vrot.slane %v5946_v5, 1  ;;  %v3160_v40 = vrot.slane %v3158_v4, 3 }
 0x874   : > { %v4112_v49 = vsel %vm4102_vm15, %v4077_v17, %v3779_v34  ;;  %v15209_v19 = vadd.s32 192, %v13310_v26  ;;  %v3163_v44 = vrot.slane %v3161_v11, 4  ;;  %v3169_v63 = vrot.slane %v3167_v36, 3  ;;  %v15225_v11 = vld [vmem:[#allocation2 + $0x58] sm:$0xff] }
 0x875   : > { %v4147_v20 = vsel %vm4137_vm5, %v4112_v49, %v15105_v55  ;;  %6162 = vrot.lane.b32.xlu1 %v5812_v25, %s11585_s11  ;;  %6113 = vrot.lane.b32.xlu0 %v6082_v62, %s11584_s10  ;;  %v3172_v0 = vrot.slane %v3170_v9, 4  ;;  %v5944_v46 = vor.u32 %v5942_v33, %v14923_v35  ;;  %v5873_v4 = vmul.bf16 %v15199_v3, %v19152_v57 }
 0x876   : > { %v4256_v53 = vshrl.u32 %v4147_v20, 16  ;;  %v4259_v45 = vshll.u32 %v4147_v20, 16  ;;  %v6273_v55 = vsel %vm3492_vm11, %v14933_v21, %v15187_v43  ;;  %v5833_v25 = vmul.bf16 %v14790_v56, %v19133_v52 }
 0x877   : > { %v2807_v34 = vpop.permute.xlu1 %2806  ;;  %v15218_v5 = vpop.permute.xlu0 %3780  ;;  %v15228_v36 = vpack.c.bf16 %v18963_v13, %v10199_v30  ;;  %v329_v35 = vadd.s32 232, %v13310_v26  ;;  %v5949_v17 = vsel %vm3305_vm9, %v5944_v46, %v5948_v23  ;;  %v5852_v21 = vmul.bf16 %v14790_v56, %v15156_v28 }
 0x878   : > { %v4258_v9 = vrot.slane %v4256_v53, 3  ;;  %v4261_v33 = vrot.slane %v4259_v45, 4  ;;  %2846 = vst.msk [vmem:[#allocation2 + $0x60] sm:$0xff] %vm285_vm1, %v2807_v34  ;;  %v3164_v49 = vor.u32 %v3163_v44, %v3160_v40  ;;  %v15238_v30 = vor.u32 %v3172_v0, %v3169_v63 }
 0x879   : > { %6304 = vrot.lane.b32.xlu1 %v6273_v55, %s11579_s8  ;;  %6222 = vrot.lane.b32.xlu0 %v5949_v17, %s11586_s12  ;;  %v5795_v45 = vmul.bf16 %v14790_v56, %v19152_v57  ;;  %v6469_v46 = vrot.slane %v5873_v4, 1  ;;  %v5874_v34 = vmul.bf16 %v15225_v11, %v14957_v15  ;;  %v6274_v52 = vrot.slane %v5833_v25, 1 }
 0x87a   : > { %v15241_v53 = vor.u32 %v4261_v33, %v4258_v9  ;;  %v5834_v24 = vmul.bf16 %v14826_v32, %v19152_v57  ;;  %v5950_v0 = vshrl.u32 %v14790_v56, 16  ;;  %v539_v40 = vand.u32 15, %v329_v35 }
 0x87b   : > { %v3452_v55 = vpop.permute.xlu1 %3451  ;;  %v2809_v62 = vpop.permute.xlu0 %2808  ;;  %v19180_v44 = vmul.bf16 %v19169_v59, %v19177_v47  ;;  %v5954_v9 = vshll.u32 %v14826_v32, 16  ;;  %v6470_v25 = vsel %vm3492_vm11, %v14872_v58, %v6469_v46  ;;  %v15265_v47 = vsel %vm3049_vm8, %v14940_v48, %v3164_v49 }
 0x87c   : > { %2847 = vst.msk [vmem:[#allocation2 + $0x68] sm:$0xff] %vm285_vm1, %v2809_v62  ;;  %v4263_v4 = vsel %vm3049_vm8, %v15113_v7, %v15241_v53  ;;  %19181 = vst [vmem:[#allocation36_spill] sm:$0xff] %v15265_v47  ;;  %v15269_v35 = vsel %vm3049_vm8, %v3164_v49, %v15238_v30  ;;  %v6886_v33 = vshrl.u32 %v6470_v25, 16  ;;  %v6889_v62 = vshll.u32 %v6470_v25, 16 }
 0x87d   : > { %v3929_v63 = vsel %vm285_vm1, %v19180_v44, %v3452_v55  ;;  %6413 = vrot.lane.b32.xlu1 %v5949_v17, %s11587_s13  ;;  %6357 = vrot.lane.b32.xlu0 %v5852_v21, %s11578_s7  ;;  %19182 = vst [vmem:[#allocation65_spill] sm:$0xff] %v15269_v35  ;;  %v5814_v7 = vmul.bf16 %v14790_v56, %v15161_v18  ;;  %v15273_v58 = vrot.slane %v5795_v45, 1  ;;  %v15275_v44 = vrot.slane %v5874_v34, 1  ;;  %v19183_v21 = vld [vmem:[#allocation69_spill] sm:$0xff] }
 0x87e   : > { %4652 = vmatmul.mubr.bf16.gmra.mrb[44].mxu0 %v4263_v4  ;;  %v5952_v55 = vor.u32 %v5950_v0, %v5948_v23  ;;  %v3974_v20 = vsel %vm940_vm0, %v3929_v63, %v15165_v39  ;;  %vm857_vm2 = vcmp.ne.s32.totalorder %v539_v40, 15  ;;  %v6888_v4 = vrot.slane %v6886_v33, 3 }
 0x87f   : > { %10316 = vmatprep.mubr.msk.bf16.mxu0 %vm285_vm1, %v19183_v21  ;;  %v3588_v48 = vpop.permute.xlu1 %3587  ;;  %v15281_v49 = vpop.permute.xlu0 %6017  ;;  %v15283_v57 = vld [vmem:[#allocation2 + $0x60] sm:$0xff]  ;;  %v6891_v25 = vrot.slane %v6889_v62, 4  ;;  %v6275_v23 = vsel %vm3492_vm11, %v15187_v43, %v6274_v52  ;;  %v15288_v45 = vrot.slane %v5834_v24, 1  ;;  %v5956_v34 = vrot.slane %v5954_v9, 1 }
 0x880   : > { %19184 = vst [vmem:[#allocation61_spill] sm:$0xff] %v15283_v57  ;;  %v4009_v56 = vsel %vm3997_vm10, %v3974_v20, %v3588_v48  ;;  %v5958_v39 = vshrl.u32 %v14826_v32, 16  ;;  %v6472_v40 = vsel %vm3492_vm11, %v6469_v46, %v15275_v44  ;;  %v3402_v63 = vshll.u32 %v15283_v57, 16 }
 0x881   : > { %6029 = vrot.lane.b32.xlu1 %v14969_v14, %s11583_s9  ;;  %6031 = vrot.lane.b32.xlu0 %v5949_v17, %s11583_s9  ;;  %v6892_v0 = vor.u32 %v6891_v25, %v6888_v4  ;;  %v5962_v20 = vshll.u32 %v15199_v3, 16  ;;  %v10219_v43 = vsel %vm857_vm2, 1.0, %v18961_v31  ;;  %v6903_v24 = vshrl.u32 %v6472_v40, 16 }
 0x882   : > { %v6906_v33 = vshll.u32 %v6472_v40, 16  ;;  %v4044_v14 = vsel %vm4032_vm12, %v4009_v56, %v15194_v42  ;;  %v3404_v46 = vrot.slane %v3402_v63, 1  ;;  %v3260_v48 = vmul.bf16 %v15000_v27, %v15283_v57 }
 0x883   : > { %v3730_v9 = vpop.permute.xlu1 %3729  ;;  %v15301_v62 = vpop.permute.xlu0 %6101  ;;  %v15303_v17 = vld [vmem:[#allocation2 + $0x68] sm:$0xff]  ;;  %v15307_v21 = vsel %vm3049_vm8, %v14929_v60, %v6892_v0  ;;  %v6277_v25 = vsel %vm3492_vm11, %v6274_v52, %v15288_v45  ;;  %v15315_v40 = vsel %vm3305_vm9, %v5952_v55, %v5956_v34  ;;  %v5796_v42 = vmul.bf16 %v14826_v32, %v14957_v15 }
 0x884   : > { %19185 = vst [vmem:[#allocation69_spill] sm:$0xff] %v15303_v17  ;;  %19186 = vst [vmem:[#allocation88_spill] sm:$0xff] %v15307_v21  ;;  %v4079_v4 = vsel %vm4067_vm14, %v4044_v14, %v3730_v9  ;;  %v19187_v60 = vmul.bf16 %v14673_v51, %v15156_v28  ;;  %v15325_v56 = vpack.c.bf16 %v10219_v43, %v18963_v13  ;;  %v6905_v63 = vrot.slane %v6903_v24, 3 }
 0x885   : > { %6166 = vrot.lane.b32.xlu0 %v5814_v7, %s11585_s11  ;;  %v6908_v9 = vrot.slane %v6906_v33, 4  ;;  %v15329_v52 = vsel %vm3305_vm9, %v15053_v61, %v3404_v46  ;;  %v4114_v55 = vsel %vm4102_vm15, %v4079_v4, %v15218_v5  ;;  %v15333_v14 = vrot.slane %v5962_v20, 1 }
 0x886   : > { %6164 = vrot.lane.b32.xlu1 %v19187_v60, %s11585_s11  ;;  %19188 = vst [vmem:[#allocation89_spill] sm:$0xff] %v15329_v52  ;;  %v19189_v21 = vand.u32 15, %v15205_v1  ;;  %v3707_v7 = vrot.slane %v3260_v48, 1  ;;  %v3410_v43 = vshll.u32 %v15303_v17, 16  ;;  %v3406_v61 = vshrl.u32 %v15283_v57, 16 }
 0x887   : > { %v3839_v24 = vpop.permute.xlu1 %3838  ;;  %v15342_v33 = vpop.permute.xlu0 %6152  ;;  %v15344_v60 = vor.u32 %v6908_v9, %v6905_v63  ;;  %v3222_v5 = vmul.bf16 %v15265_v47, %v15283_v57  ;;  %v3298_v1 = vmul.bf16 %v14986_v29, %v15283_v57  ;;  %v15352_v4 = vrot.slane %v5796_v42, 1 }
 0x888   : > { %vm15337_vm7 = vcmp.ne.s32.totalorder %v19189_v21, 0  ;;  %v4149_v20 = vsel %vm4137_vm5, %v4114_v55, %v3839_v24  ;;  %v5960_v21 = vor.u32 %v5958_v39, %v5956_v34  ;;  %v15356_v48 = vsel %vm3492_vm11, %v15051_v22, %v3707_v7 }
 0x889   : > { %19192 = vst [vmem:[#allocation90_spill] sm:$0xff] %v15356_v48  ;;  %v4273_v52 = vshrl.u32 %v4149_v20, 16  ;;  %v4276_v63 = vshll.u32 %v4149_v20, 16  ;;  %6308 = vrot.lane.b32.xlu0 %v6277_v25, %s11579_s8  ;;  %v15362_v9 = vsel %vm3049_vm8, %v6892_v0, %v15344_v60  ;;  %v3408_v57 = vor.u32 %v3406_v61, %v3404_v46 }
 0x88a   : > { %6306 = vrot.lane.b32.xlu1 %v6275_v23, %s11579_s8  ;;  %19193 = vst [vmem:[#allocation91_spill] sm:$0xff] %v15362_v9  ;;  %v3412_v28 = vrot.slane %v3410_v43, 1  ;;  %v3516_v55 = vrot.slane %v3222_v5, 1  ;;  %v3898_v34 = vrot.slane %v3298_v1, 1  ;;  %v3261_v39 = vmul.bf16 %v15265_v47, %v15303_v17 }
 0x88b   : > { %v4275_v42 = vrot.slane %v4273_v52, 3  ;;  %v4278_v22 = vrot.slane %v4276_v63, 4  ;;  %v5706_v24 = vpop.permute.xlu1 %5705  ;;  %v15366_v48 = vpop.permute.xlu0 %6210  ;;  %v15370_v23 = vsel %vm3305_vm9, %v5960_v21, %v15333_v14  ;;  %v3176_v25 = vshrl.u32 %v15325_v56, 16 }
 0x88c   : > { %5745 = vst.msk [vmem:[#allocation2 + $0x60] sm:$0xff] %vm285_vm1, %v5706_v24  ;;  %v15375_v0 = vsel %vm3305_vm9, %v3408_v57, %v3412_v28  ;;  %v15379_v46 = vsel %vm3492_vm11, %v15076_v54, %v3516_v55  ;;  %v3899_v52 = vsel %vm3492_vm11, %v15078_v16, %v3898_v34  ;;  %v3414_v43 = vshrl.u32 %v15303_v17, 16 }
 0x88d   : > { %19194 = vst [vmem:[#allocation92_spill] sm:$0xff] %v15375_v0  ;;  %19195 = vst [vmem:[#allocation93_spill] sm:$0xff] %v15379_v46  ;;  %v15384_v61 = vor.u32 %v4278_v22, %v4275_v42  ;;  %6417 = vrot.lane.b32.xlu0 %v15370_v23, %s11587_s13  ;;  %v4350_v5 = vshrl.u32 %v3899_v52, 16  ;;  %v4353_v57 = vshll.u32 %v3899_v52, 16  ;;  %v15390_v1 = vrot.slane %v3261_v39, 1 }
 0x88e   : > { %6415 = vrot.lane.b32.xlu1 %v15315_v40, %s11587_s13  ;;  %v3179_v54 = vshll.u32 %v15325_v56, 16  ;;  %v15393_v20 = vor.u32 %v3414_v43, %v3412_v28  ;;  %v3223_v16 = vmul.bf16 %v15269_v35, %v15303_v17  ;;  %v3299_v21 = vmul.bf16 %v15000_v27, %v15303_v17 }
 0x88f   : > { %19196 = vst [vmem:[#allocation94_spill] sm:$0xff] %v15384_v61  ;;  %v15399_v63 = vpop.permute.xlu1 %6019  ;;  %v15401_v42 = vpop.permute.xlu0 %6294  ;;  %v4280_v22 = vsel %vm3049_vm8, %v15241_v53, %v15384_v61  ;;  %v4352_v39 = vrot.slane %v4350_v5, 3  ;;  %v4355_v24 = vrot.slane %v4353_v57, 4  ;;  %v15408_v28 = vsel %vm3492_vm11, %v3707_v7, %v15390_v1  ;;  %v5751_v53 = vld [vmem:[#allocation2] sm:$0xf8] }
 0x890   : > { %19197 = vst [vmem:[#allocation95_spill] sm:$0xff] %v15408_v28  ;;  %4660 = vmatmul.mubr.bf16.gmra.mrb[48].mxu0 %v4280_v22  ;;  %v6084_v56 = vsel %vm3492_vm11, %v15167_v37, %v15273_v58  ;;  %v6086_v52 = vsel %vm3492_vm11, %v15273_v58, %v15352_v4  ;;  %v15416_v43 = vrot.slane %v3223_v16, 1  ;;  %v15418_v17 = vrot.slane %v3299_v21, 1 }
 0x891   : > { %6117 = vrot.lane.b32.xlu0 %v6086_v52, %s11584_s10  ;;  %v2960_v7 = vshrl.u32 %v15228_v36, 16  ;;  %v10200_v5 = vsel %vm15337_vm7, 1.0, %v18961_v31  ;;  %v19198_v37 = vand.u32 15, %v15209_v19  ;;  %v4356_v58 = vor.u32 %v4355_v24, %v4352_v39  ;;  %10369 = vmatprep.mubr.msk.bf16.mxu0 %vm285_vm1, %v14589_v38 }
 0x892   : > { %6115 = vrot.lane.b32.xlu1 %v6084_v56, %s11584_s10  ;;  %v3178_v16 = vrot.slane %v3176_v25, 3  ;;  %v3181_v21 = vrot.slane %v3179_v54, 4  ;;  %v15436_v22 = vsel %vm3492_vm11, %v3516_v55, %v15416_v43  ;;  %v3901_v51 = vsel %vm3492_vm11, %v3898_v34, %v15418_v17  ;;  %v19204_v54 = vld [vmem:[#allocation45_spill] sm:$0xff] }
 0x893   : > { %vm15428_vm6 = vcmp.ne.s32.totalorder %v19198_v37, 0  ;;  %19201 = vst [vmem:[#allocation96_spill] sm:$0xff] %v15436_v22  ;;  %v15440_v56 = vpop.permute.xlu1 %6103  ;;  %v15442_v19 = vpop.permute.xlu0 %6345  ;;  %v15447_v39 = vsel %vm2869_vm13, %v19175_v2, %v15171_v12  ;;  %v15449_v24 = vld [vmem:[#allocation2 + $0x60] sm:$0xff]  ;;  %v15453_v38 = vsel %vm3049_vm8, %v15124_v10, %v4356_v58  ;;  %v4367_v55 = vshrl.u32 %v3901_v51, 16  ;;  %v15465_v22 = vld [vmem:[#allocation2 + $0x8] sm:$0xff] }
 0x894   : > { %19202 = vst [vmem:[#allocation97_spill] sm:$0xff] %v15447_v39  ;;  %19203 = vst [vmem:[#allocation98_spill] sm:$0xff] %v15453_v38  ;;  %v4370_v25 = vshll.u32 %v3901_v51, 16  ;;  %v5768_v52 = vmul.bf16 %v5751_v53, %v19204_v54  ;;  %v15459_v34 = vsel %vm2869_vm13, %v15171_v12, %v15183_v50  ;;  %v2963_v37 = vshll.u32 %v15228_v36, 16  ;;  %v15473_v53 = vld [vmem:[#allocation2 + $0x10] sm:$0xff] }
 0x895   : > { %v15463_v2 = vpack.c.bf16 %v18963_v13, %v10200_v5  ;;  %6226 = vrot.lane.b32.xlu0 %v15370_v23, %s11586_s12  ;;  %v10201_v36 = vsel %vm15428_vm6, 1.0, %v18961_v31  ;;  %v15481_v5 = vadd.s32 208, %v13310_v26  ;;  %v5853_v51 = vmul.bf16 %v14826_v32, %v15161_v18 }
 0x896   : > { %6224 = vrot.lane.b32.xlu1 %v15315_v40, %s11586_s12  ;;  %v15485_v10 = vrot.slane %v2960_v7, 4  ;;  %v15487_v54 = vor.u32 %v3181_v21, %v3178_v16  ;;  %v5875_v28 = vmul.bf16 %v15449_v24, %v14986_v29  ;;  %v5854_v57 = vmul.bf16 %v15199_v3, %v15447_v39 }
 0x897   : > { %v15491_v38 = vpop.permute.xlu1 %6154  ;;  %v6404_v12 = vpop.permute.xlu0 %6403  ;;  %v331_v46 = vadd.s32 248, %v13310_v26  ;;  %v4369_v0 = vrot.slane %v4367_v55, 3  ;;  %v4372_v61 = vrot.slane %v4370_v25, 4  ;;  %v15496_v9 = vrot.slane %v2963_v37, 5 }
 0x898   : > { %v15501_v21 = vpack.c.bf16 %v18963_v13, %v10201_v36  ;;  %v5815_v18 = vmul.bf16 %v14826_v32, %v15447_v39  ;;  %v5835_v55 = vmul.bf16 %v15199_v3, %v14957_v15  ;;  %v5836_v25 = vmul.bf16 %v15225_v11, %v14986_v29 }
 0x899   : > { %6361 = vrot.lane.b32.xlu0 %v5854_v57, %s11578_s7  ;;  %v6489_v16 = vsel %vm285_vm1, %v5768_v52, %v15281_v49  ;;  %v5970_v36 = vshll.u32 %v15225_v11, 16  ;;  %v15515_v7 = vrot.slane %v5875_v28, 1  ;;  %v5966_v15 = vshrl.u32 %v15199_v3, 16 }
 0x89a   : > { %6359 = vrot.lane.b32.xlu1 %v5853_v51, %s11578_s7  ;;  %v15517_v51 = vor.u32 %v4372_v61, %v4369_v0  ;;  %v6539_v32 = vsel %vm940_vm0, %v6489_v16, %v15301_v62  ;;  %v15525_v37 = vsel %vm3049_vm8, %v15238_v30, %v15487_v54  ;;  %v553_v59 = vand.u32 15, %v331_v46 }
 0x89b   : > { %v6213_v57 = vpop.permute.xlu1 %6212  ;;  %v2811_v39 = vpop.permute.xlu0 %2810  ;;  %19205 = vst [vmem:[#allocation99_spill] sm:$0xff] %v15525_v37  ;;  %v6573_v49 = vsel %vm3997_vm10, %v6539_v32, %v15342_v33  ;;  %v5797_v0 = vmul.bf16 %v15199_v3, %v14986_v29  ;;  %v6474_v62 = vsel %vm3492_vm11, %v15275_v44, %v15515_v7  ;;  %v6278_v33 = vrot.slane %v5835_v55, 1 }
 0x89c   : > { %2848 = vst.msk [vmem:[#allocation2 + $0x70] sm:$0xff] %vm285_vm1, %v2811_v39  ;;  %v15537_v61 = vsel %vm3049_vm8, %v4356_v58, %v15517_v51  ;;  %v6607_v30 = vsel %vm4032_vm12, %v6573_v49, %v15366_v48  ;;  %v6920_v46 = vshrl.u32 %v6474_v62, 16  ;;  %v6923_v28 = vshll.u32 %v6474_v62, 16 }
 0x89d   : > { %19206 = vst [vmem:[#allocation100_spill] sm:$0xff] %v15537_v61  ;;  %6035 = vrot.lane.b32.xlu0 %v15370_v23, %s11583_s9  ;;  %v6641_v39 = vsel %vm4067_vm14, %v6607_v30, %v15401_v42  ;;  %v15547_v44 = vrot.slane %v5836_v25, 1  ;;  %v5972_v52 = vrot.slane %v5970_v36, 1  ;;  %v5978_v58 = vshll.u32 %v15449_v24, 16 }
 0x89e   : > { %6033 = vrot.lane.b32.xlu1 %v15315_v40, %s11583_s9  ;;  %v6675_v48 = vsel %vm4102_vm15, %v6641_v39, %v15442_v19  ;;  %v5816_v40 = vmul.bf16 %v15199_v3, %v15459_v34  ;;  %v6922_v23 = vrot.slane %v6920_v46, 3  ;;  %v6925_v55 = vrot.slane %v6923_v28, 4 }
 0x89f   : > { %v6297_v16 = vpop.permute.xlu1 %6296  ;;  %v15552_v32 = vpop.permute.xlu0 %6021  ;;  %v6709_v49 = vsel %vm4137_vm5, %v6675_v48, %v6404_v12  ;;  %v5968_v42 = vor.u32 %v5966_v15, %v15333_v14  ;;  %v6087_v25 = vrot.slane %v5797_v0, 1  ;;  %vm15558_vm2 = vcmp.ne.s32.totalorder %v553_v59, 15 }
 0x8a0   : > { %v6279_v19 = vsel %vm3492_vm11, %v15288_v45, %v6278_v33  ;;  %v5974_v3 = vshrl.u32 %v15225_v11, 16  ;;  %v5798_v62 = vmul.bf16 %v15225_v11, %v15000_v27  ;;  %v15569_v12 = vor.u32 %v6925_v55, %v6922_v23 }
 0x8a1   : > { %6170 = vrot.lane.b32.xlu0 %v5816_v40, %s11585_s11  ;;  %v19209_v15 = vmul.bf16 %v15465_v22, %v19107_v6  ;;  %v15579_v14 = vsel %vm3305_vm9, %v5968_v42, %v5972_v52  ;;  %v15581_v45 = vrot.slane %v5978_v58, 1  ;;  %v6760_v30 = vshrl.u32 %v6709_v49, 16 }
 0x8a2   : > { %6168 = vrot.lane.b32.xlu1 %v5815_v18, %s11585_s11  ;;  %v6281_v18 = vsel %vm3492_vm11, %v6278_v33, %v15547_v44  ;;  %v5976_v39 = vor.u32 %v5974_v3, %v5972_v52  ;;  %v6763_v33 = vshll.u32 %v6709_v49, 16  ;;  %v15602_v52 = vrot.slane %v5798_v62, 1 }
 0x8a3   : > { %v6492_v59 = vsel %vm285_vm1, %v19209_v15, %v15399_v63  ;;  %v6348_v46 = vpop.permute.xlu1 %6347  ;;  %v15585_v28 = vpop.permute.xlu0 %6156  ;;  %v15587_v48 = vld [vmem:[#allocation2 + $0x70] sm:$0xff]  ;;  %v15592_v63 = vsel %vm3049_vm8, %v15344_v60, %v15569_v12  ;;  %v6762_v42 = vrot.slane %v6760_v30, 3 }
 0x8a4   : > { %v6541_v0 = vsel %vm940_vm0, %v6492_v59, %v15440_v56  ;;  %19210 = vst [vmem:[#allocation101_spill] sm:$0xff] %v15587_v48  ;;  %v3418_v58 = vshll.u32 %v15587_v48, 16  ;;  %v3262_v56 = vmul.bf16 %v15269_v35, %v15587_v48  ;;  %v3224_v60 = vmul.bf16 %v15525_v37, %v15587_v48 }
 0x8a5   : > { %v6575_v22 = vsel %vm3997_vm10, %v6541_v0, %v15491_v38  ;;  %6312 = vrot.lane.b32.xlu0 %v6281_v18, %s11579_s8  ;;  %v3300_v38 = vmul.bf16 %v15265_v47, %v15587_v48  ;;  %v15611_v55 = vsel %vm3305_vm9, %v5976_v39, %v15581_v45  ;;  %v6765_v18 = vrot.slane %v6763_v33, 4 }
 0x8a6   : > { %v6609_v40 = vsel %vm4032_vm12, %v6575_v22, %v6213_v57  ;;  %6310 = vrot.lane.b32.xlu1 %v6279_v19, %s11579_s8  ;;  %v15613_v49 = vrot.slane %v3418_v58, 1  ;;  %v15615_v57 = vrot.slane %v3262_v56, 1  ;;  %v15620_v15 = vrot.slane %v3224_v60, 1 }
 0x8a7   : > { %v6643_v23 = vsel %vm4067_vm14, %v6609_v40, %v6297_v16  ;;  %v6406_v3 = vpop.permute.xlu1 %6405  ;;  %v15618_v62 = vpop.permute.xlu0 %6298  ;;  %v15622_v59 = vrot.slane %v3300_v38, 1  ;;  %v19214_v33 = vand.u32 15, %v15481_v5  ;;  %v6088_v5 = vsel %vm3492_vm11, %v15352_v4, %v6087_v25 }
 0x8a8   : > { %v6677_v19 = vsel %vm4102_vm15, %v6643_v23, %v6348_v46  ;;  %v15628_v0 = vsel %vm3305_vm9, %v15393_v20, %v15613_v49  ;;  %v15633_v30 = vsel %vm3492_vm11, %v15390_v1, %v15615_v57  ;;  %v15642_v22 = vsel %vm3492_vm11, %v15416_v43, %v15620_v15 }
 0x8a9   : > { %v6711_v16 = vsel %vm4137_vm5, %v6677_v19, %v6406_v3  ;;  %19211 = vst [vmem:[#allocation102_spill] sm:$0xff] %v15628_v0  ;;  %19212 = vst [vmem:[#allocation103_spill] sm:$0xff] %v15633_v30  ;;  %6421 = vrot.lane.b32.xlu0 %v15611_v55, %s11587_s13  ;;  %v3903_v20 = vsel %vm3492_vm11, %v15418_v17, %v15622_v59  ;;  %v2978_v1 = vshrl.u32 %v15501_v21, 16  ;;  %vm15650_vm7 = vcmp.ne.s32.totalorder %v19214_v33, 0 }
 0x8aa   : > { %v6767_v46 = vshrl.u32 %v6711_v16, 16  ;;  %v6770_v39 = vshll.u32 %v6711_v16, 16  ;;  %6419 = vrot.lane.b32.xlu1 %v15579_v14, %s11587_s13  ;;  %19213 = vst [vmem:[#allocation104_spill] sm:$0xff] %v15642_v22  ;;  %v4384_v56 = vshrl.u32 %v3903_v20, 16  ;;  %v4387_v40 = vshll.u32 %v3903_v20, 16 }
 0x8ab   : > { %v5708_v23 = vpop.permute.xlu1 %5707  ;;  %v15654_v19 = vpop.permute.xlu0 %6407  ;;  %v2981_v43 = vshll.u32 %v15501_v21, 16  ;;  %v10220_v17 = vsel %vm15558_vm2, 1.0, %v18961_v31  ;;  %v6090_v3 = vsel %vm3492_vm11, %v6087_v25, %v15602_v52  ;;  %v2966_v21 = vor.u32 %v15496_v9, %v15485_v10 }
 0x8ac   : > { %v6769_v60 = vrot.slane %v6767_v46, 3  ;;  %v6772_v38 = vrot.slane %v6770_v39, 4  ;;  %5746 = vst.msk [vmem:[#allocation2 + $0x68] sm:$0xff] %vm285_vm1, %v5708_v23  ;;  %v4386_v16 = vrot.slane %v4384_v56, 3  ;;  %v4389_v46 = vrot.slane %v4387_v40, 4 }
 0x8ad   : > { %v6766_v39 = vor.u32 %v6765_v18, %v6762_v42  ;;  %6121 = vrot.lane.b32.xlu0 %v6090_v3, %s11584_s10  ;;  %v10202_v36 = vsel %vm15650_vm7, 1.0, %v18961_v31  ;;  %v19217_v4 = vshrl.u32 %v15463_v2, 16  ;;  %v19218_v25 = vshll.u32 %v15463_v2, 16 }
 0x8ae   : > { %v15665_v20 = vor.u32 %v6772_v38, %v6769_v60  ;;  %6119 = vrot.lane.b32.xlu1 %v6088_v5, %s11584_s10  ;;  %v939_v42 = vpack.c.bf16 %v10220_v17, %v18963_v13  ;;  %v15679_v18 = vor.u32 %v4389_v46, %v4386_v16  ;;  %v19219_v40 = vmul.bf16 %v15473_v53, %v19115_v41 }
 0x8af   : > { %v2971_v33 = vrot.slane %v19217_v4, 4  ;;  %v2974_v56 = vrot.slane %v19218_v25, 5  ;;  %v6106_v10 = vpop.permute.xlu1 %6105  ;;  %v5710_v60 = vpop.permute.xlu0 %5709  ;;  %v2980_v38 = vrot.slane %v2978_v1, 4  ;;  %v2983_v23 = vrot.slane %v2981_v43, 5 }
 0x8b0   : > { %v6495_v9 = vsel %vm285_vm1, %v19219_v40, %v15552_v32  ;;  %v6774_v58 = vsel %vm3049_vm8, %v6766_v39, %v15665_v20  ;;  %5747 = vst.msk [vmem:[#allocation2 + $0x70] sm:$0xff] %vm285_vm1, %v5710_v60  ;;  %v825_v17 = vpack.c.bf16 %v18963_v13, %v10202_v36  ;;  %v15694_v53 = vsel %vm3049_vm8, %v15517_v51, %v15679_v18  ;;  %v19221_v40 = vld [vmem:[#allocation42_spill] sm:$0xff] }
 0x8b1   : > { %v6543_v2 = vsel %vm940_vm0, %v6495_v9, %v6106_v10  ;;  %7198 = vmatmul.mubr.bf16.vlgmr.msra.gmra.mrb[52].mxu0 %v6774_v58  ;;  %19220 = vst [vmem:[#allocation105_spill] sm:$0xff] %v15694_v53  ;;  %6230 = vrot.lane.b32.xlu0 %v15611_v55, %s11586_s12  ;;  %v15704_v32 = vsel %vm2869_vm13, %v15183_v50, %v2966_v21  ;;  %v3185_v43 = vshrl.u32 %v939_v42, 16  ;;  %v3188_v5 = vshll.u32 %v939_v42, 16  ;;  %v11512_v42 = vld [vmem:[#allocation2 + $0x18] sm:$0xff] }
 0x8b2   : > { %6228 = vrot.lane.b32.xlu1 %v15579_v14, %s11586_s12  ;;  %10370 = vmatprep.mubr.msk.bf16.mxu0 %vm285_vm1, %v14634_v8  ;;  %v2975_v1 = vor.u32 %v2974_v56, %v2971_v33  ;;  %v6577_v51 = vsel %vm3997_vm10, %v6543_v2, %v15585_v28  ;;  %v5855_v46 = vmul.bf16 %v15225_v11, %v15459_v34  ;;  %v2987_v4 = vshrl.u32 %v825_v17, 16 }
 0x8b3   : > { %v6215_v3 = vpop.permute.xlu1 %6214  ;;  %v15708_v16 = vpop.permute.xlu0 %6107  ;;  %v5856_v39 = vmul.bf16 %v15449_v24, %v15704_v32  ;;  %v15714_v8 = vor.u32 %v2983_v23, %v2980_v38  ;;  %v15717_v36 = vld [vmem:[#allocation2 + $0x68] sm:$0xff]  ;;  %v2990_v33 = vshll.u32 %v825_v17, 16  ;;  %v328_v25 = vadd.s32 224, %v13310_v26 }
 0x8b4   : > { %v6611_v50 = vsel %vm4032_vm12, %v6577_v51, %v6215_v3  ;;  %v5837_v28 = vmul.bf16 %v15449_v24, %v15000_v27  ;;  %v15725_v56 = vsel %vm2869_vm13, %v2966_v21, %v2975_v1  ;;  %v5771_v9 = vmul.bf16 %v11512_v42, %v19221_v40 }
 0x8b5   : > { %6365 = vrot.lane.b32.xlu0 %v5856_v39, %s11578_s7  ;;  %v3187_v10 = vrot.slane %v3185_v43, 3  ;;  %v3190_v60 = vrot.slane %v3188_v5, 4  ;;  %v6645_v38 = vsel %vm4067_vm14, %v6611_v50, %v15618_v62  ;;  %v5838_v2 = vmul.bf16 %v15717_v36, %v15265_v47 }
 0x8b6   : > { %6363 = vrot.lane.b32.xlu1 %v5855_v46, %s11578_s7  ;;  %v15736_v17 = vsel %vm2869_vm13, %v2975_v1, %v15714_v8  ;;  %v5876_v21 = vmul.bf16 %v15717_v36, %v15000_v27  ;;  %v15743_v5 = vrot.slane %v2987_v4, 4  ;;  %v15745_v51 = vrot.slane %v2990_v33, 5 }
 0x8b7   : > { %v6350_v58 = vpop.permute.xlu1 %6349  ;;  %v15730_v23 = vpop.permute.xlu0 %6216  ;;  %19222 = vst [vmem:[#allocation106_spill] sm:$0xff] %v15736_v17  ;;  %v15741_v43 = vld [vmem:[#allocation2 + $0x70] sm:$0xff]  ;;  %v532_v62 = vand.u32 15, %v328_v25  ;;  %v5817_v1 = vmul.bf16 %v15225_v11, %v15704_v32  ;;  %v6282_v39 = vrot.slane %v5837_v28, 1  ;;  %v15756_v50 = vadd.s32 240, %v13310_v26 }
 0x8b8   : > { %v6679_v3 = vsel %vm4102_vm15, %v6645_v38, %v6350_v58  ;;  %v5986_v25 = vshll.u32 %v15717_v36, 16  ;;  %v15759_v42 = vor.u32 %v3190_v60, %v3187_v10  ;;  %v5994_v11 = vshll.u32 %v15741_v43, 16 }
 0x8b9   : > { %v6713_v46 = vsel %vm4137_vm5, %v6679_v3, %v15654_v19  ;;  %6039 = vrot.lane.b32.xlu0 %v15611_v55, %s11583_s9  ;;  %v15765_v55 = vrot.slane %v5838_v2, 1  ;;  %v6475_v28 = vrot.slane %v5876_v21, 1  ;;  %v5799_v3 = vmul.bf16 %v15449_v24, %v15265_v47 }
 0x8ba   : > { %6037 = vrot.lane.b32.xlu1 %v15579_v14, %s11583_s9  ;;  %v6792_v4 = vshrl.u32 %v6713_v46, 16  ;;  %v6795_v33 = vshll.u32 %v6713_v46, 16  ;;  %19223 = vst [vmem:[#allocation107_spill] sm:$0xff] %v15759_v42  ;;  %v5818_v14 = vmul.bf16 %v15449_v24, %v15725_v56  ;;  %v5877_v10 = vmul.bf16 %v15741_v43, %v15265_v47 }
 0x8bb   : > { %v2813_v19 = vpop.permute.xlu1 %2812  ;;  %v15761_v58 = vpop.permute.xlu0 %6351  ;;  %v6283_v60 = vsel %vm3492_vm11, %v15547_v44, %v6282_v39  ;;  %v5982_v2 = vshrl.u32 %v15449_v24, 16  ;;  %v5800_v21 = vmul.bf16 %v15717_v36, %v15269_v35  ;;  %v6476_v46 = vsel %vm3492_vm11, %v15515_v7, %v6475_v28 }
 0x8bc   : > { %v6794_v38 = vrot.slane %v6792_v4, 3  ;;  %v6797_v26 = vrot.slane %v6795_v33, 4  ;;  %2849 = vst.msk [vmem:[#allocation2 + $0x78] sm:$0xff] %vm285_vm1, %v2813_v19  ;;  %v5988_v33 = vrot.slane %v5986_v25, 1  ;;  %vm15784_vm6 = vcmp.ne.s32.totalorder %v532_v62, 0 }
 0x8bd   : > { %6174 = vrot.lane.b32.xlu0 %v5818_v14, %s11585_s11  ;;  %v6940_v14 = vshll.u32 %v6476_v46, 16  ;;  %v6285_v24 = vsel %vm3492_vm11, %v6282_v39, %v15765_v55  ;;  %v5990_v44 = vshrl.u32 %v15717_v36, 16  ;;  %v15791_v29 = vrot.slane %v5994_v11, 1 }
 0x8be   : > { %6172 = vrot.lane.b32.xlu1 %v5817_v1, %s11585_s11  ;;  %v15782_v4 = vor.u32 %v6797_v26, %v6794_v38  ;;  %v6937_v1 = vshrl.u32 %v6476_v46, 16  ;;  %v15793_v40 = vrot.slane %v5877_v10, 1  ;;  %v5984_v39 = vor.u32 %v5982_v2, %v15581_v45 }
 0x8bf   : > { %v6024_v47 = vpop.permute.xlu1 %6023  ;;  %v2815_v27 = vpop.permute.xlu0 %2814  ;;  %v6942_v38 = vrot.slane %v6940_v14, 4  ;;  %v6091_v11 = vrot.slane %v5799_v3, 1  ;;  %v15803_v26 = vrot.slane %v5800_v21, 1  ;;  %v3422_v2 = vshrl.u32 %v15587_v48, 16 }
 0x8c0   : > { %v6498_v7 = vsel %vm285_vm1, %v5771_v9, %v6024_v47  ;;  %2850 = vst.msk [vmem:[#allocation2 + $0x80] sm:$0xff] %vm285_vm1, %v2815_v27  ;;  %v6799_v62 = vsel %vm3049_vm8, %v15665_v20, %v15782_v4  ;;  %v6939_v25 = vrot.slane %v6937_v1, 3  ;;  %v6478_v47 = vsel %vm3492_vm11, %v6475_v28, %v15793_v40  ;;  %v19226_v20 = vld [vmem:[#allocation62_spill] sm:$0xff] }
 0x8c1   : > { %6316 = vrot.lane.b32.xlu0 %v6285_v24, %s11579_s8  ;;  %7206 = vmatmul.mubr.bf16.gmra.mrb[56].mxu0 %v6799_v62  ;;  %v5992_v27 = vor.u32 %v5990_v44, %v5988_v33  ;;  %v6954_v10 = vshrl.u32 %v6478_v47, 16  ;;  %v6957_v46 = vshll.u32 %v6478_v47, 16  ;;  %v15814_v45 = vsel %vm3305_vm9, %v5984_v39, %v5988_v33 }
 0x8c2   : > { %6314 = vrot.lane.b32.xlu1 %v6283_v60, %s11579_s8  ;;  %v6943_v9 = vor.u32 %v6942_v38, %v6939_v25  ;;  %10371 = vmatprep.mubr.msk.bf16.mxu0 %vm285_vm1, %v19226_v20  ;;  %v6545_v60 = vsel %vm940_vm0, %v6498_v7, %v15708_v16  ;;  %v15821_v28 = vsel %vm3049_vm8, %v15487_v54, %v15759_v42  ;;  %v546_v44 = vand.u32 15, %v15756_v50 }
 0x8c3   : > { %v6159_v1 = vpop.permute.xlu1 %6158  ;;  %v15811_v14 = vpop.permute.xlu0 %6025  ;;  %v15816_v3 = vld [vmem:[#allocation2 + $0x78] sm:$0xff]  ;;  %19228 = vst [vmem:[#allocation108_spill] sm:$0xff] %v15821_v28  ;;  %v15827_v24 = vsel %vm3305_vm9, %v5992_v27, %v15791_v29  ;;  %v6956_v33 = vrot.slane %v6954_v10, 3  ;;  %v6092_v54 = vsel %vm3492_vm11, %v15602_v52, %v6091_v11  ;;  %v6959_v7 = vrot.slane %v6957_v46, 4 }
 0x8c4   : > { %19227 = vst [vmem:[#allocation62_spill] sm:$0xff] %v15816_v3  ;;  %v6579_v21 = vsel %vm3997_vm10, %v6545_v60, %v6159_v1  ;;  %v15831_v16 = vsel %vm3049_vm8, %v15569_v12, %v6943_v9  ;;  %v3426_v62 = vshll.u32 %v15816_v3, 16  ;;  %v6094_v25 = vsel %vm3492_vm11, %v6091_v11, %v15803_v26 }
 0x8c5   : > { %6425 = vrot.lane.b32.xlu0 %v15827_v24, %s11587_s13  ;;  %v3424_v12 = vor.u32 %v3422_v2, %v15613_v49  ;;  %v3263_v38 = vmul.bf16 %v15525_v37, %v15816_v3  ;;  %v3225_v39 = vmul.bf16 %v15821_v28, %v15816_v3  ;;  %v6613_v52 = vsel %vm4032_vm12, %v6579_v21, %v15730_v23 }
 0x8c6   : > { %6423 = vrot.lane.b32.xlu1 %v15814_v45, %s11587_s13  ;;  %v15856_v46 = vor.u32 %v6959_v7, %v6956_v33  ;;  %v3428_v11 = vrot.slane %v3426_v62, 1  ;;  %v3430_v49 = vshrl.u32 %v15816_v3, 16  ;;  %v10203_v23 = vsel %vm15784_vm6, 1.0, %v18961_v31 }
 0x8c7   : > { %v6301_v47 = vpop.permute.xlu1 %6300  ;;  %v15850_v27 = vpop.permute.xlu0 %6160  ;;  %v15852_v50 = vld [vmem:[#allocation2 + $0x80] sm:$0xf]  ;;  %v3713_v60 = vrot.slane %v3263_v38, 1  ;;  %v3522_v41 = vrot.slane %v3225_v39, 1  ;;  %v3301_v7 = vmul.bf16 %v15269_v35, %v15816_v3  ;;  %vm15896_vm2 = vcmp.ne.s32.totalorder %v546_v44, 0 }
 0x8c8   : > { %19229 = vst [vmem:[#allocation109_spill] sm:$0xff] %v15852_v50  ;;  %v15854_v10 = vld [vmem:[#allocation2 + $0x80] sm:$0xff]  ;;  %v6647_v20 = vsel %vm4067_vm14, %v6613_v52, %v6301_v47  ;;  %v15868_v21 = vsel %vm3049_vm8, %v6943_v9, %v15856_v46  ;;  %v15871_v33 = vsel %vm3305_vm9, %v3424_v12, %v3428_v11  ;;  %v3434_v47 = vshll.u32 %v15852_v50, 16 }
 0x8c9   : > { %19230 = vst [vmem:[#allocation110_spill] sm:$0xff] %v15854_v10  ;;  %v3048_v1 = vld [vmem:[#allocation2 + $0x80] sm:$0x1f]  ;;  %v3620_v2 = vshll.u32 %v15854_v10, 16  ;;  %6125 = vrot.lane.b32.xlu0 %v6094_v25, %s11584_s10  ;;  %19231 = vst [vmem:[#allocation111_spill] sm:$0xff] %v15871_v33  ;;  %v15877_v62 = vsel %vm3492_vm11, %v15615_v57, %v3713_v60  ;;  %v15883_v19 = vsel %vm3492_vm11, %v15620_v15, %v3522_v41  ;;  %v19243_v15 = vld [vmem:[#allocation68_spill] sm:$0xff] }
 0x8ca   : > { %6123 = vrot.lane.b32.xlu1 %v6092_v54, %s11584_s10  ;;  %19232 = vst [vmem:[#allocation112_spill] sm:$0xff] %v15877_v62  ;;  %v3432_v54 = vor.u32 %v3430_v49, %v3428_v11  ;;  %19233 = vst [vmem:[#allocation113_spill] sm:$0xff] %v15883_v19  ;;  %v6681_v9 = vsel %vm4102_vm15, %v6647_v20, %v15761_v58  ;;  %v3264_v39 = vmul.bf16 %v15854_v10, %v15821_v28  ;;  %v11513_v3 = vld [vmem:[#allocation2 + $0x20] sm:$0xff]  ;;  %vm294_vm7 = vcmask 191488  }
 0x8cb   : > { %v15879_v25 = vrot.slane %v3620_v2, 1  ;;  %v6410_v38 = vpop.permute.xlu1 %6409  ;;  %v15887_v12 = vpop.permute.xlu0 %6302  ;;  %v3226_v57 = vmul.bf16 %v15759_v42, %v3048_v1  ;;  %v5857_v11 = vmul.bf16 %v15717_v36, %v15725_v56  ;;  %v15910_v2 = vrot.slane %v3434_v47, 1 }
 0x8cc   : > { %v6715_v52 = vsel %vm4137_vm5, %v6681_v9, %v6410_v38  ;;  %v15908_v1 = vrot.slane %v3264_v39, 1  ;;  %v5858_v44 = vmul.bf16 %v15741_v43, %v15736_v17  ;;  %v3904_v9 = vrot.slane %v3301_v7, 1 }
 0x8cd   : > { %v15902_v58 = vsel %vm3305_vm9, %v3432_v54, %v15879_v25  ;;  %v6809_v49 = vshrl.u32 %v6715_v52, 16  ;;  %v6812_v20 = vshll.u32 %v6715_v52, 16  ;;  %6234 = vrot.lane.b32.xlu0 %v15827_v24, %s11586_s12  ;;  %19237 = vst [vmem:[#allocation115_spill] sm:$0xff] %v15910_v2  ;;  %v15914_v38 = vrot.slane %v3226_v57, 1  ;;  %v19241_v57 = vld [vmem:[#allocation74_spill] sm:$0xff] }
 0x8ce   : > { %19236 = vst [vmem:[#allocation114_spill] sm:$0xff] %v15902_v58  ;;  %6232 = vrot.lane.b32.xlu1 %v15814_v45, %s11586_s12  ;;  %v3302_v6 = vmul.bf16 %v15854_v10, %v15525_v37  ;;  %v15922_v39 = vsel %vm3492_vm11, %v3713_v60, %v15908_v1  ;;  %v15926_v47 = vsel %vm3305_vm9, %v3432_v54, %v15910_v2  ;;  %vm9520_vm6 = vcmask 719872  }
 0x8cf   : > { %19238 = vst [vmem:[#allocation116_spill] sm:$0xff] %v15914_v38  ;;  %v6811_v52 = vrot.slane %v6809_v49, 3  ;;  %v6814_v50 = vrot.slane %v6812_v20, 4  ;;  %v5712_v19 = vpop.permute.xlu1 %5711  ;;  %v15918_v58 = vpop.permute.xlu0 %6411  ;;  %19239 = vst [vmem:[#allocation117_spill] sm:$0xff] %v15922_v39  ;;  %v5772_v62 = vmul.bf16 %v11513_v3, %v19241_v57  ;;  %v15932_v7 = vsel %vm3492_vm11, %v3522_v41, %v15914_v38 }
 0x8d0   : > { %19240 = vst [vmem:[#allocation118_spill] sm:$0xff] %v15926_v47  ;;  %5748 = vst.msk [vmem:[#allocation2 + $0x78] sm:$0xff] %vm285_vm1, %v5712_v19  ;;  %v3905_v49 = vsel %vm3492_vm11, %v15622_v59, %v3904_v9  ;;  %v15936_v20 = vrot.slane %v3302_v6, 1  ;;  %v826_v54 = vpack.c.bf16 %v18963_v13, %v10203_v23  ;;  %v15945_v19 = vor.u32 %v15745_v51, %v15743_v5 }
 0x8d1   : > { %19242 = vst [vmem:[#allocation119_spill] sm:$0xff] %v15932_v7  ;;  %v15938_v60 = vor.u32 %v6814_v50, %v6811_v52  ;;  %6369 = vrot.lane.b32.xlu0 %v5858_v44, %s11578_s7  ;;  %v4401_v3 = vshrl.u32 %v3905_v49, 16  ;;  %v4404_v57 = vshll.u32 %v3905_v49, 16  ;;  %v5839_v41 = vmul.bf16 %v15741_v43, %v15269_v35 }
 0x8d2   : > { %6367 = vrot.lane.b32.xlu1 %v5857_v11, %s11578_s7  ;;  %v10204_v6 = vsel %vm15896_vm2, 1.0, %v18961_v31  ;;  %v3907_v59 = vsel %vm3492_vm11, %v3904_v9, %v15936_v20  ;;  %v6501_v50 = vsel %vm285_vm1, %v5772_v62, %v15811_v14  ;;  %v2996_v31 = vshrl.u32 %v826_v54, 16 }
 0x8d3   : > { %v6110_v23 = vpop.permute.xlu1 %6109  ;;  %v5714_v11 = vpop.permute.xlu0 %5713  ;;  %v6816_v5 = vsel %vm3049_vm8, %v15782_v4, %v15938_v60  ;;  %v4403_v51 = vrot.slane %v4401_v3, 3  ;;  %v4406_v44 = vrot.slane %v4404_v57, 4  ;;  %v2999_v14 = vshll.u32 %v826_v54, 16 }
 0x8d4   : > { %v6547_v52 = vsel %vm940_vm0, %v6501_v50, %v6110_v23  ;;  %5749 = vst.msk [vmem:[#allocation2 + $0x80] sm:$0xff] %vm285_vm1, %v5714_v11  ;;  %7214 = vmatmul.mubr.bf16.gmra.mrb[60].mxu0 %v6816_v5  ;;  %v5819_v4 = vmul.bf16 %v15717_v36, %v15736_v17  ;;  %v15974_v9 = vsel %vm2869_vm13, %v15714_v8, %v15945_v19  ;;  %v6286_v3 = vrot.slane %v5839_v41, 1 }
 0x8d5   : > { %6043 = vrot.lane.b32.xlu0 %v15827_v24, %s11583_s9  ;;  %v15965_v62 = vor.u32 %v4406_v44, %v4403_v51  ;;  %10372 = vmatprep.mubr.msk.bf16.mxu0 %vm285_vm1, %v19243_v15  ;;  %19244 = vst [vmem:[#allocation68_spill] sm:$0xff] %v15974_v9  ;;  %v6581_v24 = vsel %vm3997_vm10, %v6547_v52, %v15850_v27  ;;  %v5998_v41 = vshrl.u32 %v15741_v43, 16  ;;  %v2998_v23 = vrot.slane %v2996_v31, 4 }
 0x8d6   : > { %6041 = vrot.lane.b32.xlu1 %v15814_v45, %s11583_s9  ;;  %v827_v45 = vpack.c.bf16 %v18963_v13, %v10204_v6  ;;  %v5820_v54 = vmul.bf16 %v15741_v43, %v15974_v9  ;;  %v4418_v6 = vshrl.u32 %v3907_v59, 16  ;;  %v3001_v11 = vrot.slane %v2999_v14, 5 }
 0x8d7   : > { %v6219_v57 = vpop.permute.xlu1 %6218  ;;  %v15979_v49 = vpop.permute.xlu0 %6111  ;;  %v15983_v50 = vld [vmem:[#allocation2 + $0x78] sm:$0xff]  ;;  %v15988_v36 = vsel %vm3049_vm8, %v15679_v18, %v15965_v62  ;;  %v4421_v44 = vshll.u32 %v3907_v59, 16  ;;  %v5801_v31 = vmul.bf16 %v15741_v43, %v15525_v37 }
 0x8d8   : > { %19245 = vst [vmem:[#allocation120_spill] sm:$0xff] %v15988_v36  ;;  %v6615_v8 = vsel %vm4032_vm12, %v6581_v24, %v6219_v57  ;;  %v5840_v13 = vmul.bf16 %v15983_v50, %v15525_v37  ;;  %v6002_v27 = vshll.u32 %v15983_v50, 16  ;;  %v3005_v18 = vshrl.u32 %v827_v45, 16 }
 0x8d9   : > { %6178 = vrot.lane.b32.xlu0 %v5820_v54, %s11585_s11  ;;  %v3008_v51 = vshll.u32 %v827_v45, 16  ;;  %v6649_v15 = vsel %vm4067_vm14, %v6615_v8, %v15887_v12  ;;  %v6000_v24 = vor.u32 %v5998_v41, %v15791_v29  ;;  %v6287_v45 = vsel %vm3492_vm11, %v15765_v55, %v6286_v3 }
 0x8da   : > { %6176 = vrot.lane.b32.xlu1 %v5819_v4, %s11585_s11  ;;  %v15997_v5 = vrot.slane %v5840_v13, 1  ;;  %v6004_v4 = vrot.slane %v6002_v27, 1  ;;  %v4420_v54 = vrot.slane %v4418_v6, 3  ;;  %v6006_v29 = vshrl.u32 %v15983_v50, 16 }
 0x8db   : > { %v6354_v52 = vpop.permute.xlu1 %6353  ;;  %v16001_v57 = vpop.permute.xlu0 %6220  ;;  %v16004_v36 = vld [vmem:[#allocation2 + $0x80] sm:$0xff]  ;;  %v5802_v8 = vmul.bf16 %v15983_v50, %v15821_v28  ;;  %v4423_v27 = vrot.slane %v4421_v44, 4 }
 0x8dc   : > { %v6683_v14 = vsel %vm4102_vm15, %v6649_v15, %v6354_v52  ;;  %v6289_v59 = vsel %vm3492_vm11, %v6286_v3, %v15997_v5  ;;  %v6195_v43 = vshll.u32 %v16004_v36, 16  ;;  %v5878_v3 = vmul.bf16 %v15983_v50, %v15269_v35 }
 0x8dd   : > { %v6717_v12 = vsel %vm4137_vm5, %v6683_v14, %v15918_v58  ;;  %6320 = vrot.lane.b32.xlu0 %v6289_v59, %s11579_s8  ;;  %v16025_v58 = vor.u32 %v6006_v29, %v6004_v4  ;;  %v6095_v15 = vrot.slane %v5801_v31, 1  ;;  %v16029_v14 = vor.u32 %v3001_v11, %v2998_v23  ;;  %v11514_v29 = vld [vmem:[#allocation2 + $0x28] sm:$0xff] }
 0x8de   : > { %6318 = vrot.lane.b32.xlu1 %v6287_v45, %s11579_s8  ;;  %v6826_v13 = vshrl.u32 %v6717_v12, 16  ;;  %v6829_v55 = vshll.u32 %v6717_v12, 16  ;;  %v16027_v52 = vrot.slane %v6195_v43, 1  ;;  %v16033_v12 = vsel %vm3305_vm9, %v6000_v24, %v6004_v4  ;;  %v19246_v43 = vld [vmem:[#allocation76_spill] sm:$0xff] }
 0x8df   : > { %v2817_v6 = vpop.permute.xlu1 %2816  ;;  %v16023_v41 = vpop.permute.xlu0 %6355  ;;  %v5773_v35 = vmul.bf16 %v11514_v29, %v19246_v43  ;;  %v16041_v31 = vrot.slane %v5802_v8, 1  ;;  %v3007_v23 = vrot.slane %v3005_v18, 4  ;;  %v6479_v24 = vrot.slane %v5878_v3, 1  ;;  %v16055_v8 = vld [vmem:[#allocation2 + $0x90] sm:$0xf] }
 0x8e0   : > { %v6828_v45 = vrot.slane %v6826_v13, 3  ;;  %v6831_v59 = vrot.slane %v6829_v55, 4  ;;  %2851 = vst.msk [vmem:[#allocation2 + $0x88] sm:$0xf] %vm287_vm3, %v2817_v6  ;;  %v6198_v44 = vsel %vm3305_vm9, %v16025_v58, %v16027_v52  ;;  %v3010_v13 = vrot.slane %v3008_v51, 5 }
 0x8e1   : > { %6429 = vrot.lane.b32.xlu0 %v6198_v44, %s11587_s13  ;;  %v16046_v4 = vor.u32 %v4423_v27, %v4420_v54  ;;  %v6096_v38 = vsel %vm3492_vm11, %v15803_v26, %v6095_v15  ;;  %v16053_v29 = vsel %vm2869_vm13, %v15945_v19, %v16029_v14  ;;  %v5879_v18 = vmul.bf16 %v16004_v36, %v15525_v37 }
 0x8e2   : > { %6427 = vrot.lane.b32.xlu1 %v16033_v12, %s11587_s13  ;;  %v16044_v11 = vor.u32 %v6831_v59, %v6828_v45  ;;  %19247 = vst [vmem:[#allocation121_spill] sm:$0xff] %v16053_v29  ;;  %v6480_v3 = vsel %vm3492_vm11, %v15793_v40, %v6479_v24  ;;  %v3624_v26 = vshrl.u32 %v15854_v10, 16  ;;  %v6098_v19 = vsel %vm3492_vm11, %v6095_v15, %v16041_v31 }
 0x8e3   : > { %v6028_v55 = vpop.permute.xlu1 %6027  ;;  %v5716_v6 = vpop.permute.xlu0 %5715  ;;  %v6971_v27 = vshrl.u32 %v6480_v3, 16  ;;  %v6974_v45 = vshll.u32 %v6480_v3, 16  ;;  %v16069_v59 = vrot.slane %v5879_v18, 1  ;;  %v16076_v40 = vor.u32 %v3010_v13, %v3007_v23 }
 0x8e4   : > { %v6504_v51 = vsel %vm285_vm1, %v5773_v35, %v6028_v55  ;;  %v6833_v54 = vsel %vm3049_vm8, %v15938_v60, %v16044_v11  ;;  %v19248_v35 = vld [vmem:[#allocation40_spill] sm:$0xff]  ;;  %v16074_v60 = vld [vmem:[#allocation2 + $0x80] sm:$0xf]  ;;  %v6396_v55 = vshll.u32 %v16055_v8, 16  ;;  %v16083_v15 = vsel %vm3049_vm8, %v15965_v62, %v16046_v4 }
 0x8e5   : > { %7222 = vmatmul.mubr.bf16.gmra.mrb[64].mxu0 %v6833_v54  ;;  %6129 = vrot.lane.b32.xlu0 %v6098_v19, %s11584_s10  ;;  %19249 = vst [vmem:[#allocation40_spill] sm:$0xff] %v16076_v40  ;;  %19250 = vst [vmem:[#allocation122_spill] sm:$0xff] %v16083_v15  ;;  %v5859_v13 = vmul.bf16 %v15983_v50, %v15974_v9  ;;  %v6976_v37 = vrot.slane %v6974_v45, 4 }
 0x8e6   : > { %6127 = vrot.lane.b32.xlu1 %v6096_v38, %s11584_s10  ;;  %10373 = vmatprep.mubr.msk.bf16.mxu0 %vm285_vm1, %v19248_v35  ;;  %v3626_v38 = vor.u32 %v3624_v26, %v15879_v25  ;;  %v6549_v35 = vsel %vm940_vm0, %v6504_v51, %v15979_v49  ;;  %v6973_v25 = vrot.slane %v6971_v27, 3  ;;  %v6482_v26 = vsel %vm3492_vm11, %v6479_v24, %v16069_v59 }
 0x8e7   : > { %v16085_v18 = vld [vmem:[#allocation2 + $0x88] sm:$0xf]  ;;  %v6163_v19 = vpop.permute.xlu1 %6162  ;;  %v16091_v23 = vpop.permute.xlu0 %6113  ;;  %v6988_v43 = vshrl.u32 %v6482_v26, 16  ;;  %v6991_v15 = vshll.u32 %v6482_v26, 16  ;;  %v6010_v49 = vshll.u32 %v16074_v60, 16  ;;  %v5860_v24 = vmul.bf16 %v16004_v36, %v16053_v29 }
 0x8e8   : > { %19251 = vst [vmem:[#allocation123_spill] sm:$0xff] %v16085_v18  ;;  %v3248_v54 = vld [vmem:[#allocation2 + $0x88] sm:$0x1f]  ;;  %v6583_v62 = vsel %vm3997_vm10, %v6549_v35, %v6163_v19  ;;  %v3628_v2 = vshll.u32 %v16085_v18, 16 }
 0x8e9   : > { %v16087_v3 = vld [vmem:[#allocation2 + $0x88] sm:$0xff]  ;;  %v3265_v27 = vmul.bf16 %v3248_v54, %v15759_v42  ;;  %6238 = vrot.lane.b32.xlu0 %v6198_v44, %s11586_s12  ;;  %v6990_v45 = vrot.slane %v6988_v43, 3  ;;  %v6993_v19 = vrot.slane %v6991_v15, 4  ;;  %v6617_v26 = vsel %vm4032_vm12, %v6583_v62, %v16001_v57  ;;  %v5864_v57 = vld [vmem:[#allocation2 + $0x90] sm:$0x1f] }
 0x8ea   : > { %19252 = vst [vmem:[#allocation124_spill] sm:$0xff] %v16087_v3  ;;  %5750 = vst.msk [vmem:[#allocation2 + $0x88] sm:$0xf] %vm287_vm3, %v5716_v6  ;;  %6236 = vrot.lane.b32.xlu1 %v16033_v12, %s11586_s12  ;;  %v3813_v51 = vshll.u32 %v16087_v3, 16  ;;  %v6977_v6 = vor.u32 %v6976_v37, %v6973_v25  ;;  %v16114_v39 = vrot.slane %v3628_v2, 1  ;;  %v5841_v54 = vmul.bf16 %v16004_v36, %v15821_v28 }
 0x8eb   : > { %v6305_v35 = vpop.permute.xlu1 %6304  ;;  %v16110_v7 = vpop.permute.xlu0 %6222  ;;  %v16116_v18 = vrot.slane %v3265_v27, 1  ;;  %v16125_v43 = vor.u32 %v6993_v19, %v6990_v45  ;;  %v16128_v15 = vrot.slane %v6010_v49, 1  ;;  %v5786_v2 = vld [vmem:[#allocation2 + $0x80] sm:$0x1f]  ;;  %vm292_vm3 = vcmask 195584  }
 0x8ec   : > { %v16112_v47 = vrot.slane %v3813_v51, 1  ;;  %19254 = vst [vmem:[#allocation126_spill] sm:$0xff] %v16114_v39  ;;  %v6651_v44 = vsel %vm4067_vm14, %v6617_v26, %v6305_v35  ;;  %v16123_v37 = vsel %vm3049_vm8, %v15856_v46, %v6977_v6  ;;  %v16136_v62 = vsel %vm3305_vm9, %v3626_v38, %v16114_v39  ;;  %v11515_v51 = vld [vmem:[#allocation2 + $0x30] sm:$0xff] }
 0x8ed   : > { %19255 = vst [vmem:[#allocation127_spill] sm:$0xff] %v16116_v18  ;;  %19257 = vst [vmem:[#allocation129_spill] sm:$0xff] %v16136_v62  ;;  %v16141_v46 = vsel %vm3492_vm11, %v15908_v1, %v16116_v18  ;;  %6373 = vrot.lane.b32.xlu0 %v5860_v24, %s11578_s7  ;;  %v16147_v27 = vsel %vm3049_vm8, %v6977_v6, %v16125_v43  ;;  %v6685_v19 = vsel %vm4102_vm15, %v6651_v44, %v16023_v41  ;;  %v3287_v6 = vld [vmem:[#allocation2 + $0x90] sm:$0x1f] }
 0x8ee   : > { %19253 = vst [vmem:[#allocation125_spill] sm:$0xff] %v16112_v47  ;;  %6371 = vrot.lane.b32.xlu1 %v5859_v13, %s11578_s7  ;;  %v16132_v25 = vsel %vm3305_vm9, %v3626_v38, %v16112_v47  ;;  %19258 = vst [vmem:[#allocation130_spill] sm:$0xff] %v16141_v46  ;;  %v19259_v13 = vld [vmem:[#allocation87_spill] sm:$0xff]  ;;  %v16156_v1 = vsel %vm2869_vm13, %v16029_v14, %v16076_v40  ;;  %v16160_v26 = vrot.slane %v6396_v55, 1  ;;  %v6290_v55 = vrot.slane %v5841_v54, 1 }
 0x8ef   : > { %19256 = vst [vmem:[#allocation128_spill] sm:$0xff] %v16132_v25  ;;  %v5774_v49 = vmul.bf16 %v11515_v51, %v19259_v13  ;;  %v6414_v45 = vpop.permute.xlu1 %6413  ;;  %v16151_v38 = vpop.permute.xlu0 %6357  ;;  %19260 = vst [vmem:[#allocation87_spill] sm:$0xff] %v16156_v1  ;;  %v5881_v51 = vmul.bf16 %v5864_v57, %v15759_v42  ;;  %v5803_v44 = vmul.bf16 %v5786_v2, %v15759_v42  ;;  %vm296_vm13 = vcmask 195588  }
 0x8f0   : > { %v6719_v18 = vsel %vm4137_vm5, %v6685_v19, %v6414_v45  ;;  %v6013_v14 = vsel %vm3305_vm9, %v16025_v58, %v16128_v15  ;;  %v5821_v57 = vmul.bf16 %v15983_v50, %v16053_v29  ;;  %v6199_v45 = vshrl.u32 %v16004_v36, 16 }
 0x8f1   : > { %v5825_v35 = vld [vmem:[#allocation2 + $0x88] sm:$0x1f]  ;;  %v6843_v46 = vshrl.u32 %v6719_v18, 16  ;;  %v6846_v47 = vshll.u32 %v6719_v18, 16  ;;  %6047 = vrot.lane.b32.xlu0 %v6013_v14, %s11583_s9  ;;  %v3303_v2 = vmul.bf16 %v16087_v3, %v15821_v28  ;;  %v3304_v18 = vmul.bf16 %v3287_v6, %v15759_v42 }
 0x8f2   : > { %v16158_v24 = vld [vmem:[#allocation2 + $0x88] sm:$0xff]  ;;  %v5842_v39 = vmul.bf16 %v5825_v35, %v15759_v42  ;;  %6045 = vrot.lane.b32.xlu1 %v16033_v12, %s11583_s9  ;;  %v5822_v10 = vmul.bf16 %v16004_v36, %v16156_v1  ;;  %v16190_v53 = vrot.slane %v5881_v51, 1  ;;  %v16200_v6 = vrot.slane %v5803_v44, 1 }
 0x8f3   : > { %v6388_v41 = vshll.u32 %v16158_v24, 16  ;;  %v6845_v19 = vrot.slane %v6843_v46, 3  ;;  %v6848_v35 = vrot.slane %v6846_v47, 4  ;;  %v6030_v12 = vpop.permute.xlu1 %6029  ;;  %v16179_v62 = vpop.permute.xlu0 %6031  ;;  %v16183_v58 = vld [vmem:[#allocation2 + $0x88] sm:$0xf]  ;;  %v5880_v54 = vmul.bf16 %v16158_v24, %v15821_v28 }
 0x8f4   : > { %v16181_v25 = vrot.slane %v5842_v39, 1  ;;  %v6507_v14 = vsel %vm285_vm1, %v5774_v49, %v6030_v12  ;;  %v6291_v39 = vsel %vm3492_vm11, %v15997_v5, %v6290_v55  ;;  %v16198_v47 = vor.u32 %v6199_v45, %v16027_v52  ;;  %v19262_v12 = vld [vmem:[#allocation84_spill] sm:$0xff] }
 0x8f5   : > { %v6390_v3 = vrot.slane %v6388_v41, 1  ;;  %v16192_v46 = vor.u32 %v6848_v35, %v6845_v19  ;;  %6182 = vrot.lane.b32.xlu0 %v5822_v10, %s11585_s11  ;;  %v6392_v49 = vshrl.u32 %v16158_v24, 16  ;;  %v6203_v36 = vshll.u32 %v16183_v58, 16 }
 0x8f6   : > { %6180 = vrot.lane.b32.xlu1 %v5821_v57, %s11585_s11  ;;  %v6483_v51 = vrot.slane %v5880_v54, 1  ;;  %v16205_v41 = vrot.slane %v3304_v18, 1  ;;  %v6551_v57 = vsel %vm940_vm0, %v6507_v14, %v16091_v23  ;;  %v6293_v10 = vsel %vm3492_vm11, %v6290_v55, %v16181_v25 }
 0x8f7   : > { %v16209_v35 = vpop.permute.xlu0 %6166  ;;  %v6850_v5 = vsel %vm3049_vm8, %v16044_v11, %v16192_v46  ;;  %v3908_v52 = vrot.slane %v3303_v2, 1  ;;  %v6391_v45 = vsel %vm3305_vm9, %v16198_v47, %v6390_v3  ;;  %v6394_v11 = vor.u32 %v6392_v49, %v6390_v3 }
 0x8f8   : > { %19261 = vst [vmem:[#allocation131_spill] sm:$0xff] %v16205_v41  ;;  %v6165_v19 = vpop.permute.xlu1 %6164  ;;  %7230 = vmatmul.mubr.bf16.gmra.mrb[68].mxu0 %v6850_v5  ;;  %v6484_v18 = vsel %vm3492_vm11, %v16069_v59, %v6483_v51  ;;  %v6486_v23 = vsel %vm3492_vm11, %v6483_v51, %v16190_v53 }
 0x8f9   : > { %v6585_v44 = vsel %vm3997_vm10, %v6551_v57, %v6165_v19  ;;  %10374 = vmatprep.mubr.msk.bf16.mxu0 %vm285_vm1, %v19262_v12  ;;  %v7005_v55 = vshrl.u32 %v6484_v18, 16  ;;  %v7008_v2 = vshll.u32 %v6484_v18, 16  ;;  %v7022_v54 = vshrl.u32 %v6486_v23, 16  ;;  %6324 = vrot.lane.b32.xlu0 %v6293_v10, %s11579_s8 }
 0x8fa   : > { %6322 = vrot.lane.b32.xlu1 %v6291_v39, %s11579_s8  ;;  %v6619_v14 = vsel %vm4032_vm12, %v6585_v44, %v16110_v7  ;;  %v7025_v19 = vshll.u32 %v6486_v23, 16  ;;  %v3909_v59 = vsel %vm3492_vm11, %v15936_v20, %v3908_v52  ;;  %v3911_v51 = vsel %vm3492_vm11, %v3908_v52, %v16205_v41 }
 0x8fb   : > { %v16233_v57 = vpop.permute.xlu0 %6308  ;;  %v7007_v5 = vrot.slane %v7005_v55, 3  ;;  %v7010_v3 = vrot.slane %v7008_v2, 4  ;;  %v7024_v49 = vrot.slane %v7022_v54, 3  ;;  %v4435_v18 = vshrl.u32 %v3909_v59, 16 }
 0x8fc   : > { %v6307_v39 = vpop.permute.xlu1 %6306  ;;  %v7027_v10 = vrot.slane %v7025_v19, 4  ;;  %v4438_v42 = vshll.u32 %v3909_v59, 16  ;;  %v4452_v28 = vshrl.u32 %v3911_v51, 16  ;;  %v6399_v7 = vsel %vm3305_vm9, %v6394_v11, %v16160_v26 }
 0x8fd   : > { %v6653_v12 = vsel %vm4067_vm14, %v6619_v14, %v6307_v39  ;;  %v7011_v20 = vor.u32 %v7010_v3, %v7007_v5  ;;  %v4437_v44 = vrot.slane %v4435_v18, 3  ;;  %v4455_v52 = vshll.u32 %v3911_v51, 16  ;;  %6433 = vrot.lane.b32.xlu0 %v6399_v7, %s11587_s13  ;;  %v11516_v5 = vld [vmem:[#allocation2 + $0x38] sm:$0xff] }
 0x8fe   : > { %6431 = vrot.lane.b32.xlu1 %v6391_v45, %s11587_s13  ;;  %v16240_v23 = vor.u32 %v7027_v10, %v7024_v49  ;;  %v4440_v55 = vrot.slane %v4438_v42, 4  ;;  %v4454_v2 = vrot.slane %v4452_v28, 3  ;;  %v6687_v14 = vsel %vm4102_vm15, %v6653_v12, %v16151_v38  ;;  %v19263_v38 = vld [vmem:[#allocation54_spill] sm:$0xff] }
 0x8ff   : > { %v6418_v19 = vpop.permute.xlu0 %6417  ;;  %v6100_v45 = vsel %vm3492_vm11, %v16041_v31, %v16200_v6  ;;  %v16249_v11 = vsel %vm3049_vm8, %v16125_v43, %v7011_v20  ;;  %v4457_v59 = vrot.slane %v4455_v52, 4  ;;  %v6205_v39 = vrot.slane %v6203_v36, 1 }
 0x900   : > { %v6416_v54 = vpop.permute.xlu1 %6415  ;;  %v16254_v42 = vsel %vm3049_vm8, %v7011_v20, %v16240_v23  ;;  %v4441_v28 = vor.u32 %v4440_v55, %v4437_v44  ;;  %v5775_v3 = vmul.bf16 %v11516_v5, %v19263_v38  ;;  %v6207_v43 = vshrl.u32 %v16183_v58, 16 }
 0x901   : > { %v6721_v51 = vsel %vm4137_vm5, %v6687_v14, %v6416_v54  ;;  %v16258_v31 = vor.u32 %v4457_v59, %v4454_v2  ;;  %6133 = vrot.lane.b32.xlu0 %v16200_v6, %s11584_s10  ;;  %v6206_v2 = vsel %vm3305_vm9, %v16198_v47, %v6205_v39  ;;  %v6014_v5 = vshrl.u32 %v16074_v60, 16 }
 0x902   : > { %v6860_v49 = vshrl.u32 %v6721_v51, 16  ;;  %v6863_v18 = vshll.u32 %v6721_v51, 16  ;;  %6131 = vrot.lane.b32.xlu1 %v6100_v45, %s11584_s10  ;;  %v16265_v36 = vsel %vm3049_vm8, %v16046_v4, %v4441_v28  ;;  %v6510_v12 = vsel %vm285_vm1, %v5775_v3, %v16179_v62 }
 0x903   : > { %19264 = vst [vmem:[#allocation84_spill] sm:$0xff] %v16258_v31  ;;  %19265 = vst [vmem:[#allocation54_spill] sm:$0xff] %v16265_v36  ;;  %v6118_v44 = vpop.permute.xlu0 %6117  ;;  %v16271_v52 = vsel %vm3049_vm8, %v4441_v28, %v16258_v31  ;;  %v6209_v6 = vor.u32 %v6207_v43, %v6205_v39  ;;  %v5862_v4 = vmul.bf16 %v16055_v8, %v16076_v40  ;;  %v19267_v62 = vmov 0   ;;  %v19268_v28 = vld [vmem:[#allocation88_spill] sm:$0xff] }
 0x904   : > { %v6862_v10 = vrot.slane %v6860_v49, 3  ;;  %v6865_v7 = vrot.slane %v6863_v18, 4  ;;  %v6116_v20 = vpop.permute.xlu1 %6115  ;;  %19266 = vst [vmem:[#allocation132_spill] sm:$0xff] %v16271_v52  ;;  %293 = vst.msk [vmem:[#allocation3] sm:$0xff] %vm292_vm3, %v19267_v62  ;;  %v5861_v51 = vmul.bf16 %v16158_v24, %v16156_v1  ;;  %v6016_v43 = vor.u32 %v6014_v5, %v16128_v15 }
 0x905   : > { %v6553_v55 = vsel %vm940_vm0, %v6510_v12, %v6116_v20  ;;  %6242 = vrot.lane.b32.xlu0 %v6209_v6, %s11586_s12  ;;  %298 = vst.msk [vmem:[#allocation3 + $0x90] sm:$0xff] %vm292_vm3, %v19267_v62  ;;  %v5823_v15 = vmul.bf16 %v16183_v58, %v16076_v40 }
 0x906   : > { %v6866_v54 = vor.u32 %v6865_v7, %v6862_v10  ;;  %6240 = vrot.lane.b32.xlu1 %v6206_v2, %s11586_s12  ;;  %v6587_v45 = vsel %vm3997_vm10, %v6553_v55, %v16209_v35  ;;  %v19269_v35 = vld [vmem:[#allocation5_spill] sm:$0xff]  ;;  %v19271_v55 = vld [vmem:[#allocation7_spill] sm:$0xff]  ;;  %297 = vst.msk [vmem:[#allocation3 + $0x88] sm:$0xf0] %vm296_vm13, %v19267_v62 }
 0x907   : > { %v6227_v47 = vpop.permute.xlu0 %6226  ;;  %295 = vst.msk [vmem:[#allocation3 + $0x8] sm:$0xf] %vm294_vm7, %v19267_v62 }
 0x908   : > { %v6225_v14 = vpop.permute.xlu1 %6224  ;;  %v6867_v59 = vsel %vm3049_vm8, %v16192_v46, %v6866_v54 }
 0x909   : > { %v6621_v39 = vsel %vm4032_vm12, %v6587_v45, %v6225_v14  ;;  %7238 = vmatmul.mubr.bf16.gmra.mrb[72].mxu0 %v6867_v59  ;;  %6377 = vrot.lane.b32.xlu0 %v5862_v4, %s11578_s7  ;;  %v11517_v45 = vld [vmem:[#allocation2 + $0x40] sm:$0xff]  ;;  %v19273_v59 = vld [vmem:[#allocation97_spill] sm:$0xff] }
 0x90a   : > { %6375 = vrot.lane.b32.xlu1 %v5861_v51, %s11578_s7  ;;  %10375 = vmatprep.mubr.msk.bf16.mxu0 %vm285_vm1, %v19268_v28  ;;  %v4629_v3 = vpop.f32.mrb[32].mxu0  ;;  %v6655_v24 = vsel %vm4067_vm14, %v6621_v39, %v16233_v57  ;;  %v5776_v51 = vmul.bf16 %v11517_v45, %v19273_v59 }
 0x90b   : > { %v16297_v49 = vadd.f32 %v4629_v3, %v19269_v35  ;;  %v4631_v46 = vpop.f32.mrb[33].mxu0  ;;  %v6362_v10 = vpop.permute.xlu0 %6361  ;;  %v6400_v3 = vshrl.u32 %v16055_v8, 16 }
 0x90c   : > { %v6360_v18 = vpop.permute.xlu1 %6359  ;;  %v4632_v7 = vpop.f32.mrb[34].mxu0 }
 0x90d   : > { %19270 = vst [vmem:[#allocation88_spill] sm:$0xff] %v16297_v49  ;;  %v6689_v12 = vsel %vm4102_vm15, %v6655_v24, %v6360_v18  ;;  %v16305_v6 = vadd.f32 %v4632_v7, %v19271_v55  ;;  %v4634_v2 = vpop.f32.mrb[35].mxu0  ;;  %v6402_v58 = vor.u32 %v6400_v3, %v16160_v26  ;;  %v19274_v7 = vld [vmem:[#allocation91_spill] sm:$0xff] }
 0x90e   : > { %v6723_v20 = vsel %vm4137_vm5, %v6689_v12, %v6418_v19  ;;  %6049 = vrot.lane.b32.xlu1 %v6016_v43, %s11583_s9 }
 0x90f   : > { %19272 = vst [vmem:[#allocation5_spill] sm:$0xff] %v16305_v6  ;;  %v6877_v4 = vshrl.u32 %v6723_v20, 16  ;;  %v6880_v14 = vshll.u32 %v6723_v20, 16  ;;  %v6036_v19 = vpop.permute.xlu0 %6035 }
 0x910   : > { %v6034_v57 = vpop.permute.xlu1 %6033 }
 0x911   : > { %v6879_v39 = vrot.slane %v6877_v4, 3  ;;  %v6882_v28 = vrot.slane %v6880_v14, 4  ;;  %v6513_v5 = vsel %vm285_vm1, %v5776_v51, %v6034_v57  ;;  %v19275_v14 = vld [vmem:[#allocation4_spill] sm:$0xff]  ;;  %v11518_v57 = vld [vmem:[#allocation2 + $0x48] sm:$0xff] }
 0x912   : > { %6184 = vrot.lane.b32.xlu1 %v5823_v15, %s11585_s11  ;;  %v6555_v18 = vsel %vm940_vm0, %v6513_v5, %v6118_v44  ;;  %v5777_v15 = vmul.bf16 %v11518_v57, %v15459_v34  ;;  %v19277_v5 = vld [vmem:[#allocation6_spill] sm:$0xff] }
 0x913   : > { %v6883_v35 = vor.u32 %v6882_v28, %v6879_v39  ;;  %v6171_v43 = vpop.permute.xlu0 %6170 }
 0x914   : > { %v6169_v46 = vpop.permute.xlu1 %6168 }
 0x915   : > { %v6589_v24 = vsel %vm3997_vm10, %v6555_v18, %v6169_v46  ;;  %v6884_v12 = vsel %vm3049_vm8, %v6866_v54, %v6883_v35  ;;  %v6516_v18 = vsel %vm285_vm1, %v5777_v15, %v6036_v19 }
 0x916   : > { %6326 = vrot.lane.b32.xlu1 %v16181_v25, %s11579_s8  ;;  %7246 = vmatmul.mubr.bf16.gmra.mrb[76].mxu0 %v6884_v12  ;;  %v6623_v8 = vsel %vm4032_vm12, %v6589_v24, %v6227_v47 }
 0x917   : > { %10376 = vmatprep.mubr.msk.bf16.mxu0 %vm285_vm1, %v19274_v7  ;;  %v6313_v44 = vpop.permute.xlu0 %6312 }
 0x918   : > { %v6311_v20 = vpop.permute.xlu1 %6310 }
 0x919   : > { %v6657_v55 = vsel %vm4067_vm14, %v6623_v8, %v6311_v20 }
 0x91a   : > { %6435 = vrot.lane.b32.xlu1 %v6402_v58, %s11587_s13  ;;  %v6691_v54 = vsel %vm4102_vm15, %v6657_v55, %v6362_v10 }
 0x91b   : > { %v4637_v2 = vpop.f32.mrb[36].mxu0  ;;  %v6422_v45 = vpop.permute.xlu0 %6421 }
 0x91c   : > { %v6420_v4 = vpop.permute.xlu1 %6419  ;;  %v16327_v25 = vadd.f32 %v19275_v14, %v4637_v2  ;;  %v4639_v51 = vpop.f32.mrb[37].mxu0 }
 0x91d   : > { %v6725_v26 = vsel %vm4137_vm5, %v6691_v54, %v6420_v4  ;;  %v4640_v28 = vpop.f32.mrb[38].mxu0 }
 0x91e   : > { %19276 = vst [vmem:[#allocation7_spill] sm:$0xff] %v16327_v25  ;;  %v6894_v47 = vshrl.u32 %v6725_v26, 16  ;;  %v6897_v39 = vshll.u32 %v6725_v26, 16  ;;  %v16332_v3 = vadd.f32 %v19277_v5, %v4640_v28  ;;  %v4642_v46 = vpop.f32.mrb[39].mxu0 }
 0x91f   : > { %v6122_v7 = vpop.permute.xlu0 %6121 }
 0x920   : > { %19278 = vst [vmem:[#allocation97_spill] sm:$0xff] %v16332_v3  ;;  %v6896_v10 = vrot.slane %v6894_v47, 3  ;;  %v6899_v24 = vrot.slane %v6897_v39, 4  ;;  %v6120_v12 = vpop.permute.xlu1 %6119 }
 0x921   : > { %v6557_v58 = vsel %vm940_vm0, %v6516_v18, %v6120_v12 }
 0x922   : > { %v6900_v20 = vor.u32 %v6899_v24, %v6896_v10  ;;  %v6591_v55 = vsel %vm3997_vm10, %v6557_v58, %v6171_v43  ;;  %v11519_v43 = vld [vmem:[#allocation2 + $0x50] sm:$0xff] }
 0x923   : > { %v6231_v54 = vpop.permute.xlu0 %6230 }
 0x924   : > { %v6229_v8 = vpop.permute.xlu1 %6228  ;;  %v6901_v2 = vsel %vm3049_vm8, %v6883_v35, %v6900_v20  ;;  %v5778_v35 = vmul.bf16 %v11519_v43, %v15704_v32 }
 0x925   : > { %v6625_v4 = vsel %vm4032_vm12, %v6591_v55, %v6229_v8  ;;  %7254 = vmatmul.mubr.bf16.gmra.mrb[80].mxu0 %v6901_v2 }
 0x926   : > { %10377 = vmatprep.mubr.msk.bf16.mxu0 %vm285_vm1, %v15592_v63  ;;  %v6659_v14 = vsel %vm4067_vm14, %v6625_v4, %v6313_v44 }
 0x927   : > { %v6366_v51 = vpop.permute.xlu0 %6365 }
 0x928   : > { %v6364_v19 = vpop.permute.xlu1 %6363 }
 0x929   : > { %v6693_v26 = vsel %vm4102_vm15, %v6659_v14, %v6364_v19 }
 0x92a   : > { %v6727_v57 = vsel %vm4137_vm5, %v6693_v26, %v6422_v45  ;;  %v11520_v26 = vld [vmem:[#allocation2 + $0x58] sm:$0xff] }
 0x92b   : > { %v6911_v15 = vshrl.u32 %v6727_v57, 16  ;;  %v6914_v47 = vshll.u32 %v6727_v57, 16  ;;  %v6040_v18 = vpop.permute.xlu0 %6039  ;;  %v5779_v57 = vmul.bf16 %v11520_v26, %v15725_v56 }
 0x92c   : > { %v6038_v39 = vpop.permute.xlu1 %6037 }
 0x92d   : > { %v6913_v28 = vrot.slane %v6911_v15, 3  ;;  %v6916_v5 = vrot.slane %v6914_v47, 4  ;;  %v6519_v46 = vsel %vm285_vm1, %v5778_v35, %v6038_v39  ;;  %v6522_v47 = vsel %vm285_vm1, %v5779_v57, %v6040_v18 }
 0x92e   : > { %v6559_v44 = vsel %vm940_vm0, %v6519_v46, %v6122_v7 }
 0x92f   : > { %v6917_v63 = vor.u32 %v6916_v5, %v6913_v28  ;;  %v6175_v12 = vpop.permute.xlu0 %6174 }
 0x930   : > { %v6173_v10 = vpop.permute.xlu1 %6172 }
 0x931   : > { %v6593_v24 = vsel %vm3997_vm10, %v6559_v44, %v6173_v10  ;;  %v6918_v45 = vsel %vm3049_vm8, %v6900_v20, %v6917_v63  ;;  %v19279_v44 = vld [vmem:[#allocation9_spill] sm:$0xff] }
 0x932   : > { %7262 = vmatmul.mubr.bf16.gmra.mrb[84].mxu0 %v6918_v45  ;;  %v6627_v8 = vsel %vm4032_vm12, %v6593_v24, %v6231_v54 }
 0x933   : > { %10378 = vmatprep.mubr.msk.bf16.mxu0 %vm285_vm1, %v15831_v16  ;;  %v6317_v2 = vpop.permute.xlu0 %6316 }
 0x934   : > { %v6315_v58 = vpop.permute.xlu1 %6314 }
 0x935   : > { %v6661_v55 = vsel %vm4067_vm14, %v6627_v8, %v6315_v58 }
 0x936   : > { %v6695_v19 = vsel %vm4102_vm15, %v6661_v55, %v6366_v51  ;;  %v19281_v55 = vld [vmem:[#allocation11_spill] sm:$0xff] }
 0x937   : > { %v6426_v14 = vpop.permute.xlu0 %6425 }
 0x938   : > { %v6424_v4 = vpop.permute.xlu1 %6423 }
 0x939   : > { %v6729_v7 = vsel %vm4137_vm5, %v6695_v19, %v6424_v4 }
 0x93a   : > { %v6928_v20 = vshrl.u32 %v6729_v7, 16  ;;  %v6931_v15 = vshll.u32 %v6729_v7, 16 }
 0x93b   : > { %v6126_v39 = vpop.permute.xlu0 %6125 }
 0x93c   : > { %v6930_v16 = vrot.slane %v6928_v20, 3  ;;  %v6933_v43 = vrot.slane %v6931_v15, 4  ;;  %v6124_v35 = vpop.permute.xlu1 %6123 }
 0x93d   : > { %v6561_v54 = vsel %vm940_vm0, %v6522_v47, %v6124_v35  ;;  %v11521_v47 = vld [vmem:[#allocation2 + $0x60] sm:$0xff] }
 0x93e   : > { %v6934_v28 = vor.u32 %v6933_v43, %v6930_v16  ;;  %v6595_v51 = vsel %vm3997_vm10, %v6561_v54, %v6175_v12  ;;  %v5780_v16 = vmul.bf16 %v11521_v47, %v15736_v17 }
 0x93f   : > { %v4645_v5 = vpop.f32.mrb[40].mxu0  ;;  %v6235_v58 = vpop.permute.xlu0 %6234 }
 0x940   : > { %v6233_v46 = vpop.permute.xlu1 %6232  ;;  %v6935_v10 = vsel %vm3049_vm8, %v6917_v63, %v6934_v28  ;;  %v16361_v24 = vadd.f32 %v4645_v5, %v19279_v44  ;;  %v4647_v18 = vpop.f32.mrb[41].mxu0 }
 0x941   : > { %v6629_v45 = vsel %vm4032_vm12, %v6595_v51, %v6233_v46  ;;  %7270 = vmatmul.mubr.bf16.gmra.mrb[88].mxu0 %v6935_v10  ;;  %v4648_v8 = vpop.f32.mrb[42].mxu0 }
 0x942   : > { %19280 = vst [vmem:[#allocation91_spill] sm:$0xff] %v16361_v24  ;;  %10379 = vmatprep.mubr.msk.bf16.mxu0 %vm285_vm1, %v15868_v21  ;;  %v16367_v4 = vadd.f32 %v4648_v8, %v19281_v55  ;;  %v4650_v19 = vpop.f32.mrb[43].mxu0  ;;  %v6663_v12 = vsel %vm4067_vm14, %v6629_v45, %v6317_v2 }
 0x943   : > { %v6370_v26 = vpop.permute.xlu0 %6369 }
 0x944   : > { %19282 = vst [vmem:[#allocation4_spill] sm:$0xff] %v16367_v4  ;;  %v6368_v7 = vpop.permute.xlu1 %6367 }
 0x945   : > { %v6697_v63 = vsel %vm4102_vm15, %v6663_v12, %v6368_v7  ;;  %v19283_v7 = vld [vmem:[#allocation8_spill] sm:$0xff] }
 0x946   : > { %v6731_v57 = vsel %vm4137_vm5, %v6697_v63, %v6426_v14 }
 0x947   : > { %v6945_v20 = vshrl.u32 %v6731_v57, 16  ;;  %v6948_v15 = vshll.u32 %v6731_v57, 16  ;;  %v6044_v5 = vpop.permute.xlu0 %6043 }
 0x948   : > { %v6042_v43 = vpop.permute.xlu1 %6041 }
 0x949   : > { %v6947_v35 = vrot.slane %v6945_v20, 3  ;;  %v6950_v21 = vrot.slane %v6948_v15, 4  ;;  %v6525_v54 = vsel %vm285_vm1, %v5780_v16, %v6042_v43 }
 0x94a   : > { %v6563_v2 = vsel %vm940_vm0, %v6525_v54, %v6126_v39 }
 0x94b   : > { %v6951_v46 = vor.u32 %v6950_v21, %v6947_v35  ;;  %v6179_v44 = vpop.permute.xlu0 %6178 }
 0x94c   : > { %v6177_v51 = vpop.permute.xlu1 %6176 }
 0x94d   : > { %v6597_v10 = vsel %vm3997_vm10, %v6563_v2, %v6177_v51  ;;  %v6952_v14 = vsel %vm3049_vm8, %v6934_v28, %v6951_v46  ;;  %v19285_v28 = vld [vmem:[#allocation10_spill] sm:$0xff] }
 0x94e   : > { %7278 = vmatmul.mubr.bf16.gmra.mrb[92].mxu0 %v6952_v14  ;;  %v6631_v18 = vsel %vm4032_vm12, %v6597_v10, %v6235_v58  ;;  %v11522_v58 = vld [vmem:[#allocation2 + $0x68] sm:$0xff] }
 0x94f   : > { %10380 = vmatprep.mubr.msk.bf16.mxu0 %vm285_vm1, %v16123_v37  ;;  %v6321_v55 = vpop.permute.xlu0 %6320  ;;  %v5781_v43 = vmul.bf16 %v11522_v58, %v15974_v9 }
 0x950   : > { %v6319_v45 = vpop.permute.xlu1 %6318 }
 0x951   : > { %v6665_v8 = vsel %vm4067_vm14, %v6631_v18, %v6319_v45  ;;  %v4653_v19 = vpop.f32.mrb[44].mxu0  ;;  %v6528_v54 = vsel %vm285_vm1, %v5781_v43, %v6044_v5 }
 0x952   : > { %v16382_v12 = vadd.f32 %v19283_v7, %v4653_v19  ;;  %v4655_v39 = vpop.f32.mrb[45].mxu0  ;;  %v6699_v20 = vsel %vm4102_vm15, %v6665_v8, %v6370_v26 }
 0x953   : > { %v4656_v63 = vpop.f32.mrb[46].mxu0  ;;  %v6430_v16 = vpop.permute.xlu0 %6429 }
 0x954   : > { %19284 = vst [vmem:[#allocation6_spill] sm:$0xff] %v16382_v12  ;;  %v6428_v57 = vpop.permute.xlu1 %6427  ;;  %v16386_v15 = vadd.f32 %v19285_v28, %v4656_v63  ;;  %v4658_v47 = vpop.f32.mrb[47].mxu0 }
 0x955   : > { %v6733_v37 = vsel %vm4137_vm5, %v6699_v20, %v6428_v57 }
 0x956   : > { %19286 = vst [vmem:[#allocation9_spill] sm:$0xff] %v16386_v15  ;;  %v6962_v35 = vshrl.u32 %v6733_v37, 16  ;;  %v6965_v21 = vshll.u32 %v6733_v37, 16 }
 0x957   : > { %v6130_v26 = vpop.permute.xlu0 %6129 }
 0x958   : > { %v6964_v51 = vrot.slane %v6962_v35, 3  ;;  %v6967_v2 = vrot.slane %v6965_v21, 4  ;;  %v6128_v10 = vpop.permute.xlu1 %6127 }
 0x959   : > { %v6565_v14 = vsel %vm940_vm0, %v6528_v54, %v6128_v10  ;;  %v19287_v54 = vld [vmem:[#allocation13_spill] sm:$0xff] }
 0x95a   : > { %v6968_v45 = vor.u32 %v6967_v2, %v6964_v51  ;;  %v6599_v8 = vsel %vm3997_vm10, %v6565_v14, %v6179_v44  ;;  %v11523_v44 = vld [vmem:[#allocation2 + $0x70] sm:$0xff]  ;;  %v19289_v14 = vld [vmem:[#allocation15_spill] sm:$0xff] }
 0x95b   : > { %v6239_v39 = vpop.permute.xlu0 %6238 }
 0x95c   : > { %v6237_v18 = vpop.permute.xlu1 %6236  ;;  %v6969_v19 = vsel %vm3049_vm8, %v6951_v46, %v6968_v45  ;;  %v5782_v46 = vmul.bf16 %v11523_v44, %v16053_v29 }
 0x95d   : > { %v6633_v7 = vsel %vm4032_vm12, %v6599_v8, %v6237_v18  ;;  %7286 = vmatmul.mubr.bf16.gmra.mrb[96].mxu0 %v6969_v19 }
 0x95e   : > { %10381 = vmatprep.mubr.msk.bf16.mxu0 %vm285_vm1, %v16147_v27  ;;  %v6667_v63 = vsel %vm4067_vm14, %v6633_v7, %v6321_v55 }
 0x95f   : > { %v6374_v20 = vpop.permute.xlu0 %6373 }
 0x960   : > { %v6372_v5 = vpop.permute.xlu1 %6371 }
 0x961   : > { %v6701_v57 = vsel %vm4102_vm15, %v6667_v63, %v6372_v5 }
 0x962   : > { %v6735_v28 = vsel %vm4137_vm5, %v6701_v57, %v6430_v16 }
 0x963   : > { %v6979_v47 = vshrl.u32 %v6735_v28, 16  ;;  %v6982_v37 = vshll.u32 %v6735_v28, 16  ;;  %v4661_v58 = vpop.f32.mrb[48].mxu0  ;;  %v6048_v10 = vpop.permute.xlu0 %6047 }
 0x964   : > { %v6046_v43 = vpop.permute.xlu1 %6045  ;;  %v16402_v51 = vadd.f32 %v4661_v58, %v19287_v54  ;;  %v4663_v55 = vpop.f32.mrb[49].mxu0 }
 0x965   : > { %v6981_v35 = vrot.slane %v6979_v47, 3  ;;  %v6984_v21 = vrot.slane %v6982_v37, 4  ;;  %v6531_v27 = vsel %vm285_vm1, %v5782_v46, %v6046_v43  ;;  %v4664_v2 = vpop.f32.mrb[50].mxu0 }
 0x966   : > { %19288 = vst [vmem:[#allocation11_spill] sm:$0xff] %v16402_v51  ;;  %v16406_v18 = vadd.f32 %v4664_v2, %v19289_v14  ;;  %v4666_v16 = vpop.f32.mrb[51].mxu0  ;;  %v6567_v7 = vsel %vm940_vm0, %v6531_v27, %v6130_v26  ;;  %v5783_v26 = vmul.bf16 %v15983_v50, %v16156_v1  ;;  %v7039_v50 = vshrl.u32 %v16190_v53, 16 }
 0x967   : > { %v6985_v8 = vor.u32 %v6984_v21, %v6981_v35  ;;  %v6183_v47 = vpop.permute.xlu0 %6182 }
 0x968   : > { %19290 = vst [vmem:[#allocation8_spill] sm:$0xff] %v16406_v18  ;;  %v6181_v19 = vpop.permute.xlu1 %6180  ;;  %v6534_v21 = vsel %vm285_vm1, %v5783_v26, %v6048_v10  ;;  %v7042_v10 = vshll.u32 %v16190_v53, 16 }
 0x969   : > { %v6601_v5 = vsel %vm3997_vm10, %v6567_v7, %v6181_v19  ;;  %v6986_v63 = vsel %vm3049_vm8, %v6968_v45, %v6985_v8 }
 0x96a   : > { %7294 = vmatmul.mubr.bf16.gmra.mrb[100].mxu0 %v6986_v63  ;;  %v6635_v28 = vsel %vm4032_vm12, %v6601_v5, %v6239_v39 }
 0x96b   : > { %10382 = vmatprep.mubr.msk.bf16.mxu0 %vm285_vm1, %v16249_v11  ;;  %v6325_v35 = vpop.permute.xlu0 %6324 }
 0x96c   : > { %v6323_v57 = vpop.permute.xlu1 %6322 }
 0x96d   : > { %v6669_v37 = vsel %vm4067_vm14, %v6635_v28, %v6323_v57  ;;  %v7041_v28 = vrot.slane %v7039_v50, 3 }
 0x96e   : > { %v6703_v46 = vsel %vm4102_vm15, %v6669_v37, %v6374_v20 }
 0x96f   : > { %v6434_v16 = vpop.permute.xlu0 %6433 }
 0x970   : > { %v6432_v44 = vpop.permute.xlu1 %6431 }
 0x971   : > { %v6737_v58 = vsel %vm4137_vm5, %v6703_v46, %v6432_v44  ;;  %v5784_v46 = vmul.bf16 %v16074_v60, %v16076_v40 }
 0x972   : > { %v6996_v43 = vshrl.u32 %v6737_v58, 16  ;;  %v6999_v45 = vshll.u32 %v6737_v58, 16 }
 0x974   : > { %v6998_v11 = vrot.slane %v6996_v43, 3  ;;  %v7001_v54 = vrot.slane %v6999_v45, 4  ;;  %v6132_v27 = vpop.permute.xlu1 %6131 }
 0x975   : > { %v6569_v39 = vsel %vm940_vm0, %v6534_v21, %v6132_v27 }
 0x976   : > { %v7002_v55 = vor.u32 %v7001_v54, %v6998_v11  ;;  %v6603_v14 = vsel %vm3997_vm10, %v6569_v39, %v6183_v47  ;;  %v6134_v47 = vpop.permute.xlu0 %6133 }
 0x978   : > { %v6241_v2 = vpop.permute.xlu1 %6240  ;;  %v7003_v20 = vsel %vm3049_vm8, %v6985_v8, %v7002_v55  ;;  %v7044_v8 = vrot.slane %v7042_v10, 4 }
 0x979   : > { %v6637_v19 = vsel %vm4032_vm12, %v6603_v14, %v6241_v2  ;;  %7302 = vmatmul.mubr.bf16.gmra.mrb[104].mxu0 %v7003_v20 }
 0x97a   : > { %10383 = vmatprep.mubr.msk.bf16.mxu0 %vm285_vm1, %v16254_v42  ;;  %v6671_v5 = vsel %vm4067_vm14, %v6637_v19, %v6325_v35  ;;  %v7045_v43 = vor.u32 %v7044_v8, %v7041_v28  ;;  %v6243_v54 = vpop.permute.xlu0 %6242 }
 0x97c   : > { %v6376_v7 = vpop.permute.xlu1 %6375  ;;  %v7046_v20 = vsel %vm3049_vm8, %v16240_v23, %v7045_v43 }
 0x97d   : > { %v6705_v63 = vsel %vm4102_vm15, %v6671_v5, %v6376_v7 }
 0x97e   : > { %v6739_v57 = vsel %vm4137_vm5, %v6705_v63, %v6434_v16 }
 0x97f   : > { %v7013_v37 = vshrl.u32 %v6739_v57, 16  ;;  %v7016_v44 = vshll.u32 %v6739_v57, 16 }
 0x980   : > { %v6050_v42 = vpop.permute.xlu1 %6049 }
 0x981   : > { %v7015_v58 = vrot.slane %v7013_v37, 3  ;;  %v7018_v26 = vrot.slane %v7016_v44, 4  ;;  %v6537_v53 = vsel %vm285_vm1, %v5784_v46, %v6050_v42 }
 0x982   : > { %v6571_v11 = vsel %vm940_vm0, %v6537_v53, %v6134_v47 }
 0x983   : > { %v7019_v45 = vor.u32 %v7018_v26, %v7015_v58 }
 0x984   : > { %v16434_v35 = vpop.f32.mrb[52].mxu0  ;;  %v6185_v21 = vpop.permute.xlu1 %6184 }
 0x985   : > { %v6605_v27 = vsel %vm3997_vm10, %v6571_v11, %v6185_v21  ;;  %v7201_v39 = vpop.f32.mrb[53].mxu0  ;;  %v7326_v2 = vsel %vm292_vm3, %v16434_v35, 0.0  ;;  %v7020_v60 = vsel %vm3049_vm8, %v7002_v55, %v7019_v45  ;;  %v6378_v55 = vpop.permute.xlu0 %6377 }
 0x986   : > { %v16441_v14 = vpop.f32.mrb[54].mxu0  ;;  %7327 = vadd.xlane.f32.xlu0 %v7326_v2  ;;  %7310 = vmatmul.mubr.bf16.gmra.mrb[108].mxu0 %v7020_v60  ;;  %v6639_v10 = vsel %vm4032_vm12, %v6605_v27, %v6243_v54 }
 0x987   : > { %v7204_v16 = vpop.f32.mrb[55].mxu0  ;;  %10384 = vmatprep.mubr.msk.bf16.mxu0 %vm285_vm1, %v7046_v20  ;;  %v7329_v19 = vsel %vm292_vm3, %v16441_v14, 0.0 }
 0x988   : > { %7330 = vadd.xlane.f32.xlu1 %v7329_v19  ;;  %v6327_v50 = vpop.permute.xlu1 %6326 }
 0x989   : > { %v6673_v7 = vsel %vm4067_vm14, %v6639_v10, %v6327_v50 }
 0x98a   : > { %v6707_v5 = vsel %vm4102_vm15, %v6673_v7, %v6378_v55 }
 0x98c   : > { %v6436_v63 = vpop.permute.xlu1 %6435 }
 0x98d   : > { %v6741_v57 = vsel %vm4137_vm5, %v6707_v5, %v6436_v63 }
 0x98e   : > { %v7030_v28 = vshrl.u32 %v6741_v57, 16  ;;  %v7033_v23 = vshll.u32 %v6741_v57, 16 }
 0x990   : > { %v7032_v8 = vrot.slane %v7030_v28, 3  ;;  %v7035_v47 = vrot.slane %v7033_v23, 4 }
 0x992   : > { %v7036_v37 = vor.u32 %v7035_v47, %v7032_v8 }
 0x994   : > { %v7037_v44 = vsel %vm3049_vm8, %v7019_v45, %v7036_v37  ;;  %v16453_v46 = vpop.f32.mrb[56].mxu0 }
 0x995   : > { %7318 = vmatmul.mubr.bf16.gmra.mrb[112].mxu0 %v7037_v44  ;;  %v7209_v42 = vpop.f32.mrb[57].mxu0  ;;  %v7332_v58 = vsel %vm292_vm3, %v16453_v46, 0.0 }
 0x996   : > { %v16457_v26 = vpop.f32.mrb[58].mxu0  ;;  %7333 = vadd.xlane.f32.xlu0 %v7332_v58 }
 0x997   : > { %v7212_v53 = vpop.f32.mrb[59].mxu0  ;;  %v7335_v43 = vsel %vm292_vm3, %v16457_v26, 0.0 }
 0x99a   : > { %7336 = vadd.xlane.f32.xlu0 %v7335_v43 }
 0x9a7   : > { %v16461_v21 = vpop.f32.mrb[60].mxu0 }
 0x9a8   : > { %v7217_v11 = vpop.f32.mrb[61].mxu0  ;;  %v7338_v45 = vsel %vm292_vm3, %v16461_v21, 0.0 }
 0x9a9   : > { %v16465_v54 = vpop.f32.mrb[62].mxu0  ;;  %7339 = vadd.xlane.f32.xlu1 %v7338_v45 }
 0x9aa   : > { %v7220_v27 = vpop.f32.mrb[63].mxu0  ;;  %v7341_v39 = vsel %vm292_vm3, %v16465_v54, 0.0 }
 0x9ab   : > { %7342 = vadd.xlane.f32.xlu0 %v7341_v39 }
 0x9b8   : > { %v16469_v2 = vpop.f32.mrb[64].mxu0 }
 0x9b9   : > { %v7225_v60 = vpop.f32.mrb[65].mxu0  ;;  %v7344_v20 = vsel %vm292_vm3, %v16469_v2, 0.0 }
 0x9ba   : > { %v16473_v16 = vpop.f32.mrb[66].mxu0  ;;  %7345 = vadd.xlane.f32.xlu1 %v7344_v20 }
 0x9bb   : > { %v7228_v19 = vpop.f32.mrb[67].mxu0  ;;  %v7347_v50 = vsel %vm292_vm3, %v16473_v16, 0.0 }
 0x9bc   : > { %7348 = vadd.xlane.f32.xlu0 %v7347_v50 }
 0x9cb   : > { %v16477_v10 = vpop.f32.mrb[68].mxu0 }
 0x9cc   : > { %v7233_v7 = vpop.f32.mrb[69].mxu0  ;;  %v7350_v55 = vsel %vm292_vm3, %v16477_v10, 0.0 }
 0x9cd   : > { %v16481_v5 = vpop.f32.mrb[70].mxu0  ;;  %7351 = vadd.xlane.f32.xlu1 %v7350_v55 }
 0x9ce   : > { %v7236_v63 = vpop.f32.mrb[71].mxu0  ;;  %v7353_v57 = vsel %vm292_vm3, %v16481_v5, 0.0 }
 0x9cf   : > { %7354 = vadd.xlane.f32.xlu0 %v7353_v57 }
 0x9dc   : > { %v16485_v28 = vpop.f32.mrb[72].mxu0 }
 0x9dd   : > { %v7241_v23 = vpop.f32.mrb[73].mxu0  ;;  %v7356_v8 = vsel %vm292_vm3, %v16485_v28, 0.0 }
 0x9de   : > { %7357 = vadd.xlane.f32.xlu1 %v7356_v8  ;;  %v16489_v47 = vpop.f32.mrb[74].mxu0 }
 0x9df   : > { %v7244_v37 = vpop.f32.mrb[75].mxu0  ;;  %v7359_v44 = vsel %vm292_vm3, %v16489_v47, 0.0 }
 0x9e0   : > { %7360 = vadd.xlane.f32.xlu0 %v7359_v44 }
 0x9e9   : > { %v16493_v42 = vpop.f32.mrb[76].mxu0 }
 0x9ea   : > { %v7249_v58 = vpop.f32.mrb[77].mxu0  ;;  %v7362_v53 = vsel %vm292_vm3, %v16493_v42, 0.0 }
 0x9eb   : > { %7363 = vadd.xlane.f32.xlu1 %v7362_v53  ;;  %v16497_v43 = vpop.f32.mrb[78].mxu0 }
 0x9ec   : > { %v7252_v11 = vpop.f32.mrb[79].mxu0  ;;  %v7365_v45 = vsel %vm292_vm3, %v16497_v43, 0.0 }
 0x9ed   : > { %7366 = vadd.xlane.f32.xlu0 %v7365_v45 }
 0x9f8   : > { %v16501_v27 = vpop.f32.mrb[80].mxu0 }
 0x9f9   : > { %v7257_v39 = vpop.f32.mrb[81].mxu0  ;;  %v7368_v60 = vsel %vm292_vm3, %v16501_v27, 0.0 }
 0x9fa   : > { %7369 = vadd.xlane.f32.xlu1 %v7368_v60  ;;  %v16505_v20 = vpop.f32.mrb[82].mxu0 }
 0x9fb   : > { %v7260_v19 = vpop.f32.mrb[83].mxu0  ;;  %v7371_v50 = vsel %vm292_vm3, %v16505_v20, 0.0 }
 0x9fc   : > { %7372 = vadd.xlane.f32.xlu0 %v7371_v50 }
 0xa05   : > { %v16509_v7 = vpop.f32.mrb[84].mxu0 }
 0xa06   : > { %v7265_v55 = vpop.f32.mrb[85].mxu0  ;;  %v7374_v63 = vsel %vm292_vm3, %v16509_v7, 0.0 }
 0xa07   : > { %7375 = vadd.xlane.f32.xlu1 %v7374_v63  ;;  %v16513_v57 = vpop.f32.mrb[86].mxu0 }
 0xa08   : > { %v7268_v23 = vpop.f32.mrb[87].mxu0  ;;  %v7377_v8 = vsel %vm292_vm3, %v16513_v57, 0.0 }
 0xa09   : > { %7378 = vadd.xlane.f32.xlu0 %v7377_v8 }
 0xa13   : > { %v7328_v23 = vpop.xlane.xlu0 %7327 }
 0xa14   : > { %v16517_v37 = vpop.f32.mrb[88].mxu0  ;;  %v7423_v18 = vmul.f32 0.041666668, %v7328_v23 }
 0xa15   : > { %v7273_v44 = vpop.f32.mrb[89].mxu0  ;;  %v7380_v58 = vsel %vm292_vm3, %v16517_v37, 0.0 }
 0xa16   : > { %7381 = vadd.xlane.f32.xlu1 %v7380_v58  ;;  %v16521_v53 = vpop.f32.mrb[90].mxu0  ;;  %v16542_v15 = vsub.f32 %v16434_v35, %v7423_v18 }
 0xa17   : > { %v7276_v11 = vpop.f32.mrb[91].mxu0  ;;  %v7383_v45 = vsel %vm292_vm3, %v16521_v53, 0.0 }
 0xa18   : > { %7384 = vadd.xlane.f32.xlu0 %v7383_v45  ;;  %v7487_v18 = vmul.f32 %v16542_v15, %v16542_v15 }
 0xa21   : > { %v16525_v39 = vpop.f32.mrb[92].mxu0 }
 0xa22   : > { %v7281_v60 = vpop.f32.mrb[93].mxu0  ;;  %v7386_v19 = vsel %vm292_vm3, %v16525_v39, 0.0 }
 0xa23   : > { %7387 = vadd.xlane.f32.xlu1 %v7386_v19  ;;  %v16529_v50 = vpop.f32.mrb[94].mxu0  ;;  %v7334_v45 = vpop.xlane.xlu0 %7333 }
 0xa24   : > { %v7284_v55 = vpop.f32.mrb[95].mxu0  ;;  %v7389_v63 = vsel %vm292_vm3, %v16529_v50, 0.0 }
 0xa25   : > { %7390 = vadd.xlane.f32.xlu0 %v7389_v63  ;;  %v7331_v55 = vpop.xlane.xlu1 %7330 }
 0xa26   : > { %v7424_v51 = vmul.f32 0.041666668, %v7331_v55  ;;  %v7519_v55 = vsel %vm292_vm3, %v7487_v18, 0.0 }
 0xa27   : > { %v7337_v63 = vpop.xlane.xlu0 %7336 }
 0xa28   : > { %v16545_v4 = vsub.f32 %v16441_v14, %v7424_v51 }
 0xa30   : > { %v16533_v8 = vpop.f32.mrb[96].mxu0 }
 0xa31   : > { %v7289_v44 = vpop.f32.mrb[97].mxu0  ;;  %v7392_v58 = vsel %vm292_vm3, %v16533_v8, 0.0 }
 0xa32   : > { %7393 = vadd.xlane.f32.xlu1 %v7392_v58  ;;  %v16537_v11 = vpop.f32.mrb[98].mxu0  ;;  %v7425_v44 = vmul.f32 0.041666668, %v7334_v45  ;;  %v7426_v58 = vmul.f32 0.041666668, %v7337_v63 }
 0xa33   : > { %v7292_v60 = vpop.f32.mrb[99].mxu0  ;;  %v7395_v19 = vsel %vm292_vm3, %v16537_v11, 0.0 }
 0xa34   : > { %7396 = vadd.xlane.f32.xlu0 %v7395_v19  ;;  %v16550_v60 = vsub.f32 %v16453_v46, %v7425_v44  ;;  %v16559_v51 = vsub.f32 %v16457_v26, %v7426_v58 }
 0xa36   : > { %v7340_v12 = vpop.xlane.xlu1 %7339  ;;  %v7489_v63 = vmul.f32 %v16550_v60, %v16550_v60  ;;  %v7490_v44 = vmul.f32 %v16559_v51, %v16559_v51 }
 0xa37   : > { %v7427_v19 = vmul.f32 0.041666668, %v7340_v12 }
 0xa38   : > { %v7343_v24 = vpop.xlane.xlu0 %7342  ;;  %v7525_v58 = vsel %vm292_vm3, %v7489_v63, 0.0 }
 0xa39   : > { %v7428_v14 = vmul.f32 0.041666668, %v7343_v24  ;;  %v16566_v12 = vsub.f32 %v16461_v21, %v7427_v19 }
 0xa3b   : > { %v16572_v26 = vsub.f32 %v16465_v54, %v7428_v14  ;;  %v7491_v21 = vmul.f32 %v16566_v12, %v16566_v12 }
 0xa3d   : > { %v16547_v3 = vpop.f32.mrb[100].mxu0  ;;  %v7492_v18 = vmul.f32 %v16572_v26, %v16572_v26 }
 0xa3e   : > { %v7297_v25 = vpop.f32.mrb[101].mxu0  ;;  %v7398_v23 = vsel %vm292_vm3, %v16547_v3, 0.0 }
 0xa3f   : > { %7399 = vadd.xlane.f32.xlu1 %v7398_v23  ;;  %v16556_v35 = vpop.f32.mrb[102].mxu0  ;;  %v7488_v25 = vmul.f32 %v16545_v4, %v16545_v4  ;;  %v7528_v23 = vsel %vm292_vm3, %v7490_v44, 0.0  ;;  %v7534_v63 = vsel %vm292_vm3, %v7492_v18, 0.0 }
 0xa40   : > { %v7300_v45 = vpop.f32.mrb[103].mxu0  ;;  %v7401_v46 = vsel %vm292_vm3, %v16556_v35, 0.0 }
 0xa41   : > { %7402 = vadd.xlane.f32.xlu0 %v7401_v46  ;;  %v7522_v24 = vsel %vm292_vm3, %v7488_v25, 0.0  ;;  %v7531_v45 = vsel %vm292_vm3, %v7491_v21, 0.0 }
 0xa43   : > { %7520 = vadd.xlane.f32.xlu1 %v7519_v55 }
 0xa45   : > { %7523 = vadd.xlane.f32.xlu0 %v7522_v24 }
 0xa47   : > { %7526 = vadd.xlane.f32.xlu1 %v7525_v58  ;;  %v7346_v19 = vpop.xlane.xlu1 %7345 }
 0xa48   : > { %v7429_v54 = vmul.f32 0.041666668, %v7346_v19 }
 0xa49   : > { %7529 = vadd.xlane.f32.xlu0 %v7528_v23  ;;  %v7349_v14 = vpop.xlane.xlu0 %7348 }
 0xa4a   : > { %v16585_v46 = vsub.f32 %v16469_v2, %v7429_v54  ;;  %v7430_v25 = vmul.f32 0.041666668, %v7349_v14 }
 0xa4b   : > { %7532 = vadd.xlane.f32.xlu1 %v7531_v45 }
 0xa4c   : > { %v16587_v55 = vpop.f32.mrb[104].mxu0  ;;  %v16591_v24 = vsub.f32 %v16473_v16, %v7430_v25  ;;  %v7493_v58 = vmul.f32 %v16585_v46, %v16585_v46 }
 0xa4d   : > { %v7305_v44 = vpop.f32.mrb[105].mxu0  ;;  %7535 = vadd.xlane.f32.xlu0 %v7534_v63  ;;  %v7404_v16 = vsel %vm292_vm3, %v16587_v55, 0.0 }
 0xa4e   : > { %v16595_v19 = vpop.f32.mrb[106].mxu0  ;;  %v7537_v2 = vsel %vm292_vm3, %v7493_v58, 0.0  ;;  %v7494_v23 = vmul.f32 %v16591_v24, %v16591_v24 }
 0xa4f   : > { %v7308_v21 = vpop.f32.mrb[107].mxu0  ;;  %7538 = vadd.xlane.f32.xlu1 %v7537_v2  ;;  %v7407_v18 = vsel %vm292_vm3, %v16595_v19, 0.0 }
 0xa50   : > { %v7540_v54 = vsel %vm292_vm3, %v7494_v23, 0.0 }
 0xa51   : > { %7541 = vadd.xlane.f32.xlu0 %v7540_v54 }
 0xa53   : > { %7405 = vadd.xlane.f32.xlu1 %v7404_v16 }
 0xa55   : > { %7408 = vadd.xlane.f32.xlu0 %v7407_v18 }
 0xa59   : > { %v16605_v14 = vpop.f32.mrb[108].mxu0 }
 0xa5a   : > { %19291 = vst [vmem:[#allocation10_spill] sm:$0xff] %v16605_v14  ;;  %v7313_v45 = vpop.f32.mrb[109].mxu0  ;;  %v7352_v25 = vpop.xlane.xlu1 %7351 }
 0xa5b   : > { %v16607_v63 = vpop.f32.mrb[110].mxu0  ;;  %v7431_v44 = vmul.f32 0.041666668, %v7352_v25 }
 0xa5c   : > { %19292 = vst [vmem:[#allocation13_spill] sm:$0xff] %v16607_v63  ;;  %v7316_v58 = vpop.f32.mrb[111].mxu0  ;;  %v7355_v21 = vpop.xlane.xlu0 %7354 }
 0xa5d   : > { %v16610_v2 = vsub.f32 %v16477_v10, %v7431_v44  ;;  %v7432_v23 = vmul.f32 0.041666668, %v7355_v21  ;;  %v7410_v10 = vsel %vm292_vm3, %v16605_v14, 0.0 }
 0xa5f   : > { %v16613_v54 = vsub.f32 %v16481_v5, %v7432_v23  ;;  %v7495_v16 = vmul.f32 %v16610_v2, %v16610_v2  ;;  %v7413_v5 = vsel %vm292_vm3, %v16607_v63, 0.0 }
 0xa61   : > { %v7543_v18 = vsel %vm292_vm3, %v7495_v16, 0.0  ;;  %v7496_v45 = vmul.f32 %v16613_v54, %v16613_v54 }
 0xa62   : > { %7544 = vadd.xlane.f32.xlu1 %v7543_v18 }
 0xa63   : > { %v7546_v25 = vsel %vm292_vm3, %v7496_v45, 0.0 }
 0xa64   : > { %7547 = vadd.xlane.f32.xlu0 %v7546_v25 }
 0xa66   : > { %7411 = vadd.xlane.f32.xlu1 %v7410_v10 }
 0xa68   : > { %v16623_v44 = vpop.f32.mrb[112].mxu0  ;;  %7414 = vadd.xlane.f32.xlu0 %v7413_v5 }
 0xa69   : > { %19293 = vst [vmem:[#allocation15_spill] sm:$0xff] %v16623_v44  ;;  %v7321_v58 = vpop.f32.mrb[113].mxu0 }
 0xa6a   : > { %v16627_v21 = vpop.f32.mrb[114].mxu0 }
 0xa6b   : > { %19294 = vst [vmem:[#allocation133_spill] sm:$0xff] %v16627_v21  ;;  %v7358_v23 = vpop.xlane.xlu1 %7357  ;;  %v7324_v16 = vpop.f32.mrb[115].mxu0 }
 0xa6c   : > { %v7433_v6 = vmul.f32 0.041666668, %v7358_v23 }
 0xa6d   : > { %v7361_v18 = vpop.xlane.xlu0 %7360 }
 0xa6e   : > { %v16630_v45 = vsub.f32 %v16485_v28, %v7433_v6  ;;  %v7434_v25 = vmul.f32 0.041666668, %v7361_v18  ;;  %v7416_v6 = vsel %vm292_vm3, %v16623_v44, 0.0 }
 0xa70   : > { %v16633_v49 = vsub.f32 %v16489_v47, %v7434_v25  ;;  %v7497_v10 = vmul.f32 %v16630_v45, %v16630_v45  ;;  %v7419_v47 = vsel %vm292_vm3, %v16627_v21, 0.0 }
 0xa72   : > { %v7549_v31 = vsel %vm292_vm3, %v7497_v10, 0.0  ;;  %v7498_v5 = vmul.f32 %v16633_v49, %v16633_v49 }
 0xa73   : > { %7550 = vadd.xlane.f32.xlu1 %v7549_v31 }
 0xa74   : > { %v7552_v58 = vsel %vm292_vm3, %v7498_v5, 0.0 }
 0xa75   : > { %7553 = vadd.xlane.f32.xlu0 %v7552_v58 }
 0xa77   : > { %7417 = vadd.xlane.f32.xlu1 %v7416_v6 }
 0xa78   : > { %v7364_v28 = vpop.xlane.xlu1 %7363 }
 0xa79   : > { %v7435_v23 = vmul.f32 0.041666668, %v7364_v28  ;;  %7420 = vadd.xlane.f32.xlu0 %v7419_v47 }
 0xa7a   : > { %v7367_v16 = vpop.xlane.xlu0 %7366 }
 0xa7b   : > { %v16646_v18 = vsub.f32 %v16493_v42, %v7435_v23  ;;  %v7436_v25 = vmul.f32 0.041666668, %v7367_v16 }
 0xa7d   : > { %v16649_v31 = vsub.f32 %v16497_v43, %v7436_v25  ;;  %v7499_v10 = vmul.f32 %v16646_v18, %v16646_v18 }
 0xa7f   : > { %v7555_v5 = vsel %vm292_vm3, %v7499_v10, 0.0  ;;  %v7500_v58 = vmul.f32 %v16649_v31, %v16649_v31 }
 0xa80   : > { %7556 = vadd.xlane.f32.xlu1 %v7555_v5 }
 0xa81   : > { %v7558_v42 = vsel %vm292_vm3, %v7500_v58, 0.0 }
 0xa82   : > { %7559 = vadd.xlane.f32.xlu0 %v7558_v42 }
 0xa87   : > { %v7370_v6 = vpop.xlane.xlu1 %7369 }
 0xa88   : > { %v7437_v28 = vmul.f32 0.041666668, %v7370_v6 }
 0xa89   : > { %v7373_v47 = vpop.xlane.xlu0 %7372 }
 0xa8a   : > { %v16660_v43 = vsub.f32 %v16501_v27, %v7437_v28  ;;  %v7438_v23 = vmul.f32 0.041666668, %v7373_v47 }
 0xa8c   : > { %v16663_v16 = vsub.f32 %v16505_v20, %v7438_v23  ;;  %v7501_v25 = vmul.f32 %v16660_v43, %v16660_v43 }
 0xa8e   : > { %v7561_v10 = vsel %vm292_vm3, %v7501_v25, 0.0  ;;  %v7502_v5 = vmul.f32 %v16663_v16, %v16663_v16 }
 0xa8f   : > { %7562 = vadd.xlane.f32.xlu1 %v7561_v10 }
 0xa90   : > { %v7564_v58 = vsel %vm292_vm3, %v7502_v5, 0.0 }
 0xa91   : > { %7565 = vadd.xlane.f32.xlu0 %v7564_v58  ;;  %v19295_v58 = vld [vmem:[#allocation43_spill] sm:$0xff] }
 0xa94   : > { %v7376_v42 = vpop.xlane.xlu1 %7375 }
 0xa95   : > { %v7439_v6 = vmul.f32 0.041666668, %v7376_v42 }
 0xa96   : > { %v7379_v27 = vpop.xlane.xlu0 %7378 }
 0xa97   : > { %v16672_v28 = vsub.f32 %v16509_v7, %v7439_v6  ;;  %v7440_v20 = vmul.f32 0.041666668, %v7379_v27  ;;  %v19296_v7 = vld [vmem:[#allocation78_spill] sm:$0xff] }
 0xa98   : > { %v3236_v42 = vmul.bf16 %v19259_v13, %v19296_v7  ;;  %v19298_v6 = vld [vmem:[#allocation66_spill] sm:$0xff] }
 0xa99   : > { %v16675_v47 = vsub.f32 %v16513_v57, %v7440_v20  ;;  %v7503_v23 = vmul.f32 %v16672_v28, %v16672_v28  ;;  %v19297_v57 = vld [vmem:[#allocation44_spill] sm:$0xff] }
 0xa9a   : > { %v3256_v27 = vmul.bf16 %v19298_v6, %v19297_v57 }
 0xa9b   : > { %v7567_v25 = vsel %vm292_vm3, %v7503_v23, 0.0  ;;  %v7504_v10 = vmul.f32 %v16675_v47, %v16675_v47  ;;  %v19299_v23 = vld [vmem:[#allocation39_spill] sm:$0xff] }
 0xa9c   : > { %7568 = vadd.xlane.f32.xlu1 %v7567_v25  ;;  %v16690_v20 = vrot.slane %v3256_v27, 1  ;;  %v19300_v25 = vld [vmem:[#allocation71_spill] sm:$0xff] }
 0xa9d   : > { %v7570_v5 = vsel %vm292_vm3, %v7504_v10, 0.0  ;;  %v19301_v10 = vld [vmem:[#allocation64_spill] sm:$0xff] }
 0xa9e   : > { %7571 = vadd.xlane.f32.xlu0 %v7570_v5  ;;  %v3700_v5 = vsel %vm3492_vm11, %v19301_v10, %v16690_v20 }
 0xaa5   : > { %v7385_v27 = vpop.xlane.xlu0 %7384 }
 0xaad   : > { %3453 = vrot.lane.b32.xlu1 %v19295_v58, %s11583_s9  ;;  %v3275_v58 = vmul.bf16 %v19259_v13, %v19297_v57 }
 0xab1   : > { %3589 = vrot.lane.b32.xlu1 %v3236_v42, %s11585_s11  ;;  %v7382_v42 = vpop.xlane.xlu1 %7381 }
 0xab2   : > { %v16705_v52 = vpop.xlane.xlu0 %7390  ;;  %v7441_v36 = vmul.f32 0.041666668, %v7382_v42 }
 0xab4   : > { %3538 = vrot.lane.b32.xlu0 %v19299_v23, %s11584_s10  ;;  %v16714_v10 = vsub.f32 %v16517_v37, %v7441_v36 }
 0xab5   : > { %3647 = vrot.lane.b32.xlu1 %v19300_v25, %s11586_s12  ;;  %v16703_v41 = vpop.xlane.xlu1 %7387 }
 0xab6   : > { %v7505_v9 = vmul.f32 %v16714_v10, %v16714_v10 }
 0xab8   : > { %3731 = vrot.lane.b32.xlu0 %v3700_v5, %s11579_s8  ;;  %v7442_v5 = vmul.f32 0.041666668, %v7385_v27  ;;  %v7573_v37 = vsel %vm292_vm3, %v7505_v9, 0.0 }
 0xab9   : > { %3782 = vrot.lane.b32.xlu1 %v3275_v58, %s11578_s7 }
 0xaba   : > { %v16721_v42 = vsub.f32 %v16521_v53, %v7442_v5 }
 0xabc   : > { %v7506_v17 = vmul.f32 %v16721_v42, %v16721_v42 }
 0xabf   : > { %v16707_v23 = vpop.xlane.xlu1 %7393 }
 0xac1   : > { %v16709_v6 = vpop.xlane.xlu0 %7396 }
 0xacc   : > { %v16711_v40 = vpop.xlane.xlu1 %7399 }
 0xace   : > { %v16716_v1 = vpop.xlane.xlu0 %7402 }
 0xad0   : > { %v7521_v58 = vpop.xlane.xlu1 %7520 }
 0xad1   : > { %v7615_v29 = vmul.f32 0.041666668, %v7521_v58 }
 0xad2   : > { %v7524_v22 = vpop.xlane.xlu0 %7523 }
 0xad3   : > { %v7647_v33 = vadd.f32 1e-05, %v7615_v29  ;;  %v7616_v21 = vmul.f32 0.041666668, %v7524_v22 }
 0xad4   : > { %v7527_v44 = vpop.xlane.xlu1 %7526 }
 0xad5   : > { %11188 = vrsqrt.f32 %v7647_v33  ;;  %v7648_v30 = vadd.f32 1e-05, %v7616_v21  ;;  %v7617_v48 = vmul.f32 0.041666668, %v7527_v44  ;;  %v7576_v44 = vsel %vm292_vm3, %v7506_v17, 0.0 }
 0xad6   : > { %v7530_v36 = vpop.xlane.xlu0 %7529 }
 0xad7   : > { %11190 = vrsqrt.f32 %v7648_v30  ;;  %v7649_v27 = vadd.f32 1e-05, %v7617_v48  ;;  %v7618_v61 = vmul.f32 0.041666668, %v7530_v36  ;;  %7574 = vadd.xlane.f32.xlu0 %v7573_v37 }
 0xad8   : > { %v7533_v58 = vpop.xlane.xlu1 %7532 }
 0xad9   : > { %11192 = vrsqrt.f32 %v7649_v27  ;;  %v7650_v22 = vadd.f32 1e-05, %v7618_v61  ;;  %v7619_v29 = vmul.f32 0.041666668, %v7533_v58 }
 0xada   : > { %v7536_v53 = vpop.xlane.xlu0 %7535 }
 0xadb   : > { %11194 = vrsqrt.f32 %v7650_v22  ;;  %v7651_v5 = vadd.f32 1e-05, %v7619_v29  ;;  %v7620_v33 = vmul.f32 0.041666668, %v7536_v53 }
 0xadc   : > { %v7539_v9 = vpop.xlane.xlu1 %7538 }
 0xadd   : > { %11196 = vrsqrt.f32 %v7651_v5  ;;  %v7652_v21 = vadd.f32 1e-05, %v7620_v33  ;;  %7577 = vadd.xlane.f32.xlu1 %v7576_v44  ;;  %v7621_v48 = vmul.f32 0.041666668, %v7539_v9 }
 0xade   : > { %v7542_v36 = vpop.xlane.xlu0 %7541 }
 0xadf   : > { %v11189_v30 = vpop.eup %11188  ;;  %11198 = vrsqrt.f32 %v7652_v21  ;;  %v7653_v27 = vadd.f32 1e-05, %v7621_v48  ;;  %v7622_v61 = vmul.f32 0.041666668, %v7542_v36 }
 0xae0   : > { %v16728_v37 = vmul.f32 %v11189_v30, %v16542_v15 }
 0xae1   : > { %v11191_v58 = vpop.eup %11190  ;;  %11200 = vrsqrt.f32 %v7653_v27  ;;  %v7654_v17 = vadd.f32 1e-05, %v7622_v61 }
 0xae2   : > { %v10385_v22 = vmul.f32 -1.442695, %v16728_v37  ;;  %v16732_v29 = vmul.f32 %v11191_v58, %v16545_v4  ;;  %v3374_v4 = vshrl.u32 %v19297_v57, 16 }
 0xae3   : > { %v11193_v53 = vpop.eup %11192 }
 0xae4   : > { %11202 = vpow2.f32 %v10385_v22  ;;  %v10386_v5 = vmul.f32 -1.442695, %v16732_v29  ;;  %v16736_v33 = vmul.f32 %v11193_v53, %v16550_v60  ;;  %v19302_v60 = vld [vmem:[#allocation38_spill] sm:$0xff] }
 0xae5   : > { %v11195_v44 = vpop.eup %11194  ;;  %11204 = vrsqrt.f32 %v7654_v17  ;;  %v3218_v36 = vmul.bf16 %v19302_v60, %v19297_v57 }
 0xae6   : > { %11206 = vpow2.f32 %v10386_v5  ;;  %v10387_v15 = vmul.f32 -1.442695, %v16736_v33  ;;  %v16740_v21 = vmul.f32 %v11195_v44, %v16559_v51  ;;  %v19303_v51 = vld [vmem:[#allocation82_spill] sm:$0xff]  ;;  %v16755_v5 = vpop.xlane.xlu1 %7405 }
 0xae7   : > { %v11197_v9 = vpop.eup %11196  ;;  %v3376_v22 = vor.u32 %v3374_v4, %v19303_v51  ;;  %v16768_v4 = vpop.xlane.xlu0 %7408 }
 0xae8   : > { %11208 = vpow2.f32 %v10387_v15  ;;  %v10388_v48 = vmul.f32 -1.442695, %v16740_v21  ;;  %v16745_v30 = vmul.f32 %v11197_v9, %v16566_v12  ;;  %v19304_v12 = vld [vmem:[#allocation77_spill] sm:$0xff]  ;;  %v16761_v15 = vrot.slane %v3218_v36, 1 }
 0xae9   : > { %v11199_v27 = vpop.eup %11198  ;;  %v16759_v44 = vsel %vm3305_vm9, %v3376_v22, %v19304_v12  ;;  %v19305_v22 = vld [vmem:[#allocation57_spill] sm:$0xff] }
 0xaea   : > { %11210 = vpow2.f32 %v10388_v48  ;;  %v10389_v61 = vmul.f32 -1.442695, %v16745_v30  ;;  %v16751_v58 = vmul.f32 %v11199_v27, %v16572_v26 }
 0xaeb   : > { %v11201_v17 = vpop.eup %11200 }
 0xaec   : > { %11212 = vpow2.f32 %v10389_v61  ;;  %v10390_v53 = vmul.f32 -1.442695, %v16751_v58  ;;  %v16764_v9 = vmul.f32 %v11201_v17, %v16585_v46  ;;  %v3509_v17 = vsel %vm3492_vm11, %v19305_v22, %v16761_v15 }
 0xaed   : > { %3840 = vrot.lane.b32.xlu0 %v16759_v44, %s11587_s13 }
 0xaee   : > { %v11203_v26 = vpop.eup %11202  ;;  %11214 = vpow2.f32 %v10390_v53  ;;  %3455 = vrot.lane.b32.xlu1 %v19300_v25, %s11583_s9  ;;  %v10391_v61 = vmul.f32 -1.442695, %v16764_v9  ;;  %v3237_v53 = vmul.bf16 %v19263_v38, %v19297_v57 }
 0xaef   : > { %v11205_v48 = vpop.eup %11204  ;;  %v7839_v27 = vadd.f32 1.0, %v11203_v26  ;;  %v7545_v46 = vpop.xlane.xlu1 %7544 }
 0xaf0   : > { %v11207_v51 = vpop.eup %11206  ;;  %v16774_v36 = vmul.f32 %v11205_v48, %v16591_v24  ;;  %v7623_v60 = vmul.f32 0.041666668, %v7545_v46 }
 0xaf1   : > { %11216 = vrcp.f32 %v7839_v27  ;;  %v7840_v12 = vadd.f32 1.0, %v11207_v51  ;;  %3540 = vrot.lane.b32.xlu0 %v3509_v17, %s11584_s10  ;;  %v7548_v24 = vpop.xlane.xlu0 %7547 }
 0xaf2   : > { %v11209_v25 = vpop.eup %11208  ;;  %11218 = vpow2.f32 %v10391_v61  ;;  %v10392_v26 = vmul.f32 -1.442695, %v16774_v36  ;;  %3591 = vrot.lane.b32.xlu1 %v3237_v53, %s11585_s11  ;;  %v7655_v22 = vadd.f32 1e-05, %v7623_v60  ;;  %v7624_v0 = vmul.f32 0.041666668, %v7548_v24 }
 0xaf3   : > { %11220 = vrcp.f32 %v7840_v12  ;;  %v7841_v48 = vadd.f32 1.0, %v11209_v25  ;;  %v19306_v61 = vld [vmem:[#allocation50_spill] sm:$0xff] }
 0xaf4   : > { %v11211_v27 = vpop.eup %11210  ;;  %11222 = vpow2.f32 %v10392_v26  ;;  %v7656_v46 = vadd.f32 1e-05, %v7624_v0  ;;  %v3702_v17 = vsel %vm3492_vm11, %v16690_v20, %v19306_v61  ;;  %v19307_v60 = vld [vmem:[#allocation70_spill] sm:$0xff] }
 0xaf5   : > { %11224 = vrcp.f32 %v7841_v48  ;;  %v7842_v51 = vadd.f32 1.0, %v11211_v27  ;;  %3649 = vrot.lane.b32.xlu0 %v16759_v44, %s11586_s12  ;;  %v3276_v25 = vmul.bf16 %v19263_v38, %v19307_v60  ;;  %v16795_v27 = vpop.xlane.xlu1 %7411 }
 0xaf6   : > { %v11213_v53 = vpop.eup %11212  ;;  %11226 = vrsqrt.f32 %v7655_v22  ;;  %3733 = vrot.lane.b32.xlu1 %v3702_v17, %s11579_s8  ;;  %19308 = vst [vmem:[#allocation43_spill] sm:$0xff] %v16795_v27 }
 0xaf7   : > { %11228 = vrcp.f32 %v7842_v51  ;;  %v7843_v12 = vadd.f32 1.0, %v11213_v53  ;;  %v16799_v53 = vpop.xlane.xlu0 %7414 }
 0xaf8   : > { %v11215_v26 = vpop.eup %11214  ;;  %11230 = vrsqrt.f32 %v7656_v46 }
 0xaf9   : > { %11232 = vrcp.f32 %v7843_v12  ;;  %v7844_v0 = vadd.f32 1.0, %v11215_v26  ;;  %3784 = vrot.lane.b32.xlu0 %v3276_v25, %s11578_s7 }
 0xafb   : > { %v11217_v24 = vpop.eup %11216  ;;  %11234 = vrcp.f32 %v7844_v0 }
 0xafc   : > { %v11219_v48 = vpop.eup %11218  ;;  %v7935_v51 = vmul.f32 %v11217_v24, %v16728_v37 }
 0xafd   : > { %v11221_v20 = vpop.eup %11220  ;;  %v7845_v22 = vadd.f32 1.0, %v11219_v48 }
 0xafe   : > { %v11223_v61 = vpop.eup %11222  ;;  %v7936_v17 = vmul.f32 %v11221_v20, %v16732_v29 }
 0xaff   : > { %v11225_v62 = vpop.eup %11224  ;;  %11236 = vrcp.f32 %v7845_v22  ;;  %v7846_v46 = vadd.f32 1.0, %v11223_v61 }
 0xb00   : > { %v11227_v12 = vpop.eup %11226  ;;  %v7967_v26 = vpack.c.bf16 %v7936_v17, %v7935_v51  ;;  %v7551_v25 = vpop.xlane.xlu1 %7550  ;;  %v7937_v37 = vmul.f32 %v11225_v62, %v16736_v33 }
 0xb01   : > { %v11229_v14 = vpop.eup %11228  ;;  %11238 = vrcp.f32 %v7846_v46  ;;  %v16802_v0 = vmul.f32 %v11227_v12, %v16610_v2  ;;  %v7625_v63 = vmul.f32 0.041666668, %v7551_v25 }
 0xb02   : > { %v11231_v48 = vpop.eup %11230  ;;  %v7999_v27 = vrot.slane %v7967_v26, 4  ;;  %v7938_v29 = vmul.f32 %v11229_v14, %v16740_v21  ;;  %v7554_v24 = vpop.xlane.xlu0 %7553 }
 0xb03   : > { %v11233_v20 = vpop.eup %11232  ;;  %v10393_v22 = vmul.f32 -1.442695, %v16802_v0  ;;  %v16808_v61 = vmul.f32 %v11231_v48, %v16613_v54  ;;  %v7657_v51 = vadd.f32 1e-05, %v7625_v63  ;;  %v7626_v17 = vmul.f32 0.041666668, %v7554_v24 }
 0xb04   : > { %8047 = vst.msk [vmem:[#allocation3 + $0x8] sm:$0xf0] %vm296_vm13, %v7999_v27  ;;  %v7968_v2 = vpack.c.bf16 %v7938_v29, %v7937_v37  ;;  %v7939_v14 = vmul.f32 %v11233_v20, %v16745_v30  ;;  %v16816_v25 = vpop.xlane.xlu1 %7417  ;;  %v7444_v29 = vmul.f32 0.041666668, %v16705_v52 }
 0xb05   : > { %v11235_v46 = vpop.eup %11234  ;;  %11240 = vpow2.f32 %v10393_v22  ;;  %v10394_v12 = vmul.f32 -1.442695, %v16808_v61  ;;  %v7658_v26 = vadd.f32 1e-05, %v7626_v17 }
 0xb06   : > { %v8000_v62 = vrot.slane %v7968_v2, 4  ;;  %v7940_v33 = vmul.f32 %v11235_v46, %v16751_v58  ;;  %11242 = vrsqrt.f32 %v7657_v51  ;;  %v16819_v24 = vpop.xlane.xlu0 %7420  ;;  %v16827_v46 = vsub.f32 %v16529_v50, %v7444_v29 }
 0xb07   : > { %11244 = vpow2.f32 %v10394_v12 }
 0xb08   : > { %v8001_v54 = vsel %vm2752_vm4, %v7999_v27, %v8000_v62  ;;  %v7969_v21 = vpack.c.bf16 %v7940_v33, %v7939_v14  ;;  %11246 = vrsqrt.f32 %v7658_v26  ;;  %v7443_v27 = vmul.f32 0.041666668, %v16703_v41 }
 0xb09   : > { %v11237_v63 = vpop.eup %11236  ;;  %8048 = vst.msk [vmem:[#allocation3 + $0x10] sm:$0xff] %vm292_vm3, %v8001_v54 }
 0xb0a   : > { %v8002_v48 = vrot.slane %v7969_v21, 4  ;;  %v7941_v58 = vmul.f32 %v11237_v63, %v16764_v9 }
 0xb0b   : > { %v11239_v37 = vpop.eup %11238 }
 0xb0c   : > { %v8003_v30 = vsel %vm2752_vm4, %v8000_v62, %v8002_v48  ;;  %v7942_v20 = vmul.f32 %v11239_v37, %v16774_v36  ;;  %v16830_v36 = vsub.f32 %v16525_v39, %v7443_v27  ;;  %v7508_v39 = vmul.f32 %v16827_v46, %v16827_v46 }
 0xb0d   : > { %8049 = vst.msk [vmem:[#allocation3 + $0x18] sm:$0xff] %vm292_vm3, %v8003_v30  ;;  %v7557_v22 = vpop.xlane.xlu1 %7556 }
 0xb0e   : > { %v7970_v51 = vpack.c.bf16 %v7942_v20, %v7941_v58  ;;  %v7627_v17 = vmul.f32 0.041666668, %v7557_v22  ;;  %v7507_v30 = vmul.f32 %v16830_v36, %v16830_v36 }
 0xb0f   : > { %v11241_v2 = vpop.eup %11240  ;;  %v7560_v52 = vpop.xlane.xlu0 %7559 }
 0xb10   : > { %v11243_v12 = vpop.eup %11242  ;;  %v8004_v26 = vrot.slane %v7970_v51, 4  ;;  %v7847_v14 = vadd.f32 1.0, %v11241_v2  ;;  %v7659_v62 = vadd.f32 1e-05, %v7627_v17  ;;  %v7628_v33 = vmul.f32 0.041666668, %v7560_v52 }
 0xb11   : > { %v11245_v9 = vpop.eup %11244  ;;  %v16833_v41 = vmul.f32 %v11243_v12, %v16630_v45  ;;  %v7579_v58 = vsel %vm292_vm3, %v7507_v30, 0.0 }
 0xb12   : > { %v11247_v54 = vpop.eup %11246  ;;  %v8005_v21 = vsel %vm2752_vm4, %v8002_v48, %v8004_v26  ;;  %11248 = vrcp.f32 %v7847_v14  ;;  %v7848_v63 = vadd.f32 1.0, %v11245_v9  ;;  %v7660_v50 = vadd.f32 1e-05, %v7628_v33 }
 0xb13   : > { %8050 = vst.msk [vmem:[#allocation3 + $0x20] sm:$0xff] %vm292_vm3, %v8005_v21  ;;  %v10395_v37 = vmul.f32 -1.442695, %v16833_v41  ;;  %v7722_v29 = vmul.f32 %v11247_v54, %v16633_v49  ;;  %11250 = vrsqrt.f32 %v7659_v62  ;;  %v7582_v48 = vsel %vm292_vm3, %v7508_v39, 0.0 }
 0xb14   : > { %11252 = vrcp.f32 %v7848_v63 }
 0xb15   : > { %11254 = vpow2.f32 %v10395_v37  ;;  %v10396_v45 = vmul.f32 -1.442695, %v7722_v29 }
 0xb16   : > { %11256 = vrsqrt.f32 %v7660_v50 }
 0xb17   : > { %11258 = vpow2.f32 %v10396_v45 }
 0xb18   : > { %7583 = vadd.xlane.f32.xlu0 %v7582_v48 }
 0xb1a   : > { %7580 = vadd.xlane.f32.xlu1 %v7579_v58 }
 0xb1c   : > { %v11249_v20 = vpop.eup %11248  ;;  %v7563_v49 = vpop.xlane.xlu1 %7562 }
 0xb1d   : > { %v11251_v27 = vpop.eup %11250  ;;  %v7629_v22 = vmul.f32 0.041666668, %v7563_v49  ;;  %v7943_v12 = vmul.f32 %v11249_v20, %v16802_v0 }
 0xb1e   : > { %v11253_v51 = vpop.eup %11252  ;;  %v16846_v17 = vmul.f32 %v11251_v27, %v16646_v18  ;;  %v7566_v2 = vpop.xlane.xlu0 %7565 }
 0xb1f   : > { %v11255_v52 = vpop.eup %11254  ;;  %v7944_v14 = vmul.f32 %v11253_v51, %v16808_v61  ;;  %v7661_v62 = vadd.f32 1e-05, %v7629_v22  ;;  %v7630_v33 = vmul.f32 0.041666668, %v7566_v2 }
 0xb20   : > { %v11257_v9 = vpop.eup %11256  ;;  %v7849_v54 = vadd.f32 1.0, %v11255_v52  ;;  %v10397_v21 = vmul.f32 -1.442695, %v16846_v17 }
 0xb21   : > { %v11259_v63 = vpop.eup %11258  ;;  %v7971_v50 = vpack.c.bf16 %v7944_v14, %v7943_v12  ;;  %v7724_v37 = vmul.f32 %v11257_v9, %v16649_v31  ;;  %11260 = vrsqrt.f32 %v7661_v62  ;;  %v7662_v39 = vadd.f32 1e-05, %v7630_v33  ;;  %v19309_v12 = vld [vmem:[#allocation46_spill] sm:$0xff]  ;;  %v19310_v14 = vld [vmem:[#allocation51_spill] sm:$0xff] }
 0xb22   : > { %11262 = vrcp.f32 %v7849_v54  ;;  %v7850_v18 = vadd.f32 1.0, %v11259_v63  ;;  %v3238_v63 = vmul.bf16 %v19273_v59, %v19307_v60 }
 0xb23   : > { %v8006_v45 = vrot.slane %v7971_v50, 4  ;;  %11264 = vpow2.f32 %v10397_v21  ;;  %v10398_v30 = vmul.f32 -1.442695, %v7724_v37 }
 0xb24   : > { %11266 = vrcp.f32 %v7850_v18 }
 0xb25   : > { %v8007_v0 = vsel %vm2752_vm4, %v8004_v26, %v8006_v45  ;;  %11268 = vpow2.f32 %v10398_v30 }
 0xb26   : > { %8051 = vst.msk [vmem:[#allocation3 + $0x28] sm:$0xff] %vm292_vm3, %v8007_v0  ;;  %11270 = vrsqrt.f32 %v7662_v39  ;;  %v19312_v0 = vld [vmem:[#allocation81_spill] sm:$0xff] }
 0xb29   : > { %v7569_v61 = vpop.xlane.xlu1 %7568 }
 0xb2a   : > { %v7631_v48 = vmul.f32 0.041666668, %v7569_v61 }
 0xb2b   : > { %v11261_v58 = vpop.eup %11260  ;;  %3457 = vrot.lane.b32.xlu1 %v16759_v44, %s11583_s9  ;;  %v7572_v31 = vpop.xlane.xlu0 %7571  ;;  %v3511_v44 = vsel %vm3492_vm11, %v16761_v15, %v19310_v14 }
 0xb2c   : > { %v11263_v20 = vpop.eup %11262  ;;  %v16857_v49 = vmul.f32 %v11261_v58, %v16660_v43  ;;  %v7663_v27 = vadd.f32 1e-05, %v7631_v48  ;;  %v7632_v22 = vmul.f32 0.041666668, %v7572_v31 }
 0xb2d   : > { %v11265_v51 = vpop.eup %11264  ;;  %v7945_v33 = vmul.f32 %v11263_v20, %v16833_v41 }
 0xb2e   : > { %v11267_v2 = vpop.eup %11266  ;;  %v7851_v26 = vadd.f32 1.0, %v11265_v51  ;;  %v10399_v52 = vmul.f32 -1.442695, %v16857_v49  ;;  %11272 = vrsqrt.f32 %v7663_v27  ;;  %3842 = vrot.lane.b32.xlu0 %v19309_v12, %s11587_s13  ;;  %v7664_v9 = vadd.f32 1e-05, %v7632_v22 }
 0xb2f   : > { %v11269_v62 = vpop.eup %11268  ;;  %v7946_v43 = vmul.f32 %v11267_v2, %v7722_v29  ;;  %3542 = vrot.lane.b32.xlu1 %v3511_v44, %s11584_s10  ;;  %v19311_v29 = vld [vmem:[#allocation85_spill] sm:$0xff] }
 0xb30   : > { %v11271_v54 = vpop.eup %11270  ;;  %11274 = vrcp.f32 %v7851_v26  ;;  %v7852_v21 = vadd.f32 1.0, %v11269_v62  ;;  %v3277_v30 = vmul.bf16 %v19273_v59, %v19311_v29 }
 0xb31   : > { %v7972_v50 = vpack.c.bf16 %v7946_v43, %v7945_v33  ;;  %11276 = vpow2.f32 %v10399_v52  ;;  %v7726_v18 = vmul.f32 %v11271_v54, %v16663_v16  ;;  %v7445_v43 = vmul.f32 0.041666668, %v16707_v23 }
 0xb32   : > { %11278 = vrcp.f32 %v7852_v21  ;;  %3593 = vrot.lane.b32.xlu0 %v3238_v63, %s11585_s11 }
 0xb33   : > { %v8008_v15 = vrot.slane %v7972_v50, 4  ;;  %v10400_v39 = vmul.f32 -1.442695, %v7726_v18  ;;  %11280 = vrsqrt.f32 %v7664_v9  ;;  %3651 = vrot.lane.b32.xlu1 %v19309_v12, %s11586_s12  ;;  %v7446_v50 = vmul.f32 0.041666668, %v16709_v6 }
 0xb35   : > { %v8009_v41 = vsel %vm2752_vm4, %v8006_v45, %v8008_v15  ;;  %11282 = vpow2.f32 %v10400_v39 }
 0xb36   : > { %8052 = vst.msk [vmem:[#allocation3 + $0x30] sm:$0xff] %vm292_vm3, %v8009_v41  ;;  %3735 = vrot.lane.b32.xlu0 %v19312_v0, %s11579_s8  ;;  %v3454_v0 = vpop.permute.xlu1 %3453 }
 0xb37   : > { %3786 = vrot.lane.b32.xlu1 %v3277_v30, %s11578_s7  ;;  %v16894_v30 = vsub.f32 %v16537_v11, %v7446_v50 }
 0xb38   : > { %v11273_v16 = vpop.eup %11272 }
 0xb39   : > { %v7727_v61 = vmul.f32 %v11273_v16, %v16672_v28  ;;  %v7510_v6 = vmul.f32 %v16894_v30, %v16894_v30 }
 0xb3a   : > { %v11275_v48 = vpop.eup %11274  ;;  %v3590_v16 = vpop.permute.xlu1 %3589 }
 0xb3b   : > { %v11277_v58 = vpop.eup %11276  ;;  %v10401_v31 = vmul.f32 -1.442695, %v7727_v61  ;;  %v7947_v22 = vmul.f32 %v11275_v48, %v16846_v17 }
 0xb3c   : > { %v11279_v20 = vpop.eup %11278  ;;  %v7853_v27 = vadd.f32 1.0, %v11277_v58  ;;  %v3539_v58 = vpop.permute.xlu0 %3538 }
 0xb3d   : > { %v11281_v45 = vpop.eup %11280  ;;  %v7948_v51 = vmul.f32 %v11279_v20, %v7724_v37  ;;  %11284 = vpow2.f32 %v10401_v31  ;;  %v7588_v31 = vsel %vm292_vm3, %v7510_v6, 0.0  ;;  %v3239_v6 = vmul.bf16 %v15459_v34, %v19311_v29 }
 0xb3e   : > { %v7728_v2 = vmul.f32 %v11281_v45, %v16675_v47  ;;  %11286 = vrcp.f32 %v7853_v27  ;;  %v16887_v47 = vsub.f32 %v16533_v8, %v7445_v43  ;;  %v19313_v27 = vld [vmem:[#allocation79_spill] sm:$0xff] }
 0xb3f   : > { %v11283_v26 = vpop.eup %11282  ;;  %v7973_v52 = vpack.c.bf16 %v7948_v51, %v7947_v22  ;;  %v3036_v45 = vmul.bf16 %v19259_v13, %v19313_v27  ;;  %v19319_v27 = vld [vmem:[#allocation48_spill] sm:$0xff] }
 0xb40   : > { %v7854_v14 = vadd.f32 1.0, %v11283_v26  ;;  %v10402_v44 = vmul.f32 -1.442695, %v7728_v2  ;;  %v7509_v41 = vmul.f32 %v16887_v47, %v16887_v47 }
 0xb41   : > { %v8010_v62 = vrot.slane %v7973_v52, 4  ;;  %v3932_v51 = vsel %vm285_vm1, %v3036_v45, %v3454_v0  ;;  %v3648_v52 = vpop.permute.xlu1 %3647  ;;  %v19320_v45 = vld [vmem:[#allocation52_spill] sm:$0xff] }
 0xb42   : > { %11288 = vrcp.f32 %v7854_v14  ;;  %v3976_v14 = vsel %vm940_vm0, %v3932_v51, %v3539_v58  ;;  %v19317_v58 = vld [vmem:[#allocation80_spill] sm:$0xff] }
 0xb43   : > { %v8011_v28 = vsel %vm2752_vm4, %v8008_v15, %v8010_v62  ;;  %11290 = vpow2.f32 %v10402_v44  ;;  %v3732_v44 = vpop.permute.xlu0 %3731 }
 0xb44   : > { %8053 = vst.msk [vmem:[#allocation3 + $0x38] sm:$0xff] %vm292_vm3, %v8011_v28 }
 0xb47   : > { %v11285_v33 = vpop.eup %11284 }
 0xb48   : > { %v11287_v17 = vpop.eup %11286  ;;  %v7855_v37 = vadd.f32 1.0, %v11285_v33  ;;  %v3783_v33 = vpop.permute.xlu1 %3782 }
 0xb49   : > { %v7949_v21 = vmul.f32 %v11287_v17, %v16857_v49  ;;  %v7585_v49 = vsel %vm292_vm3, %v7509_v41, 0.0  ;;  %v19314_v41 = vld [vmem:[#allocation72_spill] sm:$0xff] }
 0xb4a   : > { %11292 = vrcp.f32 %v7855_v37 }
 0xb4c   : > { %v11289_v9 = vpop.eup %11288 }
 0xb4d   : > { %v11291_v54 = vpop.eup %11290  ;;  %v7950_v63 = vmul.f32 %v11289_v9, %v7726_v18 }
 0xb4e   : > { %v7856_v15 = vadd.f32 1.0, %v11291_v54 }
 0xb4f   : > { %v7974_v39 = vpack.c.bf16 %v7950_v63, %v7949_v21 }
 0xb50   : > { %11294 = vrcp.f32 %v7856_v15 }
 0xb51   : > { %v8012_v23 = vrot.slane %v7974_v39, 4 }
 0xb53   : > { %v8013_v8 = vsel %vm2752_vm4, %v8010_v62, %v8012_v23 }
 0xb54   : > { %8054 = vst.msk [vmem:[#allocation3 + $0x40] sm:$0xff] %vm292_vm3, %v8013_v8  ;;  %v11293_v18 = vpop.eup %11292 }
 0xb55   : > { %7586 = vadd.xlane.f32.xlu0 %v7585_v49  ;;  %v7951_v20 = vmul.f32 %v11293_v18, %v7727_v61  ;;  %v4011_v61 = vsel %vm3997_vm10, %v3976_v14, %v3590_v16  ;;  %v19315_v18 = vld [vmem:[#allocation67_spill] sm:$0xff]  ;;  %v19316_v16 = vld [vmem:[#allocation94_spill] sm:$0xff] }
 0xb5a   : > { %v11295_v48 = vpop.eup %11294 }
 0xb5b   : > { %v7952_v11 = vmul.f32 %v11295_v48, %v7728_v2  ;;  %7589 = vadd.xlane.f32.xlu1 %v7588_v31  ;;  %v4046_v2 = vsel %vm4032_vm12, %v4011_v61, %v3648_v52  ;;  %v19318_v31 = vld [vmem:[#allocation86_spill] sm:$0xff] }
 0xb5c   : > { %v4081_v17 = vsel %vm4067_vm14, %v4046_v2, %v3732_v44 }
 0xb5d   : > { %v7975_v22 = vpack.c.bf16 %v7952_v11, %v7951_v20  ;;  %v4116_v9 = vsel %vm4102_vm15, %v4081_v17, %v3783_v33  ;;  %v7447_v33 = vmul.f32 0.041666668, %v16711_v40 }
 0xb5f   : > { %v16905_v26 = vrot.slane %v7975_v22, 4  ;;  %v3278_v22 = vmul.bf16 %v15459_v34, %v19320_v45  ;;  %v16949_v17 = vsub.f32 %v16547_v3, %v7447_v33 }
 0xb61   : > { %v8015_v62 = vsel %vm2752_vm4, %v8012_v23, %v16905_v26 }
 0xb62   : > { %8055 = vst.msk [vmem:[#allocation3 + $0x48] sm:$0xff] %vm292_vm3, %v8015_v62 }
 0xb64   : > { %v7575_v28 = vpop.xlane.xlu0 %7574 }
 0xb65   : > { %v7633_v43 = vmul.f32 0.041666668, %v7575_v28 }
 0xb67   : > { %v7665_v37 = vadd.f32 1e-05, %v7633_v43 }
 0xb68   : > { %v3841_v54 = vpop.permute.xlu0 %3840 }
 0xb69   : > { %11296 = vrsqrt.f32 %v7665_v37  ;;  %v4151_v21 = vsel %vm4137_vm5, %v4116_v9, %v3841_v54  ;;  %v7511_v9 = vmul.f32 %v16949_v17, %v16949_v17 }
 0xb6a   : > { %v4290_v63 = vshrl.u32 %v4151_v21, 16  ;;  %v4293_v50 = vshll.u32 %v4151_v21, 16  ;;  %v7578_v15 = vpop.xlane.xlu1 %7577 }
 0xb6b   : > { %v7634_v39 = vmul.f32 0.041666668, %v7578_v15  ;;  %3844 = vrot.lane.b32.xlu0 %v19314_v41, %s11587_s13 }
 0xb6c   : > { %v4292_v23 = vrot.slane %v4290_v63, 3  ;;  %v4295_v8 = vrot.slane %v4293_v50, 4  ;;  %3459 = vrot.lane.b32.xlu1 %v19309_v12, %s11583_s9  ;;  %v4323_v12 = vsel %vm3049_vm8, %v19318_v31, %v19317_v58 }
 0xb6d   : > { %v7666_v0 = vadd.f32 1e-05, %v7634_v39 }
 0xb6e   : > { %v16920_v49 = vor.u32 %v4295_v8, %v4292_v23  ;;  %v3456_v50 = vpop.permute.xlu1 %3455  ;;  %v3037_v8 = vmul.bf16 %v19263_v38, %v19296_v7 }
 0xb6f   : > { %11298 = vrsqrt.f32 %v7666_v0  ;;  %3544 = vrot.lane.b32.xlu0 %v19315_v18, %s11584_s10 }
 0xb70   : > { %3595 = vrot.lane.b32.xlu1 %v3239_v6, %s11585_s11  ;;  %v4297_v48 = vsel %vm3049_vm8, %v19316_v16, %v16920_v49  ;;  %v3935_v6 = vsel %vm285_vm1, %v3037_v8, %v3456_v50  ;;  %v7449_v8 = vmul.f32 0.041666668, %v16755_v5 }
 0xb71   : > { %4668 = vmatmul.mubr.bf16.vlgmr.msra.gmra.mrb[0].mxu1 %v4297_v48 }
 0xb72   : > { %10318 = vmatprep.mubr.msk.bf16.mxu1 %vm285_vm1, %v4323_v12  ;;  %v3592_v0 = vpop.permute.xlu1 %3591 }
 0xb73   : > { %v11297_v20 = vpop.eup %11296  ;;  %3653 = vrot.lane.b32.xlu0 %v19314_v41, %s11586_s12 }
 0xb74   : > { %v7729_v11 = vmul.f32 %v11297_v20, %v16714_v10  ;;  %3737 = vrot.lane.b32.xlu1 %v19319_v27, %s11579_s8  ;;  %v7448_v10 = vmul.f32 0.041666668, %v16716_v1  ;;  %v3541_v1 = vpop.permute.xlu0 %3540 }
 0xb75   : > { %v3978_v18 = vsel %vm940_vm0, %v3935_v6, %v3541_v1  ;;  %v16999_v6 = vsub.f32 %v16587_v55, %v7449_v8 }
 0xb76   : > { %v10403_v51 = vmul.f32 -1.442695, %v7729_v11  ;;  %v16946_v43 = vsub.f32 %v16556_v35, %v7448_v10  ;;  %v7591_v35 = vsel %vm292_vm3, %v7511_v9, 0.0  ;;  %v4013_v48 = vsel %vm3997_vm10, %v3978_v18, %v3592_v0  ;;  %v3734_v58 = vpop.permute.xlu1 %3733  ;;  %v19324_v9 = vld [vmem:[#allocation61_spill] sm:$0xff] }
 0xb77   : > { %3788 = vrot.lane.b32.xlu0 %v3278_v22, %s11578_s7  ;;  %v7513_v18 = vmul.f32 %v16999_v6, %v16999_v6 }
 0xb78   : > { %11300 = vpow2.f32 %v10403_v51  ;;  %v3650_v39 = vpop.permute.xlu0 %3649 }
 0xb79   : > { %v11299_v52 = vpop.eup %11298  ;;  %v4048_v31 = vsel %vm4032_vm12, %v4013_v48, %v3650_v39 }
 0xb7a   : > { %v7730_v14 = vmul.f32 %v11299_v52, %v16721_v42  ;;  %v7512_v42 = vmul.f32 %v16946_v43, %v16946_v43  ;;  %v4083_v20 = vsel %vm4067_vm14, %v4048_v31, %v3734_v58  ;;  %v7597_v31 = vsel %vm292_vm3, %v7513_v18, 0.0  ;;  %v19329_v18 = vld [vmem:[#allocation95_spill] sm:$0xff] }
 0xb7c   : > { %v10404_v44 = vmul.f32 -1.442695, %v7730_v14  ;;  %v7594_v21 = vsel %vm292_vm3, %v7512_v42, 0.0  ;;  %v3785_v16 = vpop.permute.xlu0 %3784 }
 0xb7d   : > { %v4118_v22 = vsel %vm4102_vm15, %v4083_v20, %v3785_v16 }
 0xb7e   : > { %11302 = vpow2.f32 %v10404_v44 }
 0xb82   : > { %v11301_v62 = vpop.eup %11300 }
 0xb83   : > { %v7857_v61 = vadd.f32 1.0, %v11301_v62 }
 0xb85   : > { %11304 = vrcp.f32 %v7857_v61  ;;  %v19321_v61 = vld [vmem:[#allocation89_spill] sm:$0xff] }
 0xb88   : > { %v11303_v2 = vpop.eup %11302 }
 0xb89   : > { %v7858_v28 = vadd.f32 1.0, %v11303_v2 }
 0xb8b   : > { %11306 = vrcp.f32 %v7858_v28  ;;  %v19322_v28 = vld [vmem:[#allocation83_spill] sm:$0xff] }
 0xb8f   : > { %v11305_v37 = vpop.eup %11304 }
 0xb90   : > { %v7953_v63 = vmul.f32 %v11305_v37, %v7729_v11  ;;  %v19323_v37 = vld [vmem:[#allocation58_spill] sm:$0xff] }
 0xb95   : > { %v11307_v54 = vpop.eup %11306 }
 0xb96   : > { %v7954_v40 = vmul.f32 %v11307_v54, %v7730_v14  ;;  %7595 = vadd.xlane.f32.xlu0 %v7594_v21  ;;  %v3279_v54 = vmul.bf16 %v15704_v32, %v19324_v9  ;;  %v19325_v21 = vld [vmem:[#allocation90_spill] sm:$0xff] }
 0xb98   : > { %v7976_v15 = vpack.c.bf16 %v7954_v40, %v7953_v63  ;;  %7592 = vadd.xlane.f32.xlu1 %v7591_v35 }
 0xb9a   : > { %v16957_v3 = vrot.slane %v7976_v15, 4 }
 0xb9c   : > { %v8017_v23 = vsel %vm2752_vm4, %v16905_v26, %v16957_v3 }
 0xb9d   : > { %8056 = vst.msk [vmem:[#allocation3 + $0x50] sm:$0xff] %vm292_vm3, %v8017_v23 }
 0xba5   : > { %v7584_v12 = vpop.xlane.xlu0 %7583 }
 0xba6   : > { %v7636_v26 = vmul.f32 0.041666668, %v7584_v12 }
 0xba7   : > { %v7581_v11 = vpop.xlane.xlu1 %7580 }
 0xba8   : > { %v7668_v27 = vadd.f32 1e-05, %v7636_v26  ;;  %v7635_v7 = vmul.f32 0.041666668, %v7581_v11 }
 0xba9   : > { %3461 = vrot.lane.b32.xlu1 %v19314_v41, %s11583_s9  ;;  %v3843_v51 = vpop.permute.xlu0 %3842  ;;  %v3240_v41 = vmul.bf16 %v15704_v32, %v19320_v45 }
 0xbaa   : > { %11308 = vrsqrt.f32 %v7668_v27  ;;  %v7667_v52 = vadd.f32 1e-05, %v7635_v7  ;;  %v4153_v14 = vsel %vm4137_vm5, %v4118_v22, %v3843_v51  ;;  %v3038_v7 = vmul.bf16 %v19273_v59, %v19297_v57 }
 0xbab   : > { %v4307_v44 = vshrl.u32 %v4153_v14, 16  ;;  %v4310_v62 = vshll.u32 %v4153_v14, 16  ;;  %v3458_v48 = vpop.permute.xlu1 %3457 }
 0xbac   : > { %11310 = vrsqrt.f32 %v7667_v52  ;;  %3846 = vrot.lane.b32.xlu0 %v19321_v61, %s11587_s13  ;;  %v3938_v22 = vsel %vm285_vm1, %v3038_v7, %v3458_v48 }
 0xbad   : > { %v4309_v2 = vrot.slane %v4307_v44, 3  ;;  %v4312_v10 = vrot.slane %v4310_v62, 4  ;;  %3546 = vrot.lane.b32.xlu1 %v19322_v28, %s11584_s10  ;;  %v3594_v11 = vpop.permute.xlu0 %3593 }
 0xbaf   : > { %v16980_v33 = vor.u32 %v4312_v10, %v4309_v2 }
 0xbb0   : > { %3597 = vrot.lane.b32.xlu0 %v3240_v41, %s11585_s11 }
 0xbb1   : > { %3655 = vrot.lane.b32.xlu1 %v19321_v61, %s11586_s12  ;;  %v4314_v42 = vsel %vm3049_vm8, %v16920_v49, %v16980_v33  ;;  %v3736_v14 = vpop.permute.xlu0 %3735 }
 0xbb2   : > { %4676 = vmatmul.mubr.bf16.gmra.mrb[4].mxu1 %v4314_v42 }
 0xbb3   : > { %10319 = vmatprep.mubr.msk.bf16.mxu1 %vm285_vm1, %v19323_v37 }
 0xbb4   : > { %v11309_v1 = vpop.eup %11308  ;;  %3739 = vrot.lane.b32.xlu0 %v19325_v21, %s11579_s8 }
 0xbb5   : > { %v7732_v63 = vmul.f32 %v11309_v1, %v16827_v46  ;;  %3790 = vrot.lane.b32.xlu1 %v3279_v54, %s11578_s7  ;;  %v7450_v46 = vmul.f32 0.041666668, %v16768_v4  ;;  %v3543_v4 = vpop.permute.xlu1 %3542 }
 0xbb6   : > { %v11311_v40 = vpop.eup %11310  ;;  %v3980_v52 = vsel %vm940_vm0, %v3938_v22, %v3543_v4  ;;  %v19333_v22 = vld [vmem:[#allocation10_spill] sm:$0xff] }
 0xbb7   : > { %v10406_v50 = vmul.f32 -1.442695, %v7732_v63  ;;  %v7731_v35 = vmul.f32 %v11311_v40, %v16830_v36  ;;  %v17005_v16 = vsub.f32 %v16595_v19, %v7450_v46  ;;  %v4015_v44 = vsel %vm3997_vm10, %v3980_v52, %v3594_v11  ;;  %v19326_v40 = vld [vmem:[#allocation92_spill] sm:$0xff]  ;;  %v19331_v11 = vld [vmem:[#allocation43_spill] sm:$0xff] }
 0xbb9   : > { %11312 = vpow2.f32 %v10406_v50  ;;  %v10405_v49 = vmul.f32 -1.442695, %v7731_v35  ;;  %v7514_v55 = vmul.f32 %v17005_v16, %v17005_v16  ;;  %v3652_v51 = vpop.permute.xlu1 %3651 }
 0xbba   : > { %v4050_v62 = vsel %vm4032_vm12, %v4015_v44, %v3652_v51 }
 0xbbb   : > { %11314 = vpow2.f32 %v10405_v49  ;;  %v7600_v27 = vsel %vm292_vm3, %v7514_v55, 0.0 }
 0xbbd   : > { %v3787_v10 = vpop.permute.xlu1 %3786 }
 0xbc3   : > { %v11313_v15 = vpop.eup %11312 }
 0xbc4   : > { %v7860_v39 = vadd.f32 1.0, %v11313_v15 }
 0xbc5   : > { %v11315_v23 = vpop.eup %11314 }
 0xbc6   : > { %11316 = vrcp.f32 %v7860_v39  ;;  %v7859_v0 = vadd.f32 1.0, %v11315_v23  ;;  %v3241_v39 = vmul.bf16 %v15725_v56, %v19324_v9  ;;  %v19327_v23 = vld [vmem:[#allocation93_spill] sm:$0xff] }
 0xbc8   : > { %11318 = vrcp.f32 %v7859_v0  ;;  %v19328_v0 = vld [vmem:[#allocation98_spill] sm:$0xff] }
 0xbd0   : > { %v11317_v36 = vpop.eup %11316 }
 0xbd1   : > { %v7956_v5 = vmul.f32 %v11317_v36, %v7732_v63  ;;  %v19330_v36 = vld [vmem:[#allocation69_spill] sm:$0xff] }
 0xbd2   : > { %v11319_v58 = vpop.eup %11318  ;;  %v3280_v48 = vmul.bf16 %v15725_v56, %v19330_v36 }
 0xbd3   : > { %v7955_v12 = vmul.f32 %v11319_v58, %v7731_v35  ;;  %7598 = vadd.xlane.f32.xlu0 %v7597_v31 }
 0xbd5   : > { %v7977_v20 = vpack.c.bf16 %v7956_v5, %v7955_v12 }
 0xbd7   : > { %v17010_v26 = vrot.slane %v7977_v20, 4 }
 0xbd9   : > { %v8019_v19 = vsel %vm2752_vm4, %v16957_v3, %v17010_v26  ;;  %7601 = vadd.xlane.f32.xlu1 %v7600_v27  ;;  %v4085_v3 = vsel %vm4067_vm14, %v4050_v62, %v3736_v14  ;;  %v7451_v27 = vmul.f32 0.041666668, %v19331_v11 }
 0xbda   : > { %8057 = vst.msk [vmem:[#allocation3 + $0x58] sm:$0xff] %vm292_vm3, %v8019_v19  ;;  %v4120_v42 = vsel %vm4102_vm15, %v4085_v3, %v3787_v10  ;;  %v19332_v19 = vld [vmem:[#allocation13_spill] sm:$0xff] }
 0xbdb   : > { %v17057_v51 = vsub.f32 %v19333_v22, %v7451_v27  ;;  %v19337_v27 = vld [vmem:[#allocation100_spill] sm:$0xff] }
 0xbdd   : > { %v7515_v14 = vmul.f32 %v17057_v51, %v17057_v51 }
 0xbdf   : > { %v7603_v3 = vsel %vm292_vm3, %v7515_v14, 0.0 }
 0xbe2   : > { %v7587_v2 = vpop.xlane.xlu0 %7586 }
 0xbe3   : > { %v7637_v28 = vmul.f32 0.041666668, %v7587_v2 }
 0xbe5   : > { %v7669_v41 = vadd.f32 1e-05, %v7637_v28 }
 0xbe6   : > { %v3845_v37 = vpop.permute.xlu0 %3844 }
 0xbe7   : > { %11320 = vrsqrt.f32 %v7669_v41  ;;  %v4155_v57 = vsel %vm4137_vm5, %v4120_v42, %v3845_v37 }
 0xbe8   : > { %v4324_v54 = vshrl.u32 %v4155_v57, 16  ;;  %v4327_v1 = vshll.u32 %v4155_v57, 16  ;;  %v7590_v21 = vpop.xlane.xlu1 %7589 }
 0xbe9   : > { %v7638_v63 = vmul.f32 0.041666668, %v7590_v21  ;;  %3848 = vrot.lane.b32.xlu0 %v19326_v40, %s11587_s13 }
 0xbea   : > { %v4326_v50 = vrot.slane %v4324_v54, 3  ;;  %v4329_v35 = vrot.slane %v4327_v1, 4  ;;  %3463 = vrot.lane.b32.xlu1 %v19321_v61, %s11583_s9  ;;  %v3039_v54 = vmul.bf16 %v15459_v34, %v19307_v60 }
 0xbeb   : > { %v7670_v49 = vadd.f32 1e-05, %v7638_v63 }
 0xbec   : > { %v17030_v15 = vor.u32 %v4329_v35, %v4326_v50  ;;  %v3460_v28 = vpop.permute.xlu1 %3459 }
 0xbed   : > { %11322 = vrsqrt.f32 %v7670_v49  ;;  %3548 = vrot.lane.b32.xlu0 %v19327_v23, %s11584_s10  ;;  %v3941_v21 = vsel %vm285_vm1, %v3039_v54, %v3460_v28 }
 0xbee   : > { %3599 = vrot.lane.b32.xlu1 %v3241_v39, %s11585_s11  ;;  %v4331_v8 = vsel %vm3049_vm8, %v16980_v33, %v17030_v15 }
 0xbef   : > { %4684 = vmatmul.mubr.bf16.gmra.mrb[8].mxu1 %v4331_v8 }
 0xbf0   : > { %10320 = vmatprep.mubr.msk.bf16.mxu1 %vm285_vm1, %v19328_v0  ;;  %v3596_v1 = vpop.permute.xlu1 %3595 }
 0xbf1   : > { %v11321_v61 = vpop.eup %11320  ;;  %3657 = vrot.lane.b32.xlu0 %v19326_v40, %s11586_s12 }
 0xbf2   : > { %v7733_v46 = vmul.f32 %v11321_v61, %v16887_v47  ;;  %3741 = vrot.lane.b32.xlu1 %v19329_v18, %s11579_s8  ;;  %v7452_v47 = vmul.f32 0.041666668, %v16799_v53  ;;  %v3545_v53 = vpop.permute.xlu0 %3544 }
 0xbf3   : > { %v3982_v63 = vsel %vm940_vm0, %v3941_v21, %v3545_v53  ;;  %v19341_v21 = vld [vmem:[#allocation14_spill] sm:$0xff] }
 0xbf4   : > { %v10407_v58 = vmul.f32 -1.442695, %v7733_v46  ;;  %v17054_v7 = vsub.f32 %v19332_v19, %v7452_v47  ;;  %v4017_v35 = vsel %vm3997_vm10, %v3982_v63, %v3596_v1  ;;  %v3738_v49 = vpop.permute.xlu1 %3737  ;;  %v19338_v19 = vld [vmem:[#allocation101_spill] sm:$0xff] }
 0xbf5   : > { %3792 = vrot.lane.b32.xlu0 %v3280_v48, %s11578_s7 }
 0xbf6   : > { %11324 = vpow2.f32 %v10407_v58  ;;  %v3654_v37 = vpop.permute.xlu0 %3653 }
 0xbf7   : > { %v11323_v33 = vpop.eup %11322  ;;  %v4052_v39 = vsel %vm4032_vm12, %v4017_v35, %v3654_v37 }
 0xbf8   : > { %v7734_v31 = vmul.f32 %v11323_v33, %v16894_v30  ;;  %v7516_v30 = vmul.f32 %v17054_v7, %v17054_v7  ;;  %v4087_v8 = vsel %vm4067_vm14, %v4052_v39, %v3738_v49  ;;  %v7454_v49 = vmul.f32 0.041666668, %v16819_v24 }
 0xbfa   : > { %v10408_v5 = vmul.f32 -1.442695, %v7734_v31  ;;  %v7606_v62 = vsel %vm292_vm3, %v7516_v30, 0.0  ;;  %v3789_v50 = vpop.permute.xlu0 %3788 }
 0xbfc   : > { %11326 = vpow2.f32 %v10408_v5  ;;  %v19334_v5 = vld [vmem:[#allocation102_spill] sm:$0xff] }
 0xc00   : > { %v11325_v12 = vpop.eup %11324 }
 0xc01   : > { %v7861_v55 = vadd.f32 1.0, %v11325_v12 }
 0xc03   : > { %11328 = vrcp.f32 %v7861_v55 }
 0xc06   : > { %v11327_v20 = vpop.eup %11326 }
 0xc07   : > { %v7862_v4 = vadd.f32 1.0, %v11327_v20  ;;  %v19335_v20 = vld [vmem:[#allocation96_spill] sm:$0xff] }
 0xc09   : > { %11330 = vrcp.f32 %v7862_v4 }
 0xc0d   : > { %v11329_v52 = vpop.eup %11328 }
 0xc0e   : > { %v7957_v2 = vmul.f32 %v11329_v52, %v7733_v46  ;;  %v4122_v46 = vsel %vm4102_vm15, %v4087_v8, %v3789_v50  ;;  %v19339_v52 = vld [vmem:[#allocation103_spill] sm:$0xff] }
 0xc0f   : > { %v19342_v50 = vld [vmem:[#allocation15_spill] sm:$0xff] }
 0xc13   : > { %v11331_v44 = vpop.eup %11330 }
 0xc14   : > { %v7958_v10 = vmul.f32 %v11331_v44, %v7734_v31  ;;  %7607 = vadd.xlane.f32.xlu0 %v7606_v62 }
 0xc16   : > { %v7978_v41 = vpack.c.bf16 %v7958_v10, %v7957_v2  ;;  %7604 = vadd.xlane.f32.xlu1 %v7603_v3  ;;  %v7453_v3 = vmul.f32 0.041666668, %v16816_v25 }
 0xc18   : > { %v17065_v42 = vrot.slane %v7978_v41, 4  ;;  %v17113_v35 = vsub.f32 %v19342_v50, %v7453_v3  ;;  %v19346_v50 = vld [vmem:[#allocation104_spill] sm:$0xff] }
 0xc1a   : > { %v8021_v57 = vsel %vm2752_vm4, %v17010_v26, %v17065_v42  ;;  %v7517_v25 = vmul.f32 %v17113_v35, %v17113_v35 }
 0xc1b   : > { %8058 = vst.msk [vmem:[#allocation3 + $0x60] sm:$0xff] %vm292_vm3, %v8021_v57  ;;  %v19340_v57 = vld [vmem:[#allocation12_spill] sm:$0xff] }
 0xc23   : > { %v7596_v23 = vpop.xlane.xlu0 %7595 }
 0xc24   : > { %v7640_v26 = vmul.f32 0.041666668, %v7596_v23  ;;  %v19343_v23 = vld [vmem:[#allocation133_spill] sm:$0xff] }
 0xc25   : > { %v7593_v0 = vpop.xlane.xlu1 %7592  ;;  %v17119_v8 = vsub.f32 %v19343_v23, %v7454_v49  ;;  %v19348_v23 = vld [vmem:[#allocation112_spill] sm:$0xff] }
 0xc26   : > { %v7672_v61 = vadd.f32 1e-05, %v7640_v26  ;;  %v7639_v60 = vmul.f32 0.041666668, %v7593_v0 }
 0xc27   : > { %3465 = vrot.lane.b32.xlu1 %v19326_v40, %s11583_s9  ;;  %v3847_v18 = vpop.permute.xlu0 %3846  ;;  %v19336_v40 = vld [vmem:[#allocation106_spill] sm:$0xff] }
 0xc28   : > { %11332 = vrsqrt.f32 %v7672_v61  ;;  %v7671_v48 = vadd.f32 1e-05, %v7639_v60  ;;  %v4157_v58 = vsel %vm4137_vm5, %v4122_v46, %v3847_v18  ;;  %v3242_v47 = vmul.bf16 %v19336_v40, %v19330_v36 }
 0xc29   : > { %v4341_v33 = vshrl.u32 %v4157_v58, 16  ;;  %v4344_v31 = vshll.u32 %v4157_v58, 16  ;;  %v3281_v22 = vmul.bf16 %v19336_v40, %v19338_v19  ;;  %v3462_v26 = vpop.permute.xlu1 %3461  ;;  %v7609_v61 = vsel %vm292_vm3, %v7517_v25, 0.0  ;;  %v19347_v25 = vld [vmem:[#allocation105_spill] sm:$0xff] }
 0xc2a   : > { %11334 = vrsqrt.f32 %v7671_v48  ;;  %3850 = vrot.lane.b32.xlu0 %v19334_v5, %s11587_s13  ;;  %v7518_v18 = vmul.f32 %v17119_v8, %v17119_v8 }
 0xc2b   : > { %v4343_v12 = vrot.slane %v4341_v33, 3  ;;  %v4346_v55 = vrot.slane %v4344_v31, 4  ;;  %3550 = vrot.lane.b32.xlu1 %v19335_v20, %s11584_s10  ;;  %v3598_v33 = vpop.permute.xlu0 %3597 }
 0xc2c   : > { %v7612_v31 = vsel %vm292_vm3, %v7518_v18, 0.0  ;;  %v19351_v18 = vld [vmem:[#allocation113_spill] sm:$0xff] }
 0xc2d   : > { %v17088_v4 = vor.u32 %v4346_v55, %v4343_v12  ;;  %v3547_v24 = vpop.permute.xlu1 %3546  ;;  %v3040_v55 = vmul.bf16 %v15704_v32, %v19311_v29 }
 0xc2e   : > { %3601 = vrot.lane.b32.xlu0 %v3242_v47, %s11585_s11 }
 0xc2f   : > { %3659 = vrot.lane.b32.xlu1 %v19334_v5, %s11586_s12  ;;  %v4348_v11 = vsel %vm3049_vm8, %v17030_v15, %v17088_v4  ;;  %v3944_v20 = vsel %vm285_vm1, %v3040_v55, %v3462_v26  ;;  %v19349_v26 = vld [vmem:[#allocation62_spill] sm:$0xff] }
 0xc30   : > { %4692 = vmatmul.mubr.bf16.gmra.mrb[12].mxu1 %v4348_v11  ;;  %v3984_v11 = vsel %vm940_vm0, %v3944_v20, %v3547_v24  ;;  %v19355_v20 = vld [vmem:[#allocation128_spill] sm:$0xff] }
 0xc31   : > { %10321 = vmatprep.mubr.msk.bf16.mxu1 %vm285_vm1, %v19337_v27  ;;  %v3656_v47 = vpop.permute.xlu1 %3655  ;;  %v3740_v27 = vpop.permute.xlu0 %3739 }
 0xc32   : > { %v11333_v30 = vpop.eup %11332  ;;  %3743 = vrot.lane.b32.xlu0 %v19339_v52, %s11579_s8 }
 0xc33   : > { %v7736_v14 = vmul.f32 %v11333_v30, %v16946_v43  ;;  %3794 = vrot.lane.b32.xlu1 %v3281_v22, %s11578_s7  ;;  %v4019_v22 = vsel %vm3997_vm10, %v3984_v11, %v3598_v33  ;;  %v19356_v11 = vld [vmem:[#allocation118_spill] sm:$0xff] }
 0xc34   : > { %v11335_v44 = vpop.eup %11334  ;;  %v4054_v30 = vsel %vm4032_vm12, %v4019_v22, %v3656_v47 }
 0xc35   : > { %v10410_v53 = vmul.f32 -1.442695, %v7736_v14  ;;  %v7735_v62 = vmul.f32 %v11335_v44, %v16949_v17 }
 0xc37   : > { %11336 = vpow2.f32 %v10410_v53  ;;  %v10409_v15 = vmul.f32 -1.442695, %v7735_v62 }
 0xc39   : > { %11338 = vpow2.f32 %v10409_v15 }
 0xc41   : > { %v11337_v2 = vpop.eup %11336 }
 0xc42   : > { %v7864_v10 = vadd.f32 1.0, %v11337_v2 }
 0xc43   : > { %v11339_v28 = vpop.eup %11338 }
 0xc44   : > { %11340 = vrcp.f32 %v7864_v10  ;;  %v7863_v41 = vadd.f32 1.0, %v11339_v28  ;;  %v4669_v37 = vpop.f32.mrb[0].mxu1 }
 0xc45   : > { %v17107_v54 = vadd.f32 %v19340_v57, %v4669_v37  ;;  %v4671_v43 = vpop.f32.mrb[1].mxu1 }
 0xc46   : > { %11342 = vrcp.f32 %v7863_v41  ;;  %v4672_v1 = vpop.f32.mrb[2].mxu1  ;;  %v19344_v41 = vld [vmem:[#allocation111_spill] sm:$0xff] }
 0xc47   : > { %v17110_v63 = vadd.f32 %v19341_v21, %v4672_v1  ;;  %v4674_v17 = vpop.f32.mrb[3].mxu1  ;;  %v19345_v21 = vld [vmem:[#allocation68_spill] sm:$0xff] }
 0xc48   : > { %v3243_v17 = vmul.bf16 %v19345_v21, %v19338_v19 }
 0xc4e   : > { %v11341_v39 = vpop.eup %11340 }
 0xc4f   : > { %v7960_v60 = vmul.f32 %v11341_v39, %v7736_v14  ;;  %v3791_v14 = vpop.permute.xlu1 %3790 }
 0xc50   : > { %v11343_v0 = vpop.eup %11342 }
 0xc51   : > { %v7959_v46 = vmul.f32 %v11343_v0, %v7735_v62  ;;  %7610 = vadd.xlane.f32.xlu0 %v7609_v61  ;;  %v3282_v0 = vmul.bf16 %v19345_v21, %v19349_v26 }
 0xc53   : > { %v7979_v48 = vpack.c.bf16 %v7960_v60, %v7959_v46 }
 0xc55   : > { %v17124_v58 = vrot.slane %v7979_v48, 4  ;;  %v19352_v48 = vld [vmem:[#allocation121_spill] sm:$0xff] }
 0xc56   : > { %v3244_v24 = vmul.bf16 %v19352_v48, %v19349_v26 }
 0xc57   : > { %v8023_v12 = vsel %vm2752_vm4, %v17065_v42, %v17124_v58  ;;  %7613 = vadd.xlane.f32.xlu1 %v7612_v31  ;;  %v4089_v42 = vsel %vm4067_vm14, %v4054_v30, %v3740_v27  ;;  %v19353_v31 = vld [vmem:[#allocation110_spill] sm:$0xff]  ;;  %v17185_v27 = vld [vmem:[#allocation2 + $0x90] sm:$0xf] }
 0xc58   : > { %8059 = vst.msk [vmem:[#allocation3 + $0x68] sm:$0xff] %vm292_vm3, %v8023_v12  ;;  %v4124_v62 = vsel %vm4102_vm15, %v4089_v42, %v3791_v14  ;;  %v19354_v12 = vld [vmem:[#allocation117_spill] sm:$0xff]  ;;  %v19358_v42 = vld [vmem:[#allocation87_spill] sm:$0xff] }
 0xc60   : > { %v7599_v52 = vpop.xlane.xlu0 %7598 }
 0xc61   : > { %v7641_v44 = vmul.f32 0.041666668, %v7599_v52  ;;  %v19357_v52 = vld [vmem:[#allocation17_spill] sm:$0xff] }
 0xc63   : > { %v7673_v53 = vadd.f32 1e-05, %v7641_v44 }
 0xc64   : > { %v3849_v15 = vpop.permute.xlu0 %3848 }
 0xc65   : > { %11344 = vrsqrt.f32 %v7673_v53  ;;  %v4159_v29 = vsel %vm4137_vm5, %v4124_v62, %v3849_v15  ;;  %v3245_v53 = vmul.bf16 %v19353_v31, %v19358_v42  ;;  %v19359_v62 = vld [vmem:[#allocation119_spill] sm:$0xff] }
 0xc66   : > { %v4358_v2 = vshrl.u32 %v4159_v29, 16  ;;  %v4361_v10 = vshll.u32 %v4159_v29, 16  ;;  %v7602_v28 = vpop.xlane.xlu1 %7601  ;;  %v3821_v29 = vshll.u32 %v17185_v27, 16 }
 0xc67   : > { %v7642_v3 = vmul.f32 0.041666668, %v7602_v28  ;;  %3852 = vrot.lane.b32.xlu0 %v19344_v41, %s11587_s13 }
 0xc68   : > { %v4360_v37 = vrot.slane %v4358_v2, 3  ;;  %v4363_v57 = vrot.slane %v4361_v10, 4  ;;  %3467 = vrot.lane.b32.xlu1 %v19334_v5, %s11583_s9  ;;  %v19360_v2 = vld [vmem:[#allocation19_spill] sm:$0xff] }
 0xc69   : > { %v7674_v43 = vadd.f32 1e-05, %v7642_v3  ;;  %v19361_v3 = vld [vmem:[#allocation124_spill] sm:$0xff] }
 0xc6a   : > { %v17144_v1 = vor.u32 %v4363_v57, %v4360_v37  ;;  %v19362_v37 = vld [vmem:[#allocation129_spill] sm:$0xff] }
 0xc6b   : > { %11346 = vrsqrt.f32 %v7674_v43  ;;  %3552 = vrot.lane.b32.xlu0 %v19346_v50, %s11584_s10  ;;  %v19363_v57 = vld [vmem:[#allocation125_spill] sm:$0xff]  ;;  %v19364_v50 = vld [vmem:[#allocation130_spill] sm:$0xff] }
 0xc6c   : > { %3603 = vrot.lane.b32.xlu1 %v3243_v17, %s11585_s11  ;;  %v4365_v49 = vsel %vm3049_vm8, %v17088_v4, %v17144_v1  ;;  %v19350_v4 = vld [vmem:[#allocation114_spill] sm:$0xff]  ;;  %v3823_v17 = vrot.slane %v3821_v29, 1 }
 0xc6d   : > { %4700 = vmatmul.mubr.bf16.gmra.mrb[16].mxu1 %v4365_v49  ;;  %v3284_v49 = vmul.bf16 %v19361_v3, %v19358_v42 }
 0xc6e   : > { %10322 = vmatprep.mubr.msk.bf16.mxu1 %vm285_vm1, %v19347_v25 }
 0xc6f   : > { %v11345_v5 = vpop.eup %11344  ;;  %3661 = vrot.lane.b32.xlu0 %v19344_v41, %s11586_s12 }
 0xc70   : > { %v7737_v39 = vmul.f32 %v11345_v5, %v16999_v6  ;;  %3745 = vrot.lane.b32.xlu1 %v19348_v23, %s11579_s8  ;;  %v19365_v23 = vld [vmem:[#allocation109_spill] sm:$0xff] }
 0xc72   : > { %v10411_v61 = vmul.f32 -1.442695, %v7737_v39 }
 0xc73   : > { %3796 = vrot.lane.b32.xlu0 %v3282_v0, %s11578_s7  ;;  %v3438_v0 = vshrl.u32 %v19365_v23, 16 }
 0xc74   : > { %11348 = vpow2.f32 %v10411_v61  ;;  %3854 = vrot.lane.b32.xlu1 %v19350_v4, %s11587_s13  ;;  %v8098_v61 = vld [vmem:[#allocation3] sm:$0xf0] }
 0xc75   : > { %v11347_v60 = vpop.eup %11346 }
 0xc76   : > { %v7738_v46 = vmul.f32 %v11347_v60, %v17005_v16  ;;  %v3283_v16 = vmul.bf16 %v19353_v31, %v19352_v48  ;;  %v3549_v60 = vpop.permute.xlu0 %3548  ;;  %v3464_v31 = vpop.permute.xlu1 %3463 }
 0xc77   : > { %3469 = vrot.lane.b32.xlu0 %v19344_v41, %s11583_s9  ;;  %v3817_v41 = vshrl.u32 %v19361_v3, 16 }
 0xc78   : > { %v10412_v6 = vmul.f32 -1.442695, %v7738_v46  ;;  %3554 = vrot.lane.b32.xlu1 %v19351_v18, %s11584_s10 }
 0xc79   : > { %v3819_v43 = vor.u32 %v3817_v41, %v19363_v57  ;;  %v3041_v41 = vmul.bf16 %v15725_v56, %v19320_v45  ;;  %v19372_v45 = vmov 0  }
 0xc7a   : > { %11350 = vpow2.f32 %v10412_v6  ;;  %v19366_v6 = vld [vmem:[#allocation115_spill] sm:$0xff]  ;;  %v3600_v57 = vpop.permute.xlu1 %3599 }
 0xc7b   : > { %3605 = vrot.lane.b32.xlu0 %v3244_v24, %s11585_s11  ;;  %v3824_v5 = vsel %vm3305_vm9, %v3819_v43, %v3823_v17  ;;  %v3440_v18 = vor.u32 %v3438_v0, %v19366_v6  ;;  %v10599_v43 = vld [vmem:[%s18598_s4 + $0x8] sm:$0xff]   ;;  %v19374_v6 = vld [vmem:[#allocation49_spill] sm:$0xff] }
 0xc7c   : > { %3663 = vrot.lane.b32.xlu1 %v19350_v4, %s11586_s12 }
 0xc7e   : > { %v11349_v33 = vpop.eup %11348 }
 0xc7f   : > { %3747 = vrot.lane.b32.xlu0 %v19354_v12, %s11579_s8  ;;  %v7865_v55 = vadd.f32 1.0, %v11349_v33 }
 0xc80   : > { %3798 = vrot.lane.b32.xlu1 %v3283_v16, %s11578_s7  ;;  %v8198_v16 = vshll.u32 %v8098_v61, 16 }
 0xc81   : > { %11352 = vrcp.f32 %v7865_v55  ;;  %v19367_v55 = vld [vmem:[#allocation116_spill] sm:$0xff] }
 0xc83   : > { %3856 = vrot.lane.b32.xlu0 %v19355_v20, %s11587_s13  ;;  %v19368_v20 = vld [vmem:[#allocation123_spill] sm:$0xff] }
 0xc84   : > { %v11351_v47 = vpop.eup %11350  ;;  %3471 = vrot.lane.b32.xlu1 %v19356_v11, %s11583_s9  ;;  %v8065_v11 = vld [vmem:[#allocation3 + $0x8] sm:$0xff] }
 0xc85   : > { %v7866_v22 = vadd.f32 1.0, %v11351_v47  ;;  %v4677_v30 = vpop.f32.mrb[4].mxu1  ;;  %v3632_v47 = vshrl.u32 %v19368_v20, 16  ;;  %v8203_v29 = vshll.u32 %v8065_v11, 16 }
 0xc86   : > { %v17188_v14 = vadd.f32 %v4677_v30, %v19357_v52  ;;  %v4679_v44 = vpop.f32.mrb[5].mxu1 }
 0xc87   : > { %11354 = vrcp.f32 %v7866_v22  ;;  %3556 = vrot.lane.b32.xlu0 %v19359_v62, %s11584_s10  ;;  %v4680_v15 = vpop.f32.mrb[6].mxu1  ;;  %v19369_v22 = vld [vmem:[#allocation40_spill] sm:$0xff]  ;;  %v19370_v44 = vld [vmem:[#allocation126_spill] sm:$0xff]  ;;  %v8196_v62 = vshrl.u32 %v8098_v61, 16 }
 0xc88   : > { %v17196_v10 = vadd.f32 %v4680_v15, %v19360_v2  ;;  %3607 = vrot.lane.b32.xlu1 %v3245_v53, %s11585_s11  ;;  %v4682_v28 = vpop.f32.mrb[7].mxu1  ;;  %v3246_v30 = vmul.bf16 %v19368_v20, %v19369_v22  ;;  %v3634_v53 = vor.u32 %v3632_v47, %v19370_v44  ;;  %v8200_v15 = vrot.slane %v8198_v16, 1  ;;  %v17223_v2 = vld [vmem:[#allocation3 + $0x10] sm:$0xff]  ;;  %v17257_v20 = vld [vmem:[#allocation3 + $0x8] sm:$0xf0]  ;;  %v17259_v47 = vld [vmem:[#allocation3 + $0x18] sm:$0xff] }
 0xc89   : > { %v10598_v28 = vld [vmem:[%s18598_s4] sm:$0xff]   ;;  %v8207_v16 = vshrl.u32 %v8065_v11, 16 }
 0xc8a   : > { %9574 = vmatpush1.bf16.msra.mxu1 %v10598_v28  ;;  %v8201_v0 = vor.u32 %v8200_v15, %v8196_v62 }
 0xc8b   : > { %3665 = vrot.lane.b32.xlu0 %v19362_v37, %s11586_s12  ;;  %v11353_v25 = vpop.eup %11352  ;;  %v3285_v37 = vmul.bf16 %v17185_v27, %v19369_v22  ;;  %9575 = vmatprep.subr.bf16.mxu1 %v19372_v45 }
 0xc8c   : > { %3749 = vrot.lane.b32.xlu1 %v19364_v50, %s11579_s8  ;;  %v7961_v24 = vmul.f32 %v11353_v25, %v7737_v39  ;;  %v3658_v39 = vpop.permute.xlu0 %3657  ;;  %v3947_v50 = vsel %vm285_vm1, %v3041_v41, %v3464_v31 }
 0xc8e   : > { %9576 = vmatpush1.bf16.msra.mxu1 %v10599_v43 }
 0xc8f   : > { %3800 = vrot.lane.b32.xlu0 %v3284_v49, %s11578_s7  ;;  %v19371_v49 = vld [vmem:[#allocation41_spill] sm:$0xff]  ;;  %9577 = vmatprep.subr.bf16.mxu1 %v19372_v45 }
 0xc90   : > { %3858 = vrot.lane.b32.xlu1 %v3824_v5, %s11587_s13  ;;  %v8100_v25 = vmul.bf16 %v8098_v61, %v19371_v49  ;;  %v19373_v5 = vld [vmem:[#allocation127_spill] sm:$0xff]  ;;  %v10600_v61 = vld [vmem:[%s18598_s4 + $0x10] sm:$0xff]  }
 0xc91   : > { %v11355_v4 = vpop.eup %11354 }
 0xc92   : > { %v7962_v33 = vmul.f32 %v11355_v4, %v7738_v46  ;;  %v3825_v46 = vshrl.u32 %v17185_v27, 16  ;;  %v8205_v4 = vrot.slane %v8203_v29, 1  ;;  %v8381_v44 = vrot.slane %v8100_v25, 1  ;;  %9578 = vmatpush1.bf16.msra.mxu1 %v10600_v61 }
 0xc93   : > { %3473 = vrot.lane.b32.xlu0 %v3440_v18, %s11583_s9  ;;  %v8101_v18 = vmul.bf16 %v8065_v11, %v19374_v6  ;;  %v8140_v11 = vmul.bf16 %v17223_v2, %v19374_v6  ;;  %v8139_v29 = vmul.bf16 %v17257_v20, %v19371_v49  ;;  %9579 = vmatprep.subr.bf16.mxu1 %v19372_v45 }
 0xc94   : > { %v7980_v12 = vpack.c.bf16 %v7962_v33, %v7961_v24  ;;  %3558 = vrot.lane.b32.xlu1 %v19367_v55, %s11584_s10  ;;  %v3827_v27 = vor.u32 %v3825_v46, %v3823_v17  ;;  %v3986_v24 = vsel %vm940_vm0, %v3947_v50, %v3549_v60  ;;  %v3793_v33 = vpop.permute.xlu0 %3792  ;;  %v19375_v17 = vld [vmem:[#allocation47_spill] sm:$0xff]  ;;  %v3742_v60 = vpop.permute.xlu1 %3741  ;;  %v8209_v46 = vor.u32 %v8207_v16, %v8205_v4  ;;  %s11590_s10 = smov 72  }
 0xc95   : > { %v4021_v31 = vsel %vm3997_vm10, %v3986_v24, %v3600_v57  ;;  %v8102_v55 = vmul.bf16 %v17223_v2, %v19375_v17  ;;  %v8141_v28 = vmul.bf16 %v17259_v47, %v19375_v17  ;;  %v10602_v24 = vld [vmem:[%s18598_s4 + $0x20] sm:$0xff]  }
 0xc96   : > { %v17218_v52 = vrot.slane %v7980_v12, 4  ;;  %v4056_v62 = vsel %vm4032_vm12, %v4021_v31, %v3658_v39 }
 0xc97   : > { %3609 = vrot.lane.b32.xlu0 %v3246_v30, %s11585_s11  ;;  %v8206_v30 = vsel %vm3305_vm9, %v8201_v0, %v8205_v4  ;;  %v4091_v41 = vsel %vm4067_vm14, %v4056_v62, %v3742_v60  ;;  %v17278_v43 = vrot.slane %v8102_v55, 1  ;;  %v8574_v4 = vrot.slane %v8139_v29, 1  ;;  %v17293_v55 = vld [vmem:[#allocation3 + $0x10] sm:$0xf0]  ;;  %v19376_v29 = vld [vmem:[#allocation45_spill] sm:$0xff] }
 0xc98   : > { %v8025_v3 = vsel %vm2752_vm4, %v17124_v58, %v17218_v52  ;;  %3667 = vrot.lane.b32.xlu1 %v3634_v53, %s11586_s12  ;;  %v8211_v58 = vshll.u32 %v17223_v2, 16  ;;  %v8382_v53 = vrot.slane %v8101_v18, 1  ;;  %v17285_v18 = vrot.slane %v8141_v28, 1 }
 0xc99   : > { %8060 = vst.msk [vmem:[#allocation3 + $0x70] sm:$0xff] %vm292_vm3, %v8025_v3  ;;  %v10601_v3 = vld [vmem:[%s18598_s4 + $0x18] sm:$0xff]   ;;  %v8695_v62 = vshll.u32 %v17293_v55, 16 }
 0xc9a   : > { %v17253_v12 = vrot.slane %v8211_v58, 1  ;;  %v8383_v50 = vsel %vm3492_vm11, %v8381_v44, %v8382_v53  ;;  %v8575_v58 = vrot.slane %v8140_v11, 1  ;;  %9580 = vmatpush1.bf16.msra.mxu1 %v10601_v3  ;;  %v8385_v16 = vsel %vm3492_vm11, %v8382_v53, %v17278_v43  ;;  %v8156_v44 = vld [vmem:[#allocation3 + $0x10] sm:$0xf8] }
 0xc9b   : > { %3751 = vrot.lane.b32.xlu0 %v19373_v5, %s11579_s8  ;;  %s11588_s8 = smov 24   ;;  %9581 = vmatprep.subr.bf16.mxu1 %v19372_v45  ;;  %v10603_v53 = vld [vmem:[%s18598_s4 + $0x28] sm:$0xff]   ;;  %v8159_v28 = vmul.bf16 %v8156_v44, %v19376_v29  ;;  %v10605_v44 = vld [vmem:[%s18598_s4 + $0x38] sm:$0xff]  }
 0xc9c   : > { %3802 = vrot.lane.b32.xlu1 %v3285_v37, %s11578_s7  ;;  %v8214_v57 = vsel %vm3305_vm9, %v8209_v46, %v17253_v12 }
 0xc9e   : > { %9582 = vmatpush1.bf16.msra.mxu1 %v10602_v24 }
 0xc9f   : > { %3860 = vrot.lane.b32.xlu0 %v3827_v27, %s11587_s13  ;;  %v4126_v27 = vsel %vm4102_vm15, %v4091_v41, %v3793_v33  ;;  %9583 = vmatprep.subr.bf16.mxu1 %v19372_v45  ;;  %v8117_v41 = vld [vmem:[#allocation3 + $0x8] sm:$0xf8] }
 0xca0   : > { %8330 = vrot.lane.b32.xlu1 %v8206_v30, %s11588_s8  ;;  %v8576_v30 = vsel %vm3492_vm11, %v8574_v4, %v8575_v58 }
 0xca1   : > { %v7608_v15 = vpop.xlane.xlu0 %7607 }
 0xca2   : > { %v7644_v37 = vmul.f32 0.041666668, %v7608_v15  ;;  %v8578_v15 = vsel %vm3492_vm11, %v8575_v58, %v17285_v18  ;;  %9584 = vmatpush1.bf16.msra.mxu1 %v10603_v53  ;;  %v8500_v53 = vshrl.u32 %v17257_v20, 16 }
 0xca3   : > { %v7605_v39 = vpop.xlane.xlu1 %7604  ;;  %8332 = vrot.lane.b32.xlu0 %v8214_v57, %s11588_s8  ;;  %v17311_v57 = vld [vmem:[#allocation3 + $0x20] sm:$0xff]  ;;  %9585 = vmatprep.subr.bf16.mxu1 %v19372_v45 }
 0xca4   : > { %v7676_v25 = vadd.f32 1e-05, %v7644_v37  ;;  %v7643_v5 = vmul.f32 0.041666668, %v7605_v39  ;;  %8414 = vrot.lane.b32.xlu1 %v8383_v50, %s11585_s11  ;;  %v8219_v37 = vshll.u32 %v17259_v47, 16  ;;  %v19377_v50 = vld [vmem:[#allocation55_spill] sm:$0xff] }
 0xca5   : > { %v3851_v0 = vpop.permute.xlu0 %3850  ;;  %v8160_v58 = vmul.bf16 %v17259_v47, %v19377_v50  ;;  %v8227_v4 = vshll.u32 %v17311_v57, 16 }
 0xca6   : > { %11356 = vrsqrt.f32 %v7676_v25  ;;  %v7675_v61 = vadd.f32 1e-05, %v7643_v5  ;;  %v4161_v31 = vsel %vm4137_vm5, %v4126_v27, %v3851_v0  ;;  %v8697_v25 = vrot.slane %v8695_v62, 1  ;;  %v10604_v27 = vld [vmem:[%s18598_s4 + $0x30] sm:$0xff]  }
 0xca7   : > { %v4375_v33 = vshrl.u32 %v4161_v31, 16  ;;  %v4378_v60 = vshll.u32 %v4161_v31, 16  ;;  %8416 = vrot.lane.b32.xlu0 %v8385_v16, %s11585_s11  ;;  %v8502_v5 = vshll.u32 %v17257_v20, 16  ;;  %v8120_v0 = vmul.bf16 %v8117_v41, %v19376_v29  ;;  %9586 = vmatpush1.bf16.msra.mxu1 %v10604_v27 }
 0xca8   : > { %11358 = vrsqrt.f32 %v7675_v61  ;;  %8607 = vrot.lane.b32.xlu1 %v8576_v30, %s11589_s19  ;;  %v8221_v24 = vrot.slane %v8219_v37, 1  ;;  %v8693_v61 = vshrl.u32 %v17293_v55, 16  ;;  %v17340_v62 = vrot.slane %v8227_v4, 1  ;;  %9587 = vmatprep.subr.bf16.mxu1 %v19372_v45 }
 0xca9   : > { %v4377_v11 = vrot.slane %v4375_v33, 3  ;;  %v4380_v46 = vrot.slane %v4378_v60, 4  ;;  %v8121_v33 = vmul.bf16 %v17223_v2, %v19377_v50  ;;  %v8504_v30 = vrot.slane %v8502_v5, 1 }
 0xcaa   : > { %v8698_v60 = vor.u32 %v8697_v25, %v8693_v61  ;;  %v8179_v41 = vmul.bf16 %v17259_v47, %v19374_v6  ;;  %v8215_v6 = vshrl.u32 %v17223_v2, 16  ;;  %v8180_v5 = vmul.bf16 %v17311_v57, %v19375_v17  ;;  %v10607_v2 = vld [vmem:[%s18598_s4 + $0x48] sm:$0xff]  }
 0xcab   : > { %v17307_v3 = vor.u32 %v4380_v46, %v4377_v11  ;;  %8609 = vrot.lane.b32.xlu0 %v8578_v15, %s11589_s19  ;;  %v8223_v46 = vshrl.u32 %v17259_v47, 16  ;;  %9588 = vmatpush1.bf16.msra.mxu1 %v10605_v44 }
 0xcac   : > { %8658 = vrot.lane.b32.xlu1 %v8159_v28, %s11583_s9  ;;  %v8699_v28 = vsel %vm3305_vm9, %v8698_v60, %v8221_v24  ;;  %9589 = vmatprep.subr.bf16.mxu1 %v19372_v45  ;;  %v8217_v27 = vor.u32 %v8215_v6, %v17253_v12  ;;  %v8770_v4 = vrot.slane %v8180_v5, 1  ;;  %v19381_v5 = vld [vmem:[#allocation18_spill] sm:$0xff] }
 0xcad   : > { %v4382_v39 = vsel %vm3049_vm8, %v17144_v1, %v17307_v3  ;;  %v19378_v1 = vld [vmem:[#allocation120_spill] sm:$0xff]  ;;  %v8225_v37 = vor.u32 %v8223_v46, %v8221_v24 }
 0xcae   : > { %4708 = vmatmul.mubr.bf16.gmra.mrb[20].mxu1 %v4382_v39  ;;  %v8505_v39 = vor.u32 %v8504_v30, %v8500_v53  ;;  %v8222_v17 = vsel %vm3305_vm9, %v8217_v27, %v8221_v24  ;;  %v10608_v24 = vld [vmem:[%s18598_s4 + $0x50] sm:$0xff]   ;;  %v19382_v27 = vld [vmem:[#allocation53_spill] sm:$0xff] }
 0xcaf   : > { %8660 = vrot.lane.b32.xlu0 %v8160_v58, %s11583_s9  ;;  %10323 = vmatprep.mubr.msk.bf16.mxu1 %vm285_vm1, %v19378_v1  ;;  %v8178_v58 = vmul.bf16 %v17293_v55, %v19371_v49  ;;  %v17361_v25 = vsel %vm3305_vm9, %v8225_v37, %v17340_v62  ;;  %v8768_v55 = vrot.slane %v8179_v41, 1  ;;  %v19379_v1 = vld [vmem:[#allocation59_spill] sm:$0xff] }
 0xcb0   : > { %v11357_v31 = vpop.eup %11356  ;;  %8465 = vrot.lane.b32.xlu1 %v8120_v0, %s11590_s10  ;;  %v8506_v49 = vsel %vm3305_vm9, %v8505_v39, %v17253_v12  ;;  %v8103_v61 = vmul.bf16 %v17259_v47, %v19379_v1  ;;  %v8142_v12 = vmul.bf16 %v17311_v57, %v19379_v1  ;;  %v19380_v39 = vld [vmem:[#allocation16_spill] sm:$0xff] }
 0xcb1   : > { %v17332_v16 = vmul.f32 %v11357_v31, %v17054_v7  ;;  %v8767_v0 = vrot.slane %v8178_v58, 1 }
 0xcb2   : > { %v11359_v11 = vpop.eup %11358  ;;  %v8386_v60 = vrot.slane %v8103_v61, 1  ;;  %v8579_v44 = vrot.slane %v8142_v12, 1  ;;  %v10611_v12 = vld [vmem:[%s18598_s4 + $0x68] ss:$0 sps:$4 sm:$0xff]  }
 0xcb3   : > { %v10414_v7 = vmul.f32 -1.442695, %v17332_v16  ;;  %v17346_v15 = vmul.f32 %v11359_v11, %v17057_v51  ;;  %8467 = vrot.lane.b32.xlu0 %v8121_v33, %s11590_s10  ;;  %v10606_v51 = vld [vmem:[%s18598_s4 + $0x40] sm:$0xff]   ;;  %v8769_v31 = vsel %vm3492_vm11, %v8767_v0, %v8768_v55  ;;  %v8771_v33 = vsel %vm3492_vm11, %v8768_v55, %v8770_v4 }
 0xcb4   : > { %8716 = vrot.lane.b32.xlu1 %v8699_v28, %s11591_s30  ;;  %9590 = vmatpush1.bf16.msra.mxu1 %v10606_v51  ;;  %v17391_v11 = vld [vmem:[#allocation3 + $0x28] sm:$0xff]  ;;  %v8387_v41 = vsel %vm3492_vm11, %v17278_v43, %v8386_v60  ;;  %v8580_v6 = vsel %vm3492_vm11, %v17285_v18, %v8579_v44  ;;  %v8161_v0 = vmul.bf16 %v17311_v57, %v19382_v27  ;;  %v8231_v18 = vshrl.u32 %v17311_v57, 16 }
 0xcb5   : > { %11360 = vpow2.f32 %v10414_v7  ;;  %v10413_v20 = vmul.f32 -1.442695, %v17346_v15  ;;  %9591 = vmatprep.subr.bf16.mxu1 %v19372_v45  ;;  %v8235_v37 = vshll.u32 %v17391_v11, 16 }
 0xcb7   : > { %11362 = vpow2.f32 %v10413_v20  ;;  %8718 = vrot.lane.b32.xlu0 %v17361_v25, %s11591_s30  ;;  %v10609_v20 = vld [vmem:[%s18598_s4 + $0x58] sm:$0xff]   ;;  %v8237_v61 = vrot.slane %v8235_v37, 1 }
 0xcb8   : > { %8523 = vrot.lane.b32.xlu1 %v8506_v49, %s11578_s7  ;;  %9592 = vmatpush1.bf16.msra.mxu1 %v10607_v2  ;;  %v10610_v2 = vld [vmem:[%s18598_s4 + $0x60] sm:$0xff]  }
 0xcb9   : > { %9593 = vmatprep.subr.bf16.mxu1 %v19372_v45 }
 0xcbb   : > { %8525 = vrot.lane.b32.xlu0 %v8222_v17, %s11578_s7 }
 0xcbc   : > { %8800 = vrot.lane.b32.xlu1 %v8769_v31, %s11586_s12  ;;  %9594 = vmatpush1.bf16.msra.mxu1 %v10608_v24  ;;  %v8181_v31 = vmul.bf16 %v17391_v11, %v19379_v1  ;;  %v8233_v24 = vor.u32 %v8231_v18, %v17340_v62  ;;  %v9571_v1 = vsel %vm2752_vm4, %v10611_v12, 0  ;;  %v3466_v62 = vpop.permute.xlu1 %3465 }
 0xcbd   : > { %9595 = vmatprep.subr.bf16.mxu1 %v19372_v45 }
 0xcbf   : > { %v11361_v30 = vpop.eup %11360  ;;  %8802 = vrot.lane.b32.xlu0 %v8771_v33, %s11586_s12  ;;  %v8772_v33 = vrot.slane %v8181_v31, 1  ;;  %v3042_v31 = vmul.bf16 %v19336_v40, %v19324_v9 }
 0xcc0   : > { %v7868_v46 = vadd.f32 1.0, %v11361_v30  ;;  %8334 = vrot.lane.b32.xlu1 %v8222_v17, %s11588_s8  ;;  %9596 = vmatpush1.bf16.msra.mxu1 %v10609_v20  ;;  %v8122_v17 = vmul.bf16 %v17259_v47, %v19382_v27  ;;  %v8238_v47 = vsel %vm3305_vm9, %v8233_v24, %v8237_v61  ;;  %v19383_v30 = vld [vmem:[#allocation63_spill] sm:$0xff] }
 0xcc1   : > { %v11363_v53 = vpop.eup %11362  ;;  %9597 = vmatprep.subr.bf16.mxu1 %v19372_v45  ;;  %v3950_v12 = vsel %vm285_vm1, %v3042_v31, %v3466_v62 }
 0xcc2   : > { %11364 = vrcp.f32 %v7868_v46  ;;  %v7867_v7 = vadd.f32 1.0, %v11363_v53  ;;  %v4685_v28 = vpop.f32.mrb[8].mxu1  ;;  %v8104_v46 = vmul.bf16 %v17311_v57, %v19383_v30  ;;  %v8143_v53 = vmul.bf16 %v17391_v11, %v19383_v30 }
 0xcc3   : > { %v17402_v58 = vadd.f32 %v19380_v39, %v4685_v28  ;;  %8418 = vrot.lane.b32.xlu0 %v8387_v41, %s11585_s11  ;;  %v4687_v51 = vpop.f32.mrb[9].mxu1  ;;  %v8773_v41 = vsel %vm3492_vm11, %v8770_v4, %v8772_v33  ;;  %v3551_v4 = vpop.permute.xlu1 %3550 }
 0xcc4   : > { %11366 = vrcp.f32 %v7867_v7  ;;  %8611 = vrot.lane.b32.xlu1 %v8580_v6, %s11589_s19  ;;  %v4688_v43 = vpop.f32.mrb[10].mxu1  ;;  %9598 = vmatpush1.bf16.msra.mxu1 %v10610_v2  ;;  %v8388_v37 = vrot.slane %v8104_v46, 1  ;;  %v8581_v39 = vrot.slane %v8143_v53, 1  ;;  %v17442_v51 = vld [vmem:[#allocation3 + $0x30] sm:$0xff]  ;;  %v3988_v46 = vsel %vm940_vm0, %v3950_v12, %v3551_v4  ;;  %v19386_v12 = vld [vmem:[#allocation74_spill] sm:$0xff] }
 0xcc5   : > { %v17409_v49 = vadd.f32 %v19381_v5, %v4688_v43  ;;  %v4690_v55 = vpop.f32.mrb[11].mxu1  ;;  %9599 = vmatprep.subr.bf16.mxu1 %v19372_v45  ;;  %v8243_v5 = vshll.u32 %v17442_v51, 16 }
 0xcc6   : > { %v8389_v43 = vsel %vm3492_vm11, %v8386_v60, %v8388_v37 }
 0xcc7   : > { %8662 = vrot.lane.b32.xlu0 %v8161_v0, %s11583_s9  ;;  %v8245_v18 = vrot.slane %v8243_v5, 1  ;;  %v3660_v24 = vpop.permute.xlu1 %3659  ;;  %v17491_v5 = vld [vmem:[#allocation3 + $0x38] sm:$0xff] }
 0xcc8   : > { %8469 = vrot.lane.b32.xlu1 %v8122_v17, %s11590_s10  ;;  %9600 = vmatpush1.bf16.msra.mxu1 %v9571_v1  ;;  %v8239_v17 = vshrl.u32 %v17391_v11, 16 }
 0xccb   : > { %8720 = vrot.lane.b32.xlu0 %v8238_v47, %s11591_s30 }
 0xccc   : > { %v11365_v7 = vpop.eup %11364  ;;  %8527 = vrot.lane.b32.xlu1 %v17361_v25, %s11578_s7 }
 0xccd   : > { %v7964_v20 = vmul.f32 %v11365_v7, %v17332_v16  ;;  %v8582_v16 = vsel %vm3492_vm11, %v8579_v44, %v8581_v39  ;;  %v8182_v44 = vmul.bf16 %v17442_v51, %v19383_v30  ;;  %v19385_v30 = vld [vmem:[#allocation37_spill] sm:$0xff] }
 0xcce   : > { %v11367_v28 = vpop.eup %11366  ;;  %v8105_v7 = vmul.bf16 %v17391_v11, %v19385_v30  ;;  %v8144_v9 = vmul.bf16 %v17442_v51, %v19385_v30 }
 0xccf   : > { %v7963_v45 = vmul.f32 %v11367_v28, %v17346_v15  ;;  %8804 = vrot.lane.b32.xlu0 %v8773_v41, %s11586_s12  ;;  %v3602_v15 = vpop.permute.xlu0 %3601  ;;  %v17473_v53 = vrot.slane %v8182_v44, 1 }
 0xcd0   : > { %8336 = vrot.lane.b32.xlu1 %v17361_v25, %s11588_s8  ;;  %v19384_v25 = vld [vmem:[#allocation42_spill] sm:$0xff] }
 0xcd1   : > { %v7981_v6 = vpack.c.bf16 %v7964_v20, %v7963_v45  ;;  %v8162_v2 = vmul.bf16 %v17391_v11, %v19384_v25  ;;  %v8123_v60 = vmul.bf16 %v17311_v57, %v19384_v25  ;;  %v8775_v41 = vsel %vm3492_vm11, %v8772_v33, %v17473_v53  ;;  %v3795_v45 = vpop.permute.xlu1 %3794 }
 0xcd2   : > { %v17486_v20 = vrot.slane %v8105_v7, 1 }
 0xcd3   : > { %v17448_v55 = vrot.slane %v7981_v6, 4  ;;  %8420 = vrot.lane.b32.xlu0 %v8389_v43, %s11585_s11  ;;  %v3744_v57 = vpop.permute.xlu0 %3743  ;;  %v17489_v43 = vrot.slane %v8144_v9, 1 }
 0xcd4   : > { %8613 = vrot.lane.b32.xlu1 %v8582_v16, %s11589_s19  ;;  %v8391_v33 = vsel %vm3492_vm11, %v8388_v37, %v17486_v20  ;;  %v8124_v37 = vmul.bf16 %v17391_v11, %v19386_v12 }
 0xcd5   : > { %v8027_v0 = vsel %vm2752_vm4, %v17218_v52, %v17448_v55  ;;  %v8241_v52 = vor.u32 %v8239_v17, %v8237_v61  ;;  %v4023_v61 = vsel %vm3997_vm10, %v3988_v46, %v3602_v15  ;;  %v8584_v17 = vsel %vm3492_vm11, %v8581_v39, %v17489_v43 }
 0xcd6   : > { %8061 = vst.msk [vmem:[#allocation3 + $0x78] sm:$0xff] %vm292_vm3, %v8027_v0  ;;  %v4058_v62 = vsel %vm4032_vm12, %v4023_v61, %v3660_v24  ;;  %v8163_v24 = vmul.bf16 %v17442_v51, %v19386_v12  ;;  %v8247_v46 = vshrl.u32 %v17442_v51, 16  ;;  %v8183_v39 = vmul.bf16 %v17491_v5, %v19385_v30 }
 0xcd7   : > { %8664 = vrot.lane.b32.xlu0 %v8162_v2, %s11583_s9  ;;  %v17471_v1 = vsel %vm3305_vm9, %v8241_v52, %v8245_v18  ;;  %v4093_v4 = vsel %vm4067_vm14, %v4058_v62, %v3744_v57  ;;  %v8251_v2 = vshll.u32 %v17491_v5, 16 }
 0xcd8   : > { %8471 = vrot.lane.b32.xlu1 %v8123_v60, %s11590_s10  ;;  %v4128_v15 = vsel %vm4102_vm15, %v4093_v4, %v3795_v45  ;;  %v8249_v45 = vor.u32 %v8247_v46, %v8245_v18 }
 0xcd9   : > { %v8253_v61 = vrot.slane %v8251_v2, 1 }
 0xcdb   : > { %8722 = vrot.lane.b32.xlu0 %v17471_v1, %s11591_s30 }
 0xcdc   : > { %8529 = vrot.lane.b32.xlu1 %v8238_v47, %s11578_s7 }
 0xcde   : > { %v7611_v28 = vpop.xlane.xlu0 %7610 }
 0xcdf   : > { %v7645_v6 = vmul.f32 0.041666668, %v7611_v28  ;;  %8806 = vrot.lane.b32.xlu0 %v8775_v41, %s11586_s12  ;;  %v3043_v28 = vmul.bf16 %v19345_v21, %v19330_v36  ;;  %v19387_v36 = vld [vmem:[#allocation73_spill] sm:$0xff] }
 0xce0   : > { %8338 = vrot.lane.b32.xlu1 %v8238_v47, %s11588_s8  ;;  %v8145_v18 = vmul.bf16 %v17491_v5, %v19387_v36 }
 0xce1   : > { %v7677_v16 = vadd.f32 1e-05, %v7645_v6 }
 0xce2   : > { %v3853_v0 = vpop.permute.xlu0 %3852 }
 0xce3   : > { %11368 = vrsqrt.f32 %v7677_v16  ;;  %v4163_v60 = vsel %vm4137_vm5, %v4128_v15, %v3853_v0  ;;  %8422 = vrot.lane.b32.xlu0 %v8391_v33, %s11585_s11  ;;  %v17519_v16 = vsel %vm3305_vm9, %v8249_v45, %v8253_v61  ;;  %v17524_v15 = vrot.slane %v8183_v39, 1 }
 0xce4   : > { %v4392_v47 = vshrl.u32 %v4163_v60, 16  ;;  %v4395_v44 = vshll.u32 %v4163_v60, 16  ;;  %8615 = vrot.lane.b32.xlu1 %v8584_v17, %s11589_s19  ;;  %v7614_v31 = vpop.xlane.xlu1 %7613  ;;  %v8106_v0 = vmul.bf16 %v17442_v51, %v19387_v36  ;;  %v19388_v60 = vld [vmem:[#allocation122_spill] sm:$0xff] }
 0xce5   : > { %v7646_v52 = vmul.f32 0.041666668, %v7614_v31  ;;  %v8777_v31 = vsel %vm3492_vm11, %v17473_v53, %v17524_v15 }
 0xce6   : > { %v4394_v57 = vrot.slane %v4392_v47, 3  ;;  %v4397_v7 = vrot.slane %v4395_v44, 4  ;;  %v3553_v9 = vpop.permute.xlu0 %3552 }
 0xce7   : > { %v7678_v62 = vadd.f32 1e-05, %v7646_v52  ;;  %8666 = vrot.lane.b32.xlu0 %v8163_v24, %s11583_s9  ;;  %v17544_v52 = vrot.slane %v8106_v0, 1  ;;  %v17547_v24 = vrot.slane %v8145_v18, 1 }
 0xce8   : > { %v17514_v41 = vor.u32 %v4397_v7, %v4394_v57  ;;  %8473 = vrot.lane.b32.xlu1 %v8124_v37, %s11590_s10  ;;  %v3468_v11 = vpop.permute.xlu1 %3467  ;;  %v17549_v37 = vld [vmem:[#allocation3 + $0x40] sm:$0xff] }
 0xce9   : > { %11370 = vrsqrt.f32 %v7678_v62  ;;  %v3953_v6 = vsel %vm285_vm1, %v3043_v28, %v3468_v11  ;;  %v8259_v39 = vshll.u32 %v17549_v37, 16  ;;  %v3044_v11 = vmul.bf16 %v19352_v48, %v19338_v19 }
 0xcea   : > { %v3662_v4 = vpop.permute.xlu0 %3661  ;;  %v4399_v30 = vsel %vm3049_vm8, %v17307_v3, %v17514_v41  ;;  %v3990_v2 = vsel %vm940_vm0, %v3953_v6, %v3553_v9  ;;  %v8393_v9 = vsel %vm3492_vm11, %v17486_v20, %v17544_v52  ;;  %v19389_v20 = vld [vmem:[#allocation76_spill] sm:$0xff] }
 0xceb   : > { %8724 = vrot.lane.b32.xlu0 %v17519_v16, %s11591_s30  ;;  %4716 = vmatmul.mubr.bf16.gmra.mrb[24].mxu1 %v4399_v30  ;;  %v8164_v0 = vmul.bf16 %v17491_v5, %v19389_v20 }
 0xcec   : > { %8531 = vrot.lane.b32.xlu1 %v17471_v1, %s11578_s7  ;;  %v3604_v33 = vpop.permute.xlu1 %3603  ;;  %10324 = vmatprep.mubr.msk.bf16.mxu1 %vm285_vm1, %v19388_v60  ;;  %v17580_v60 = vrot.slane %v8259_v39, 1 }
 0xced   : > { %v11369_v3 = vpop.eup %11368  ;;  %v4025_v17 = vsel %vm3997_vm10, %v3990_v2, %v3604_v33 }
 0xcee   : > { %v17539_v47 = vmul.f32 %v11369_v3, %v17113_v35  ;;  %v3797_v44 = vpop.permute.xlu0 %3796  ;;  %v4060_v57 = vsel %vm4032_vm12, %v4025_v17, %v3662_v4  ;;  %v8125_v4 = vmul.bf16 %v17442_v51, %v19389_v20 }
 0xcef   : > { %8808 = vrot.lane.b32.xlu0 %v8777_v31, %s11586_s12 }
 0xcf0   : > { %v10415_v46 = vmul.f32 -1.442695, %v17539_v47  ;;  %8340 = vrot.lane.b32.xlu1 %v17471_v1, %s11588_s8  ;;  %v3746_v35 = vpop.permute.xlu1 %3745  ;;  %v8586_v1 = vsel %vm3492_vm11, %v17489_v43, %v17547_v24  ;;  %v8255_v43 = vshrl.u32 %v17491_v5, 16 }
 0xcf1   : > { %v4095_v7 = vsel %vm4067_vm14, %v4060_v57, %v3746_v35 }
 0xcf2   : > { %11372 = vpow2.f32 %v10415_v46  ;;  %v3470_v53 = vpop.permute.xlu0 %3469  ;;  %v4130_v6 = vsel %vm4102_vm15, %v4095_v7, %v3797_v44  ;;  %v8257_v51 = vor.u32 %v8255_v43, %v8253_v61  ;;  %v19390_v46 = vld [vmem:[#allocation66_spill] sm:$0xff] }
 0xcf3   : > { %v11371_v62 = vpop.eup %11370  ;;  %8424 = vrot.lane.b32.xlu0 %v8393_v9, %s11585_s11  ;;  %v3956_v3 = vsel %vm285_vm1, %v3044_v11, %v3470_v53  ;;  %v8107_v35 = vmul.bf16 %v17491_v5, %v19390_v46  ;;  %v8146_v53 = vmul.bf16 %v17549_v37, %v19390_v46 }
 0xcf4   : > { %v17565_v28 = vmul.f32 %v11371_v62, %v17119_v8  ;;  %v3855_v45 = vpop.permute.xlu1 %3854  ;;  %8617 = vrot.lane.b32.xlu1 %v8586_v1, %s11589_s19  ;;  %v8184_v8 = vmul.bf16 %v17549_v37, %v19387_v36  ;;  %v17592_v9 = vsel %vm3305_vm9, %v8257_v51, %v17580_v60 }
 0xcf5   : > { %v4165_v30 = vsel %vm4137_vm5, %v4130_v6, %v3855_v45  ;;  %v19391_v6 = vld [vmem:[#allocation54_spill] sm:$0xff]  ;;  %v17614_v43 = vrot.slane %v8146_v53, 1 }
 0xcf6   : > { %v10416_v19 = vmul.f32 -1.442695, %v17565_v28  ;;  %v4409_v18 = vshrl.u32 %v4165_v30, 16  ;;  %v4412_v33 = vshll.u32 %v4165_v30, 16  ;;  %v3606_v2 = vpop.permute.xlu0 %3605  ;;  %v17594_v61 = vrot.slane %v8184_v8, 1 }
 0xcf7   : > { %8668 = vrot.lane.b32.xlu0 %v8164_v0, %s11583_s9  ;;  %v17612_v0 = vrot.slane %v8107_v35, 1 }
 0xcf8   : > { %11374 = vpow2.f32 %v10416_v19  ;;  %v4411_v17 = vrot.slane %v4409_v18, 3  ;;  %v4414_v44 = vrot.slane %v4412_v33, 4  ;;  %v3555_v31 = vpop.permute.xlu1 %3554  ;;  %8475 = vrot.lane.b32.xlu1 %v8125_v4, %s11590_s10  ;;  %v8779_v30 = vsel %vm3492_vm11, %v17524_v15, %v17594_v61  ;;  %v17617_v19 = vld [vmem:[#allocation3 + $0x48] sm:$0xff] }
 0xcf9   : > { %v3992_v36 = vsel %vm940_vm0, %v3956_v3, %v3555_v31  ;;  %v3045_v15 = vmul.bf16 %v19358_v42, %v19349_v26  ;;  %v8267_v31 = vshll.u32 %v17617_v19, 16  ;;  %v19392_v26 = vld [vmem:[#allocation21_spill] sm:$0xff] }
 0xcfa   : > { %v17588_v57 = vor.u32 %v4414_v44, %v4411_v17  ;;  %v3748_v7 = vpop.permute.xlu0 %3747  ;;  %v4027_v1 = vsel %vm3997_vm10, %v3992_v36, %v3606_v2  ;;  %v8395_v17 = vsel %vm3492_vm11, %v17544_v52, %v17612_v0  ;;  %v8588_v44 = vsel %vm3492_vm11, %v17547_v24, %v17614_v43 }
 0xcfb   : > { %8726 = vrot.lane.b32.xlu0 %v17592_v9, %s11591_s30  ;;  %v8126_v24 = vmul.bf16 %v17491_v5, %v19259_v13 }
 0xcfc   : > { %v11373_v39 = vpop.eup %11372  ;;  %v3664_v62 = vpop.permute.xlu1 %3663  ;;  %8533 = vrot.lane.b32.xlu1 %v17519_v16, %s11578_s7  ;;  %v4416_v11 = vsel %vm3049_vm8, %v17514_v41, %v17588_v57 }
 0xcfd   : > { %v4062_v45 = vsel %vm4032_vm12, %v4027_v1, %v3664_v62  ;;  %4724 = vmatmul.mubr.bf16.gmra.mrb[28].mxu1 %v4416_v11  ;;  %v7869_v8 = vadd.f32 1.0, %v11373_v39  ;;  %v8165_v62 = vmul.bf16 %v17549_v37, %v19259_v13 }
 0xcfe   : > { %10325 = vmatprep.mubr.msk.bf16.mxu1 %vm285_vm1, %v19391_v6  ;;  %v3857_v4 = vpop.permute.xlu0 %3856  ;;  %v4097_v18 = vsel %vm4067_vm14, %v4062_v45, %v3748_v7 }
 0xcff   : > { %8810 = vrot.lane.b32.xlu0 %v8779_v30, %s11586_s12  ;;  %11376 = vrcp.f32 %v7869_v8 }
 0xd00   : > { %v3799_v41 = vpop.permute.xlu1 %3798  ;;  %8342 = vrot.lane.b32.xlu1 %v17519_v16, %s11588_s8 }
 0xd01   : > { %v4132_v33 = vsel %vm4102_vm15, %v4097_v18, %v3799_v41  ;;  %v8263_v18 = vshrl.u32 %v17549_v37, 16 }
 0xd02   : > { %v11375_v2 = vpop.eup %11374  ;;  %v4167_v51 = vsel %vm4137_vm5, %v4132_v33, %v3857_v4  ;;  %v3557_v3 = vpop.permute.xlu0 %3556  ;;  %v19393_v4 = vld [vmem:[#allocation23_spill] sm:$0xff]  ;;  %v17647_v33 = vrot.slane %v8267_v31, 1 }
 0xd03   : > { %v7870_v16 = vadd.f32 1.0, %v11375_v2  ;;  %v4426_v36 = vshrl.u32 %v4167_v51, 16  ;;  %v4429_v35 = vshll.u32 %v4167_v51, 16  ;;  %v4693_v7 = vpop.f32.mrb[12].mxu1  ;;  %8426 = vrot.lane.b32.xlu0 %v8395_v17, %s11585_s11  ;;  %v8185_v2 = vmul.bf16 %v17617_v19, %v19390_v46 }
 0xd04   : > { %v17635_v53 = vadd.f32 %v4693_v7, %v19392_v26  ;;  %v3472_v39 = vpop.permute.xlu1 %3471  ;;  %8619 = vrot.lane.b32.xlu1 %v8588_v44, %s11589_s19  ;;  %v4695_v52 = vpop.f32.mrb[13].mxu1  ;;  %v8265_v17 = vor.u32 %v8263_v18, %v17580_v60  ;;  %v19395_v60 = vld [vmem:[#allocation132_spill] sm:$0xff]  ;;  %v19396_v7 = vld [vmem:[#allocation131_spill] sm:$0xff] }
 0xd05   : > { %11378 = vrcp.f32 %v7870_v16  ;;  %v4428_v1 = vrot.slane %v4426_v36, 3  ;;  %v4431_v11 = vrot.slane %v4429_v35, 4  ;;  %v3959_v45 = vsel %vm285_vm1, %v3045_v15, %v3472_v39  ;;  %v4696_v6 = vpop.f32.mrb[14].mxu1  ;;  %v19394_v16 = vld [vmem:[#allocation38_spill] sm:$0xff] }
 0xd06   : > { %v17644_v30 = vadd.f32 %v4696_v6, %v19393_v4  ;;  %v4698_v8 = vpop.f32.mrb[15].mxu1  ;;  %v3666_v41 = vpop.permute.xlu0 %3665  ;;  %v3994_v15 = vsel %vm940_vm0, %v3959_v45, %v3557_v3  ;;  %v8108_v46 = vmul.bf16 %v17549_v37, %v19394_v16  ;;  %v17665_v35 = vsel %vm3305_vm9, %v8265_v17, %v17647_v33 }
 0xd07   : > { %8670 = vrot.lane.b32.xlu0 %v8165_v62, %s11583_s9  ;;  %v17652_v5 = vor.u32 %v4431_v11, %v4428_v1  ;;  %v17667_v3 = vrot.slane %v8185_v2, 1  ;;  %v4469_v26 = vshrl.u32 %v19396_v7, 16  ;;  %v4472_v39 = vshll.u32 %v19396_v7, 16  ;;  %v17689_v2 = vld [vmem:[#allocation3 + $0x50] sm:$0xff] }
 0xd08   : > { %v3608_v51 = vpop.permute.xlu1 %3607  ;;  %8477 = vrot.lane.b32.xlu1 %v8126_v24, %s11590_s10  ;;  %v17681_v11 = vrot.slane %v8108_v46, 1 }
 0xd09   : > { %v4029_v44 = vsel %vm3997_vm10, %v3994_v15, %v3608_v51  ;;  %v4433_v31 = vsel %vm3049_vm8, %v17588_v57, %v17652_v5  ;;  %v8147_v57 = vmul.bf16 %v17617_v19, %v19394_v16  ;;  %v11377_v24 = vpop.eup %11376  ;;  %v8781_v6 = vsel %vm3492_vm11, %v17594_v61, %v17667_v3 }
 0xd0a   : > { %4732 = vmatmul.mubr.bf16.gmra.mrb[32].mxu1 %v4433_v31  ;;  %v3801_v36 = vpop.permute.xlu0 %3800  ;;  %v4064_v62 = vsel %vm4032_vm12, %v4029_v44, %v3666_v41  ;;  %v4471_v18 = vrot.slane %v4469_v26, 3  ;;  %v4474_v41 = vrot.slane %v4472_v39, 4  ;;  %v7965_v51 = vmul.f32 %v11377_v24, %v17539_v47 }
 0xd0b   : > { %8728 = vrot.lane.b32.xlu0 %v17665_v35, %s11591_s30  ;;  %10326 = vmatprep.mubr.msk.bf16.mxu1 %vm285_vm1, %v19395_v60  ;;  %v17687_v8 = vrot.slane %v8147_v57, 1  ;;  %v3046_v61 = vmul.bf16 %v19369_v22, %v19365_v23  ;;  %v8397_v46 = vsel %vm3492_vm11, %v17612_v0, %v17681_v11  ;;  %v8166_v24 = vmul.bf16 %v17617_v19, %v19263_v38 }
 0xd0c   : > { %v3750_v52 = vpop.permute.xlu1 %3749  ;;  %8535 = vrot.lane.b32.xlu1 %v17592_v9, %s11578_s7 }
 0xd0d   : > { %v4099_v1 = vsel %vm4067_vm14, %v4064_v62, %v3750_v52 }
 0xd0e   : > { %v3474_v45 = vpop.permute.xlu0 %3473  ;;  %v4134_v44 = vsel %vm4102_vm15, %v4099_v1, %v3801_v36  ;;  %v4475_v36 = vor.u32 %v4474_v41, %v4471_v18  ;;  %v8127_v1 = vmul.bf16 %v17549_v37, %v19263_v38  ;;  %v8186_v41 = vmul.bf16 %v17689_v2, %v19394_v16 }
 0xd0f   : > { %v11379_v4 = vpop.eup %11378  ;;  %8812 = vrot.lane.b32.xlu0 %v8781_v6, %s11586_s12  ;;  %v3962_v26 = vsel %vm285_vm1, %v3046_v61, %v3474_v45  ;;  %v8271_v6 = vshrl.u32 %v17617_v19, 16 }
 0xd10   : > { %v7966_v15 = vmul.f32 %v11379_v4, %v17565_v28  ;;  %v3859_v17 = vpop.permute.xlu1 %3858  ;;  %8344 = vrot.lane.b32.xlu1 %v17592_v9, %s11588_s8  ;;  %v8275_v28 = vshll.u32 %v17689_v2, 16  ;;  %v8590_v9 = vsel %vm3492_vm11, %v17614_v43, %v17687_v8 }
 0xd11   : > { %v4169_v31 = vsel %vm4137_vm5, %v4134_v44, %v3859_v17  ;;  %v19397_v44 = vld [vmem:[#allocation84_spill] sm:$0xff] }
 0xd12   : > { %v7982_v60 = vpack.c.bf16 %v7966_v15, %v7965_v51  ;;  %v4443_v57 = vshrl.u32 %v4169_v31, 16  ;;  %v4446_v47 = vshll.u32 %v4169_v31, 16  ;;  %v3610_v7 = vpop.permute.xlu0 %3609  ;;  %v8277_v18 = vrot.slane %v8275_v28, 1 }
 0xd13   : > { %8428 = vrot.lane.b32.xlu0 %v8397_v46, %s11585_s11  ;;  %v8273_v15 = vor.u32 %v8271_v6, %v17647_v33  ;;  %v4476_v16 = vsel %vm3049_vm8, %v19397_v44, %v4475_v36  ;;  %v8782_v46 = vrot.slane %v8186_v41, 1 }
 0xd14   : > { %v8028_v23 = vrot.slane %v7982_v60, 4  ;;  %v4445_v39 = vrot.slane %v4443_v57, 3  ;;  %v4448_v52 = vrot.slane %v4446_v47, 4  ;;  %v3559_v62 = vpop.permute.xlu1 %3558  ;;  %8621 = vrot.lane.b32.xlu1 %v8590_v9, %s11589_s19  ;;  %v19398_v60 = vld [vmem:[#allocation75_spill] sm:$0xff] }
 0xd15   : > { %v3996_v0 = vsel %vm940_vm0, %v3962_v26, %v3559_v62  ;;  %v8278_v31 = vsel %vm3305_vm9, %v8273_v15, %v8277_v18  ;;  %v8109_v57 = vmul.bf16 %v17617_v19, %v19398_v60  ;;  %v8148_v33 = vmul.bf16 %v17689_v2, %v19398_v60  ;;  %v17745_v62 = vld [vmem:[#allocation3 + $0x58] sm:$0xff] }
 0xd16   : > { %v8029_v43 = vsel %vm2752_vm4, %v17448_v55, %v8028_v23  ;;  %8063 = vst.msk [vmem:[#allocation3 + $0x88] sm:$0xf] %vm294_vm7, %v8028_v23  ;;  %v4449_v45 = vor.u32 %v4448_v52, %v4445_v39  ;;  %v3752_v4 = vpop.permute.xlu0 %3751  ;;  %v4031_v37 = vsel %vm3997_vm10, %v3996_v0, %v3610_v7  ;;  %v8783_v36 = vsel %vm3492_vm11, %v17667_v3, %v8782_v46 }
 0xd17   : > { %8062 = vst.msk [vmem:[#allocation3 + $0x80] sm:$0xff] %vm292_vm3, %v8029_v43  ;;  %8672 = vrot.lane.b32.xlu0 %v8166_v24, %s11583_s9  ;;  %v8398_v23 = vrot.slane %v8109_v57, 1  ;;  %v8591_v52 = vrot.slane %v8148_v33, 1  ;;  %v8283_v3 = vshll.u32 %v17745_v62, 16  ;;  %v8279_v15 = vshrl.u32 %v17689_v2, 16 }
 0xd18   : > { %v3668_v51 = vpop.permute.xlu1 %3667  ;;  %8479 = vrot.lane.b32.xlu1 %v8127_v1, %s11590_s10  ;;  %v4450_v55 = vsel %vm3049_vm8, %v17652_v5, %v4449_v45  ;;  %vm8919_vm4 = vcmask 588800  }
 0xd19   : > { %v4066_v17 = vsel %vm4032_vm12, %v4031_v37, %v3668_v51  ;;  %4740 = vmatmul.mubr.bf16.gmra.mrb[36].mxu1 %v4450_v55  ;;  %v8399_v43 = vsel %vm3492_vm11, %v17681_v11, %v8398_v23  ;;  %v8128_v11 = vmul.bf16 %v17617_v19, %v19273_v59  ;;  %v19399_v19 = vld [vmem:[#allocation56_spill] sm:$0xff] }
 0xd1a   : > { %10327 = vmatprep.mubr.msk.bf16.mxu1 %vm285_vm1, %v4476_v16  ;;  %v3861_v61 = vpop.permute.xlu0 %3860  ;;  %v4101_v47 = vsel %vm4067_vm14, %v4066_v17, %v3752_v4  ;;  %v8592_v4 = vsel %vm3492_vm11, %v17687_v8, %v8591_v52  ;;  %v8285_v17 = vrot.slane %v8283_v3, 1  ;;  %v8187_v8 = vmul.bf16 %v17745_v62, %v19398_v60 }
 0xd1b   : > { %8730 = vrot.lane.b32.xlu0 %v8278_v31, %s11591_s30  ;;  %v8110_v33 = vmul.bf16 %v17689_v2, %v19399_v19  ;;  %v8149_v60 = vmul.bf16 %v17745_v62, %v19399_v19  ;;  %vm8988_vm14 = vcmask 982016  }
 0xd1c   : > { %v3803_v5 = vpop.permute.xlu1 %3802  ;;  %8537 = vrot.lane.b32.xlu1 %v17665_v35, %s11578_s7  ;;  %v17771_v57 = vrot.slane %v8187_v8, 1 }
 0xd1d   : > { %v4136_v7 = vsel %vm4102_vm15, %v4101_v47, %v3803_v5 }
 0xd1e   : > { %v4171_v28 = vsel %vm4137_vm5, %v4136_v7, %v3861_v61  ;;  %v8333_v9 = vpop.permute.xlu0 %8332  ;;  %v17782_v7 = vrot.slane %v8110_v33, 1  ;;  %vm9057_vm5 = vcmask 326656  }
 0xd1f   : > { %v4460_v26 = vshrl.u32 %v4171_v28, 16  ;;  %v4463_v39 = vshll.u32 %v4171_v28, 16  ;;  %8814 = vrot.lane.b32.xlu0 %v8783_v36, %s11586_s12  ;;  %v8064_v28 = vld [vmem:[#allocation3] sm:$0xf8]  ;;  %v17785_v36 = vrot.slane %v8149_v60, 1 }
 0xd20   : > { %v8331_v0 = vpop.permute.xlu1 %8330  ;;  %8346 = vrot.lane.b32.xlu1 %v17665_v35, %s11588_s8  ;;  %v8167_v35 = vmul.bf16 %v17689_v2, %v19273_v59 }
 0xd21   : > { %v4462_v24 = vrot.slane %v4460_v26, 3  ;;  %v4465_v1 = vrot.slane %v4463_v39, 4  ;;  %v17787_v26 = vld [vmem:[#allocation3 + $0x60] sm:$0xff] }
 0xd22   : > { %v8417_v6 = vpop.permute.xlu0 %8416 }
 0xd23   : > { %8430 = vrot.lane.b32.xlu0 %v8399_v43, %s11585_s11  ;;  %v4466_v41 = vor.u32 %v4465_v1, %v4462_v24  ;;  %v11524_v24 = vld [vmem:[#allocation3 + $0x8] sm:$0xff]  ;;  %v8081_v43 = vmul.bf16 %v8064_v28, %v19376_v29  ;;  %v8129_v29 = vmul.bf16 %v17689_v2, %v15459_v34 }
 0xd24   : > { %v8415_v51 = vpop.permute.xlu1 %8414  ;;  %8623 = vrot.lane.b32.xlu1 %v8592_v4, %s11589_s19  ;;  %v8082_v1 = vmul.bf16 %v11524_v24, %v19377_v50  ;;  %v8291_v4 = vshll.u32 %v17787_v26, 16 }
 0xd25   : > { %v4467_v37 = vsel %vm3049_vm8, %v4449_v45, %v4466_v41  ;;  %v8281_v45 = vor.u32 %v8279_v15, %v8277_v18  ;;  %v8785_v18 = vsel %vm3492_vm11, %v8782_v46, %v17771_v57  ;;  %v8401_v46 = vsel %vm3492_vm11, %v8398_v23, %v17782_v7 }
 0xd26   : > { %4748 = vmatmul.mubr.bf16.gmra.mrb[40].mxu1 %v4467_v37  ;;  %v8610_v55 = vpop.permute.xlu0 %8609  ;;  %v8594_v41 = vsel %vm3492_vm11, %v8591_v52, %v17785_v36  ;;  %v8839_v37 = vsel %vm292_vm3, %v8082_v1, %v8333_v9  ;;  %v8168_v23 = vmul.bf16 %v17745_v62, %v15459_v34  ;;  %v8836_v52 = vsel %vm292_vm3, %v8081_v43, %v8331_v0 }
 0xd27   : > { %8674 = vrot.lane.b32.xlu0 %v8167_v35, %s11583_s9  ;;  %v17769_v61 = vsel %vm3305_vm9, %v8281_v45, %v8285_v17  ;;  %v8888_v50 = vsel %vm3997_vm10, %v8839_v37, %v8417_v6  ;;  %v8287_v35 = vshrl.u32 %v17745_v62, 16  ;;  %v17810_v8 = vrot.slane %v8291_v4, 1  ;;  %v19400_v45 = vld [vmem:[#allocation60_spill] sm:$0xff] }
 0xd28   : > { %v17765_v44 = vpop.permute.xlu1 %8607  ;;  %8481 = vrot.lane.b32.xlu1 %v8128_v11, %s11590_s10  ;;  %v8188_v11 = vmul.bf16 %v17787_v26, %v19399_v19  ;;  %v8886_v2 = vsel %vm3997_vm10, %v8836_v52, %v8415_v51  ;;  %v8111_v33 = vmul.bf16 %v17745_v62, %v19400_v45  ;;  %v8150_v51 = vmul.bf16 %v17787_v26, %v19400_v45 }
 0xd29   : > { %v8289_v0 = vor.u32 %v8287_v35, %v8285_v17 }
 0xd2a   : > { %v8661_v16 = vpop.permute.xlu0 %8660  ;;  %v17821_v28 = vrot.slane %v8188_v11, 1  ;;  %v17846_v11 = vrot.slane %v8150_v51, 1 }
 0xd2b   : > { %8732 = vrot.lane.b32.xlu0 %v17769_v61, %s11591_s30  ;;  %v9026_v24 = vsel %vm285_vm1, %v8610_v55, %v8661_v16  ;;  %v17830_v43 = vsel %vm3305_vm9, %v8289_v0, %v17810_v8 }
 0xd2c   : > { %v8659_v5 = vpop.permute.xlu1 %8658  ;;  %8539 = vrot.lane.b32.xlu1 %v8278_v31, %s11578_s7  ;;  %v8787_v35 = vsel %vm3492_vm11, %v17771_v57, %v17821_v28 }
 0xd2e   : > { %v8468_v47 = vpop.permute.xlu0 %8467 }
 0xd2f   : > { %8816 = vrot.lane.b32.xlu0 %v8785_v18, %s11586_s12  ;;  %v8923_v9 = vsel %vm8919_vm4, %v8888_v50, %v8468_v47 }
 0xd30   : > { %v8466_v39 = vpop.permute.xlu1 %8465  ;;  %8348 = vrot.lane.b32.xlu1 %v8278_v31, %s11588_s8 }
 0xd31   : > { %v8921_v60 = vsel %vm8919_vm4, %v8886_v2, %v8466_v39 }
 0xd32   : > { %v8719_v3 = vpop.permute.xlu0 %8718 }
 0xd33   : > { %8432 = vrot.lane.b32.xlu0 %v8401_v46, %s11585_s11  ;;  %v9061_v17 = vsel %vm9057_vm5, %v9026_v24, %v8719_v3  ;;  %v19401_v24 = vld [vmem:[#allocation20_spill] sm:$0xff] }
 0xd34   : > { %v8717_v31 = vpop.permute.xlu1 %8716  ;;  %8625 = vrot.lane.b32.xlu1 %v8594_v41, %s11589_s19  ;;  %v17835_v41 = vrot.slane %v8111_v33, 1 }
 0xd36   : > { %v8526_v15 = vpop.permute.xlu0 %8525 }
 0xd37   : > { %v8957_v6 = vsel %vm4102_vm15, %v8923_v9, %v8526_v15  ;;  %8676 = vrot.lane.b32.xlu0 %v8168_v23, %s11583_s9 }
 0xd38   : > { %v8524_v19 = vpop.permute.xlu1 %8523  ;;  %8483 = vrot.lane.b32.xlu1 %v8129_v29, %s11590_s10  ;;  %v8992_v47 = vsel %vm8988_vm14, %v8957_v6, %v8610_v55  ;;  %v9024_v55 = vsel %vm285_vm1, %v17765_v44, %v8659_v5 }
 0xd39   : > { %v8955_v18 = vsel %vm4102_vm15, %v8921_v60, %v8524_v19  ;;  %v9160_v16 = vshrl.u32 %v8992_v47, 16  ;;  %v9163_v37 = vshll.u32 %v8992_v47, 16  ;;  %v9059_v3 = vsel %vm9057_vm5, %v9024_v55, %v8717_v31  ;;  %v17850_v60 = vld [vmem:[#allocation3 + $0x68] sm:$0xff] }
 0xd3a   : > { %v8990_v1 = vsel %vm8988_vm14, %v8955_v18, %v17765_v44  ;;  %v8803_v39 = vpop.permute.xlu0 %8802  ;;  %v8403_v55 = vsel %vm3492_vm11, %v17782_v7, %v17835_v41  ;;  %v11525_v7 = vld [vmem:[#allocation3 + $0x10] sm:$0xff] }
 0xd3b   : > { %v9153_v46 = vshrl.u32 %v8990_v1, 16  ;;  %v9156_v4 = vshll.u32 %v8990_v1, 16  ;;  %8734 = vrot.lane.b32.xlu0 %v17830_v43, %s11591_s30  ;;  %v9095_v29 = vsel %vm4032_vm12, %v9061_v17, %v8803_v39  ;;  %v9162_v31 = vrot.slane %v9160_v16, 3 }
 0xd3c   : > { %v8801_v50 = vpop.permute.xlu1 %8800  ;;  %8541 = vrot.lane.b32.xlu1 %v17769_v61, %s11578_s7  ;;  %v9175_v23 = vshrl.u32 %v9095_v29, 16  ;;  %v9178_v44 = vshll.u32 %v9095_v29, 16  ;;  %v9165_v19 = vrot.slane %v9163_v37, 4  ;;  %v8596_v16 = vsel %vm3492_vm11, %v17785_v36, %v17846_v11 }
 0xd3d   : > { %v9155_v52 = vrot.slane %v9153_v46, 3  ;;  %v9158_v9 = vrot.slane %v9156_v4, 4  ;;  %v9093_v5 = vsel %vm4032_vm12, %v9059_v3, %v8801_v50  ;;  %v19402_v50 = vld [vmem:[#allocation22_spill] sm:$0xff] }
 0xd3e   : > { %v8419_v15 = vpop.permute.xlu0 %8418  ;;  %v9177_v2 = vrot.slane %v9175_v23, 3  ;;  %v9168_v6 = vshrl.u32 %v9093_v5, 16  ;;  %v9171_v33 = vshll.u32 %v9093_v5, 16  ;;  %v9180_v0 = vrot.slane %v9178_v44, 4 }
 0xd3f   : > { %8818 = vrot.lane.b32.xlu0 %v8787_v35, %s11586_s12  ;;  %v9159_v17 = vor.u32 %v9158_v9, %v9155_v52  ;;  %v17868_v35 = vor.u32 %v9165_v19, %v9162_v31  ;;  %v8083_v9 = vmul.bf16 %v11525_v7, %v19382_v27  ;;  %v8169_v44 = vmul.bf16 %v17787_v26, %v15704_v32 }
 0xd40   : > { %v8335_v47 = vpop.permute.xlu1 %8334  ;;  %8350 = vrot.lane.b32.xlu1 %v17769_v61, %s11588_s8  ;;  %v4701_v57 = vpop.f32.mrb[16].mxu1  ;;  %v9170_v18 = vrot.slane %v9168_v6, 3  ;;  %v9173_v51 = vrot.slane %v9171_v33, 4  ;;  %v8299_v61 = vshll.u32 %v17850_v60, 16  ;;  %v9181_v37 = vor.u32 %v9180_v0, %v9177_v2 }
 0xd41   : > { %v17855_v1 = vadd.f32 %v19401_v24, %v4701_v57  ;;  %v4703_v39 = vpop.f32.mrb[17].mxu1  ;;  %v8130_v5 = vmul.bf16 %v17745_v62, %v15704_v32  ;;  %v9167_v2 = vsel %vm3049_vm8, %v9159_v17, %v17868_v35  ;;  %v8295_v33 = vshrl.u32 %v17787_v26, 16 }
 0xd42   : > { %v4704_v46 = vpop.f32.mrb[18].mxu1  ;;  %v8663_v4 = vpop.permute.xlu0 %8662  ;;  %v9174_v29 = vor.u32 %v9173_v51, %v9170_v18  ;;  %v17881_v31 = vrot.slane %v8299_v61, 1  ;;  %v8189_v27 = vmul.bf16 %v17850_v60, %v19400_v45  ;;  %v8842_v62 = vsel %vm292_vm3, %v8083_v9, %v8335_v47  ;;  %v19403_v18 = vld [vmem:[#allocation36_spill] sm:$0xff] }
 0xd43   : > { %v17865_v3 = vadd.f32 %v19402_v50, %v4704_v46  ;;  %v4706_v23 = vpop.f32.mrb[19].mxu1  ;;  %8434 = vrot.lane.b32.xlu0 %v8403_v55, %s11585_s11  ;;  %v8297_v57 = vor.u32 %v8295_v33, %v17810_v8  ;;  %v8112_v51 = vmul.bf16 %v17787_v26, %v19403_v18  ;;  %v8890_v46 = vsel %vm3997_vm10, %v8842_v62, %v8419_v15 }
 0xd44   : > { %v8612_v52 = vpop.permute.xlu1 %8611  ;;  %8627 = vrot.lane.b32.xlu1 %v8596_v16, %s11589_s19  ;;  %v9182_v36 = vsel %vm3049_vm8, %v9174_v29, %v9181_v37  ;;  %v17897_v17 = vrot.slane %v8189_v27, 1  ;;  %v8151_v8 = vmul.bf16 %v17850_v60, %v19403_v18 }
 0xd45   : > { %10431 = vmatprep.mubr.msk.bf16.mxu1 %vm9520_vm6, %v9182_v36  ;;  %v9028_v19 = vsel %vm285_vm1, %v8612_v52, %v8663_v4  ;;  %v17895_v45 = vsel %vm3305_vm9, %v8297_v57, %v17881_v31  ;;  %v17909_v50 = vrot.slane %v8112_v51, 1 }
 0xd46   : > { %v8721_v6 = vpop.permute.xlu0 %8720  ;;  %9606 = vmatmul.mubr.bf16.vlgmr.msra.gmra.mrb[44].mxu1 %v9167_v2  ;;  %v8789_v36 = vsel %vm3492_vm11, %v17821_v28, %v17897_v17  ;;  %v17916_v2 = vrot.slane %v8151_v8, 1  ;;  %v8303_v8 = vshrl.u32 %v17850_v60, 16 }
 0xd47   : > { %8678 = vrot.lane.b32.xlu0 %v8169_v44, %s11583_s9  ;;  %v9063_v24 = vsel %vm9057_vm5, %v9028_v19, %v8721_v6  ;;  %v17918_v6 = vld [vmem:[#allocation3 + $0x70] sm:$0xff]  ;;  %v8405_v28 = vsel %vm3492_vm11, %v17835_v41, %v17909_v50 }
 0xd48   : > { %v8470_v0 = vpop.permute.xlu1 %8469  ;;  %8485 = vrot.lane.b32.xlu1 %v8130_v5, %s11590_s10  ;;  %v8307_v57 = vshll.u32 %v17918_v6, 16 }
 0xd49   : > { %v8925_v4 = vsel %vm8919_vm4, %v8890_v46, %v8470_v0  ;;  %v8170_v46 = vmul.bf16 %v17850_v60, %v15725_v56 }
 0xd4a   : > { %v8805_v39 = vpop.permute.xlu0 %8804 }
 0xd4b   : > { %v9097_v47 = vsel %vm4032_vm12, %v9063_v24, %v8805_v39  ;;  %8736 = vrot.lane.b32.xlu0 %v17895_v45, %s11591_s30  ;;  %v11526_v39 = vld [vmem:[#allocation3 + $0x18] sm:$0xff] }
 0xd4c   : > { %v9191_v55 = vshrl.u32 %v9097_v47, 16  ;;  %v9194_v16 = vshll.u32 %v9097_v47, 16  ;;  %v8528_v61 = vpop.permute.xlu1 %8527  ;;  %8543 = vrot.lane.b32.xlu1 %v17830_v43, %s11578_s7  ;;  %v8084_v41 = vmul.bf16 %v11526_v39, %v19384_v25 }
 0xd4d   : > { %v8959_v29 = vsel %vm4102_vm15, %v8925_v4, %v8528_v61  ;;  %v17947_v4 = vrot.slane %v8307_v57, 1  ;;  %v8305_v61 = vor.u32 %v8303_v8, %v17881_v31 }
 0xd4e   : > { %v9193_v15 = vrot.slane %v9191_v55, 3  ;;  %v9196_v23 = vrot.slane %v9194_v16, 4  ;;  %v8994_v7 = vsel %vm8988_vm14, %v8959_v29, %v8612_v52  ;;  %v8421_v9 = vpop.permute.xlu0 %8420  ;;  %v8190_v55 = vmul.bf16 %v17918_v6, %v19403_v18  ;;  %v19404_v29 = vld [vmem:[#allocation65_spill] sm:$0xff] }
 0xd4f   : > { %v9183_v44 = vshrl.u32 %v8994_v7, 16  ;;  %v9186_v5 = vshll.u32 %v8994_v7, 16  ;;  %8820 = vrot.lane.b32.xlu0 %v8789_v36, %s11586_s12  ;;  %v17961_v18 = vsel %vm3305_vm9, %v8305_v61, %v17947_v4  ;;  %v8152_v31 = vmul.bf16 %v17918_v6, %v19404_v29 }
 0xd50   : > { %v17920_v33 = vor.u32 %v9196_v23, %v9193_v15  ;;  %v8337_v27 = vpop.permute.xlu1 %8336  ;;  %8352 = vrot.lane.b32.xlu1 %v17830_v43, %s11588_s8  ;;  %v8598_v43 = vsel %vm3492_vm11, %v17846_v11, %v17916_v2  ;;  %v8131_v11 = vmul.bf16 %v17787_v26, %v15725_v56  ;;  %v8113_v26 = vmul.bf16 %v17850_v60, %v19404_v29 }
 0xd51   : > { %v9185_v52 = vrot.slane %v9183_v44, 3  ;;  %v9188_v19 = vrot.slane %v9186_v5, 4  ;;  %v17963_v7 = vrot.slane %v8190_v55, 1 }
 0xd52   : > { %v8665_v62 = vpop.permute.xlu0 %8664  ;;  %v9198_v0 = vsel %vm3049_vm8, %v9181_v37, %v17920_v33 }
 0xd53   : > { %8436 = vrot.lane.b32.xlu0 %v8405_v28, %s11585_s11  ;;  %10432 = vmatprep.mubr.msk.bf16.mxu1 %vm9520_vm6, %v9198_v0  ;;  %v17935_v51 = vor.u32 %v9188_v19, %v9185_v52  ;;  %v17975_v28 = vrot.slane %v8113_v26, 1  ;;  %v8791_v39 = vsel %vm3492_vm11, %v17897_v17, %v17963_v7 }
 0xd54   : > { %v8614_v24 = vpop.permute.xlu1 %8613  ;;  %8629 = vrot.lane.b32.xlu1 %v8598_v43, %s11589_s19 }
 0xd55   : > { %v9190_v37 = vsel %vm3049_vm8, %v17868_v35, %v17935_v51  ;;  %v9030_v25 = vsel %vm285_vm1, %v8614_v24, %v8665_v62  ;;  %v8845_v35 = vsel %vm292_vm3, %v8084_v41, %v8337_v27  ;;  %v8407_v17 = vsel %vm3492_vm11, %v17909_v50, %v17975_v28  ;;  %v11527_v50 = vld [vmem:[#allocation3 + $0x20] sm:$0xff] }
 0xd56   : > { %9614 = vmatmul.mubr.bf16.gmra.mrb[48].mxu1 %v9190_v37  ;;  %v8723_v47 = vpop.permute.xlu0 %8722  ;;  %v8892_v36 = vsel %vm3997_vm10, %v8845_v35, %v8421_v9 }
 0xd57   : > { %8680 = vrot.lane.b32.xlu0 %v8170_v46, %s11583_s9  ;;  %v9065_v15 = vsel %vm9057_vm5, %v9030_v25, %v8723_v47  ;;  %v17982_v46 = vrot.slane %v8152_v31, 1  ;;  %v17984_v47 = vld [vmem:[#allocation3 + $0x78] sm:$0xff] }
 0xd58   : > { %v8472_v16 = vpop.permute.xlu1 %8471  ;;  %8487 = vrot.lane.b32.xlu1 %v8131_v11, %s11590_s10 }
 0xd59   : > { %v8927_v5 = vsel %vm8919_vm4, %v8892_v36, %v8472_v16  ;;  %v8315_v16 = vshll.u32 %v17984_v47, 16 }
 0xd5a   : > { %v8807_v23 = vpop.permute.xlu0 %8806 }
 0xd5b   : > { %v9099_v44 = vsel %vm4032_vm12, %v9065_v15, %v8807_v23  ;;  %8738 = vrot.lane.b32.xlu0 %v17961_v18, %s11591_s30  ;;  %v8085_v15 = vmul.bf16 %v11527_v50, %v19386_v12  ;;  %v8171_v23 = vmul.bf16 %v17918_v6, %v19336_v40  ;;  %v18014_v31 = vrot.slane %v8315_v16, 1 }
 0xd5c   : > { %v9207_v27 = vshrl.u32 %v9099_v44, 16  ;;  %v9210_v52 = vshll.u32 %v9099_v44, 16  ;;  %v8530_v19 = vpop.permute.xlu1 %8529  ;;  %8545 = vrot.lane.b32.xlu1 %v17895_v45, %s11578_s7  ;;  %v8311_v44 = vshrl.u32 %v17918_v6, 16 }
 0xd5d   : > { %v8961_v62 = vsel %vm4102_vm15, %v8927_v5, %v8530_v19  ;;  %v8191_v5 = vmul.bf16 %v17984_v47, %v19404_v29  ;;  %v19405_v19 = vld [vmem:[#allocation99_spill] sm:$0xff] }
 0xd5e   : > { %v9209_v9 = vrot.slane %v9207_v27, 3  ;;  %v9212_v0 = vrot.slane %v9210_v52, 4  ;;  %v8996_v57 = vsel %vm8988_vm14, %v8961_v62, %v8614_v24  ;;  %v8423_v43 = vpop.permute.xlu0 %8422  ;;  %v8313_v52 = vor.u32 %v8311_v44, %v17947_v4 }
 0xd5f   : > { %v9199_v41 = vshrl.u32 %v8996_v57, 16  ;;  %v9202_v37 = vshll.u32 %v8996_v57, 16  ;;  %8822 = vrot.lane.b32.xlu0 %v8791_v39, %s11586_s12  ;;  %v8153_v4 = vmul.bf16 %v17984_v47, %v19405_v19 }
 0xd60   : > { %v17986_v11 = vor.u32 %v9212_v0, %v9209_v9  ;;  %v8339_v8 = vpop.permute.xlu1 %8338  ;;  %8354 = vrot.lane.b32.xlu1 %v17895_v45, %s11588_s8  ;;  %v8600_v45 = vsel %vm3492_vm11, %v17916_v2, %v17982_v46  ;;  %v8132_v2 = vmul.bf16 %v17850_v60, %v19336_v40  ;;  %v8114_v60 = vmul.bf16 %v17918_v6, %v19405_v19 }
 0xd61   : > { %v9201_v24 = vrot.slane %v9199_v41, 3  ;;  %v9204_v55 = vrot.slane %v9202_v37, 4  ;;  %v18028_v29 = vsel %vm3305_vm9, %v8313_v52, %v18014_v31  ;;  %v18030_v0 = vrot.slane %v8191_v5, 1 }
 0xd62   : > { %v8667_v25 = vpop.permute.xlu0 %8666  ;;  %v9214_v35 = vsel %vm3049_vm8, %v17920_v33, %v17986_v11 }
 0xd63   : > { %8438 = vrot.lane.b32.xlu0 %v8407_v17, %s11585_s11  ;;  %10433 = vmatprep.mubr.msk.bf16.mxu1 %vm9520_vm6, %v9214_v35  ;;  %v18002_v61 = vor.u32 %v9204_v55, %v9201_v24 }
 0xd64   : > { %v8616_v26 = vpop.permute.xlu1 %8615  ;;  %8631 = vrot.lane.b32.xlu1 %v8600_v45, %s11589_s19  ;;  %v8793_v45 = vsel %vm3492_vm11, %v17963_v7, %v18030_v0 }
 0xd65   : > { %v9206_v33 = vsel %vm3049_vm8, %v17935_v51, %v18002_v61  ;;  %v9032_v12 = vsel %vm285_vm1, %v8616_v26, %v8667_v25  ;;  %v8848_v51 = vsel %vm292_vm3, %v8085_v15, %v8339_v8  ;;  %v18042_v25 = vrot.slane %v8114_v60, 1 }
 0xd66   : > { %9622 = vmatmul.mubr.bf16.gmra.mrb[52].mxu1 %v9206_v33  ;;  %v8725_v36 = vpop.permute.xlu0 %8724  ;;  %v8894_v57 = vsel %vm3997_vm10, %v8848_v51, %v8423_v43  ;;  %v18049_v33 = vrot.slane %v8153_v4, 1 }
 0xd67   : > { %8682 = vrot.lane.b32.xlu0 %v8171_v23, %s11583_s9  ;;  %v9067_v62 = vsel %vm9057_vm5, %v9032_v12, %v8725_v36  ;;  %v18051_v23 = vld [vmem:[#allocation3 + $0x80] sm:$0xff]  ;;  %v8409_v7 = vsel %vm3492_vm11, %v17975_v28, %v18042_v25  ;;  %v11528_v28 = vld [vmem:[#allocation3 + $0x28] sm:$0xff] }
 0xd68   : > { %v8474_v27 = vpop.permute.xlu1 %8473  ;;  %8489 = vrot.lane.b32.xlu1 %v8132_v2, %s11590_s10  ;;  %v8508_v51 = vshll.u32 %v18051_v23, 16  ;;  %v8086_v60 = vmul.bf16 %v11528_v28, %v19389_v20  ;;  %v8192_v4 = vmul.bf16 %v18051_v23, %v19405_v19 }
 0xd69   : > { %v8929_v41 = vsel %vm8919_vm4, %v8894_v57, %v8474_v27  ;;  %v8319_v57 = vshrl.u32 %v17984_v47, 16 }
 0xd6a   : > { %v8809_v9 = vpop.permute.xlu0 %8808 }
 0xd6b   : > { %v9101_v39 = vsel %vm4032_vm12, %v9067_v62, %v8809_v9  ;;  %8740 = vrot.lane.b32.xlu0 %v18028_v29, %s11591_s30  ;;  %v8172_v62 = vmul.bf16 %v17984_v47, %v19345_v21 }
 0xd6c   : > { %v9223_v37 = vshrl.u32 %v9101_v39, 16  ;;  %v9226_v8 = vshll.u32 %v9101_v39, 16  ;;  %v8532_v24 = vpop.permute.xlu1 %8531  ;;  %8547 = vrot.lane.b32.xlu1 %v17961_v18, %s11578_s7  ;;  %v18081_v39 = vrot.slane %v8508_v51, 1 }
 0xd6d   : > { %v8963_v55 = vsel %vm4102_vm15, %v8929_v41, %v8532_v24 }
 0xd6e   : > { %v9225_v43 = vrot.slane %v9223_v37, 3  ;;  %v9228_v17 = vrot.slane %v9226_v8, 4  ;;  %v8998_v35 = vsel %vm8988_vm14, %v8963_v55, %v8616_v26  ;;  %v8425_v16 = vpop.permute.xlu0 %8424  ;;  %v18090_v37 = vor.u32 %v8319_v57, %v18014_v31  ;;  %v18125_v57 = vld [vmem:[#allocation3 + $0x88] sm:$0xff] }
 0xd6f   : > { %v9215_v50 = vshrl.u32 %v8998_v35, 16  ;;  %v9218_v15 = vshll.u32 %v8998_v35, 16  ;;  %8824 = vrot.lane.b32.xlu0 %v8793_v45, %s11586_s12 }
 0xd70   : > { %v18053_v36 = vor.u32 %v9228_v17, %v9225_v43  ;;  %v8341_v2 = vpop.permute.xlu1 %8340  ;;  %8356 = vrot.lane.b32.xlu1 %v17961_v18, %s11588_s8  ;;  %v8602_v18 = vsel %vm3492_vm11, %v17982_v46, %v18049_v33  ;;  %v8133_v46 = vmul.bf16 %v17918_v6, %v19345_v21  ;;  %v19406_v6 = vld [vmem:[#allocation108_spill] sm:$0xff]  ;;  %v18098_v19 = vsel %vm3305_vm9, %v18090_v37, %v18081_v39 }
 0xd71   : > { %v9217_v26 = vrot.slane %v9215_v50, 3  ;;  %v9220_v44 = vrot.slane %v9218_v15, 4  ;;  %v8115_v8 = vmul.bf16 %v17984_v47, %v19406_v6  ;;  %v18100_v43 = vrot.slane %v8192_v4, 1  ;;  %v19407_v4 = vld [vmem:[#allocation25_spill] sm:$0xff] }
 0xd72   : > { %v8669_v5 = vpop.permute.xlu0 %8668  ;;  %v9230_v12 = vsel %vm3049_vm8, %v17986_v11, %v18053_v36  ;;  %v8154_v31 = vmul.bf16 %v18051_v23, %v19406_v6 }
 0xd73   : > { %8440 = vrot.lane.b32.xlu0 %v8409_v7, %s11585_s11  ;;  %10434 = vmatprep.mubr.msk.bf16.mxu1 %vm9520_vm6, %v9230_v12  ;;  %v18069_v27 = vor.u32 %v9220_v44, %v9217_v26  ;;  %v18112_v44 = vrot.slane %v8115_v8, 1  ;;  %v8795_v51 = vsel %vm3492_vm11, %v18030_v0, %v18100_v43 }
 0xd74   : > { %v8618_v52 = vpop.permute.xlu1 %8617  ;;  %8633 = vrot.lane.b32.xlu1 %v8602_v18, %s11589_s19 }
 0xd75   : > { %v9222_v11 = vsel %vm3049_vm8, %v18002_v61, %v18069_v27  ;;  %v9034_v20 = vsel %vm285_vm1, %v8618_v52, %v8669_v5  ;;  %v8851_v61 = vsel %vm292_vm3, %v8086_v60, %v8341_v2  ;;  %v18119_v60 = vrot.slane %v8154_v31, 1 }
 0xd76   : > { %9630 = vmatmul.mubr.bf16.gmra.mrb[56].mxu1 %v9222_v11  ;;  %v8727_v9 = vpop.permute.xlu0 %8726  ;;  %v8896_v17 = vsel %vm3997_vm10, %v8851_v61, %v8425_v16 }
 0xd77   : > { %8684 = vrot.lane.b32.xlu0 %v8172_v62, %s11583_s9  ;;  %v9069_v24 = vsel %vm9057_vm5, %v9034_v20, %v8727_v9 }
 0xd78   : > { %v8476_v41 = vpop.permute.xlu1 %8475  ;;  %8491 = vrot.lane.b32.xlu1 %v8133_v46, %s11590_s10 }
 0xd79   : > { %v8931_v45 = vsel %vm8919_vm4, %v8896_v17, %v8476_v41  ;;  %v8411_v41 = vsel %vm3492_vm11, %v18042_v25, %v18112_v44  ;;  %v19408_v17 = vld [vmem:[#allocation27_spill] sm:$0xff] }
 0xd7a   : > { %v8811_v55 = vpop.permute.xlu0 %8810 }
 0xd7b   : > { %v9103_v35 = vsel %vm4032_vm12, %v9069_v24, %v8811_v55  ;;  %8742 = vrot.lane.b32.xlu0 %v18098_v19, %s11591_s30 }
 0xd7c   : > { %v9239_v50 = vshrl.u32 %v9103_v35, 16  ;;  %v9242_v15 = vshll.u32 %v9103_v35, 16  ;;  %v8534_v2 = vpop.permute.xlu1 %8533  ;;  %8549 = vrot.lane.b32.xlu1 %v18028_v29, %s11578_s7 }
 0xd7d   : > { %v8965_v26 = vsel %vm4102_vm15, %v8931_v45, %v8534_v2  ;;  %v8701_v45 = vshll.u32 %v18125_v57, 16  ;;  %v8193_v2 = vmul.bf16 %v18125_v57, %v19406_v6 }
 0xd7e   : > { %v9241_v16 = vrot.slane %v9239_v50, 3  ;;  %v9244_v5 = vrot.slane %v9242_v15, 4  ;;  %v9000_v7 = vsel %vm8988_vm14, %v8965_v26, %v8618_v52  ;;  %v8427_v12 = vpop.permute.xlu0 %8426  ;;  %v18149_v50 = vld [vmem:[#allocation3 + $0x80] sm:$0xf]  ;;  %v11529_v26 = vld [vmem:[#allocation3 + $0x30] sm:$0xff] }
 0xd7f   : > { %v9231_v18 = vshrl.u32 %v9000_v7, 16  ;;  %v9234_v28 = vshll.u32 %v9000_v7, 16  ;;  %8826 = vrot.lane.b32.xlu0 %v8795_v51, %s11586_s12  ;;  %v8134_v7 = vmul.bf16 %v17984_v47, %v19352_v48 }
 0xd80   : > { %v18121_v11 = vor.u32 %v9244_v5, %v9241_v16  ;;  %v8343_v62 = vpop.permute.xlu1 %8342  ;;  %8358 = vrot.lane.b32.xlu1 %v18028_v29, %s11588_s8  ;;  %v8604_v29 = vsel %vm3492_vm11, %v18049_v33, %v18119_v60  ;;  %v8173_v33 = vmul.bf16 %v18051_v23, %v19352_v48  ;;  %v8087_v16 = vmul.bf16 %v11529_v26, %v19259_v13 }
 0xd81   : > { %v9233_v9 = vrot.slane %v9231_v18, 3  ;;  %v9236_v46 = vrot.slane %v9234_v28, 4  ;;  %v4709_v52 = vpop.f32.mrb[20].mxu1  ;;  %v8099_v28 = vld [vmem:[#allocation3 + $0x80] sm:$0x1f]  ;;  %v8703_v13 = vrot.slane %v8701_v45, 1 }
 0xd82   : > { %v18128_v20 = vadd.f32 %v4709_v52, %v19407_v4  ;;  %v4711_v0 = vpop.f32.mrb[21].mxu1  ;;  %v8671_v61 = vpop.permute.xlu0 %8670  ;;  %v9246_v8 = vsel %vm3049_vm8, %v18053_v36, %v18121_v11  ;;  %v8512_v36 = vshrl.u32 %v18051_v23, 16  ;;  %v8854_v6 = vsel %vm292_vm3, %v8087_v16, %v8343_v62 }
 0xd83   : > { %v4712_v24 = vpop.f32.mrb[22].mxu1  ;;  %8442 = vrot.lane.b32.xlu0 %v8411_v41, %s11585_s11  ;;  %10435 = vmatprep.mubr.msk.bf16.mxu1 %vm9520_vm6, %v9246_v8  ;;  %v18141_v55 = vor.u32 %v9236_v46, %v9233_v9  ;;  %v8138_v46 = vld [vmem:[#allocation3 + $0x88] sm:$0x1f]  ;;  %v18169_v52 = vrot.slane %v8193_v2, 1  ;;  %v8898_v8 = vsel %vm3997_vm10, %v8854_v6, %v8427_v12 }
 0xd84   : > { %v18144_v35 = vadd.f32 %v4712_v24, %v19408_v17  ;;  %v8620_v31 = vpop.permute.xlu1 %8619  ;;  %v4714_v25 = vpop.f32.mrb[23].mxu1  ;;  %8635 = vrot.lane.b32.xlu1 %v8604_v29, %s11589_s19  ;;  %v18162_v51 = vor.u32 %v8512_v36, %v18081_v39 }
 0xd85   : > { %v9238_v15 = vsel %vm3049_vm8, %v18069_v27, %v18141_v55  ;;  %v9036_v18 = vsel %vm285_vm1, %v8620_v31, %v8671_v61  ;;  %v8323_v27 = vshll.u32 %v18149_v50, 16  ;;  %v19409_v61 = vld [vmem:[#allocation107_spill] sm:$0xff]  ;;  %v8797_v12 = vsel %vm3492_vm11, %v18100_v43, %v18169_v52 }
 0xd86   : > { %9638 = vmatmul.mubr.bf16.gmra.mrb[60].mxu1 %v9238_v15  ;;  %v8729_v5 = vpop.permute.xlu0 %8728  ;;  %v8704_v0 = vsel %vm3305_vm9, %v18162_v51, %v8703_v13  ;;  %v8116_v41 = vmul.bf16 %v8099_v28, %v19409_v61  ;;  %v8155_v29 = vmul.bf16 %v8138_v46, %v19409_v61  ;;  %v18197_v28 = vld [vmem:[#allocation3 + $0x90] sm:$0xf] }
 0xd87   : > { %8686 = vrot.lane.b32.xlu0 %v8173_v33, %s11583_s9  ;;  %v9071_v4 = vsel %vm9057_vm5, %v9036_v18, %v8729_v5  ;;  %v18178_v62 = vrot.slane %v8323_v27, 1 }
 0xd88   : > { %v8478_v9 = vpop.permute.xlu1 %8477  ;;  %8493 = vrot.lane.b32.xlu1 %v8134_v7, %s11590_s10  ;;  %v18189_v5 = vrot.slane %v8116_v41, 1  ;;  %v18195_v27 = vrot.slane %v8155_v29, 1  ;;  %v8177_v41 = vld [vmem:[#allocation3 + $0x90] sm:$0x1f] }
 0xd89   : > { %v8933_v17 = vsel %vm8919_vm4, %v8898_v8, %v8478_v9 }
 0xd8a   : > { %v8813_v39 = vpop.permute.xlu0 %8812  ;;  %v8606_v8 = vsel %vm3492_vm11, %v18119_v60, %v18195_v27 }
 0xd8b   : > { %v9105_v24 = vsel %vm4032_vm12, %v9071_v4, %v8813_v39  ;;  %8744 = vrot.lane.b32.xlu0 %v8704_v0, %s11591_s30  ;;  %v8413_v4 = vsel %vm3492_vm11, %v18112_v44, %v18189_v5  ;;  %v8709_v39 = vshll.u32 %v18197_v28, 16  ;;  %v18209_v0 = vld [vmem:[#allocation3 + $0x88] sm:$0xf]  ;;  %v8705_v44 = vshrl.u32 %v18125_v57, 16 }
 0xd8c   : > { %v9255_v25 = vshrl.u32 %v9105_v24, 16  ;;  %v9258_v36 = vshll.u32 %v9105_v24, 16  ;;  %v8536_v45 = vpop.permute.xlu1 %8535  ;;  %8551 = vrot.lane.b32.xlu1 %v18098_v19, %s11578_s7  ;;  %v8326_v19 = vsel %vm3305_vm9, %v18090_v37, %v18178_v62 }
 0xd8d   : > { %v8967_v15 = vsel %vm4102_vm15, %v8933_v17, %v8536_v45  ;;  %v8174_v17 = vmul.bf16 %v18125_v57, %v19358_v42  ;;  %v11530_v45 = vld [vmem:[#allocation3 + $0x38] sm:$0xff] }
 0xd8e   : > { %v9257_v33 = vrot.slane %v9255_v25, 3  ;;  %v9260_v2 = vrot.slane %v9258_v36, 4  ;;  %v9002_v26 = vsel %vm8988_vm14, %v8967_v15, %v8620_v31  ;;  %v8429_v16 = vpop.permute.xlu0 %8428  ;;  %v8516_v25 = vshll.u32 %v18209_v0, 16 }
 0xd8f   : > { %v9247_v7 = vshrl.u32 %v9002_v26, 16  ;;  %v9250_v18 = vshll.u32 %v9002_v26, 16  ;;  %8828 = vrot.lane.b32.xlu0 %v8797_v12, %s11586_s12  ;;  %v8194_v36 = vmul.bf16 %v8177_v41, %v19409_v61  ;;  %v8088_v15 = vmul.bf16 %v11530_v45, %v19263_v38 }
 0xd90   : > { %v18199_v43 = vor.u32 %v9260_v2, %v9257_v33  ;;  %v8345_v6 = vpop.permute.xlu1 %8344  ;;  %8360 = vrot.lane.b32.xlu1 %v8326_v19, %s11588_s8  ;;  %v8135_v12 = vmul.bf16 %v18051_v23, %v19358_v42  ;;  %v8707_v33 = vor.u32 %v8705_v44, %v8703_v13  ;;  %v8711_v2 = vrot.slane %v8709_v39, 1 }
 0xd91   : > { %v9249_v31 = vrot.slane %v9247_v7, 3  ;;  %v9252_v9 = vrot.slane %v9250_v18, 4  ;;  %v8857_v57 = vsel %vm292_vm3, %v8088_v15, %v8345_v6  ;;  %v8518_v61 = vrot.slane %v8516_v25, 1 }
 0xd92   : > { %v8673_v46 = vpop.permute.xlu0 %8672  ;;  %v9262_v37 = vsel %vm3049_vm8, %v18121_v11, %v18199_v43  ;;  %v18231_v7 = vrot.slane %v8194_v36, 1  ;;  %v8712_v19 = vsel %vm3305_vm9, %v8707_v33, %v8711_v2  ;;  %v8900_v23 = vsel %vm3997_vm10, %v8857_v57, %v8429_v16 }
 0xd93   : > { %8444 = vrot.lane.b32.xlu0 %v8413_v4, %s11585_s11  ;;  %10436 = vmatprep.mubr.msk.bf16.mxu1 %vm9520_vm6, %v9262_v37  ;;  %v9253_v24 = vor.u32 %v9252_v9, %v9249_v31  ;;  %v8519_v6 = vsel %vm3305_vm9, %v18162_v51, %v8518_v61  ;;  %v8327_v37 = vshrl.u32 %v18149_v50, 16  ;;  %v8713_v33 = vshrl.u32 %v18197_v28, 16 }
 0xd94   : > { %v8622_v29 = vpop.permute.xlu1 %8621  ;;  %8637 = vrot.lane.b32.xlu1 %v8606_v8, %s11589_s19  ;;  %v8799_v16 = vsel %vm3492_vm11, %v18169_v52, %v18231_v7 }
 0xd95   : > { %v9254_v11 = vsel %vm3049_vm8, %v18141_v55, %v9253_v24  ;;  %v9038_v26 = vsel %vm285_vm1, %v8622_v29, %v8673_v46 }
 0xd96   : > { %9646 = vmatmul.mubr.bf16.gmra.mrb[64].mxu1 %v9254_v11  ;;  %v8731_v60 = vpop.permute.xlu0 %8730  ;;  %v8329_v11 = vor.u32 %v8327_v37, %v18178_v62 }
 0xd97   : > { %8688 = vrot.lane.b32.xlu0 %v8174_v17, %s11583_s9  ;;  %v9073_v38 = vsel %vm9057_vm5, %v9038_v26, %v8731_v60 }
 0xd98   : > { %v8480_v55 = vpop.permute.xlu1 %8479  ;;  %8495 = vrot.lane.b32.xlu1 %v8135_v12, %s11590_s10 }
 0xd99   : > { %v8935_v31 = vsel %vm8919_vm4, %v8900_v23, %v8480_v55  ;;  %v11531_v55 = vld [vmem:[#allocation3 + $0x40] sm:$0xff] }
 0xd9a   : > { %v8815_v18 = vpop.permute.xlu0 %8814 }
 0xd9b   : > { %v9107_v13 = vsel %vm4032_vm12, %v9073_v38, %v8815_v18  ;;  %8746 = vrot.lane.b32.xlu0 %v8712_v19, %s11591_s30  ;;  %v8715_v19 = vor.u32 %v8713_v33, %v8711_v2 }
 0xd9c   : > { %v9271_v9 = vshrl.u32 %v9107_v13, 16  ;;  %v9274_v46 = vshll.u32 %v9107_v13, 16  ;;  %v8538_v4 = vpop.permute.xlu1 %8537  ;;  %8553 = vrot.lane.b32.xlu1 %v8519_v6, %s11578_s7 }
 0xd9d   : > { %v8969_v39 = vsel %vm4102_vm15, %v8935_v31, %v8538_v4 }
 0xd9e   : > { %v9273_v41 = vrot.slane %v9271_v9, 3  ;;  %v9276_v8 = vrot.slane %v9274_v46, 4  ;;  %v9004_v44 = vsel %vm8988_vm14, %v8969_v39, %v8622_v29  ;;  %v8431_v51 = vpop.permute.xlu0 %8430  ;;  %v8175_v29 = vmul.bf16 %v18197_v28, %v19369_v22 }
 0xd9f   : > { %v9263_v17 = vshrl.u32 %v9004_v44, 16  ;;  %v9266_v25 = vshll.u32 %v9004_v44, 16  ;;  %8830 = vrot.lane.b32.xlu0 %v8799_v16, %s11586_s12 }
 0xda0   : > { %v9277_v36 = vor.u32 %v9276_v8, %v9273_v41  ;;  %v8347_v45 = vpop.permute.xlu1 %8346  ;;  %8362 = vrot.lane.b32.xlu1 %v8329_v11, %s11588_s8  ;;  %s18439_s8 = scalar_lea.vmem %s18600_s6, %s10482_s23 }
 0xda1   : > { %v9265_v15 = vrot.slane %v9263_v17, 3  ;;  %v9268_v60 = vrot.slane %v9266_v25, 4 }
 0xda2   : > { %v8675_v12 = vpop.permute.xlu0 %8674  ;;  %v9278_v52 = vsel %vm3049_vm8, %v18199_v43, %v9277_v36  ;;  %v8089_v43 = vmul.bf16 %v11531_v55, %v19273_v59 }
 0xda3   : > { %8446 = vrot.lane.b32.xlu0 %v18189_v5, %s11585_s11  ;;  %10437 = vmatprep.mubr.msk.bf16.mxu1 %vm9520_vm6, %v9278_v52  ;;  %v9269_v62 = vor.u32 %v9268_v60, %v9265_v15  ;;  %v8136_v5 = vmul.bf16 %v18209_v0, %v19369_v22  ;;  %v11532_v52 = vld [vmem:[#allocation3 + $0x48] sm:$0xff] }
 0xda4   : > { %v8624_v26 = vpop.permute.xlu1 %8623  ;;  %8639 = vrot.lane.b32.xlu1 %v18195_v27, %s11589_s19  ;;  %v8860_v28 = vsel %vm292_vm3, %v8089_v43, %v8347_v45  ;;  %v8520_v27 = vshrl.u32 %v18209_v0, 16 }
 0xda5   : > { %v9270_v57 = vsel %vm3049_vm8, %v9253_v24, %v9269_v62  ;;  %v9040_v18 = vsel %vm285_vm1, %v8624_v26, %v8675_v12  ;;  %v8902_v6 = vsel %vm3997_vm10, %v8860_v28, %v8431_v51 }
 0xda6   : > { %9654 = vmatmul.mubr.bf16.gmra.mrb[68].mxu1 %v9270_v57  ;;  %v8733_v38 = vpop.permute.xlu0 %8732  ;;  %v8522_v13 = vor.u32 %v8520_v27, %v8518_v61 }
 0xda7   : > { %8690 = vrot.lane.b32.xlu0 %v8175_v29, %s11583_s9  ;;  %v9075_v24 = vsel %vm9057_vm5, %v9040_v18, %v8733_v38  ;;  %v8090_v29 = vmul.bf16 %v11532_v52, %v15459_v34 }
 0xda8   : > { %v8482_v23 = vpop.permute.xlu1 %8481  ;;  %8497 = vrot.lane.b32.xlu1 %v8136_v5, %s11590_s10 }
 0xda9   : > { %v8937_v9 = vsel %vm8919_vm4, %v8902_v6, %v8482_v23 }
 0xdaa   : > { %v8817_v59 = vpop.permute.xlu0 %8816 }
 0xdab   : > { %v9109_v31 = vsel %vm4032_vm12, %v9075_v24, %v8817_v59  ;;  %8748 = vrot.lane.b32.xlu0 %v8715_v19, %s11591_s30 }
 0xdac   : > { %v9287_v2 = vshrl.u32 %v9109_v31, 16  ;;  %v9290_v46 = vshll.u32 %v9109_v31, 16  ;;  %v8540_v4 = vpop.permute.xlu1 %8539  ;;  %8555 = vrot.lane.b32.xlu1 %v8522_v13, %s11578_s7  ;;  %v19410_v31 = vld [vmem:[#allocation24_spill] sm:$0xff] }
 0xdad   : > { %v8971_v37 = vsel %vm4102_vm15, %v8937_v9, %v8540_v4 }
 0xdae   : > { %v9289_v0 = vrot.slane %v9287_v2, 3  ;;  %v9292_v39 = vrot.slane %v9290_v46, 4  ;;  %v9006_v16 = vsel %vm8988_vm14, %v8971_v37, %v8624_v26  ;;  %v8433_v61 = vpop.permute.xlu0 %8432 }
 0xdaf   : > { %v9279_v41 = vshrl.u32 %v9006_v16, 16  ;;  %v9282_v8 = vshll.u32 %v9006_v16, 16  ;;  %8832 = vrot.lane.b32.xlu0 %v18231_v7, %s11586_s12  ;;  %v19411_v16 = vld [vmem:[#allocation26_spill] sm:$0xff] }
 0xdb0   : > { %v9293_v44 = vor.u32 %v9292_v39, %v9289_v0  ;;  %v8349_v51 = vpop.permute.xlu1 %8348 }
 0xdb1   : > { %v9281_v11 = vrot.slane %v9279_v41, 3  ;;  %v9284_v17 = vrot.slane %v9282_v8, 4  ;;  %v8863_v26 = vsel %vm292_vm3, %v8090_v29, %v8349_v51 }
 0xdb2   : > { %v8677_v25 = vpop.permute.xlu0 %8676  ;;  %v9294_v45 = vsel %vm3049_vm8, %v9277_v36, %v9293_v44  ;;  %v8904_v36 = vsel %vm3997_vm10, %v8863_v26, %v8433_v61 }
 0xdb3   : > { %10438 = vmatprep.mubr.msk.bf16.mxu1 %vm9520_vm6, %v9294_v45  ;;  %v9285_v15 = vor.u32 %v9284_v17, %v9281_v11  ;;  %v11533_v45 = vld [vmem:[#allocation3 + $0x50] sm:$0xff] }
 0xdb4   : > { %v8626_v60 = vpop.permute.xlu1 %8625 }
 0xdb5   : > { %v9286_v12 = vsel %vm3049_vm8, %v9269_v62, %v9285_v15  ;;  %v9042_v7 = vsel %vm285_vm1, %v8626_v60, %v8677_v25 }
 0xdb6   : > { %9662 = vmatmul.mubr.bf16.gmra.mrb[72].mxu1 %v9286_v12  ;;  %v8735_v33 = vpop.permute.xlu0 %8734 }
 0xdb7   : > { %v9077_v55 = vsel %vm9057_vm5, %v9042_v7, %v8735_v33 }
 0xdb8   : > { %v8484_v57 = vpop.permute.xlu1 %8483 }
 0xdb9   : > { %v8939_v5 = vsel %vm8919_vm4, %v8904_v36, %v8484_v57 }
 0xdba   : > { %v8819_v43 = vpop.permute.xlu0 %8818 }
 0xdbb   : > { %v9111_v38 = vsel %vm4032_vm12, %v9077_v55, %v8819_v43 }
 0xdbc   : > { %v9303_v62 = vshrl.u32 %v9111_v38, 16  ;;  %v9306_v18 = vshll.u32 %v9111_v38, 16  ;;  %v8542_v19 = vpop.permute.xlu1 %8541 }
 0xdbd   : > { %v8973_v34 = vsel %vm4102_vm15, %v8939_v5, %v8542_v19 }
 0xdbe   : > { %v9305_v28 = vrot.slane %v9303_v62, 3  ;;  %v9308_v23 = vrot.slane %v9306_v18, 4  ;;  %v9008_v27 = vsel %vm8988_vm14, %v8973_v34, %v8626_v60  ;;  %v4717_v24 = vpop.f32.mrb[24].mxu1  ;;  %v8435_v59 = vpop.permute.xlu0 %8434  ;;  %v8091_v60 = vmul.bf16 %v11533_v45, %v15704_v32 }
 0xdbf   : > { %v9295_v13 = vshrl.u32 %v9008_v27, 16  ;;  %v9298_v6 = vshll.u32 %v9008_v27, 16  ;;  %v18293_v9 = vadd.f32 %v19410_v31, %v4717_v24  ;;  %v4719_v2 = vpop.f32.mrb[25].mxu1 }
 0xdc0   : > { %v9309_v46 = vor.u32 %v9308_v23, %v9305_v28  ;;  %v8351_v4 = vpop.permute.xlu1 %8350  ;;  %v4720_v37 = vpop.f32.mrb[26].mxu1 }
 0xdc1   : > { %v9297_v0 = vrot.slane %v9295_v13, 3  ;;  %v9300_v39 = vrot.slane %v9298_v6, 4  ;;  %v18296_v61 = vadd.f32 %v19411_v16, %v4720_v37  ;;  %v4722_v41 = vpop.f32.mrb[27].mxu1  ;;  %v8866_v29 = vsel %vm292_vm3, %v8091_v60, %v8351_v4  ;;  %v19412_v13 = vld [vmem:[#allocation29_spill] sm:$0xff] }
 0xdc2   : > { %v8679_v8 = vpop.permute.xlu0 %8678  ;;  %v9310_v51 = vsel %vm3049_vm8, %v9293_v44, %v9309_v46  ;;  %v8906_v44 = vsel %vm3997_vm10, %v8866_v29, %v8435_v59 }
 0xdc3   : > { %10439 = vmatprep.mubr.msk.bf16.mxu1 %vm9520_vm6, %v9310_v51  ;;  %v9301_v11 = vor.u32 %v9300_v39, %v9297_v0  ;;  %v19413_v0 = vld [vmem:[#allocation31_spill] sm:$0xff] }
 0xdc4   : > { %v8628_v17 = vpop.permute.xlu1 %8627 }
 0xdc5   : > { %v9302_v25 = vsel %vm3049_vm8, %v9285_v15, %v9301_v11  ;;  %v9044_v52 = vsel %vm285_vm1, %v8628_v17, %v8679_v8 }
 0xdc6   : > { %9670 = vmatmul.mubr.bf16.gmra.mrb[76].mxu1 %v9302_v25  ;;  %v8737_v12 = vpop.permute.xlu0 %8736 }
 0xdc7   : > { %v9079_v7 = vsel %vm9057_vm5, %v9044_v52, %v8737_v12 }
 0xdc8   : > { %v8486_v33 = vpop.permute.xlu1 %8485 }
 0xdc9   : > { %v8941_v55 = vsel %vm8919_vm4, %v8906_v44, %v8486_v33 }
 0xdca   : > { %v8821_v26 = vpop.permute.xlu0 %8820 }
 0xdcb   : > { %v9113_v57 = vsel %vm4032_vm12, %v9079_v7, %v8821_v26 }
 0xdcc   : > { %v9319_v15 = vshrl.u32 %v9113_v57, 16  ;;  %v9322_v43 = vshll.u32 %v9113_v57, 16  ;;  %v8544_v36 = vpop.permute.xlu1 %8543 }
 0xdcd   : > { %v8975_v32 = vsel %vm4102_vm15, %v8941_v55, %v8544_v36 }
 0xdce   : > { %v9321_v38 = vrot.slane %v9319_v15, 3  ;;  %v9324_v5 = vrot.slane %v9322_v43, 4  ;;  %v9010_v62 = vsel %vm8988_vm14, %v8975_v32, %v8628_v17  ;;  %v8437_v18 = vpop.permute.xlu0 %8436  ;;  %v11534_v17 = vld [vmem:[#allocation3 + $0x58] sm:$0xff] }
 0xdcf   : > { %v9311_v19 = vshrl.u32 %v9010_v62, 16  ;;  %v9314_v34 = vshll.u32 %v9010_v62, 16  ;;  %v8092_v25 = vmul.bf16 %v11534_v17, %v15725_v56  ;;  %v19414_v32 = vld [vmem:[#allocation28_spill] sm:$0xff] }
 0xdd0   : > { %v9325_v28 = vor.u32 %v9324_v5, %v9321_v38  ;;  %v8353_v23 = vpop.permute.xlu1 %8352  ;;  %v4725_v27 = vpop.f32.mrb[28].mxu1 }
 0xdd1   : > { %v9313_v24 = vrot.slane %v9311_v19, 3  ;;  %v9316_v59 = vrot.slane %v9314_v34, 4  ;;  %v18311_v6 = vadd.f32 %v4725_v27, %v19412_v13  ;;  %v4727_v31 = vpop.f32.mrb[29].mxu1  ;;  %v8869_v12 = vsel %vm292_vm3, %v8092_v25, %v8353_v23  ;;  %v19415_v27 = vld [vmem:[#allocation30_spill] sm:$0xff] }
 0xdd2   : > { %v4728_v2 = vpop.f32.mrb[30].mxu1  ;;  %v8681_v4 = vpop.permute.xlu0 %8680  ;;  %v9326_v37 = vsel %vm3049_vm8, %v9309_v46, %v9325_v28  ;;  %v8908_v33 = vsel %vm3997_vm10, %v8869_v12, %v8437_v18 }
 0xdd3   : > { %v18315_v39 = vadd.f32 %v4728_v2, %v19413_v0  ;;  %v4730_v16 = vpop.f32.mrb[31].mxu1  ;;  %10440 = vmatprep.mubr.msk.bf16.mxu1 %vm9520_vm6, %v9326_v37  ;;  %v9317_v41 = vor.u32 %v9316_v59, %v9313_v24 }
 0xdd4   : > { %v8630_v8 = vpop.permute.xlu1 %8629 }
 0xdd5   : > { %v9318_v51 = vsel %vm3049_vm8, %v9301_v11, %v9317_v41  ;;  %v9046_v60 = vsel %vm285_vm1, %v8630_v8, %v8681_v4 }
 0xdd6   : > { %9678 = vmatmul.mubr.bf16.gmra.mrb[80].mxu1 %v9318_v51  ;;  %v8739_v45 = vpop.permute.xlu0 %8738  ;;  %v11535_v51 = vld [vmem:[#allocation3 + $0x60] sm:$0xff] }
 0xdd7   : > { %v9081_v52 = vsel %vm9057_vm5, %v9046_v60, %v8739_v45  ;;  %v8093_v17 = vmul.bf16 %v11535_v51, %v19336_v40  ;;  %v11536_v51 = vld [vmem:[#allocation3 + $0x68] sm:$0xff] }
 0xdd8   : > { %v8488_v46 = vpop.permute.xlu1 %8487 }
 0xdd9   : > { %v8943_v26 = vsel %vm8919_vm4, %v8908_v33, %v8488_v46 }
 0xdda   : > { %v8823_v29 = vpop.permute.xlu0 %8822 }
 0xddb   : > { %v9115_v7 = vsel %vm4032_vm12, %v9081_v52, %v8823_v29 }
 0xddc   : > { %v9335_v11 = vshrl.u32 %v9115_v7, 16  ;;  %v9338_v44 = vshll.u32 %v9115_v7, 16  ;;  %v8546_v57 = vpop.permute.xlu1 %8545 }
 0xddd   : > { %v8977_v56 = vsel %vm4102_vm15, %v8943_v26, %v8546_v57  ;;  %v4733_v55 = vpop.f32.mrb[32].mxu1 }
 0xdde   : > { %v9337_v15 = vrot.slane %v9335_v11, 3  ;;  %v9340_v43 = vrot.slane %v9338_v44, 4  ;;  %v9012_v36 = vsel %vm8988_vm14, %v8977_v56, %v8630_v8  ;;  %v18329_v38 = vadd.f32 %v19414_v32, %v4733_v55  ;;  %v4735_v5 = vpop.f32.mrb[33].mxu1  ;;  %v8439_v62 = vpop.permute.xlu0 %8438  ;;  %v19416_v44 = vld [vmem:[#allocation33_spill] sm:$0xff] }
 0xddf   : > { %v9327_v18 = vshrl.u32 %v9012_v36, 16  ;;  %v9330_v19 = vshll.u32 %v9012_v36, 16  ;;  %v4736_v34 = vpop.f32.mrb[34].mxu1 }
 0xde0   : > { %v9341_v23 = vor.u32 %v9340_v43, %v9337_v15  ;;  %v18332_v24 = vadd.f32 %v19415_v27, %v4736_v34  ;;  %v8355_v59 = vpop.permute.xlu1 %8354  ;;  %v4738_v13 = vpop.f32.mrb[35].mxu1 }
 0xde1   : > { %v9329_v31 = vrot.slane %v9327_v18, 3  ;;  %v9332_v2 = vrot.slane %v9330_v19, 4  ;;  %v8872_v60 = vsel %vm292_vm3, %v8093_v17, %v8355_v59  ;;  %v19417_v18 = vld [vmem:[#allocation35_spill] sm:$0xff]  ;;  %v8094_v17 = vmul.bf16 %v11536_v51, %v19345_v21 }
 0xde2   : > { %v8683_v4 = vpop.permute.xlu0 %8682  ;;  %v9342_v37 = vsel %vm3049_vm8, %v9325_v28, %v9341_v23  ;;  %v8910_v28 = vsel %vm3997_vm10, %v8872_v60, %v8439_v62 }
 0xde3   : > { %10441 = vmatprep.mubr.msk.bf16.mxu1 %vm9520_vm6, %v9342_v37  ;;  %v9333_v0 = vor.u32 %v9332_v2, %v9329_v31 }
 0xde4   : > { %v8632_v16 = vpop.permute.xlu1 %8631 }
 0xde5   : > { %v9334_v8 = vsel %vm3049_vm8, %v9317_v41, %v9333_v0  ;;  %v9048_v45 = vsel %vm285_vm1, %v8632_v16, %v8683_v4 }
 0xde6   : > { %9686 = vmatmul.mubr.bf16.gmra.mrb[84].mxu1 %v9334_v8  ;;  %v8741_v25 = vpop.permute.xlu0 %8740 }
 0xde7   : > { %v9083_v46 = vsel %vm9057_vm5, %v9048_v45, %v8741_v25 }
 0xde8   : > { %v8490_v12 = vpop.permute.xlu1 %8489 }
 0xde9   : > { %v8945_v33 = vsel %vm8919_vm4, %v8910_v28, %v8490_v12 }
 0xdea   : > { %v8825_v52 = vpop.permute.xlu0 %8824 }
 0xdeb   : > { %v9117_v29 = vsel %vm4032_vm12, %v9083_v46, %v8825_v52 }
 0xdec   : > { %v9351_v41 = vshrl.u32 %v9117_v29, 16  ;;  %v9354_v7 = vshll.u32 %v9117_v29, 16  ;;  %v8548_v26 = vpop.permute.xlu1 %8547  ;;  %v4741_v40 = vpop.f32.mrb[36].mxu1 }
 0xded   : > { %v8979_v11 = vsel %vm4102_vm15, %v8945_v33, %v8548_v26  ;;  %v18346_v57 = vadd.f32 %v4741_v40, %v19416_v44  ;;  %v4743_v56 = vpop.f32.mrb[37].mxu1 }
 0xdee   : > { %v9353_v55 = vrot.slane %v9351_v41, 3  ;;  %v9356_v15 = vrot.slane %v9354_v7, 4  ;;  %v9014_v43 = vsel %vm8988_vm14, %v8979_v11, %v8632_v16  ;;  %v4744_v36 = vpop.f32.mrb[38].mxu1  ;;  %v8441_v32 = vpop.permute.xlu0 %8440  ;;  %v19419_v11 = vld [vmem:[#allocation34_spill] sm:$0xff] }
 0xdef   : > { %v9343_v5 = vshrl.u32 %v9014_v43, 16  ;;  %v9346_v62 = vshll.u32 %v9014_v43, 16  ;;  %v18350_v19 = vadd.f32 %v4744_v36, %v19417_v18  ;;  %v4746_v34 = vpop.f32.mrb[39].mxu1 }
 0xdf0   : > { %v9357_v27 = vor.u32 %v9356_v15, %v9353_v55  ;;  %v8357_v59 = vpop.permute.xlu1 %8356 }
 0xdf1   : > { %v9345_v13 = vrot.slane %v9343_v5, 3  ;;  %v9348_v31 = vrot.slane %v9346_v62, 4  ;;  %v8875_v60 = vsel %vm292_vm3, %v8094_v17, %v8357_v59 }
 0xdf2   : > { %v8685_v2 = vpop.permute.xlu0 %8684  ;;  %v9358_v4 = vsel %vm3049_vm8, %v9341_v23, %v9357_v27  ;;  %v19418_v23 = vld [vmem:[#allocation32_spill] sm:$0xff] }
 0xdf3   : > { %10442 = vmatprep.mubr.msk.bf16.mxu1 %vm9520_vm6, %v9358_v4  ;;  %v9349_v37 = vor.u32 %v9348_v31, %v9345_v13 }
 0xdf4   : > { %v8634_v8 = vpop.permute.xlu1 %8633 }
 0xdf5   : > { %v9350_v16 = vsel %vm3049_vm8, %v9333_v0, %v9349_v37  ;;  %v9050_v45 = vsel %vm285_vm1, %v8634_v8, %v8685_v2  ;;  %v8912_v0 = vsel %vm3997_vm10, %v8875_v60, %v8441_v32 }
 0xdf6   : > { %9694 = vmatmul.mubr.bf16.gmra.mrb[88].mxu1 %v9350_v16  ;;  %v8743_v25 = vpop.permute.xlu0 %8742 }
 0xdf7   : > { %v9085_v52 = vsel %vm9057_vm5, %v9050_v45, %v8743_v25  ;;  %v11537_v25 = vld [vmem:[#allocation3 + $0x70] sm:$0xff] }
 0xdf8   : > { %v8492_v12 = vpop.permute.xlu1 %8491  ;;  %v8095_v45 = vmul.bf16 %v11537_v25, %v19352_v48 }
 0xdf9   : > { %v4749_v46 = vpop.f32.mrb[40].mxu1  ;;  %v8947_v7 = vsel %vm8919_vm4, %v8912_v0, %v8492_v12 }
 0xdfa   : > { %v18360_v28 = vadd.f32 %v19418_v23, %v4749_v46  ;;  %v4751_v29 = vpop.f32.mrb[41].mxu1  ;;  %v8827_v33 = vpop.permute.xlu0 %8826 }
 0xdfb   : > { %v9119_v41 = vsel %vm4032_vm12, %v9085_v52, %v8827_v33  ;;  %v4752_v21 = vpop.f32.mrb[42].mxu1 }
 0xdfc   : > { %v9367_v26 = vshrl.u32 %v9119_v41, 16  ;;  %v9370_v40 = vshll.u32 %v9119_v41, 16  ;;  %v18366_v44 = vadd.f32 %v19419_v11, %v4752_v21  ;;  %v8550_v56 = vpop.permute.xlu1 %8549  ;;  %v4754_v55 = vpop.f32.mrb[43].mxu1 }
 0xdfd   : > { %v8981_v15 = vsel %vm4102_vm15, %v8947_v7, %v8550_v56 }
 0xdfe   : > { %v9369_v43 = vrot.slane %v9367_v26, 3  ;;  %v9372_v36 = vrot.slane %v9370_v40, 4  ;;  %v9016_v5 = vsel %vm8988_vm14, %v8981_v15, %v8634_v8  ;;  %v8443_v62 = vpop.permute.xlu0 %8442 }
 0xdff   : > { %v9359_v32 = vshrl.u32 %v9016_v5, 16  ;;  %v9362_v18 = vshll.u32 %v9016_v5, 16 }
 0xe00   : > { %v9373_v34 = vor.u32 %v9372_v36, %v9369_v43  ;;  %v8359_v59 = vpop.permute.xlu1 %8358 }
 0xe01   : > { %v9361_v13 = vrot.slane %v9359_v32, 3  ;;  %v9364_v31 = vrot.slane %v9362_v18, 4  ;;  %v8878_v12 = vsel %vm292_vm3, %v8095_v45, %v8359_v59 }
 0xe02   : > { %v8687_v2 = vpop.permute.xlu0 %8686  ;;  %v9374_v4 = vsel %vm3049_vm8, %v9357_v27, %v9373_v34  ;;  %v8914_v27 = vsel %vm3997_vm10, %v8878_v12, %v8443_v62 }
 0xe03   : > { %10443 = vmatprep.mubr.msk.bf16.mxu1 %vm9520_vm6, %v9374_v4  ;;  %v9365_v16 = vor.u32 %v9364_v31, %v9361_v13  ;;  %v8096_v13 = vmul.bf16 %v17984_v47, %v19358_v42 }
 0xe04   : > { %v8636_v51 = vpop.permute.xlu1 %8635 }
 0xe05   : > { %v9366_v17 = vsel %vm3049_vm8, %v9349_v37, %v9365_v16  ;;  %v9052_v60 = vsel %vm285_vm1, %v8636_v51, %v8687_v2 }
 0xe06   : > { %9702 = vmatmul.mubr.bf16.gmra.mrb[92].mxu1 %v9366_v17  ;;  %v8745_v8 = vpop.permute.xlu0 %8744 }
 0xe07   : > { %v9087_v52 = vsel %vm9057_vm5, %v9052_v60, %v8745_v8  ;;  %v19420_v8 = vld [vmem:[#allocation88_spill] sm:$0xff] }
 0xe08   : > { %v8494_v46 = vpop.permute.xlu1 %8493 }
 0xe09   : > { %v8949_v33 = vsel %vm8919_vm4, %v8914_v27, %v8494_v46 }
 0xe0a   : > { %v8829_v23 = vpop.permute.xlu0 %8828 }
 0xe0b   : > { %v9121_v29 = vsel %vm4032_vm12, %v9087_v52, %v8829_v23 }
 0xe0c   : > { %v9383_v37 = vshrl.u32 %v9121_v29, 16  ;;  %v9386_v0 = vshll.u32 %v9121_v29, 16  ;;  %v8552_v41 = vpop.permute.xlu1 %8551 }
 0xe0d   : > { %v8983_v48 = vsel %vm4102_vm15, %v8949_v33, %v8552_v41  ;;  %v19421_v33 = vld [vmem:[#allocation5_spill] sm:$0xff] }
 0xe0e   : > { %v9385_v21 = vrot.slane %v9383_v37, 3  ;;  %v9388_v7 = vrot.slane %v9386_v0, 4  ;;  %v9018_v26 = vsel %vm8988_vm14, %v8983_v48, %v8636_v51  ;;  %v8445_v40 = vpop.permute.xlu0 %8444 }
 0xe0f   : > { %v9375_v11 = vshrl.u32 %v9018_v26, 16  ;;  %v9378_v56 = vshll.u32 %v9018_v26, 16 }
 0xe10   : > { %v9389_v55 = vor.u32 %v9388_v7, %v9385_v21  ;;  %v8361_v15 = vpop.permute.xlu1 %8360 }
 0xe11   : > { %v9377_v43 = vrot.slane %v9375_v11, 3  ;;  %v9380_v36 = vrot.slane %v9378_v56, 4  ;;  %v8881_v4 = vsel %vm292_vm3, %v8096_v13, %v8361_v15 }
 0xe12   : > { %v8689_v5 = vpop.permute.xlu0 %8688  ;;  %v9390_v62 = vsel %vm3049_vm8, %v9373_v34, %v9389_v55  ;;  %v18393_v34 = vld [vmem:[%s18599_s5] ss:$0 sm:$0xff] }
 0xe13   : > { %10444 = vmatprep.mubr.msk.bf16.mxu1 %vm9520_vm6, %v9390_v62  ;;  %v9381_v32 = vor.u32 %v9380_v36, %v9377_v43 }
 0xe14   : > { %v8638_v18 = vpop.permute.xlu1 %8637 }
 0xe15   : > { %v9382_v59 = vsel %vm3049_vm8, %v9365_v16, %v9381_v32  ;;  %v9054_v2 = vsel %vm285_vm1, %v8638_v18, %v8689_v5  ;;  %v8916_v16 = vsel %vm3997_vm10, %v8881_v4, %v8445_v40  ;;  %v11538_v40 = vld [vmem:[%s11643_s26] sm:$0xff] }
 0xe16   : > { %9710 = vmatmul.mubr.bf16.gmra.mrb[96].mxu1 %v9382_v59  ;;  %v8747_v31 = vpop.permute.xlu0 %8746  ;;  %v11539_v59 = vld [vmem:[%s11643_s26 + $0x8] sm:$0xff] }
 0xe17   : > { %v9089_v17 = vsel %vm9057_vm5, %v9054_v2, %v8747_v31 }
 0xe18   : > { %v8496_v51 = vpop.permute.xlu1 %8495 }
 0xe19   : > { %v9607_v25 = vpop.f32.mrb[44].mxu1  ;;  %v8951_v12 = vsel %vm8919_vm4, %v8916_v16, %v8496_v51 }
 0xe1a   : > { %v8831_v45 = vpop.permute.xlu0 %8830  ;;  %v9766_v42 = vadd.f32 %v19420_v8, %v9607_v25  ;;  %v9609_v47 = vpop.f32.mrb[45].mxu1 }
 0xe1b   : > { %v9123_v60 = vsel %vm4032_vm12, %v9089_v17, %v8831_v45  ;;  %v9610_v23 = vpop.f32.mrb[46].mxu1  ;;  %v8097_v45 = vmul.bf16 %v18149_v50, %v19369_v22 }
 0xe1c   : > { %v9399_v46 = vshrl.u32 %v9123_v60, 16  ;;  %v9402_v52 = vshll.u32 %v9123_v60, 16  ;;  %v8554_v27 = vpop.permute.xlu1 %8553  ;;  %v9805_v29 = vadd.f32 %v18393_v34, %v9766_v42  ;;  %v9767_v37 = vadd.f32 %v19421_v33, %v9610_v23  ;;  %v9612_v41 = vpop.f32.mrb[47].mxu1 }
 0xe1d   : > { %v8985_v0 = vsel %vm4102_vm15, %v8951_v12, %v8554_v27  ;;  %v19423_v41 = vld [vmem:[#allocation97_spill] sm:$0xff] }
 0xe1e   : > { %v9401_v48 = vrot.slane %v9399_v46, 3  ;;  %v9404_v21 = vrot.slane %v9402_v52, 4  ;;  %v9020_v7 = vsel %vm8988_vm14, %v8985_v0, %v8638_v18  ;;  %v8447_v26 = vpop.permute.xlu0 %8446  ;;  %v18404_v11 = vadd.f32 %v11538_v40, %v9805_v29  ;;  %v19422_v52 = vld [vmem:[#allocation7_spill] sm:$0xff] }
 0xe1f   : > { %v9806_v56 = vadd.f32 %v18393_v34, %v9767_v37  ;;  %v9391_v15 = vshrl.u32 %v9020_v7, 16  ;;  %v9394_v43 = vshll.u32 %v9020_v7, 16 }
 0xe20   : > { %v9405_v36 = vor.u32 %v9404_v21, %v9401_v48  ;;  %v8363_v5 = vpop.permute.xlu1 %8362  ;;  %v10448_v62 = vmul.f32 -1.442695, %v18404_v11 }
 0xe21   : > { %v18409_v13 = vadd.f32 %v11539_v59, %v9806_v56  ;;  %v9393_v31 = vrot.slane %v9391_v15, 3  ;;  %v9396_v2 = vrot.slane %v9394_v43, 4  ;;  %v8884_v42 = vsel %vm292_vm3, %v8097_v45, %v8363_v5  ;;  %v11540_v15 = vld [vmem:[%s11643_s26 + $0x10] sm:$0xff]  ;;  %v11541_v45 = vld [vmem:[%s11643_s26 + $0x18] sm:$0xff] }
 0xe22   : > { %v8691_v4 = vpop.permute.xlu0 %8690  ;;  %v9406_v18 = vsel %vm3049_vm8, %v9389_v55, %v9405_v36  ;;  %11380 = vpow2.f32 %v10448_v62  ;;  %v8918_v46 = vsel %vm3997_vm10, %v8884_v42, %v8447_v26 }
 0xe23   : > { %v10449_v51 = vmul.f32 -1.442695, %v18409_v13  ;;  %10445 = vmatprep.mubr.msk.bf16.mxu1 %vm9520_vm6, %v9406_v18  ;;  %v9397_v17 = vor.u32 %v9396_v2, %v9393_v31 }
 0xe24   : > { %v8640_v25 = vpop.permute.xlu1 %8639 }
 0xe25   : > { %11382 = vpow2.f32 %v10449_v51  ;;  %v9398_v16 = vsel %vm3049_vm8, %v9381_v32, %v9397_v17  ;;  %v9056_v47 = vsel %vm285_vm1, %v8640_v25, %v8691_v4 }
 0xe26   : > { %9718 = vmatmul.mubr.bf16.gmra.mrb[100].mxu1 %v9398_v16  ;;  %v8749_v8 = vpop.permute.xlu0 %8748 }
 0xe27   : > { %v9091_v12 = vsel %vm9057_vm5, %v9056_v47, %v8749_v8 }
 0xe28   : > { %v8498_v55 = vpop.permute.xlu1 %8497 }
 0xe29   : > { %v9615_v60 = vpop.f32.mrb[48].mxu1  ;;  %v8953_v22 = vsel %vm8919_vm4, %v8918_v46, %v8498_v55 }
 0xe2a   : > { %v9768_v23 = vadd.f32 %v19422_v52, %v9615_v60  ;;  %v9617_v27 = vpop.f32.mrb[49].mxu1  ;;  %v8833_v29 = vpop.permute.xlu0 %8832 }
 0xe2b   : > { %v9125_v50 = vsel %vm4032_vm12, %v9091_v12, %v8833_v29  ;;  %v9618_v32 = vpop.f32.mrb[50].mxu1 }
 0xe2c   : > { %v9807_v33 = vadd.f32 %v18393_v34, %v9768_v23  ;;  %v9415_v37 = vshrl.u32 %v9125_v50, 16  ;;  %v9418_v0 = vshll.u32 %v9125_v50, 16  ;;  %v9769_v48 = vadd.f32 %v19423_v41, %v9618_v32  ;;  %v8556_v21 = vpop.permute.xlu1 %8555  ;;  %v9620_v7 = vpop.f32.mrb[51].mxu1 }
 0xe2d   : > { %v11381_v26 = vpop.eup %11380  ;;  %v8987_v40 = vsel %vm4102_vm15, %v8953_v22, %v8556_v21  ;;  %v11542_v7 = vld [vmem:[%s11643_s26 + $0x20] sm:$0xff] }
 0xe2e   : > { %v9965_v56 = vadd.f32 1.0, %v11381_v26  ;;  %v9839_v43 = vadd.f32 %v11540_v15, %v9807_v33  ;;  %v9417_v5 = vrot.slane %v9415_v37, 3  ;;  %v9420_v62 = vrot.slane %v9418_v0, 4  ;;  %v19425_v33 = vld [vmem:[#allocation4_spill] sm:$0xff] }
 0xe2f   : > { %v11383_v59 = vpop.eup %11382  ;;  %v9808_v31 = vadd.f32 %v18393_v34, %v9769_v48  ;;  %v9022_v2 = vsel %vm8988_vm14, %v8987_v40, %v8640_v25 }
 0xe30   : > { %11384 = vrcp.f32 %v9965_v56  ;;  %v9966_v4 = vadd.f32 1.0, %v11383_v59  ;;  %v10450_v18 = vmul.f32 -1.442695, %v9839_v43  ;;  %v9421_v51 = vor.u32 %v9420_v62, %v9417_v5  ;;  %v11543_v5 = vld [vmem:[%s11643_s26 + $0x28] sm:$0xff] }
 0xe31   : > { %v9840_v16 = vadd.f32 %v11541_v45, %v9808_v31  ;;  %v9407_v8 = vshrl.u32 %v9022_v2, 16  ;;  %v9410_v42 = vshll.u32 %v9022_v2, 16  ;;  %v19426_v2 = vld [vmem:[#allocation6_spill] sm:$0xff] }
 0xe32   : > { %11386 = vrcp.f32 %v9966_v4  ;;  %v9422_v47 = vsel %vm3049_vm8, %v9405_v36, %v9421_v51  ;;  %v19424_v36 = vld [vmem:[#allocation91_spill] sm:$0xff] }
 0xe33   : > { %11388 = vpow2.f32 %v10450_v18  ;;  %v10451_v55 = vmul.f32 -1.442695, %v9840_v16  ;;  %v9409_v60 = vrot.slane %v9407_v8, 3  ;;  %v9412_v12 = vrot.slane %v9410_v42, 4  ;;  %10446 = vmatprep.mubr.msk.bf16.mxu1 %vm9520_vm6, %v9422_v47  ;;  %v19427_v47 = vld [vmem:[#allocation9_spill] sm:$0xff] }
 0xe35   : > { %11390 = vpow2.f32 %v10451_v55  ;;  %v9413_v25 = vor.u32 %v9412_v12, %v9409_v60 }
 0xe37   : > { %v9414_v46 = vsel %vm3049_vm8, %v9397_v17, %v9413_v25 }
 0xe38   : > { %9726 = vmatmul.mubr.bf16.gmra.mrb[104].mxu1 %v9414_v46 }
 0xe39   : > { %v9623_v52 = vpop.f32.mrb[52].mxu1 }
 0xe3a   : > { %v11385_v23 = vpop.eup %11384  ;;  %v9770_v27 = vadd.f32 %v19424_v36, %v9623_v52  ;;  %v9625_v29 = vpop.f32.mrb[53].mxu1 }
 0xe3b   : > { %v10061_v22 = vmul.f32 %v11385_v23, %v18404_v11  ;;  %v9626_v50 = vpop.f32.mrb[54].mxu1  ;;  %v11544_v23 = vld [vmem:[%s11643_s26 + $0x30] sm:$0xff] }
 0xe3c   : > { %v11387_v32 = vpop.eup %11386  ;;  %v9809_v17 = vadd.f32 %v18393_v34, %v9770_v27  ;;  %v9771_v37 = vadd.f32 %v19425_v33, %v9626_v50  ;;  %v9628_v0 = vpop.f32.mrb[55].mxu1  ;;  %v19428_v33 = vld [vmem:[#allocation11_spill] sm:$0xff] }
 0xe3d   : > { %v11389_v41 = vpop.eup %11388  ;;  %10093 = vst.msk [vmem:[%s18439_s8] sm:$0xff] %vm940_vm0, %v10061_v22  ;;  %v10062_v48 = vmul.f32 %v11387_v32, %v18409_v13  ;;  %v11545_v22 = vld [vmem:[%s11643_s26 + $0x38] sm:$0xff] }
 0xe3e   : > { %v9967_v21 = vadd.f32 1.0, %v11389_v41  ;;  %v9841_v26 = vadd.f32 %v11542_v7, %v9809_v17  ;;  %v9810_v40 = vadd.f32 %v18393_v34, %v9771_v37 }
 0xe3f   : > { %v11391_v56 = vpop.eup %11390  ;;  %10094 = vst.msk [vmem:[%s18439_s8 + $0x8] sm:$0xff] %vm940_vm0, %v10062_v48 }
 0xe40   : > { %11392 = vrcp.f32 %v9967_v21  ;;  %v9968_v11 = vadd.f32 1.0, %v11391_v56  ;;  %v10452_v15 = vmul.f32 -1.442695, %v9841_v26  ;;  %v9842_v62 = vadd.f32 %v11543_v5, %v9810_v40 }
 0xe42   : > { %11394 = vrcp.f32 %v9968_v11  ;;  %v10453_v59 = vmul.f32 -1.442695, %v9842_v62  ;;  %v19429_v11 = vld [vmem:[#allocation8_spill] sm:$0xff] }
 0xe43   : > { %11396 = vpow2.f32 %v10452_v15 }
 0xe44   : > { %11398 = vpow2.f32 %v10453_v59 }
 0xe49   : > { %v9631_v13 = vpop.f32.mrb[56].mxu1 }
 0xe4a   : > { %v11393_v31 = vpop.eup %11392  ;;  %v9772_v4 = vadd.f32 %v19426_v2, %v9631_v13  ;;  %v9633_v18 = vpop.f32.mrb[57].mxu1 }
 0xe4b   : > { %v10063_v51 = vmul.f32 %v11393_v31, %v9839_v43  ;;  %v9634_v45 = vpop.f32.mrb[58].mxu1  ;;  %v11546_v31 = vld [vmem:[%s11643_s26 + $0x40] sm:$0xff] }
 0xe4c   : > { %v11395_v8 = vpop.eup %11394  ;;  %v9811_v42 = vadd.f32 %v18393_v34, %v9772_v4  ;;  %v9773_v55 = vadd.f32 %v19427_v47, %v9634_v45  ;;  %v9636_v60 = vpop.f32.mrb[59].mxu1 }
 0xe4d   : > { %v11397_v12 = vpop.eup %11396  ;;  %10095 = vst.msk [vmem:[%s18439_s8 + $0x10] sm:$0xff] %vm940_vm0, %v10063_v51  ;;  %v10064_v25 = vmul.f32 %v11395_v8, %v9840_v16 }
 0xe4e   : > { %v11399_v46 = vpop.eup %11398  ;;  %v9969_v52 = vadd.f32 1.0, %v11397_v12  ;;  %v9843_v36 = vadd.f32 %v11544_v23, %v9811_v42  ;;  %v9812_v27 = vadd.f32 %v18393_v34, %v9773_v55 }
 0xe4f   : > { %10096 = vst.msk [vmem:[%s18439_s8 + $0x18] sm:$0xff] %vm940_vm0, %v10064_v25  ;;  %v9970_v43 = vadd.f32 1.0, %v11399_v46 }
 0xe50   : > { %11400 = vrcp.f32 %v9969_v52  ;;  %v10454_v29 = vmul.f32 -1.442695, %v9843_v36  ;;  %v9844_v50 = vadd.f32 %v11545_v22, %v9812_v27 }
 0xe51   : > { %11402 = vrcp.f32 %v9970_v43 }
 0xe52   : > { %11404 = vpow2.f32 %v10454_v29  ;;  %v10455_v32 = vmul.f32 -1.442695, %v9844_v50 }
 0xe54   : > { %11406 = vpow2.f32 %v10455_v32 }
 0xe59   : > { %v9639_v16 = vpop.f32.mrb[60].mxu1 }
 0xe5a   : > { %v11401_v17 = vpop.eup %11400  ;;  %v9774_v37 = vadd.f32 %v19428_v33, %v9639_v16  ;;  %v9641_v0 = vpop.f32.mrb[61].mxu1  ;;  %v11549_v33 = vld [vmem:[%s11643_s26 + $0x58] sm:$0xff] }
 0xe5b   : > { %v11403_v41 = vpop.eup %11402  ;;  %v10065_v48 = vmul.f32 %v11401_v17, %v9841_v26  ;;  %v9642_v21 = vpop.f32.mrb[62].mxu1 }
 0xe5c   : > { %v11405_v7 = vpop.eup %11404  ;;  %v10066_v40 = vmul.f32 %v11403_v41, %v9842_v62  ;;  %v9813_v56 = vadd.f32 %v18393_v34, %v9774_v37  ;;  %v9775_v15 = vadd.f32 %v19429_v11, %v9642_v21  ;;  %v9644_v5 = vpop.f32.mrb[63].mxu1  ;;  %v11547_v62 = vld [vmem:[%s11643_s26 + $0x48] sm:$0xff] }
 0xe5d   : > { %10097 = vst.msk [vmem:[%s18439_s8 + $0x20] sm:$0xff] %vm940_vm0, %v10065_v48  ;;  %v9971_v59 = vadd.f32 1.0, %v11405_v7 }
 0xe5e   : > { %v11407_v13 = vpop.eup %11406  ;;  %10098 = vst.msk [vmem:[%s18439_s8 + $0x28] sm:$0xff] %vm940_vm0, %v10066_v40  ;;  %v9845_v2 = vadd.f32 %v11546_v31, %v9813_v56  ;;  %v9814_v4 = vadd.f32 %v18393_v34, %v9775_v15 }
 0xe5f   : > { %11408 = vrcp.f32 %v9971_v59  ;;  %v9972_v26 = vadd.f32 1.0, %v11407_v13 }
 0xe60   : > { %v10456_v18 = vmul.f32 -1.442695, %v9845_v2  ;;  %v9846_v51 = vadd.f32 %v11547_v62, %v9814_v4  ;;  %v11551_v62 = vld [vmem:[%s11643_s26 + $0x68] sm:$0xff] }
 0xe61   : > { %11410 = vrcp.f32 %v9972_v26 }
 0xe62   : > { %11412 = vpow2.f32 %v10456_v18  ;;  %v10457_v45 = vmul.f32 -1.442695, %v9846_v51 }
 0xe64   : > { %11414 = vpow2.f32 %v10457_v45 }
 0xe69   : > { %v11409_v8 = vpop.eup %11408  ;;  %v9647_v42 = vpop.f32.mrb[64].mxu1 }
 0xe6a   : > { %v10067_v47 = vmul.f32 %v11409_v8, %v9843_v36  ;;  %v9776_v55 = vadd.f32 %v17107_v54, %v9647_v42  ;;  %v9649_v60 = vpop.f32.mrb[65].mxu1  ;;  %v11548_v36 = vld [vmem:[%s11643_s26 + $0x50] sm:$0xff] }
 0xe6b   : > { %v11411_v12 = vpop.eup %11410  ;;  %v9650_v25 = vpop.f32.mrb[66].mxu1 }
 0xe6c   : > { %v11413_v46 = vpop.eup %11412  ;;  %10099 = vst.msk [vmem:[%s18439_s8 + $0x30] sm:$0xff] %vm940_vm0, %v10067_v47  ;;  %v10068_v52 = vmul.f32 %v11411_v12, %v9844_v50  ;;  %v9815_v23 = vadd.f32 %v18393_v34, %v9776_v55  ;;  %v9777_v27 = vadd.f32 %v17110_v63, %v9650_v25  ;;  %v9652_v43 = vpop.f32.mrb[67].mxu1 }
 0xe6d   : > { %v9973_v29 = vadd.f32 1.0, %v11413_v46 }
 0xe6e   : > { %v11415_v22 = vpop.eup %11414  ;;  %10100 = vst.msk [vmem:[%s18439_s8 + $0x38] sm:$0xff] %vm940_vm0, %v10068_v52  ;;  %v9847_v32 = vadd.f32 %v11548_v36, %v9815_v23  ;;  %v9816_v54 = vadd.f32 %v18393_v34, %v9777_v27 }
 0xe6f   : > { %11416 = vrcp.f32 %v9973_v29  ;;  %v9974_v16 = vadd.f32 1.0, %v11415_v22  ;;  %v11552_v22 = vld [vmem:[%s11643_s26 + $0x70] sm:$0xff] }
 0xe70   : > { %v10458_v17 = vmul.f32 -1.442695, %v9847_v32  ;;  %v9848_v37 = vadd.f32 %v11549_v33, %v9816_v54 }
 0xe71   : > { %11418 = vrcp.f32 %v9974_v16  ;;  %v11553_v16 = vld [vmem:[%s11643_s26 + $0x78] sm:$0xff] }
 0xe72   : > { %11420 = vpow2.f32 %v10458_v17  ;;  %v10459_v50 = vmul.f32 -1.442695, %v9848_v37 }
 0xe74   : > { %11422 = vpow2.f32 %v10459_v50 }
 0xe79   : > { %v11417_v63 = vpop.eup %11416  ;;  %v9655_v0 = vpop.f32.mrb[68].mxu1 }
 0xe7a   : > { %v10069_v41 = vmul.f32 %v11417_v63, %v9845_v2  ;;  %v9778_v48 = vadd.f32 %v17188_v14, %v9655_v0  ;;  %v9657_v21 = vpop.f32.mrb[69].mxu1  ;;  %v11550_v2 = vld [vmem:[%s11643_s26 + $0x60] sm:$0xff] }
 0xe7b   : > { %v11419_v7 = vpop.eup %11418  ;;  %v9658_v40 = vpop.f32.mrb[70].mxu1 }
 0xe7c   : > { %v11421_v56 = vpop.eup %11420  ;;  %10101 = vst.msk [vmem:[%s18439_s8 + $0x40] sm:$0xff] %vm940_vm0, %v10069_v41  ;;  %v10070_v11 = vmul.f32 %v11419_v7, %v9846_v51  ;;  %v9817_v15 = vadd.f32 %v18393_v34, %v9778_v48  ;;  %v9779_v5 = vadd.f32 %v17196_v10, %v9658_v40  ;;  %v9660_v59 = vpop.f32.mrb[71].mxu1 }
 0xe7d   : > { %v9975_v13 = vadd.f32 1.0, %v11421_v56  ;;  %v11554_v59 = vld [vmem:[%s11643_s26 + $0x80] sm:$0xff] }
 0xe7e   : > { %v11423_v31 = vpop.eup %11422  ;;  %10102 = vst.msk [vmem:[%s18439_s8 + $0x48] sm:$0xff] %vm940_vm0, %v10070_v11  ;;  %v9849_v4 = vadd.f32 %v11550_v2, %v9817_v15  ;;  %v9818_v14 = vadd.f32 %v18393_v34, %v9779_v5 }
 0xe7f   : > { %11424 = vrcp.f32 %v9975_v13  ;;  %v9976_v26 = vadd.f32 1.0, %v11423_v31 }
 0xe80   : > { %v10460_v18 = vmul.f32 -1.442695, %v9849_v4  ;;  %v9850_v45 = vadd.f32 %v11551_v62, %v9818_v14 }
 0xe81   : > { %11426 = vrcp.f32 %v9976_v26 }
 0xe82   : > { %11428 = vpow2.f32 %v10460_v18  ;;  %v10461_v51 = vmul.f32 -1.442695, %v9850_v45 }
 0xe84   : > { %11430 = vpow2.f32 %v10461_v51 }
 0xe89   : > { %v11425_v10 = vpop.eup %11424  ;;  %v9663_v8 = vpop.f32.mrb[72].mxu1 }
 0xe8a   : > { %v10071_v42 = vmul.f32 %v11425_v10, %v9847_v32  ;;  %v9780_v47 = vadd.f32 %v17402_v58, %v9663_v8  ;;  %v9665_v55 = vpop.f32.mrb[73].mxu1 }
 0xe8b   : > { %v11427_v60 = vpop.eup %11426  ;;  %v9666_v12 = vpop.f32.mrb[74].mxu1 }
 0xe8c   : > { %v11429_v25 = vpop.eup %11428  ;;  %10103 = vst.msk [vmem:[%s18439_s8 + $0x50] sm:$0xff] %vm940_vm0, %v10071_v42  ;;  %v10072_v46 = vmul.f32 %v11427_v60, %v9848_v37  ;;  %v9819_v52 = vadd.f32 %v18393_v34, %v9780_v47  ;;  %v9781_v23 = vadd.f32 %v17409_v49, %v9666_v12  ;;  %v9668_v27 = vpop.f32.mrb[75].mxu1 }
 0xe8d   : > { %v9977_v43 = vadd.f32 1.0, %v11429_v25 }
 0xe8e   : > { %v11431_v29 = vpop.eup %11430  ;;  %10104 = vst.msk [vmem:[%s18439_s8 + $0x58] sm:$0xff] %vm940_vm0, %v10072_v46  ;;  %v9851_v36 = vadd.f32 %v11552_v22, %v9819_v52  ;;  %v9820_v58 = vadd.f32 %v18393_v34, %v9781_v23  ;;  %v11556_v52 = vld [vmem:[%s11643_s26 + $0x90] sm:$0xff] }
 0xe8f   : > { %11432 = vrcp.f32 %v9977_v43  ;;  %v9978_v32 = vadd.f32 1.0, %v11431_v29  ;;  %v11557_v29 = vld [vmem:[%s11643_s26 + $0x98] sm:$0xff] }
 0xe90   : > { %v10462_v54 = vmul.f32 -1.442695, %v9851_v36  ;;  %v9852_v17 = vadd.f32 %v11553_v16, %v9820_v58 }
 0xe91   : > { %11434 = vrcp.f32 %v9978_v32 }
 0xe92   : > { %11436 = vpow2.f32 %v10462_v54  ;;  %v10463_v33 = vmul.f32 -1.442695, %v9852_v17 }
 0xe94   : > { %11438 = vpow2.f32 %v10463_v33 }
 0xe99   : > { %v11433_v49 = vpop.eup %11432  ;;  %v9671_v37 = vpop.f32.mrb[76].mxu1 }
 0xe9a   : > { %v10073_v50 = vmul.f32 %v11433_v49, %v9849_v4  ;;  %v9782_v63 = vadd.f32 %v17635_v53, %v9671_v37  ;;  %v9673_v0 = vpop.f32.mrb[77].mxu1  ;;  %v11555_v4 = vld [vmem:[%s11643_s26 + $0x88] sm:$0xff] }
 0xe9b   : > { %v11435_v41 = vpop.eup %11434  ;;  %v9674_v48 = vpop.f32.mrb[78].mxu1 }
 0xe9c   : > { %v11437_v21 = vpop.eup %11436  ;;  %10105 = vst.msk [vmem:[%s18439_s8 + $0x60] sm:$0xff] %vm940_vm0, %v10073_v50  ;;  %v10074_v7 = vmul.f32 %v11435_v41, %v9850_v45  ;;  %v9821_v40 = vadd.f32 %v18393_v34, %v9782_v63  ;;  %v9783_v56 = vadd.f32 %v17644_v30, %v9674_v48  ;;  %v9676_v11 = vpop.f32.mrb[79].mxu1 }
 0xe9d   : > { %v9979_v15 = vadd.f32 1.0, %v11437_v21  ;;  %v11558_v21 = vld [vmem:[%s11643_s26 + $0xa0] sm:$0xff]  ;;  %v11559_v11 = vld [vmem:[%s11643_s26 + $0xa8] sm:$0xff] }
 0xe9e   : > { %v11439_v5 = vpop.eup %11438  ;;  %10106 = vst.msk [vmem:[%s18439_s8 + $0x68] sm:$0xff] %vm940_vm0, %v10074_v7  ;;  %v9853_v13 = vadd.f32 %v11554_v59, %v9821_v40  ;;  %v9822_v53 = vadd.f32 %v18393_v34, %v9783_v56 }
 0xe9f   : > { %11440 = vrcp.f32 %v9979_v15  ;;  %v9980_v31 = vadd.f32 1.0, %v11439_v5 }
 0xea0   : > { %v10464_v2 = vmul.f32 -1.442695, %v9853_v13  ;;  %v9854_v14 = vadd.f32 %v11555_v4, %v9822_v53 }
 0xea1   : > { %11442 = vrcp.f32 %v9980_v31 }
 0xea2   : > { %11444 = vpow2.f32 %v10464_v2  ;;  %v10465_v26 = vmul.f32 -1.442695, %v9854_v14 }
 0xea4   : > { %11446 = vpow2.f32 %v10465_v26 }
 0xea9   : > { %v11441_v30 = vpop.eup %11440  ;;  %v9679_v18 = vpop.f32.mrb[80].mxu1 }
 0xeaa   : > { %v10075_v62 = vmul.f32 %v11441_v30, %v9851_v36  ;;  %v9784_v45 = vadd.f32 %v17855_v1, %v9679_v18  ;;  %v9681_v51 = vpop.f32.mrb[81].mxu1 }
 0xeab   : > { %v11443_v10 = vpop.eup %11442  ;;  %v9682_v8 = vpop.f32.mrb[82].mxu1 }
 0xeac   : > { %v11445_v42 = vpop.eup %11444  ;;  %10107 = vst.msk [vmem:[%s18439_s8 + $0x70] sm:$0xff] %vm940_vm0, %v10075_v62  ;;  %v10076_v47 = vmul.f32 %v11443_v10, %v9852_v17  ;;  %v9823_v55 = vadd.f32 %v18393_v34, %v9784_v45  ;;  %v9785_v60 = vadd.f32 %v17865_v3, %v9682_v8  ;;  %v9684_v12 = vpop.f32.mrb[83].mxu1  ;;  %v11560_v10 = vld [vmem:[%s11643_s26 + $0xb0] sm:$0xff] }
 0xead   : > { %v9981_v25 = vadd.f32 1.0, %v11445_v42 }
 0xeae   : > { %v11447_v46 = vpop.eup %11446  ;;  %10108 = vst.msk [vmem:[%s18439_s8 + $0x78] sm:$0xff] %vm940_vm0, %v10076_v47  ;;  %v9855_v23 = vadd.f32 %v11556_v52, %v9823_v55  ;;  %v9824_v1 = vadd.f32 %v18393_v34, %v9785_v60  ;;  %v11561_v55 = vld [vmem:[%s11643_s26 + $0xb8] sm:$0xff] }
 0xeaf   : > { %11448 = vrcp.f32 %v9981_v25  ;;  %v9982_v27 = vadd.f32 1.0, %v11447_v46 }
 0xeb0   : > { %v10466_v43 = vmul.f32 -1.442695, %v9855_v23  ;;  %v9856_v22 = vadd.f32 %v11557_v29, %v9824_v1 }
 0xeb1   : > { %11450 = vrcp.f32 %v9982_v27 }
 0xeb2   : > { %11452 = vpow2.f32 %v10466_v43  ;;  %v10467_v36 = vmul.f32 -1.442695, %v9856_v22 }
 0xeb4   : > { %11454 = vpow2.f32 %v10467_v36 }
 0xeb9   : > { %v11449_v3 = vpop.eup %11448  ;;  %v9687_v58 = vpop.f32.mrb[84].mxu1 }
 0xeba   : > { %v10077_v32 = vmul.f32 %v11449_v3, %v9853_v13  ;;  %v9786_v54 = vadd.f32 %v18128_v20, %v9687_v58  ;;  %v9689_v16 = vpop.f32.mrb[85].mxu1 }
 0xebb   : > { %v11451_v17 = vpop.eup %11450  ;;  %v9690_v33 = vpop.f32.mrb[86].mxu1 }
 0xebc   : > { %v11453_v49 = vpop.eup %11452  ;;  %10109 = vst.msk [vmem:[%s18439_s8 + $0x80] sm:$0xff] %vm940_vm0, %v10077_v32  ;;  %v10078_v37 = vmul.f32 %v11451_v17, %v9854_v14  ;;  %v9825_v50 = vadd.f32 %v18393_v34, %v9786_v54  ;;  %v9787_v63 = vadd.f32 %v18144_v35, %v9690_v33  ;;  %v9692_v0 = vpop.f32.mrb[87].mxu1  ;;  %v11562_v54 = vld [vmem:[%s11643_s26 + $0xc0] sm:$0xff] }
 0xebd   : > { %v9983_v41 = vadd.f32 1.0, %v11453_v49  ;;  %v11563_v49 = vld [vmem:[%s11643_s26 + $0xc8] sm:$0xff] }
 0xebe   : > { %v11455_v48 = vpop.eup %11454  ;;  %10110 = vst.msk [vmem:[%s18439_s8 + $0x88] sm:$0xff] %vm940_vm0, %v10078_v37  ;;  %v9857_v7 = vadd.f32 %v11558_v21, %v9825_v50  ;;  %v9826_v20 = vadd.f32 %v18393_v34, %v9787_v63 }
 0xebf   : > { %11456 = vrcp.f32 %v9983_v41  ;;  %v9984_v40 = vadd.f32 1.0, %v11455_v48 }
 0xec0   : > { %v10468_v56 = vmul.f32 -1.442695, %v9857_v7  ;;  %v9858_v15 = vadd.f32 %v11559_v11, %v9826_v20 }
 0xec1   : > { %11458 = vrcp.f32 %v9984_v40 }
 0xec2   : > { %11460 = vpow2.f32 %v10468_v56  ;;  %v10469_v5 = vmul.f32 -1.442695, %v9858_v15 }
 0xec4   : > { %11462 = vpow2.f32 %v10469_v5 }
 0xec9   : > { %v11457_v35 = vpop.eup %11456  ;;  %v9695_v59 = vpop.f32.mrb[88].mxu1 }
 0xeca   : > { %v10079_v13 = vmul.f32 %v11457_v35, %v9855_v23  ;;  %v9788_v53 = vadd.f32 %v18293_v9, %v9695_v59  ;;  %v9697_v31 = vpop.f32.mrb[89].mxu1  ;;  %v11564_v59 = vld [vmem:[%s11643_s26 + $0xd0] sm:$0xff] }
 0xecb   : > { %v11459_v2 = vpop.eup %11458  ;;  %v9698_v4 = vpop.f32.mrb[90].mxu1 }
 0xecc   : > { %v11461_v14 = vpop.eup %11460  ;;  %10111 = vst.msk [vmem:[%s18439_s8 + $0x90] sm:$0xff] %vm940_vm0, %v10079_v13  ;;  %v10080_v26 = vmul.f32 %v11459_v2, %v9856_v22  ;;  %v9827_v30 = vadd.f32 %v18393_v34, %v9788_v53  ;;  %v9789_v18 = vadd.f32 %v18296_v61, %v9698_v4  ;;  %v9700_v62 = vpop.f32.mrb[91].mxu1  ;;  %v11565_v2 = vld [vmem:[%s11643_s26 + $0xd8] sm:$0xff] }
 0xecd   : > { %v9985_v45 = vadd.f32 1.0, %v11461_v14 }
 0xece   : > { %v11463_v51 = vpop.eup %11462  ;;  %10112 = vst.msk [vmem:[%s18439_s8 + $0x98] sm:$0xff] %vm940_vm0, %v10080_v26  ;;  %v9859_v8 = vadd.f32 %v11560_v10, %v9827_v30  ;;  %v9828_v9 = vadd.f32 %v18393_v34, %v9789_v18 }
 0xecf   : > { %11464 = vrcp.f32 %v9985_v45  ;;  %v9986_v42 = vadd.f32 1.0, %v11463_v51 }
 0xed0   : > { %v10470_v47 = vmul.f32 -1.442695, %v9859_v8  ;;  %v9860_v60 = vadd.f32 %v11561_v55, %v9828_v9 }
 0xed1   : > { %11466 = vrcp.f32 %v9986_v42 }
 0xed2   : > { %11468 = vpow2.f32 %v10470_v47  ;;  %v10471_v12 = vmul.f32 -1.442695, %v9860_v60 }
 0xed4   : > { %11470 = vpow2.f32 %v10471_v12  ;;  %v11566_v12 = vld [vmem:[%s11643_s26 + $0xe0] sm:$0xff] }
 0xed9   : > { %v11465_v61 = vpop.eup %11464  ;;  %v9703_v25 = vpop.f32.mrb[92].mxu1 }
 0xeda   : > { %v10081_v46 = vmul.f32 %v11465_v61, %v9857_v7  ;;  %v9790_v52 = vadd.f32 %v18311_v6, %v9703_v25  ;;  %v9705_v23 = vpop.f32.mrb[93].mxu1 }
 0xedb   : > { %v11467_v1 = vpop.eup %11466  ;;  %v9706_v27 = vpop.f32.mrb[94].mxu1 }
 0xedc   : > { %v11469_v43 = vpop.eup %11468  ;;  %10113 = vst.msk [vmem:[%s18439_s8 + $0xa0] sm:$0xff] %vm940_vm0, %v10081_v46  ;;  %v10082_v29 = vmul.f32 %v11467_v1, %v9858_v15  ;;  %v9829_v22 = vadd.f32 %v18393_v34, %v9790_v52  ;;  %v9791_v36 = vadd.f32 %v18315_v39, %v9706_v27  ;;  %v9708_v3 = vpop.f32.mrb[95].mxu1  ;;  %v11567_v52 = vld [vmem:[%s11643_s26 + $0xe8] sm:$0xff] }
 0xedd   : > { %v9987_v58 = vadd.f32 1.0, %v11469_v43 }
 0xede   : > { %v11471_v32 = vpop.eup %11470  ;;  %10114 = vst.msk [vmem:[%s18439_s8 + $0xa8] sm:$0xff] %vm940_vm0, %v10082_v29  ;;  %v9861_v16 = vadd.f32 %v11562_v54, %v9829_v22  ;;  %v9830_v6 = vadd.f32 %v18393_v34, %v9791_v36 }
 0xedf   : > { %11472 = vrcp.f32 %v9987_v58  ;;  %v9988_v17 = vadd.f32 1.0, %v11471_v32 }
 0xee0   : > { %v10472_v33 = vmul.f32 -1.442695, %v9861_v16  ;;  %v9862_v37 = vadd.f32 %v11563_v49, %v9830_v6 }
 0xee1   : > { %11474 = vrcp.f32 %v9988_v17 }
 0xee2   : > { %11476 = vpow2.f32 %v10472_v33  ;;  %v10473_v50 = vmul.f32 -1.442695, %v9862_v37 }
 0xee4   : > { %11478 = vpow2.f32 %v10473_v50 }
 0xee9   : > { %v11473_v39 = vpop.eup %11472  ;;  %v9711_v63 = vpop.f32.mrb[96].mxu1 }
 0xeea   : > { %v10083_v0 = vmul.f32 %v11473_v39, %v9859_v8  ;;  %v9792_v41 = vadd.f32 %v18329_v38, %v9711_v63  ;;  %v9713_v48 = vpop.f32.mrb[97].mxu1  ;;  %v11569_v63 = vld [vmem:[%s11643_s26 + $0xf8] sm:$0xff] }
 0xeeb   : > { %v11475_v21 = vpop.eup %11474  ;;  %v9714_v7 = vpop.f32.mrb[98].mxu1 }
 0xeec   : > { %v11477_v20 = vpop.eup %11476  ;;  %10115 = vst.msk [vmem:[%s18439_s8 + $0xb0] sm:$0xff] %vm940_vm0, %v10083_v0  ;;  %v10084_v40 = vmul.f32 %v11475_v21, %v9860_v60  ;;  %v9831_v56 = vadd.f32 %v18393_v34, %v9792_v41  ;;  %v9793_v11 = vadd.f32 %v18332_v24, %v9714_v7  ;;  %v9716_v15 = vpop.f32.mrb[99].mxu1 }
 0xeed   : > { %v9989_v5 = vadd.f32 1.0, %v11477_v20 }
 0xeee   : > { %v11479_v35 = vpop.eup %11478  ;;  %10116 = vst.msk [vmem:[%s18439_s8 + $0xb8] sm:$0xff] %vm940_vm0, %v10084_v40  ;;  %v9863_v13 = vadd.f32 %v11564_v59, %v9831_v56  ;;  %v9832_v38 = vadd.f32 %v18393_v34, %v9793_v11 }
 0xeef   : > { %11480 = vrcp.f32 %v9989_v5  ;;  %v9990_v53 = vadd.f32 1.0, %v11479_v35 }
 0xef0   : > { %v10474_v31 = vmul.f32 -1.442695, %v9863_v13  ;;  %v9864_v4 = vadd.f32 %v11565_v2, %v9832_v38 }
 0xef1   : > { %11482 = vrcp.f32 %v9990_v53 }
 0xef2   : > { %11484 = vpow2.f32 %v10474_v31  ;;  %v10475_v14 = vmul.f32 -1.442695, %v9864_v4 }
 0xef4   : > { %11486 = vpow2.f32 %v10475_v14 }
 0xef9   : > { %v11481_v24 = vpop.eup %11480  ;;  %v9719_v26 = vpop.f32.mrb[100].mxu1 }
 0xefa   : > { %v10085_v30 = vmul.f32 %v11481_v24, %v9861_v16  ;;  %v9794_v18 = vadd.f32 %v18346_v57, %v9719_v26  ;;  %v9721_v62 = vpop.f32.mrb[101].mxu1 }
 0xefb   : > { %v11483_v45 = vpop.eup %11482  ;;  %v9722_v51 = vpop.f32.mrb[102].mxu1 }
 0xefc   : > { %v11485_v10 = vpop.eup %11484  ;;  %10117 = vst.msk [vmem:[%s18439_s8 + $0xc0] sm:$0xff] %vm940_vm0, %v10085_v30  ;;  %v10086_v8 = vmul.f32 %v11483_v45, %v9862_v37  ;;  %v9833_v9 = vadd.f32 %v18393_v34, %v9794_v18  ;;  %v9795_v42 = vadd.f32 %v18350_v19, %v9722_v51  ;;  %v9724_v47 = vpop.f32.mrb[103].mxu1  ;;  %v11568_v37 = vld [vmem:[%s11643_s26 + $0xf0] sm:$0xff] }
 0xefd   : > { %v9991_v55 = vadd.f32 1.0, %v11485_v10 }
 0xefe   : > { %v11487_v60 = vpop.eup %11486  ;;  %10118 = vst.msk [vmem:[%s18439_s8 + $0xc8] sm:$0xff] %vm940_vm0, %v10086_v8  ;;  %v9865_v61 = vadd.f32 %v11566_v12, %v9833_v9  ;;  %v9834_v57 = vadd.f32 %v18393_v34, %v9795_v42 }
 0xeff   : > { %11488 = vrcp.f32 %v9991_v55  ;;  %v9992_v25 = vadd.f32 1.0, %v11487_v60 }
 0xf00   : > { %v10476_v46 = vmul.f32 -1.442695, %v9865_v61  ;;  %v9866_v23 = vadd.f32 %v11567_v52, %v9834_v57 }
 0xf01   : > { %11490 = vrcp.f32 %v9992_v25 }
 0xf02   : > { %11492 = vpow2.f32 %v10476_v46  ;;  %v10477_v1 = vmul.f32 -1.442695, %v9866_v23 }
 0xf04   : > { %11494 = vpow2.f32 %v10477_v1 }
 0xf09   : > { %v11489_v19 = vpop.eup %11488 }
 0xf0a   : > { %v10087_v27 = vmul.f32 %v11489_v19, %v9863_v13 }
 0xf0b   : > { %v11491_v43 = vpop.eup %11490  ;;  %v9727_v29 = vpop.f32.mrb[104].mxu1 }
 0xf0c   : > { %v11493_v22 = vpop.eup %11492  ;;  %10119 = vst.msk [vmem:[%s18439_s8 + $0xd0] sm:$0xff] %vm940_vm0, %v10087_v27  ;;  %v10088_v36 = vmul.f32 %v11491_v43, %v9864_v4  ;;  %v9796_v3 = vadd.f32 %v18360_v28, %v9727_v29  ;;  %v9729_v58 = vpop.f32.mrb[105].mxu1 }
 0xf0d   : > { %v9993_v32 = vadd.f32 1.0, %v11493_v22  ;;  %v9730_v54 = vpop.f32.mrb[106].mxu1 }
 0xf0e   : > { %v11495_v16 = vpop.eup %11494  ;;  %10120 = vst.msk [vmem:[%s18439_s8 + $0xd8] sm:$0xff] %vm940_vm0, %v10088_v36  ;;  %v9835_v6 = vadd.f32 %v18393_v34, %v9796_v3  ;;  %v9797_v17 = vadd.f32 %v18366_v44, %v9730_v54  ;;  %v9732_v33 = vpop.f32.mrb[107].mxu1 }
 0xf0f   : > { %11496 = vrcp.f32 %v9993_v32  ;;  %v9994_v49 = vadd.f32 1.0, %v11495_v16 }
 0xf10   : > { %v9867_v50 = vadd.f32 %v11568_v37, %v9835_v6  ;;  %v9836_v28 = vadd.f32 %v18393_v34, %v9797_v17 }
 0xf11   : > { %11498 = vrcp.f32 %v9994_v49 }
 0xf12   : > { %v10478_v39 = vmul.f32 -1.442695, %v9867_v50  ;;  %v9868_v0 = vadd.f32 %v11569_v63, %v9836_v28 }
 0xf14   : > { %11500 = vpow2.f32 %v10478_v39  ;;  %v10479_v41 = vmul.f32 -1.442695, %v9868_v0 }
 0xf16   : > { %11502 = vpow2.f32 %v10479_v41 }
 0xf19   : > { %v11497_v48 = vpop.eup %11496 }
 0xf1a   : > { %v10089_v21 = vmul.f32 %v11497_v48, %v9865_v61 }
 0xf1b   : > { %v11499_v44 = vpop.eup %11498 }
 0xf1c   : > { %10121 = vst.msk [vmem:[%s18439_s8 + $0xe0] sm:$0xff] %vm940_vm0, %v10089_v21  ;;  %v10090_v7 = vmul.f32 %v11499_v44, %v9866_v23 }
 0xf1e   : > { %v11501_v20 = vpop.eup %11500  ;;  %10122 = vst.msk [vmem:[%s18439_s8 + $0xe8] sm:$0xff] %vm940_vm0, %v10090_v7 }
 0xf1f   : > { %v9995_v40 = vadd.f32 1.0, %v11501_v20 }
 0xf20   : > { %v11503_v34 = vpop.eup %11502 }
 0xf21   : > { %11504 = vrcp.f32 %v9995_v40  ;;  %v9996_v56 = vadd.f32 1.0, %v11503_v34 }
 0xf23   : > { %11506 = vrcp.f32 %v9996_v56 }
 0xf2b   : > { %v11505_v11 = vpop.eup %11504 }
 0xf2c   : > { %v10091_v15 = vmul.f32 %v11505_v11, %v9867_v50 }
 0xf2d   : > { %v11507_v5 = vpop.eup %11506 }
 0xf2e   : > { %10123 = vst.msk [vmem:[%s18439_s8 + $0xf0] sm:$0xff] %vm940_vm0, %v10091_v15  ;;  %v10092_v35 = vmul.f32 %v11507_v5, %v9868_v0 }
 0xf30   : > { %10124 = vst.msk [vmem:[%s18439_s8 + $0xf8] sm:$0xff] %vm940_vm0, %v10092_v35 }
 0xf31 PF: > { %s16_s21 = sadd.s32 1, %s11576_s21  }
 0xf32   : > { %p13_p4 = scmp.ge.s32.totalorder %s16_s21, 4  }
 0xf34   :  { %15 = sbr.rel (!%p13_p4) target bundleno = 1 (0x1), region = 74 }

</bundles_post_ra>
